<compile_context>
chip_gen: v6e
topology: v6e:2x2x1
jax: 0.10.0
libtpu: 0.0.40
codegen_flags: <defaults>
</compile_context>

<pallas_src>
import numpy as np
import jax
import jax.numpy as jnp
from jax import lax
from jax.experimental import pallas as pl
from jax.experimental.pallas import tpu as pltpu

# ----------------------------- synthetic config ------------------------------
PAD_IDX, NONE_IDX, DONTCARE_IDX, EOS_IDX = 0, 1, 2, 3
VOCAB_SIZE = 128          # len(self.vocab)
EMB = 32                  # args.embedding_size
HID = 32                  # args.hidden_size
NUM_GATES = 3
DOMAIN_SLOTS = ["hotel-price", "hotel-area", "train-day"]   # synthetic ontology

_domain_slot_w2i = {}
for _ds in DOMAIN_SLOTS:
    for _w in _ds.split('-'):
        if _w not in _domain_slot_w2i:
            _domain_slot_w2i[_w] = len(_domain_slot_w2i)
NUM_DS_WORDS = len(_domain_slot_w2i)


def _full_spec(shape):
    """Whole-array block for grid=(1,)."""
    n = len(shape)
    return pl.BlockSpec(shape, lambda *_, _n=n: (0,) * _n)


# --------------------------- single fused kernel ------------------------------
def _fused_kernel(
        x_emb_ref, enc_mask_ref, len_mask_ref, pad_x_ref,
        dec_in_ref, last_y_ref, mask_rel_ref, ds_emb_ref,
        enc_wih_ref, enc_whh_ref, enc_bih_ref, enc_bhh_ref,
        dec_wih_ref, dec_whh_ref, dec_bih_ref, dec_bhh_ref,
        gen_w_emb_ref, attn_w_enc_ref, attn_e_ref,
        rel_w_emb_ref, rel_w_dec_ref, rel_b_ref, rel_e_ref,
        w_dec_cat_ref, b_dec_cat_ref, w_ctx_main_ref,
        w_ctx_extra_ref, b_ctx_extra_ref,
        final_ref, gate_ref,
        all_h_scr, egr_scr, egz_scr, egn_scr,
        dgr_scr, dgz_scr, dgn_scr, gen_scr):
    f32 = jnp.float32
    S, B, E = x_emb_ref.shape
    H = enc_whh_ref.shape[1]
    T, _, D, _ = dec_in_ref.shape
    V = final_ref.shape[3]
    G = gate_ref.shape[2]
    BD = B * D

    # ================================ encoder ================================
    x_flat = x_emb_ref[...].reshape(S * B, E)
    ewih = enc_wih_ref[...]
    ebih = enc_bih_ref[...]
    # gate-separated input projections for ALL timesteps (lane offset 0 each)
    egr_scr[...] = (jnp.dot(x_flat, ewih[0], preferred_element_type=f32)
                    + ebih[0]).reshape(S, B, H)
    egz_scr[...] = (jnp.dot(x_flat, ewih[1], preferred_element_type=f32)
                    + ebih[1]).reshape(S, B, H)
    egn_scr[...] = (jnp.dot(x_flat, ewih[2], preferred_element_type=f32)
                    + ebih[2]).reshape(S, B, H)

    ewhh = enc_whh_ref[...]
    ebhh = enc_bhh_ref[...]

    def enc_step(t, h):
        gh_r = jnp.dot(h, ewhh[0], preferred_element_type=f32) + ebhh[0]
        gh_z = jnp.dot(h, ewhh[1], preferred_element_type=f32) + ebhh[1]
        gh_n = jnp.dot(h, ewhh[2], preferred_element_type=f32) + ebhh[2]
        r = jax.nn.sigmoid(egr_scr[t] + gh_r)
        z = jax.nn.sigmoid(egz_scr[t] + gh_z)
        n = jnp.tanh(egn_scr[t] + r * gh_n)
        h_new = (1.0 - z) * n + z * h
        valid = enc_mask_ref[t]                       # (B, 1)
        all_h_scr[t] = h_new * valid                  # zeros past sequence length
        return valid * h_new + (1.0 - valid) * h      # freeze hidden past length

    enc_unroll = True if S <= 16 else 8
    ht = lax.fori_loop(0, S, enc_step, jnp.zeros((B, H), f32), unroll=enc_unroll)

    # ================= decoder (all T steps, all D slots, in-VMEM) =================
    all_h = all_h_scr[...]                                                # (S, B, H)
    # (S,B,H) -> (B,S,H) via static per-batch restack (no dynamic transpose op)
    enc_h = jnp.stack([all_h[:, b, :] for b in range(B)], axis=0)        # (B, S, H)
    enc_proj = jnp.dot(enc_h.reshape(B * S, H), attn_w_enc_ref[...],
                       preferred_element_type=f32).reshape(B, S, H)

    dec_in_flat = dec_in_ref[...].reshape(T * BD, E)
    dwih = dec_wih_ref[...]
    dbih = dec_bih_ref[...]
    dgr_scr[...] = (jnp.dot(dec_in_flat, dwih[0], preferred_element_type=f32)
                    + dbih[0]).reshape(T, B, D, H)
    dgz_scr[...] = (jnp.dot(dec_in_flat, dwih[1], preferred_element_type=f32)
                    + dbih[1]).reshape(T, B, D, H)
    dgn_scr[...] = (jnp.dot(dec_in_flat, dwih[2], preferred_element_type=f32)
                    + dbih[2]).reshape(T, B, D, H)
    # decoder_input @ gen_w_emb for every step (own scratch, not a lane-96 slice)
    gen_scr[...] = jnp.dot(dec_in_flat, gen_w_emb_ref[...],
                           preferred_element_type=f32).reshape(T, BD, 1)

    ds_proj = jnp.dot(ds_emb_ref[...], rel_w_emb_ref[...],
                      preferred_element_type=f32) + rel_b_ref[...]        # (D, H)
    attn_e = attn_e_ref[...].reshape(1, 1, 1, H)
    rel_e = rel_e_ref[...].reshape(1, 1, 1, H)
    len_mask = len_mask_ref[...]                                          # (B, S)
    # one-hot of source tokens, built once per kernel.  PAD columns only get
    # ~0 mass because the masked attention drives padded scores to ~0
    # (same behaviour as the reference scatter_add_ over pad_x).
    onehot_x = (pad_x_ref[...][:, :, None] ==
                lax.broadcasted_iota(jnp.int32, (B, S, V), 2)).astype(f32)  # (B,S,V)
    dwhh = dec_whh_ref[...]
    dbhh = dec_bhh_ref[...]
    w_dec_cat = w_dec_cat_ref[...]
    b_dec_cat = b_dec_cat_ref[...]
    w_ctx_main = w_ctx_main_ref[...]

    def dec_core(t, h_flat):
        """GRU cell + attention + vocab/gen heads for one decode step."""
        gh_r = jnp.dot(h_flat, dwhh[0], preferred_element_type=f32) + dbhh[0]
        gh_z = jnp.dot(h_flat, dwhh[1], preferred_element_type=f32) + dbhh[1]
        gh_n = jnp.dot(h_flat, dwhh[2], preferred_element_type=f32) + dbhh[2]
        r = jax.nn.sigmoid(dgr_scr[t].reshape(BD, H) + gh_r)
        z = jax.nn.sigmoid(dgz_scr[t].reshape(BD, H) + gh_z)
        n = jnp.tanh(dgn_scr[t].reshape(BD, H) + r * gh_n)
        dec_out = (1.0 - z) * n + z * h_flat                               # (BD, H)

        # lane-aligned wide head matmul: [vocab(128) | attn | gen]
        dcat = jnp.dot(dec_out, w_dec_cat, preferred_element_type=f32) + b_dec_cat
        vocab_dec = dcat[:, :V].reshape(B, D, V)
        attn_dec = dcat[:, V:V + H].reshape(B, D, H)
        gen_dec = dcat[:, V + H:V + H + 1]                                 # (BD, 1)

        # attention over encoder states (broadcast over D, no tiling)
        attn_hid = jnp.tanh(enc_proj[:, None, :, :] + attn_dec[:, :, None, :])  # (B,D,S,H)
        sc = jnp.sum(attn_hid * attn_e, axis=-1)                                # (B,D,S)
        sc = jnp.where(len_mask[:, None, :] > 0.0, sc, -1e30)
        sc = jnp.exp(sc - jnp.max(sc, axis=-1, keepdims=True))
        scores = sc * pl.reciprocal(jnp.sum(sc, axis=-1, keepdims=True), approx=True)
        context = jnp.einsum('bds,bsh->bdh', scores, enc_h,
                             preferred_element_type=f32)                        # (B,D,H)

        # lane-aligned wide head matmul: [vocab(128) | gen]
        ccat = jnp.dot(context.reshape(BD, H), w_ctx_main, preferred_element_type=f32)
        vocab_ctx = ccat[:, :V].reshape(B, D, V)
        gen_ctx = ccat[:, V:V + 1]                                              # (BD, 1)

        lg = vocab_dec + vocab_ctx
        lg = jnp.exp(lg - jnp.max(lg, axis=-1, keepdims=True))
        gen_dist = lg * pl.reciprocal(jnp.sum(lg, axis=-1, keepdims=True), approx=True)
        gen_prob = jax.nn.sigmoid(gen_dec + gen_ctx + gen_scr[t]).reshape(B, D, 1)
        return dec_out, context, scores, gen_dist, gen_prob

    # ------- step 0 (peeled): also computes the rel / copy / gate heads -------
    dec_h0 = jnp.broadcast_to(ht[:, None, :], (B, D, H)).reshape(BD, H)
    dec_out0, ctx0, scores0, gen_dist0, gen_prob0 = dec_core(0, dec_h0)

    rel_dec0 = jnp.dot(dec_out0, rel_w_dec_ref[...],
                       preferred_element_type=f32).reshape(B, D, H)
    rel_hid = jnp.tanh(ds_proj[None, None, :, :] + rel_dec0[:, :, None, :])    # (B,D,D,H)
    rel_sc = jnp.sum(rel_hid * rel_e, axis=-1)                                 # (B,D,D)
    # TODO(synk): masked_softmax source not provided; mask-multiplied softmax used.
    exps = jnp.exp(rel_sc - jnp.max(rel_sc, axis=-1, keepdims=True)) * mask_rel_ref[...]
    rel0 = exps * pl.reciprocal(jnp.sum(exps, axis=-1, keepdims=True) + 1e-13,
                                approx=True)                                   # (B,D,D)

    cextra = (jnp.dot(ctx0.reshape(BD, H), w_ctx_extra_ref[...],
                      preferred_element_type=f32) + b_ctx_extra_ref[...])      # (BD, 1+G)
    copy0 = jax.nn.sigmoid(cextra[:, :1]).reshape(B, D, 1)
    gate_ref[...] = cextra[:, 1:1 + G].reshape(B, D, G)

    not_copy = 1.0 - copy0                         # frozen for every decode step
    w_rel = copy0 * rel0                           # (B, D, D), frozen

    def emit_final(t, scores, gen_dist, gen_prob):
        final = not_copy * gen_prob * gen_dist                                 # (B,D,V)
        w_x = not_copy * (1.0 - gen_prob) * scores                             # (B,D,S)
        final = final + jnp.einsum('bds,bsv->bdv', w_x, onehot_x,
                                   preferred_element_type=f32)
        ly = last_y_ref[t]                                                     # (B,D) int32
        # PAD indices of last_y do receive copy*rel mass, exactly like the
        # reference scatter_add_ over pad_last_y.
        onehot_y = (ly[:, :, None] ==
                    lax.broadcasted_iota(jnp.int32, (B, D, V), 2)).astype(f32)
        final = final + jnp.einsum('bdk,bkv->bdv', w_rel, onehot_y,
                                   preferred_element_type=f32)
        final_ref[t] = final

    emit_final(0, scores0, gen_dist0, gen_prob0)

    # ------- remaining steps: rel / copy / gate are frozen closures -------
    def dec_step(t, h_flat):
        dec_out, _ctx, scores, gen_dist, gen_prob = dec_core(t, h_flat)
        emit_final(t, scores, gen_dist, gen_prob)
        return dec_out

    dec_unroll = True if T <= 8 else 4
    lax.fori_loop(1, T, dec_step, dec_out0, unroll=dec_unroll)


def run_model_kernel(p, fp, x_emb_sbe, enc_mask_sb1, len_mask_bs, pad_x_bs,
                     dec_in_all, last_y_tbd, mask_rel, ds_emb):
    S, B, _ = x_emb_sbe.shape
    T, _, D, _ = dec_in_all.shape
    H, V, G = HID, VOCAB_SIZE, NUM_GATES
    args = (x_emb_sbe, enc_mask_sb1, len_mask_bs, pad_x_bs,
            dec_in_all, last_y_tbd, mask_rel, ds_emb,
            p['enc_wih'], p['enc_whh'], p['enc_bih'], p['enc_bhh'],
            p['dec_wih'], p['dec_whh'], p['dec_bih'], p['dec_bhh'],
            p['gen_w_emb'], p['attn_w_enc'], p['attn_e'],
            p['rel_w_emb'], p['rel_w_dec'], p['rel_b'], p['rel_e'],
            fp['w_dec_cat'], fp['b_dec_cat'], fp['w_ctx_main'],
            fp['w_ctx_extra'], fp['b_ctx_extra'])
    out_shape = [jax.ShapeDtypeStruct((T, B, D, V), jnp.float32),
                 jax.ShapeDtypeStruct((B, D, G), jnp.float32)]
    scratch = [pltpu.VMEM((S, B, H), jnp.float32),      # encoder all_h
               pltpu.VMEM((S, B, H), jnp.float32),      # encoder gi_r
               pltpu.VMEM((S, B, H), jnp.float32),      # encoder gi_z
               pltpu.VMEM((S, B, H), jnp.float32),      # encoder gi_n
               pltpu.VMEM((T, B, D, H), jnp.float32),   # decoder gi_r
               pltpu.VMEM((T, B, D, H), jnp.float32),   # decoder gi_z
               pltpu.VMEM((T, B, D, H), jnp.float32),   # decoder gi_n
               pltpu.VMEM((T, B * D, 1), jnp.float32)]  # dec_in @ gen_w_emb
    return pl.pallas_call(
        _fused_kernel,
        grid=(1,),
        in_specs=[_full_spec(a.shape) for a in args],
        out_specs=[_full_spec(s.shape) for s in out_shape],
        out_shape=out_shape,
        scratch_shapes=scratch,
        compiler_params=pltpu.CompilerParams(
            dimension_semantics=("arbitrary",),
            vmem_limit_bytes=32 * 1024 * 1024),
        # TODO(synk): on v7x a second "parallel" grid axis over D could use the
        # second TensorCore; skipped here because the fused kernel would then
        # re-run the encoder on both cores at these tiny shapes.
    )(*args)


# ------------------------------- parameters ----------------------------------
def init_params(key):
    ks = jax.random.split(key, 24)
    u = lambda k, shape: jax.random.uniform(k, shape, jnp.float32, -0.1, 0.1)
    p = {}
    p['embedding'] = u(ks[0], (VOCAB_SIZE, EMB))
    p['ds_word_emb'] = u(ks[1], (NUM_DS_WORDS, EMB))            # domain_slot_embedding
    # encoder GRU (input_encoder), gate-major [r, z, n], uni-directional, 1 layer
    p['enc_wih'] = u(ks[2], (3, EMB, HID)); p['enc_whh'] = u(ks[3], (3, HID, HID))
    p['enc_bih'] = jnp.zeros((3, 1, HID));  p['enc_bhh'] = jnp.zeros((3, 1, HID))
    # decoder GRU (bs_decoder), gate-major
    p['dec_wih'] = u(ks[4], (3, EMB, HID)); p['dec_whh'] = u(ks[5], (3, HID, HID))
    p['dec_bih'] = jnp.zeros((3, 1, HID));  p['dec_bhh'] = jnp.zeros((3, 1, HID))
    # attn_w_linear: Linear(2H -> H) split into [encoder ; decoder] blocks
    p['attn_w_enc'] = u(ks[6], (HID, HID)); p['attn_w_dec'] = u(ks[7], (HID, HID))
    p['attn_b'] = jnp.zeros((1, HID))
    p['attn_e'] = u(ks[8], (1, HID))                            # attn_e_linear (no bias)
    # vocab_linear: Linear(2H -> V) split into [decoder ; context]
    p['vocab_w_dec'] = u(ks[9], (HID, VOCAB_SIZE)); p['vocab_w_ctx'] = u(ks[10], (HID, VOCAB_SIZE))
    p['vocab_b'] = jnp.zeros((1, VOCAB_SIZE))
    # gen_linear: Linear(2H + E -> 1) split into [decoder ; context ; emb]
    p['gen_w_dec'] = u(ks[11], (HID, 1)); p['gen_w_ctx'] = u(ks[12], (HID, 1))
    p['gen_w_emb'] = u(ks[13], (EMB, 1)); p['gen_b'] = jnp.zeros((1, 1))
    # rel_attn_w_linear: Linear(H + E -> H) split into [emb ; decoder]
    p['rel_w_emb'] = u(ks[14], (EMB, HID)); p['rel_w_dec'] = u(ks[15], (HID, HID))
    p['rel_b'] = jnp.zeros((1, HID))
    p['rel_e'] = u(ks[16], (1, HID))                            # rel_attn_e_linear (no bias)
    p['copy_w'] = u(ks[17], (HID, 1)); p['copy_b'] = jnp.zeros((1, 1))     # copy_rel_linear
    p['gate_w'] = u(ks[18], (HID, NUM_GATES)); p['gate_b'] = jnp.zeros((1, NUM_GATES))  # slot_gate
    return p


def prepare_fused_params(p):
    """Lane-aligned wide heads: the 128-wide vocab block sits at lane offset 0."""
    return dict(
        w_dec_cat=jnp.concatenate([p['vocab_w_dec'], p['attn_w_dec'],
                                   p['gen_w_dec']], axis=1),          # (H, V+H+1)
        b_dec_cat=jnp.concatenate([p['vocab_b'], p['attn_b'],
                                   p['gen_b']], axis=1),              # (1, V+H+1)
        w_ctx_main=jnp.concatenate([p['vocab_w_ctx'], p['gen_w_ctx']], axis=1),  # (H, V+1)
        w_ctx_extra=jnp.concatenate([p['copy_w'], p['gate_w']], axis=1),         # (H, 1+G)
        b_ctx_extra=jnp.concatenate([p['copy_b'], p['gate_b']], axis=1),         # (1, 1+G)
    )


def get_domain_slot_embedding(p):
    idx_d = jnp.asarray([_domain_slot_w2i[ds.split('-')[0]] for ds in DOMAIN_SLOTS])
    idx_s = jnp.asarray([_domain_slot_w2i[ds.split('-')[1]] for ds in DOMAIN_SLOTS])
    return p['ds_word_emb'][idx_d] + p['ds_word_emb'][idx_s]     # (D, E)


# ------------------------------- glue (numpy) ---------------------------------
def pad_x_fn(x):
    # NOTE: the reference sorts by length for pack_padded_sequence and unsorts
    # every result afterwards; that round trip is an identity on the outputs,
    # so the masked-GRU encoder here just runs in the original batch order.
    batch_size = len(x)
    lengths = np.array([max(1, len(one)) for one in x])
    max_length = int(lengths.max())
    padded = np.full((batch_size, max_length), PAD_IDX, dtype=np.int32)
    for i, one in enumerate(x):
        padded[i, :len(one)] = one
    return padded, lengths


def pad_y_fn(y, max_length=0):
    batch_size = len(y)
    num_slots = len(y[0])
    lengths = np.zeros((num_slots, batch_size), dtype=np.int32)
    for i in range(num_slots):
        for j, one in enumerate(y):
            l = len(one[i]); max_length = max(l, max_length); lengths[i, j] = l
    padded = np.full((num_slots, batch_size, max_length), PAD_IDX, dtype=np.int32)
    for i in range(num_slots):
        for j, one in enumerate(y):
            padded[i, j, :len(one[i])] = one[i]
    return padded, lengths


# ------------------------------- forward pass ---------------------------------
@jax.jit
def _forward_device(p, pad_x, x_lengths, pad_y, pad_last_y):
    B, S = pad_x.shape
    D, _, T = pad_y.shape

    fp = prepare_fused_params(p)
    all_ds_emb = get_domain_slot_embedding(p)                    # (D, E)

    # embedding lookup (word_dropout = 0, dropout p=0 -> identity)
    x_emb_sbe = jnp.transpose(p['embedding'][pad_x], (1, 0, 2))  # (S, B, E)
    enc_mask = (jnp.arange(S)[:, None] <
                x_lengths[None, :]).astype(jnp.float32)[:, :, None]          # (S, B, 1)
    len_mask = (jnp.arange(S)[None, :] <
                x_lengths[:, None]).astype(jnp.float32)                      # (B, S)

    # decoder inputs for all T steps (teacher forcing ratio 1.0 -> known ahead)
    dec_in0 = jnp.broadcast_to(all_ds_emb[None, :, :], (B, D, EMB))          # (B, D, E)
    tgt_emb = p['embedding'][jnp.transpose(pad_y, (2, 1, 0))]                # (T, B, D, E)
    dec_in_all = jnp.concatenate([dec_in0[None], tgt_emb[:-1]], axis=0)      # (T, B, D, E)

    last_y_tbd = jnp.transpose(pad_last_y, (2, 1, 0)).astype(jnp.int32)      # (T, B, D)

    mask_not_none = (pad_last_y[:, :, 0] != NONE_IDX).astype(jnp.float32)    # (D, B)
    not_self = 1.0 - jnp.eye(D, dtype=jnp.float32)
    # mask_rel[b, d, k] = (k != d) * (pad_last_y[k, b, 0] != none)
    mask_rel = not_self[None, :, :] * mask_not_none.T[:, None, :]            # (B, D, D)

    final_out, gate_out = run_model_kernel(
        p, fp, x_emb_sbe, enc_mask, len_mask, pad_x.astype(jnp.int32),
        dec_in_all, last_y_tbd, mask_rel, all_ds_emb)

    all_decoder_output = jnp.transpose(final_out, (2, 1, 0, 3))              # (D, B, T, V)
    all_gate_output = jnp.transpose(gate_out, (1, 0, 2))                     # (D, B, G)
    return all_decoder_output, all_gate_output


def model_forward(p, x, y, last_y):
    pad_x_np, x_lengths = pad_x_fn(x)
    pad_y_np, y_lengths = pad_y_fn(y)
    T = pad_y_np.shape[2]
    pad_last_y_np, _ = pad_y_fn(last_y, T)

    pad_y_j = jnp.asarray(pad_y_np)
    all_dec, all_gate = _forward_device(p,
                                        jnp.asarray(pad_x_np),
                                        jnp.asarray(x_lengths),
                                        pad_y_j,
                                        jnp.asarray(pad_last_y_np))
    return all_dec, pad_y_j, jnp.asarray(y_lengths), all_gate


# ----------------------------------- main --------------------------------------
if __name__ == "__main__":
    key = jax.random.PRNGKey(0)
    pkey, xkey = jax.random.split(key)
    params = init_params(pkey)

    # B=2 dialogue turns, max source length S=8, D=3 domain-slots, T=3 decode steps.
    tok = np.asarray(jax.random.randint(xkey, (2, 8), 5, VOCAB_SIZE))
    x = [list(tok[0, :8]), list(tok[1, :5])]
    y = [
        [[int(tok[0, 0]), int(tok[0, 1]), EOS_IDX], [NONE_IDX, EOS_IDX], [DONTCARE_IDX, EOS_IDX]],
        [[NONE_IDX, EOS_IDX], [int(tok[1, 2]), EOS_IDX], [int(tok[1, 3]), int(tok[1, 4]), EOS_IDX]],
    ]
    last_y = [
        [[NONE_IDX, EOS_IDX], [NONE_IDX, EOS_IDX], [int(tok[0, 2]), EOS_IDX]],
        [[int(tok[1, 0]), EOS_IDX], [NONE_IDX, EOS_IDX], [NONE_IDX, EOS_IDX]],
    ]

    out = model_forward(params, x, y, last_y)
    out = jax.block_until_ready(out)
    all_dec, pad_y_out, y_lens, all_gate = out
    assert all_dec.shape == (len(DOMAIN_SLOTS), 2, pad_y_out.shape[2], VOCAB_SIZE)
    assert all_gate.shape == (len(DOMAIN_SLOTS), 2, NUM_GATES)
    assert bool(jnp.all(jnp.isfinite(all_dec))) and bool(jnp.all(jnp.isfinite(all_gate)))
    print("KERNEL_OK")
</pallas_src>

<mosaic_0001>
module attributes {stable_mosaic.version = 11 : i64} {
  func.func @_fused_kernel(%arg0: i32, %arg1: memref<8x2x32xf32, #tpu.memory_space<vmem>>, %arg2: memref<8x2x1xf32, #tpu.memory_space<vmem>>, %arg3: memref<2x8xf32, #tpu.memory_space<vmem>>, %arg4: memref<2x8xi32, #tpu.memory_space<vmem>>, %arg5: memref<3x2x3x32xf32, #tpu.memory_space<vmem>>, %arg6: memref<3x2x3xi32, #tpu.memory_space<vmem>>, %arg7: memref<2x3x3xf32, #tpu.memory_space<vmem>>, %arg8: memref<3x32xf32, #tpu.memory_space<vmem>>, %arg9: memref<3x32x32xf32, #tpu.memory_space<vmem>>, %arg10: memref<3x32x32xf32, #tpu.memory_space<vmem>>, %arg11: memref<3x1x32xf32, #tpu.memory_space<vmem>>, %arg12: memref<3x1x32xf32, #tpu.memory_space<vmem>>, %arg13: memref<3x32x32xf32, #tpu.memory_space<vmem>>, %arg14: memref<3x32x32xf32, #tpu.memory_space<vmem>>, %arg15: memref<3x1x32xf32, #tpu.memory_space<vmem>>, %arg16: memref<3x1x32xf32, #tpu.memory_space<vmem>>, %arg17: memref<32x1xf32, #tpu.memory_space<vmem>>, %arg18: memref<32x32xf32, #tpu.memory_space<vmem>>, %arg19: memref<1x32xf32, #tpu.memory_space<vmem>>, %arg20: memref<32x32xf32, #tpu.memory_space<vmem>>, %arg21: memref<32x32xf32, #tpu.memory_space<vmem>>, %arg22: memref<1x32xf32, #tpu.memory_space<vmem>>, %arg23: memref<1x32xf32, #tpu.memory_space<vmem>>, %arg24: memref<32x161xf32, #tpu.memory_space<vmem>>, %arg25: memref<1x161xf32, #tpu.memory_space<vmem>>, %arg26: memref<32x129xf32, #tpu.memory_space<vmem>>, %arg27: memref<32x4xf32, #tpu.memory_space<vmem>>, %arg28: memref<1x4xf32, #tpu.memory_space<vmem>>, %arg29: memref<3x2x3x128xf32, #tpu.memory_space<vmem>>, %arg30: memref<2x3x3xf32, #tpu.memory_space<vmem>>, %arg31: memref<8x2x32xf32, #tpu.memory_space<vmem>>, %arg32: memref<8x2x32xf32, #tpu.memory_space<vmem>>, %arg33: memref<8x2x32xf32, #tpu.memory_space<vmem>>, %arg34: memref<8x2x32xf32, #tpu.memory_space<vmem>>, %arg35: memref<3x2x3x32xf32, #tpu.memory_space<vmem>>, %arg36: memref<3x2x3x32xf32, #tpu.memory_space<vmem>>, %arg37: memref<3x2x3x32xf32, #tpu.memory_space<vmem>>, %arg38: memref<3x6x1xf32, #tpu.memory_space<vmem>>) attributes {dimension_semantics = [#tpu.dimension_semantics<arbitrary>], iteration_bounds = array<i64: 1>, scalar_prefetch = 0 : i64, scratch_operands = 8 : i64, tpu.core_type = #tpu.core_type<tc>, window_params = [{pipeline_mode = #tpu.pipeline_mode<synchronous>, transform_indices = @transform_0, window_bounds = array<i64: 8, 2, 32>}, {pipeline_mode = #tpu.pipeline_mode<synchronous>, transform_indices = @transform_1, window_bounds = array<i64: 8, 2, 1>}, {pipeline_mode = #tpu.pipeline_mode<synchronous>, transform_indices = @transform_2, window_bounds = array<i64: 2, 8>}, {pipeline_mode = #tpu.pipeline_mode<synchronous>, transform_indices = @transform_3, window_bounds = array<i64: 2, 8>}, {pipeline_mode = #tpu.pipeline_mode<synchronous>, transform_indices = @transform_4, window_bounds = array<i64: 3, 2, 3, 32>}, {pipeline_mode = #tpu.pipeline_mode<synchronous>, transform_indices = @transform_5, window_bounds = array<i64: 3, 2, 3>}, {pipeline_mode = #tpu.pipeline_mode<synchronous>, transform_indices = @transform_6, window_bounds = array<i64: 2, 3, 3>}, {pipeline_mode = #tpu.pipeline_mode<synchronous>, transform_indices = @transform_7, window_bounds = array<i64: 3, 32>}, {pipeline_mode = #tpu.pipeline_mode<synchronous>, transform_indices = @transform_8, window_bounds = array<i64: 3, 32, 32>}, {pipeline_mode = #tpu.pipeline_mode<synchronous>, transform_indices = @transform_9, window_bounds = array<i64: 3, 32, 32>}, {pipeline_mode = #tpu.pipeline_mode<synchronous>, transform_indices = @transform_10, window_bounds = array<i64: 3, 1, 32>}, {pipeline_mode = #tpu.pipeline_mode<synchronous>, transform_indices = @transform_11, window_bounds = array<i64: 3, 1, 32>}, {pipeline_mode = #tpu.pipeline_mode<synchronous>, transform_indices = @transform_12, window_bounds = array<i64: 3, 32, 32>}, {pipeline_mode = #tpu.pipeline_mode<synchronous>, transform_indices = @transform_13, window_bounds = array<i64: 3, 32, 32>}, {pipeline_mode = #tpu.pipeline_mode<synchronous>, transform_indices = @transform_14, window_bounds = array<i64: 3, 1, 32>}, {pipeline_mode = #tpu.pipeline_mode<synchronous>, transform_indices = @transform_15, window_bounds = array<i64: 3, 1, 32>}, {pipeline_mode = #tpu.pipeline_mode<synchronous>, transform_indices = @transform_16, window_bounds = array<i64: 32, 1>}, {pipeline_mode = #tpu.pipeline_mode<synchronous>, transform_indices = @transform_17, window_bounds = array<i64: 32, 32>}, {pipeline_mode = #tpu.pipeline_mode<synchronous>, transform_indices = @transform_18, window_bounds = array<i64: 1, 32>}, {pipeline_mode = #tpu.pipeline_mode<synchronous>, transform_indices = @transform_19, window_bounds = array<i64: 32, 32>}, {pipeline_mode = #tpu.pipeline_mode<synchronous>, transform_indices = @transform_20, window_bounds = array<i64: 32, 32>}, {pipeline_mode = #tpu.pipeline_mode<synchronous>, transform_indices = @transform_21, window_bounds = array<i64: 1, 32>}, {pipeline_mode = #tpu.pipeline_mode<synchronous>, transform_indices = @transform_22, window_bounds = array<i64: 1, 32>}, {pipeline_mode = #tpu.pipeline_mode<synchronous>, transform_indices = @transform_23, window_bounds = array<i64: 32, 161>}, {pipeline_mode = #tpu.pipeline_mode<synchronous>, transform_indices = @transform_24, window_bounds = array<i64: 1, 161>}, {pipeline_mode = #tpu.pipeline_mode<synchronous>, transform_indices = @transform_25, window_bounds = array<i64: 32, 129>}, {pipeline_mode = #tpu.pipeline_mode<synchronous>, transform_indices = @transform_26, window_bounds = array<i64: 32, 4>}, {pipeline_mode = #tpu.pipeline_mode<synchronous>, transform_indices = @transform_27, window_bounds = array<i64: 1, 4>}, {pipeline_mode = #tpu.pipeline_mode<synchronous>, transform_indices = @transform_28, window_bounds = array<i64: 3, 2, 3, 128>}, {pipeline_mode = #tpu.pipeline_mode<synchronous>, transform_indices = @transform_29, window_bounds = array<i64: 2, 3, 3>}]} {
    %c0 = arith.constant 0 : index
    %c0_0 = arith.constant 0 : index
    %c0_1 = arith.constant 0 : index
    %0 = vector.load %arg1[%c0, %c0_0, %c0_1] : memref<8x2x32xf32, #tpu.memory_space<vmem>>, vector<8x2x32xf32>
    %1 = vector.shape_cast %0 : vector<8x2x32xf32> to vector<16x32xf32>
    %c0_2 = arith.constant 0 : index
    %c0_3 = arith.constant 0 : index
    %c0_4 = arith.constant 0 : index
    %2 = vector.load %arg9[%c0_2, %c0_3, %c0_4] : memref<3x32x32xf32, #tpu.memory_space<vmem>>, vector<3x32x32xf32>
    %c0_5 = arith.constant 0 : index
    %c0_6 = arith.constant 0 : index
    %c0_7 = arith.constant 0 : index
    %3 = vector.load %arg11[%c0_5, %c0_6, %c0_7] : memref<3x1x32xf32, #tpu.memory_space<vmem>>, vector<3x1x32xf32>
    %4 = vector.extract_strided_slice %2 {offsets = [0, 0, 0], sizes = [1, 32, 32], strides = [1, 1, 1]} : vector<3x32x32xf32> to vector<1x32x32xf32>
    %5 = vector.shape_cast %4 : vector<1x32x32xf32> to vector<32x32xf32>
    %cst = arith.constant dense<0.000000e+00> : vector<16x32xf32>
    %6 = tpu.matmul %1, %5, %cst {dimension_numbers = #tpu.dot_dimension_numbers<[1], [0], [0], [1], [0, 0, 1, 1], [], []>} : vector<16x32xf32>, vector<32x32xf32>, vector<16x32xf32> -> vector<16x32xf32>
    %7 = vector.extract_strided_slice %3 {offsets = [0, 0, 0], sizes = [1, 1, 32], strides = [1, 1, 1]} : vector<3x1x32xf32> to vector<1x1x32xf32>
    %8 = vector.shape_cast %7 : vector<1x1x32xf32> to vector<1x32xf32>
    %9 = vector.broadcast %8 : vector<1x32xf32> to vector<16x32xf32>
    %10 = arith.addf %6, %9 : vector<16x32xf32>
    %11 = vector.shape_cast %10 : vector<16x32xf32> to vector<8x2x32xf32>
    %c0_8 = arith.constant 0 : index
    %c0_9 = arith.constant 0 : index
    %c0_10 = arith.constant 0 : index
    %12 = vector.load %arg32[%c0_8, %c0_9, %c0_10] : memref<8x2x32xf32, #tpu.memory_space<vmem>>, vector<8x2x32xf32>
    tpu.vector_store %arg32[%c0_8, %c0_9, %c0_10], %11 {strides = array<i32>} : memref<8x2x32xf32, #tpu.memory_space<vmem>>, vector<8x2x32xf32>,
    %13 = vector.extract_strided_slice %2 {offsets = [1, 0, 0], sizes = [1, 32, 32], strides = [1, 1, 1]} : vector<3x32x32xf32> to vector<1x32x32xf32>
    %14 = vector.shape_cast %13 : vector<1x32x32xf32> to vector<32x32xf32>
    %cst_11 = arith.constant dense<0.000000e+00> : vector<16x32xf32>
    %15 = tpu.matmul %1, %14, %cst_11 {dimension_numbers = #tpu.dot_dimension_numbers<[1], [0], [0], [1], [0, 0, 1, 1], [], []>} : vector<16x32xf32>, vector<32x32xf32>, vector<16x32xf32> -> vector<16x32xf32>
    %16 = vector.extract_strided_slice %3 {offsets = [1, 0, 0], sizes = [1, 1, 32], strides = [1, 1, 1]} : vector<3x1x32xf32> to vector<1x1x32xf32>
    %17 = vector.shape_cast %16 : vector<1x1x32xf32> to vector<1x32xf32>
    %18 = vector.broadcast %17 : vector<1x32xf32> to vector<16x32xf32>
    %19 = arith.addf %15, %18 : vector<16x32xf32>
    %20 = vector.shape_cast %19 : vector<16x32xf32> to vector<8x2x32xf32>
    %c0_12 = arith.constant 0 : index
    %c0_13 = arith.constant 0 : index
    %c0_14 = arith.constant 0 : index
    %21 = vector.load %arg33[%c0_12, %c0_13, %c0_14] : memref<8x2x32xf32, #tpu.memory_space<vmem>>, vector<8x2x32xf32>
    tpu.vector_store %arg33[%c0_12, %c0_13, %c0_14], %20 {strides = array<i32>} : memref<8x2x32xf32, #tpu.memory_space<vmem>>, vector<8x2x32xf32>,
    %22 = vector.extract_strided_slice %2 {offsets = [2, 0, 0], sizes = [1, 32, 32], strides = [1, 1, 1]} : vector<3x32x32xf32> to vector<1x32x32xf32>
    %23 = vector.shape_cast %22 : vector<1x32x32xf32> to vector<32x32xf32>
    %cst_15 = arith.constant dense<0.000000e+00> : vector<16x32xf32>
    %24 = tpu.matmul %1, %23, %cst_15 {dimension_numbers = #tpu.dot_dimension_numbers<[1], [0], [0], [1], [0, 0, 1, 1], [], []>} : vector<16x32xf32>, vector<32x32xf32>, vector<16x32xf32> -> vector<16x32xf32>
    %25 = vector.extract_strided_slice %3 {offsets = [2, 0, 0], sizes = [1, 1, 32], strides = [1, 1, 1]} : vector<3x1x32xf32> to vector<1x1x32xf32>
    %26 = vector.shape_cast %25 : vector<1x1x32xf32> to vector<1x32xf32>
    %27 = vector.broadcast %26 : vector<1x32xf32> to vector<16x32xf32>
    %28 = arith.addf %24, %27 : vector<16x32xf32>
    %29 = vector.shape_cast %28 : vector<16x32xf32> to vector<8x2x32xf32>
    %c0_16 = arith.constant 0 : index
    %c0_17 = arith.constant 0 : index
    %c0_18 = arith.constant 0 : index
    %30 = vector.load %arg34[%c0_16, %c0_17, %c0_18] : memref<8x2x32xf32, #tpu.memory_space<vmem>>, vector<8x2x32xf32>
    tpu.vector_store %arg34[%c0_16, %c0_17, %c0_18], %29 {strides = array<i32>} : memref<8x2x32xf32, #tpu.memory_space<vmem>>, vector<8x2x32xf32>,
    %c0_19 = arith.constant 0 : index
    %c0_20 = arith.constant 0 : index
    %c0_21 = arith.constant 0 : index
    %31 = vector.load %arg10[%c0_19, %c0_20, %c0_21] : memref<3x32x32xf32, #tpu.memory_space<vmem>>, vector<3x32x32xf32>
    %c0_22 = arith.constant 0 : index
    %c0_23 = arith.constant 0 : index
    %c0_24 = arith.constant 0 : index
    %32 = vector.load %arg12[%c0_22, %c0_23, %c0_24] : memref<3x1x32xf32, #tpu.memory_space<vmem>>, vector<3x1x32xf32>
    %cst_25 = arith.constant 0.000000e+00 : f32
    %33 = vector.broadcast %cst_25 : f32 to vector<2x32xf32>
    %c0_i32 = arith.constant 0 : i32
    %34 = vector.extract_strided_slice %31 {offsets = [0, 0, 0], sizes = [1, 32, 32], strides = [1, 1, 1]} : vector<3x32x32xf32> to vector<1x32x32xf32>
    %35 = vector.shape_cast %34 : vector<1x32x32xf32> to vector<32x32xf32>
    %cst_26 = arith.constant dense<0.000000e+00> : vector<2x32xf32>
    %36 = tpu.matmul %33, %35, %cst_26 {dimension_numbers = #tpu.dot_dimension_numbers<[1], [0], [0], [1], [0, 0, 1, 1], [], []>} : vector<2x32xf32>, vector<32x32xf32>, vector<2x32xf32> -> vector<2x32xf32>
    %37 = vector.extract_strided_slice %32 {offsets = [0, 0, 0], sizes = [1, 1, 32], strides = [1, 1, 1]} : vector<3x1x32xf32> to vector<1x1x32xf32>
    %38 = vector.shape_cast %37 : vector<1x1x32xf32> to vector<1x32xf32>
    %39 = vector.broadcast %38 : vector<1x32xf32> to vector<2x32xf32>
    %40 = arith.addf %36, %39 : vector<2x32xf32>
    %41 = vector.extract_strided_slice %31 {offsets = [1, 0, 0], sizes = [1, 32, 32], strides = [1, 1, 1]} : vector<3x32x32xf32> to vector<1x32x32xf32>
    %42 = vector.shape_cast %41 : vector<1x32x32xf32> to vector<32x32xf32>
    %cst_27 = arith.constant dense<0.000000e+00> : vector<2x32xf32>
    %43 = tpu.matmul %33, %42, %cst_27 {dimension_numbers = #tpu.dot_dimension_numbers<[1], [0], [0], [1], [0, 0, 1, 1], [], []>} : vector<2x32xf32>, vector<32x32xf32>, vector<2x32xf32> -> vector<2x32xf32>
    %44 = vector.extract_strided_slice %32 {offsets = [1, 0, 0], sizes = [1, 1, 32], strides = [1, 1, 1]} : vector<3x1x32xf32> to vector<1x1x32xf32>
    %45 = vector.shape_cast %44 : vector<1x1x32xf32> to vector<1x32xf32>
    %46 = vector.broadcast %45 : vector<1x32xf32> to vector<2x32xf32>
    %47 = arith.addf %43, %46 : vector<2x32xf32>
    %48 = vector.extract_strided_slice %31 {offsets = [2, 0, 0], sizes = [1, 32, 32], strides = [1, 1, 1]} : vector<3x32x32xf32> to vector<1x32x32xf32>
    %49 = vector.shape_cast %48 : vector<1x32x32xf32> to vector<32x32xf32>
    %cst_28 = arith.constant dense<0.000000e+00> : vector<2x32xf32>
    %50 = tpu.matmul %33, %49, %cst_28 {dimension_numbers = #tpu.dot_dimension_numbers<[1], [0], [0], [1], [0, 0, 1, 1], [], []>} : vector<2x32xf32>, vector<32x32xf32>, vector<2x32xf32> -> vector<2x32xf32>
    %51 = vector.extract_strided_slice %32 {offsets = [2, 0, 0], sizes = [1, 1, 32], strides = [1, 1, 1]} : vector<3x1x32xf32> to vector<1x1x32xf32>
    %52 = vector.shape_cast %51 : vector<1x1x32xf32> to vector<1x32xf32>
    %53 = vector.broadcast %52 : vector<1x32xf32> to vector<2x32xf32>
    %54 = arith.addf %50, %53 : vector<2x32xf32>
    %55 = arith.index_cast %c0_i32 : i32 to index
    %c0_29 = arith.constant 0 : index
    %c0_30 = arith.constant 0 : index
    %56 = vector.load %arg32[%55, %c0_29, %c0_30] : memref<8x2x32xf32, #tpu.memory_space<vmem>>, vector<1x2x32xf32>
    %57 = vector.shape_cast %56 : vector<1x2x32xf32> to vector<2x32xf32>
    %58 = arith.addf %57, %40 : vector<2x32xf32>
    %59 = arith.negf %58 : vector<2x32xf32>
    %60 = math.exp %59 : vector<2x32xf32>
    %cst_31 = arith.constant 1.000000e+00 : f32
    %61 = vector.broadcast %cst_31 : f32 to vector<2x32xf32>
    %62 = arith.addf %61, %60 : vector<2x32xf32>
    %63 = arith.divf %61, %62 : vector<2x32xf32>
    %64 = arith.index_cast %c0_i32 : i32 to index
    %c0_32 = arith.constant 0 : index
    %c0_33 = arith.constant 0 : index
    %65 = vector.load %arg33[%64, %c0_32, %c0_33] : memref<8x2x32xf32, #tpu.memory_space<vmem>>, vector<1x2x32xf32>
    %66 = vector.shape_cast %65 : vector<1x2x32xf32> to vector<2x32xf32>
    %67 = arith.addf %66, %47 : vector<2x32xf32>
    %68 = arith.negf %67 : vector<2x32xf32>
    %69 = math.exp %68 : vector<2x32xf32>
    %cst_34 = arith.constant 1.000000e+00 : f32
    %70 = vector.broadcast %cst_34 : f32 to vector<2x32xf32>
    %71 = arith.addf %70, %69 : vector<2x32xf32>
    %72 = arith.divf %70, %71 : vector<2x32xf32>
    %73 = arith.index_cast %c0_i32 : i32 to index
    %c0_35 = arith.constant 0 : index
    %c0_36 = arith.constant 0 : index
    %74 = vector.load %arg34[%73, %c0_35, %c0_36] : memref<8x2x32xf32, #tpu.memory_space<vmem>>, vector<1x2x32xf32>
    %75 = vector.shape_cast %74 : vector<1x2x32xf32> to vector<2x32xf32>
    %76 = arith.mulf %63, %54 : vector<2x32xf32>
    %77 = arith.addf %75, %76 : vector<2x32xf32>
    %78 = math.tanh %77 : vector<2x32xf32>
    %cst_37 = arith.constant 1.000000e+00 : f32
    %79 = vector.broadcast %cst_37 : f32 to vector<2x32xf32>
    %80 = arith.subf %79, %72 : vector<2x32xf32>
    %81 = arith.mulf %80, %78 : vector<2x32xf32>
    %82 = arith.mulf %72, %33 : vector<2x32xf32>
    %83 = arith.addf %81, %82 : vector<2x32xf32>
    %84 = arith.index_cast %c0_i32 : i32 to index
    %c0_38 = arith.constant 0 : index
    %c0_39 = arith.constant 0 : index
    %85 = vector.load %arg2[%84, %c0_38, %c0_39] : memref<8x2x1xf32, #tpu.memory_space<vmem>>, vector<1x2x1xf32>
    %86 = vector.shape_cast %85 : vector<1x2x1xf32> to vector<2x1xf32>
    %87 = vector.broadcast %86 : vector<2x1xf32> to vector<2x32xf32>
    %88 = arith.mulf %83, %87 : vector<2x32xf32>
    %89 = arith.index_cast %c0_i32 : i32 to index
    %c0_40 = arith.constant 0 : index
    %c0_41 = arith.constant 0 : index
    %90 = vector.load %arg31[%89, %c0_40, %c0_41] : memref<8x2x32xf32, #tpu.memory_space<vmem>>, vector<1x2x32xf32>
    %91 = vector.shape_cast %90 : vector<1x2x32xf32> to vector<2x32xf32>
    %92 = vector.shape_cast %88 : vector<2x32xf32> to vector<1x2x32xf32>
    tpu.vector_store %arg31[%89, %c0_40, %c0_41], %92 {strides = array<i32>} : memref<8x2x32xf32, #tpu.memory_space<vmem>>, vector<1x2x32xf32>,
    %93 = vector.broadcast %86 : vector<2x1xf32> to vector<2x32xf32>
    %94 = arith.mulf %93, %83 : vector<2x32xf32>
    %cst_42 = arith.constant 1.000000e+00 : f32
    %95 = vector.broadcast %cst_42 : f32 to vector<2x1xf32>
    %96 = arith.subf %95, %86 : vector<2x1xf32>
    %97 = vector.broadcast %96 : vector<2x1xf32> to vector<2x32xf32>
    %98 = arith.mulf %97, %33 : vector<2x32xf32>
    %99 = arith.addf %94, %98 : vector<2x32xf32>
    %c1_i32 = arith.constant 1 : i32
    %100 = vector.extract_strided_slice %31 {offsets = [0, 0, 0], sizes = [1, 32, 32], strides = [1, 1, 1]} : vector<3x32x32xf32> to vector<1x32x32xf32>
    %101 = vector.shape_cast %100 : vector<1x32x32xf32> to vector<32x32xf32>
    %cst_43 = arith.constant dense<0.000000e+00> : vector<2x32xf32>
    %102 = tpu.matmul %99, %101, %cst_43 {dimension_numbers = #tpu.dot_dimension_numbers<[1], [0], [0], [1], [0, 0, 1, 1], [], []>} : vector<2x32xf32>, vector<32x32xf32>, vector<2x32xf32> -> vector<2x32xf32>
    %103 = vector.extract_strided_slice %32 {offsets = [0, 0, 0], sizes = [1, 1, 32], strides = [1, 1, 1]} : vector<3x1x32xf32> to vector<1x1x32xf32>
    %104 = vector.shape_cast %103 : vector<1x1x32xf32> to vector<1x32xf32>
    %105 = vector.broadcast %104 : vector<1x32xf32> to vector<2x32xf32>
    %106 = arith.addf %102, %105 : vector<2x32xf32>
    %107 = vector.extract_strided_slice %31 {offsets = [1, 0, 0], sizes = [1, 32, 32], strides = [1, 1, 1]} : vector<3x32x32xf32> to vector<1x32x32xf32>
    %108 = vector.shape_cast %107 : vector<1x32x32xf32> to vector<32x32xf32>
    %cst_44 = arith.constant dense<0.000000e+00> : vector<2x32xf32>
    %109 = tpu.matmul %99, %108, %cst_44 {dimension_numbers = #tpu.dot_dimension_numbers<[1], [0], [0], [1], [0, 0, 1, 1], [], []>} : vector<2x32xf32>, vector<32x32xf32>, vector<2x32xf32> -> vector<2x32xf32>
    %110 = vector.extract_strided_slice %32 {offsets = [1, 0, 0], sizes = [1, 1, 32], strides = [1, 1, 1]} : vector<3x1x32xf32> to vector<1x1x32xf32>
    %111 = vector.shape_cast %110 : vector<1x1x32xf32> to vector<1x32xf32>
    %112 = vector.broadcast %111 : vector<1x32xf32> to vector<2x32xf32>
    %113 = arith.addf %109, %112 : vector<2x32xf32>
    %114 = vector.extract_strided_slice %31 {offsets = [2, 0, 0], sizes = [1, 32, 32], strides = [1, 1, 1]} : vector<3x32x32xf32> to vector<1x32x32xf32>
    %115 = vector.shape_cast %114 : vector<1x32x32xf32> to vector<32x32xf32>
    %cst_45 = arith.constant dense<0.000000e+00> : vector<2x32xf32>
    %116 = tpu.matmul %99, %115, %cst_45 {dimension_numbers = #tpu.dot_dimension_numbers<[1], [0], [0], [1], [0, 0, 1, 1], [], []>} : vector<2x32xf32>, vector<32x32xf32>, vector<2x32xf32> -> vector<2x32xf32>
    %117 = vector.extract_strided_slice %32 {offsets = [2, 0, 0], sizes = [1, 1, 32], strides = [1, 1, 1]} : vector<3x1x32xf32> to vector<1x1x32xf32>
    %118 = vector.shape_cast %117 : vector<1x1x32xf32> to vector<1x32xf32>
    %119 = vector.broadcast %118 : vector<1x32xf32> to vector<2x32xf32>
    %120 = arith.addf %116, %119 : vector<2x32xf32>
    %121 = arith.index_cast %c1_i32 : i32 to index
    %c0_46 = arith.constant 0 : index
    %c0_47 = arith.constant 0 : index
    %122 = vector.load %arg32[%121, %c0_46, %c0_47] : memref<8x2x32xf32, #tpu.memory_space<vmem>>, vector<1x2x32xf32>
    %123 = vector.shape_cast %122 : vector<1x2x32xf32> to vector<2x32xf32>
    %124 = arith.addf %123, %106 : vector<2x32xf32>
    %125 = arith.negf %124 : vector<2x32xf32>
    %126 = math.exp %125 : vector<2x32xf32>
    %cst_48 = arith.constant 1.000000e+00 : f32
    %127 = vector.broadcast %cst_48 : f32 to vector<2x32xf32>
    %128 = arith.addf %127, %126 : vector<2x32xf32>
    %129 = arith.divf %127, %128 : vector<2x32xf32>
    %130 = arith.index_cast %c1_i32 : i32 to index
    %c0_49 = arith.constant 0 : index
    %c0_50 = arith.constant 0 : index
    %131 = vector.load %arg33[%130, %c0_49, %c0_50] : memref<8x2x32xf32, #tpu.memory_space<vmem>>, vector<1x2x32xf32>
    %132 = vector.shape_cast %131 : vector<1x2x32xf32> to vector<2x32xf32>
    %133 = arith.addf %132, %113 : vector<2x32xf32>
    %134 = arith.negf %133 : vector<2x32xf32>
    %135 = math.exp %134 : vector<2x32xf32>
    %cst_51 = arith.constant 1.000000e+00 : f32
    %136 = vector.broadcast %cst_51 : f32 to vector<2x32xf32>
    %137 = arith.addf %136, %135 : vector<2x32xf32>
    %138 = arith.divf %136, %137 : vector<2x32xf32>
    %139 = arith.index_cast %c1_i32 : i32 to index
    %c0_52 = arith.constant 0 : index
    %c0_53 = arith.constant 0 : index
    %140 = vector.load %arg34[%139, %c0_52, %c0_53] : memref<8x2x32xf32, #tpu.memory_space<vmem>>, vector<1x2x32xf32>
    %141 = vector.shape_cast %140 : vector<1x2x32xf32> to vector<2x32xf32>
    %142 = arith.mulf %129, %120 : vector<2x32xf32>
    %143 = arith.addf %141, %142 : vector<2x32xf32>
    %144 = math.tanh %143 : vector<2x32xf32>
    %cst_54 = arith.constant 1.000000e+00 : f32
    %145 = vector.broadcast %cst_54 : f32 to vector<2x32xf32>
    %146 = arith.subf %145, %138 : vector<2x32xf32>
    %147 = arith.mulf %146, %144 : vector<2x32xf32>
    %148 = arith.mulf %138, %99 : vector<2x32xf32>
    %149 = arith.addf %147, %148 : vector<2x32xf32>
    %150 = arith.index_cast %c1_i32 : i32 to index
    %c0_55 = arith.constant 0 : index
    %c0_56 = arith.constant 0 : index
    %151 = vector.load %arg2[%150, %c0_55, %c0_56] : memref<8x2x1xf32, #tpu.memory_space<vmem>>, vector<1x2x1xf32>
    %152 = vector.shape_cast %151 : vector<1x2x1xf32> to vector<2x1xf32>
    %153 = vector.broadcast %152 : vector<2x1xf32> to vector<2x32xf32>
    %154 = arith.mulf %149, %153 : vector<2x32xf32>
    %155 = arith.index_cast %c1_i32 : i32 to index
    %c0_57 = arith.constant 0 : index
    %c0_58 = arith.constant 0 : index
    %156 = vector.load %arg31[%155, %c0_57, %c0_58] : memref<8x2x32xf32, #tpu.memory_space<vmem>>, vector<1x2x32xf32>
    %157 = vector.shape_cast %156 : vector<1x2x32xf32> to vector<2x32xf32>
    %158 = vector.shape_cast %154 : vector<2x32xf32> to vector<1x2x32xf32>
    tpu.vector_store %arg31[%155, %c0_57, %c0_58], %158 {strides = array<i32>} : memref<8x2x32xf32, #tpu.memory_space<vmem>>, vector<1x2x32xf32>,
    %159 = vector.broadcast %152 : vector<2x1xf32> to vector<2x32xf32>
    %160 = arith.mulf %159, %149 : vector<2x32xf32>
    %cst_59 = arith.constant 1.000000e+00 : f32
    %161 = vector.broadcast %cst_59 : f32 to vector<2x1xf32>
    %162 = arith.subf %161, %152 : vector<2x1xf32>
    %163 = vector.broadcast %162 : vector<2x1xf32> to vector<2x32xf32>
    %164 = arith.mulf %163, %99 : vector<2x32xf32>
    %165 = arith.addf %160, %164 : vector<2x32xf32>
    %c2_i32 = arith.constant 2 : i32
    %166 = vector.extract_strided_slice %31 {offsets = [0, 0, 0], sizes = [1, 32, 32], strides = [1, 1, 1]} : vector<3x32x32xf32> to vector<1x32x32xf32>
    %167 = vector.shape_cast %166 : vector<1x32x32xf32> to vector<32x32xf32>
    %cst_60 = arith.constant dense<0.000000e+00> : vector<2x32xf32>
    %168 = tpu.matmul %165, %167, %cst_60 {dimension_numbers = #tpu.dot_dimension_numbers<[1], [0], [0], [1], [0, 0, 1, 1], [], []>} : vector<2x32xf32>, vector<32x32xf32>, vector<2x32xf32> -> vector<2x32xf32>
    %169 = vector.extract_strided_slice %32 {offsets = [0, 0, 0], sizes = [1, 1, 32], strides = [1, 1, 1]} : vector<3x1x32xf32> to vector<1x1x32xf32>
    %170 = vector.shape_cast %169 : vector<1x1x32xf32> to vector<1x32xf32>
    %171 = vector.broadcast %170 : vector<1x32xf32> to vector<2x32xf32>
    %172 = arith.addf %168, %171 : vector<2x32xf32>
    %173 = vector.extract_strided_slice %31 {offsets = [1, 0, 0], sizes = [1, 32, 32], strides = [1, 1, 1]} : vector<3x32x32xf32> to vector<1x32x32xf32>
    %174 = vector.shape_cast %173 : vector<1x32x32xf32> to vector<32x32xf32>
    %cst_61 = arith.constant dense<0.000000e+00> : vector<2x32xf32>
    %175 = tpu.matmul %165, %174, %cst_61 {dimension_numbers = #tpu.dot_dimension_numbers<[1], [0], [0], [1], [0, 0, 1, 1], [], []>} : vector<2x32xf32>, vector<32x32xf32>, vector<2x32xf32> -> vector<2x32xf32>
    %176 = vector.extract_strided_slice %32 {offsets = [1, 0, 0], sizes = [1, 1, 32], strides = [1, 1, 1]} : vector<3x1x32xf32> to vector<1x1x32xf32>
    %177 = vector.shape_cast %176 : vector<1x1x32xf32> to vector<1x32xf32>
    %178 = vector.broadcast %177 : vector<1x32xf32> to vector<2x32xf32>
    %179 = arith.addf %175, %178 : vector<2x32xf32>
    %180 = vector.extract_strided_slice %31 {offsets = [2, 0, 0], sizes = [1, 32, 32], strides = [1, 1, 1]} : vector<3x32x32xf32> to vector<1x32x32xf32>
    %181 = vector.shape_cast %180 : vector<1x32x32xf32> to vector<32x32xf32>
    %cst_62 = arith.constant dense<0.000000e+00> : vector<2x32xf32>
    %182 = tpu.matmul %165, %181, %cst_62 {dimension_numbers = #tpu.dot_dimension_numbers<[1], [0], [0], [1], [0, 0, 1, 1], [], []>} : vector<2x32xf32>, vector<32x32xf32>, vector<2x32xf32> -> vector<2x32xf32>
    %183 = vector.extract_strided_slice %32 {offsets = [2, 0, 0], sizes = [1, 1, 32], strides = [1, 1, 1]} : vector<3x1x32xf32> to vector<1x1x32xf32>
    %184 = vector.shape_cast %183 : vector<1x1x32xf32> to vector<1x32xf32>
    %185 = vector.broadcast %184 : vector<1x32xf32> to vector<2x32xf32>
    %186 = arith.addf %182, %185 : vector<2x32xf32>
    %187 = arith.index_cast %c2_i32 : i32 to index
    %c0_63 = arith.constant 0 : index
    %c0_64 = arith.constant 0 : index
    %188 = vector.load %arg32[%187, %c0_63, %c0_64] : memref<8x2x32xf32, #tpu.memory_space<vmem>>, vector<1x2x32xf32>
    %189 = vector.shape_cast %188 : vector<1x2x32xf32> to vector<2x32xf32>
    %190 = arith.addf %189, %172 : vector<2x32xf32>
    %191 = arith.negf %190 : vector<2x32xf32>
    %192 = math.exp %191 : vector<2x32xf32>
    %cst_65 = arith.constant 1.000000e+00 : f32
    %193 = vector.broadcast %cst_65 : f32 to vector<2x32xf32>
    %194 = arith.addf %193, %192 : vector<2x32xf32>
    %195 = arith.divf %193, %194 : vector<2x32xf32>
    %196 = arith.index_cast %c2_i32 : i32 to index
    %c0_66 = arith.constant 0 : index
    %c0_67 = arith.constant 0 : index
    %197 = vector.load %arg33[%196, %c0_66, %c0_67] : memref<8x2x32xf32, #tpu.memory_space<vmem>>, vector<1x2x32xf32>
    %198 = vector.shape_cast %197 : vector<1x2x32xf32> to vector<2x32xf32>
    %199 = arith.addf %198, %179 : vector<2x32xf32>
    %200 = arith.negf %199 : vector<2x32xf32>
    %201 = math.exp %200 : vector<2x32xf32>
    %cst_68 = arith.constant 1.000000e+00 : f32
    %202 = vector.broadcast %cst_68 : f32 to vector<2x32xf32>
    %203 = arith.addf %202, %201 : vector<2x32xf32>
    %204 = arith.divf %202, %203 : vector<2x32xf32>
    %205 = arith.index_cast %c2_i32 : i32 to index
    %c0_69 = arith.constant 0 : index
    %c0_70 = arith.constant 0 : index
    %206 = vector.load %arg34[%205, %c0_69, %c0_70] : memref<8x2x32xf32, #tpu.memory_space<vmem>>, vector<1x2x32xf32>
    %207 = vector.shape_cast %206 : vector<1x2x32xf32> to vector<2x32xf32>
    %208 = arith.mulf %195, %186 : vector<2x32xf32>
    %209 = arith.addf %207, %208 : vector<2x32xf32>
    %210 = math.tanh %209 : vector<2x32xf32>
    %cst_71 = arith.constant 1.000000e+00 : f32
    %211 = vector.broadcast %cst_71 : f32 to vector<2x32xf32>
    %212 = arith.subf %211, %204 : vector<2x32xf32>
    %213 = arith.mulf %212, %210 : vector<2x32xf32>
    %214 = arith.mulf %204, %165 : vector<2x32xf32>
    %215 = arith.addf %213, %214 : vector<2x32xf32>
    %216 = arith.index_cast %c2_i32 : i32 to index
    %c0_72 = arith.constant 0 : index
    %c0_73 = arith.constant 0 : index
    %217 = vector.load %arg2[%216, %c0_72, %c0_73] : memref<8x2x1xf32, #tpu.memory_space<vmem>>, vector<1x2x1xf32>
    %218 = vector.shape_cast %217 : vector<1x2x1xf32> to vector<2x1xf32>
    %219 = vector.broadcast %218 : vector<2x1xf32> to vector<2x32xf32>
    %220 = arith.mulf %215, %219 : vector<2x32xf32>
    %221 = arith.index_cast %c2_i32 : i32 to index
    %c0_74 = arith.constant 0 : index
    %c0_75 = arith.constant 0 : index
    %222 = vector.load %arg31[%221, %c0_74, %c0_75] : memref<8x2x32xf32, #tpu.memory_space<vmem>>, vector<1x2x32xf32>
    %223 = vector.shape_cast %222 : vector<1x2x32xf32> to vector<2x32xf32>
    %224 = vector.shape_cast %220 : vector<2x32xf32> to vector<1x2x32xf32>
    tpu.vector_store %arg31[%221, %c0_74, %c0_75], %224 {strides = array<i32>} : memref<8x2x32xf32, #tpu.memory_space<vmem>>, vector<1x2x32xf32>,
    %225 = vector.broadcast %218 : vector<2x1xf32> to vector<2x32xf32>
    %226 = arith.mulf %225, %215 : vector<2x32xf32>
    %cst_76 = arith.constant 1.000000e+00 : f32
    %227 = vector.broadcast %cst_76 : f32 to vector<2x1xf32>
    %228 = arith.subf %227, %218 : vector<2x1xf32>
    %229 = vector.broadcast %228 : vector<2x1xf32> to vector<2x32xf32>
    %230 = arith.mulf %229, %165 : vector<2x32xf32>
    %231 = arith.addf %226, %230 : vector<2x32xf32>
    %c3_i32 = arith.constant 3 : i32
    %232 = vector.extract_strided_slice %31 {offsets = [0, 0, 0], sizes = [1, 32, 32], strides = [1, 1, 1]} : vector<3x32x32xf32> to vector<1x32x32xf32>
    %233 = vector.shape_cast %232 : vector<1x32x32xf32> to vector<32x32xf32>
    %cst_77 = arith.constant dense<0.000000e+00> : vector<2x32xf32>
    %234 = tpu.matmul %231, %233, %cst_77 {dimension_numbers = #tpu.dot_dimension_numbers<[1], [0], [0], [1], [0, 0, 1, 1], [], []>} : vector<2x32xf32>, vector<32x32xf32>, vector<2x32xf32> -> vector<2x32xf32>
    %235 = vector.extract_strided_slice %32 {offsets = [0, 0, 0], sizes = [1, 1, 32], strides = [1, 1, 1]} : vector<3x1x32xf32> to vector<1x1x32xf32>
    %236 = vector.shape_cast %235 : vector<1x1x32xf32> to vector<1x32xf32>
    %237 = vector.broadcast %236 : vector<1x32xf32> to vector<2x32xf32>
    %238 = arith.addf %234, %237 : vector<2x32xf32>
    %239 = vector.extract_strided_slice %31 {offsets = [1, 0, 0], sizes = [1, 32, 32], strides = [1, 1, 1]} : vector<3x32x32xf32> to vector<1x32x32xf32>
    %240 = vector.shape_cast %239 : vector<1x32x32xf32> to vector<32x32xf32>
    %cst_78 = arith.constant dense<0.000000e+00> : vector<2x32xf32>
    %241 = tpu.matmul %231, %240, %cst_78 {dimension_numbers = #tpu.dot_dimension_numbers<[1], [0], [0], [1], [0, 0, 1, 1], [], []>} : vector<2x32xf32>, vector<32x32xf32>, vector<2x32xf32> -> vector<2x32xf32>
    %242 = vector.extract_strided_slice %32 {offsets = [1, 0, 0], sizes = [1, 1, 32], strides = [1, 1, 1]} : vector<3x1x32xf32> to vector<1x1x32xf32>
    %243 = vector.shape_cast %242 : vector<1x1x32xf32> to vector<1x32xf32>
    %244 = vector.broadcast %243 : vector<1x32xf32> to vector<2x32xf32>
    %245 = arith.addf %241, %244 : vector<2x32xf32>
    %246 = vector.extract_strided_slice %31 {offsets = [2, 0, 0], sizes = [1, 32, 32], strides = [1, 1, 1]} : vector<3x32x32xf32> to vector<1x32x32xf32>
    %247 = vector.shape_cast %246 : vector<1x32x32xf32> to vector<32x32xf32>
    %cst_79 = arith.constant dense<0.000000e+00> : vector<2x32xf32>
    %248 = tpu.matmul %231, %247, %cst_79 {dimension_numbers = #tpu.dot_dimension_numbers<[1], [0], [0], [1], [0, 0, 1, 1], [], []>} : vector<2x32xf32>, vector<32x32xf32>, vector<2x32xf32> -> vector<2x32xf32>
    %249 = vector.extract_strided_slice %32 {offsets = [2, 0, 0], sizes = [1, 1, 32], strides = [1, 1, 1]} : vector<3x1x32xf32> to vector<1x1x32xf32>
    %250 = vector.shape_cast %249 : vector<1x1x32xf32> to vector<1x32xf32>
    %251 = vector.broadcast %250 : vector<1x32xf32> to vector<2x32xf32>
    %252 = arith.addf %248, %251 : vector<2x32xf32>
    %253 = arith.index_cast %c3_i32 : i32 to index
    %c0_80 = arith.constant 0 : index
    %c0_81 = arith.constant 0 : index
    %254 = vector.load %arg32[%253, %c0_80, %c0_81] : memref<8x2x32xf32, #tpu.memory_space<vmem>>, vector<1x2x32xf32>
    %255 = vector.shape_cast %254 : vector<1x2x32xf32> to vector<2x32xf32>
    %256 = arith.addf %255, %238 : vector<2x32xf32>
    %257 = arith.negf %256 : vector<2x32xf32>
    %258 = math.exp %257 : vector<2x32xf32>
    %cst_82 = arith.constant 1.000000e+00 : f32
    %259 = vector.broadcast %cst_82 : f32 to vector<2x32xf32>
    %260 = arith.addf %259, %258 : vector<2x32xf32>
    %261 = arith.divf %259, %260 : vector<2x32xf32>
    %262 = arith.index_cast %c3_i32 : i32 to index
    %c0_83 = arith.constant 0 : index
    %c0_84 = arith.constant 0 : index
    %263 = vector.load %arg33[%262, %c0_83, %c0_84] : memref<8x2x32xf32, #tpu.memory_space<vmem>>, vector<1x2x32xf32>
    %264 = vector.shape_cast %263 : vector<1x2x32xf32> to vector<2x32xf32>
    %265 = arith.addf %264, %245 : vector<2x32xf32>
    %266 = arith.negf %265 : vector<2x32xf32>
    %267 = math.exp %266 : vector<2x32xf32>
    %cst_85 = arith.constant 1.000000e+00 : f32
    %268 = vector.broadcast %cst_85 : f32 to vector<2x32xf32>
    %269 = arith.addf %268, %267 : vector<2x32xf32>
    %270 = arith.divf %268, %269 : vector<2x32xf32>
    %271 = arith.index_cast %c3_i32 : i32 to index
    %c0_86 = arith.constant 0 : index
    %c0_87 = arith.constant 0 : index
    %272 = vector.load %arg34[%271, %c0_86, %c0_87] : memref<8x2x32xf32, #tpu.memory_space<vmem>>, vector<1x2x32xf32>
    %273 = vector.shape_cast %272 : vector<1x2x32xf32> to vector<2x32xf32>
    %274 = arith.mulf %261, %252 : vector<2x32xf32>
    %275 = arith.addf %273, %274 : vector<2x32xf32>
    %276 = math.tanh %275 : vector<2x32xf32>
    %cst_88 = arith.constant 1.000000e+00 : f32
    %277 = vector.broadcast %cst_88 : f32 to vector<2x32xf32>
    %278 = arith.subf %277, %270 : vector<2x32xf32>
    %279 = arith.mulf %278, %276 : vector<2x32xf32>
    %280 = arith.mulf %270, %231 : vector<2x32xf32>
    %281 = arith.addf %279, %280 : vector<2x32xf32>
    %282 = arith.index_cast %c3_i32 : i32 to index
    %c0_89 = arith.constant 0 : index
    %c0_90 = arith.constant 0 : index
    %283 = vector.load %arg2[%282, %c0_89, %c0_90] : memref<8x2x1xf32, #tpu.memory_space<vmem>>, vector<1x2x1xf32>
    %284 = vector.shape_cast %283 : vector<1x2x1xf32> to vector<2x1xf32>
    %285 = vector.broadcast %284 : vector<2x1xf32> to vector<2x32xf32>
    %286 = arith.mulf %281, %285 : vector<2x32xf32>
    %287 = arith.index_cast %c3_i32 : i32 to index
    %c0_91 = arith.constant 0 : index
    %c0_92 = arith.constant 0 : index
    %288 = vector.load %arg31[%287, %c0_91, %c0_92] : memref<8x2x32xf32, #tpu.memory_space<vmem>>, vector<1x2x32xf32>
    %289 = vector.shape_cast %288 : vector<1x2x32xf32> to vector<2x32xf32>
    %290 = vector.shape_cast %286 : vector<2x32xf32> to vector<1x2x32xf32>
    tpu.vector_store %arg31[%287, %c0_91, %c0_92], %290 {strides = array<i32>} : memref<8x2x32xf32, #tpu.memory_space<vmem>>, vector<1x2x32xf32>,
    %291 = vector.broadcast %284 : vector<2x1xf32> to vector<2x32xf32>
    %292 = arith.mulf %291, %281 : vector<2x32xf32>
    %cst_93 = arith.constant 1.000000e+00 : f32
    %293 = vector.broadcast %cst_93 : f32 to vector<2x1xf32>
    %294 = arith.subf %293, %284 : vector<2x1xf32>
    %295 = vector.broadcast %294 : vector<2x1xf32> to vector<2x32xf32>
    %296 = arith.mulf %295, %231 : vector<2x32xf32>
    %297 = arith.addf %292, %296 : vector<2x32xf32>
    %c4_i32 = arith.constant 4 : i32
    %298 = vector.extract_strided_slice %31 {offsets = [0, 0, 0], sizes = [1, 32, 32], strides = [1, 1, 1]} : vector<3x32x32xf32> to vector<1x32x32xf32>
    %299 = vector.shape_cast %298 : vector<1x32x32xf32> to vector<32x32xf32>
    %cst_94 = arith.constant dense<0.000000e+00> : vector<2x32xf32>
    %300 = tpu.matmul %297, %299, %cst_94 {dimension_numbers = #tpu.dot_dimension_numbers<[1], [0], [0], [1], [0, 0, 1, 1], [], []>} : vector<2x32xf32>, vector<32x32xf32>, vector<2x32xf32> -> vector<2x32xf32>
    %301 = vector.extract_strided_slice %32 {offsets = [0, 0, 0], sizes = [1, 1, 32], strides = [1, 1, 1]} : vector<3x1x32xf32> to vector<1x1x32xf32>
    %302 = vector.shape_cast %301 : vector<1x1x32xf32> to vector<1x32xf32>
    %303 = vector.broadcast %302 : vector<1x32xf32> to vector<2x32xf32>
    %304 = arith.addf %300, %303 : vector<2x32xf32>
    %305 = vector.extract_strided_slice %31 {offsets = [1, 0, 0], sizes = [1, 32, 32], strides = [1, 1, 1]} : vector<3x32x32xf32> to vector<1x32x32xf32>
    %306 = vector.shape_cast %305 : vector<1x32x32xf32> to vector<32x32xf32>
    %cst_95 = arith.constant dense<0.000000e+00> : vector<2x32xf32>
    %307 = tpu.matmul %297, %306, %cst_95 {dimension_numbers = #tpu.dot_dimension_numbers<[1], [0], [0], [1], [0, 0, 1, 1], [], []>} : vector<2x32xf32>, vector<32x32xf32>, vector<2x32xf32> -> vector<2x32xf32>
    %308 = vector.extract_strided_slice %32 {offsets = [1, 0, 0], sizes = [1, 1, 32], strides = [1, 1, 1]} : vector<3x1x32xf32> to vector<1x1x32xf32>
    %309 = vector.shape_cast %308 : vector<1x1x32xf32> to vector<1x32xf32>
    %310 = vector.broadcast %309 : vector<1x32xf32> to vector<2x32xf32>
    %311 = arith.addf %307, %310 : vector<2x32xf32>
    %312 = vector.extract_strided_slice %31 {offsets = [2, 0, 0], sizes = [1, 32, 32], strides = [1, 1, 1]} : vector<3x32x32xf32> to vector<1x32x32xf32>
    %313 = vector.shape_cast %312 : vector<1x32x32xf32> to vector<32x32xf32>
    %cst_96 = arith.constant dense<0.000000e+00> : vector<2x32xf32>
    %314 = tpu.matmul %297, %313, %cst_96 {dimension_numbers = #tpu.dot_dimension_numbers<[1], [0], [0], [1], [0, 0, 1, 1], [], []>} : vector<2x32xf32>, vector<32x32xf32>, vector<2x32xf32> -> vector<2x32xf32>
    %315 = vector.extract_strided_slice %32 {offsets = [2, 0, 0], sizes = [1, 1, 32], strides = [1, 1, 1]} : vector<3x1x32xf32> to vector<1x1x32xf32>
    %316 = vector.shape_cast %315 : vector<1x1x32xf32> to vector<1x32xf32>
    %317 = vector.broadcast %316 : vector<1x32xf32> to vector<2x32xf32>
    %318 = arith.addf %314, %317 : vector<2x32xf32>
    %319 = arith.index_cast %c4_i32 : i32 to index
    %c0_97 = arith.constant 0 : index
    %c0_98 = arith.constant 0 : index
    %320 = vector.load %arg32[%319, %c0_97, %c0_98] : memref<8x2x32xf32, #tpu.memory_space<vmem>>, vector<1x2x32xf32>
    %321 = vector.shape_cast %320 : vector<1x2x32xf32> to vector<2x32xf32>
    %322 = arith.addf %321, %304 : vector<2x32xf32>
    %323 = arith.negf %322 : vector<2x32xf32>
    %324 = math.exp %323 : vector<2x32xf32>
    %cst_99 = arith.constant 1.000000e+00 : f32
    %325 = vector.broadcast %cst_99 : f32 to vector<2x32xf32>
    %326 = arith.addf %325, %324 : vector<2x32xf32>
    %327 = arith.divf %325, %326 : vector<2x32xf32>
    %328 = arith.index_cast %c4_i32 : i32 to index
    %c0_100 = arith.constant 0 : index
    %c0_101 = arith.constant 0 : index
    %329 = vector.load %arg33[%328, %c0_100, %c0_101] : memref<8x2x32xf32, #tpu.memory_space<vmem>>, vector<1x2x32xf32>
    %330 = vector.shape_cast %329 : vector<1x2x32xf32> to vector<2x32xf32>
    %331 = arith.addf %330, %311 : vector<2x32xf32>
    %332 = arith.negf %331 : vector<2x32xf32>
    %333 = math.exp %332 : vector<2x32xf32>
    %cst_102 = arith.constant 1.000000e+00 : f32
    %334 = vector.broadcast %cst_102 : f32 to vector<2x32xf32>
    %335 = arith.addf %334, %333 : vector<2x32xf32>
    %336 = arith.divf %334, %335 : vector<2x32xf32>
    %337 = arith.index_cast %c4_i32 : i32 to index
    %c0_103 = arith.constant 0 : index
    %c0_104 = arith.constant 0 : index
    %338 = vector.load %arg34[%337, %c0_103, %c0_104] : memref<8x2x32xf32, #tpu.memory_space<vmem>>, vector<1x2x32xf32>
    %339 = vector.shape_cast %338 : vector<1x2x32xf32> to vector<2x32xf32>
    %340 = arith.mulf %327, %318 : vector<2x32xf32>
    %341 = arith.addf %339, %340 : vector<2x32xf32>
    %342 = math.tanh %341 : vector<2x32xf32>
    %cst_105 = arith.constant 1.000000e+00 : f32
    %343 = vector.broadcast %cst_105 : f32 to vector<2x32xf32>
    %344 = arith.subf %343, %336 : vector<2x32xf32>
    %345 = arith.mulf %344, %342 : vector<2x32xf32>
    %346 = arith.mulf %336, %297 : vector<2x32xf32>
    %347 = arith.addf %345, %346 : vector<2x32xf32>
    %348 = arith.index_cast %c4_i32 : i32 to index
    %c0_106 = arith.constant 0 : index
    %c0_107 = arith.constant 0 : index
    %349 = vector.load %arg2[%348, %c0_106, %c0_107] : memref<8x2x1xf32, #tpu.memory_space<vmem>>, vector<1x2x1xf32>
    %350 = vector.shape_cast %349 : vector<1x2x1xf32> to vector<2x1xf32>
    %351 = vector.broadcast %350 : vector<2x1xf32> to vector<2x32xf32>
    %352 = arith.mulf %347, %351 : vector<2x32xf32>
    %353 = arith.index_cast %c4_i32 : i32 to index
    %c0_108 = arith.constant 0 : index
    %c0_109 = arith.constant 0 : index
    %354 = vector.load %arg31[%353, %c0_108, %c0_109] : memref<8x2x32xf32, #tpu.memory_space<vmem>>, vector<1x2x32xf32>
    %355 = vector.shape_cast %354 : vector<1x2x32xf32> to vector<2x32xf32>
    %356 = vector.shape_cast %352 : vector<2x32xf32> to vector<1x2x32xf32>
    tpu.vector_store %arg31[%353, %c0_108, %c0_109], %356 {strides = array<i32>} : memref<8x2x32xf32, #tpu.memory_space<vmem>>, vector<1x2x32xf32>,
    %357 = vector.broadcast %350 : vector<2x1xf32> to vector<2x32xf32>
    %358 = arith.mulf %357, %347 : vector<2x32xf32>
    %cst_110 = arith.constant 1.000000e+00 : f32
    %359 = vector.broadcast %cst_110 : f32 to vector<2x1xf32>
    %360 = arith.subf %359, %350 : vector<2x1xf32>
    %361 = vector.broadcast %360 : vector<2x1xf32> to vector<2x32xf32>
    %362 = arith.mulf %361, %297 : vector<2x32xf32>
    %363 = arith.addf %358, %362 : vector<2x32xf32>
    %c5_i32 = arith.constant 5 : i32
    %364 = vector.extract_strided_slice %31 {offsets = [0, 0, 0], sizes = [1, 32, 32], strides = [1, 1, 1]} : vector<3x32x32xf32> to vector<1x32x32xf32>
    %365 = vector.shape_cast %364 : vector<1x32x32xf32> to vector<32x32xf32>
    %cst_111 = arith.constant dense<0.000000e+00> : vector<2x32xf32>
    %366 = tpu.matmul %363, %365, %cst_111 {dimension_numbers = #tpu.dot_dimension_numbers<[1], [0], [0], [1], [0, 0, 1, 1], [], []>} : vector<2x32xf32>, vector<32x32xf32>, vector<2x32xf32> -> vector<2x32xf32>
    %367 = vector.extract_strided_slice %32 {offsets = [0, 0, 0], sizes = [1, 1, 32], strides = [1, 1, 1]} : vector<3x1x32xf32> to vector<1x1x32xf32>
    %368 = vector.shape_cast %367 : vector<1x1x32xf32> to vector<1x32xf32>
    %369 = vector.broadcast %368 : vector<1x32xf32> to vector<2x32xf32>
    %370 = arith.addf %366, %369 : vector<2x32xf32>
    %371 = vector.extract_strided_slice %31 {offsets = [1, 0, 0], sizes = [1, 32, 32], strides = [1, 1, 1]} : vector<3x32x32xf32> to vector<1x32x32xf32>
    %372 = vector.shape_cast %371 : vector<1x32x32xf32> to vector<32x32xf32>
    %cst_112 = arith.constant dense<0.000000e+00> : vector<2x32xf32>
    %373 = tpu.matmul %363, %372, %cst_112 {dimension_numbers = #tpu.dot_dimension_numbers<[1], [0], [0], [1], [0, 0, 1, 1], [], []>} : vector<2x32xf32>, vector<32x32xf32>, vector<2x32xf32> -> vector<2x32xf32>
    %374 = vector.extract_strided_slice %32 {offsets = [1, 0, 0], sizes = [1, 1, 32], strides = [1, 1, 1]} : vector<3x1x32xf32> to vector<1x1x32xf32>
    %375 = vector.shape_cast %374 : vector<1x1x32xf32> to vector<1x32xf32>
    %376 = vector.broadcast %375 : vector<1x32xf32> to vector<2x32xf32>
    %377 = arith.addf %373, %376 : vector<2x32xf32>
    %378 = vector.extract_strided_slice %31 {offsets = [2, 0, 0], sizes = [1, 32, 32], strides = [1, 1, 1]} : vector<3x32x32xf32> to vector<1x32x32xf32>
    %379 = vector.shape_cast %378 : vector<1x32x32xf32> to vector<32x32xf32>
    %cst_113 = arith.constant dense<0.000000e+00> : vector<2x32xf32>
    %380 = tpu.matmul %363, %379, %cst_113 {dimension_numbers = #tpu.dot_dimension_numbers<[1], [0], [0], [1], [0, 0, 1, 1], [], []>} : vector<2x32xf32>, vector<32x32xf32>, vector<2x32xf32> -> vector<2x32xf32>
    %381 = vector.extract_strided_slice %32 {offsets = [2, 0, 0], sizes = [1, 1, 32], strides = [1, 1, 1]} : vector<3x1x32xf32> to vector<1x1x32xf32>
    %382 = vector.shape_cast %381 : vector<1x1x32xf32> to vector<1x32xf32>
    %383 = vector.broadcast %382 : vector<1x32xf32> to vector<2x32xf32>
    %384 = arith.addf %380, %383 : vector<2x32xf32>
    %385 = arith.index_cast %c5_i32 : i32 to index
    %c0_114 = arith.constant 0 : index
    %c0_115 = arith.constant 0 : index
    %386 = vector.load %arg32[%385, %c0_114, %c0_115] : memref<8x2x32xf32, #tpu.memory_space<vmem>>, vector<1x2x32xf32>
    %387 = vector.shape_cast %386 : vector<1x2x32xf32> to vector<2x32xf32>
    %388 = arith.addf %387, %370 : vector<2x32xf32>
    %389 = arith.negf %388 : vector<2x32xf32>
    %390 = math.exp %389 : vector<2x32xf32>
    %cst_116 = arith.constant 1.000000e+00 : f32
    %391 = vector.broadcast %cst_116 : f32 to vector<2x32xf32>
    %392 = arith.addf %391, %390 : vector<2x32xf32>
    %393 = arith.divf %391, %392 : vector<2x32xf32>
    %394 = arith.index_cast %c5_i32 : i32 to index
    %c0_117 = arith.constant 0 : index
    %c0_118 = arith.constant 0 : index
    %395 = vector.load %arg33[%394, %c0_117, %c0_118] : memref<8x2x32xf32, #tpu.memory_space<vmem>>, vector<1x2x32xf32>
    %396 = vector.shape_cast %395 : vector<1x2x32xf32> to vector<2x32xf32>
    %397 = arith.addf %396, %377 : vector<2x32xf32>
    %398 = arith.negf %397 : vector<2x32xf32>
    %399 = math.exp %398 : vector<2x32xf32>
    %cst_119 = arith.constant 1.000000e+00 : f32
    %400 = vector.broadcast %cst_119 : f32 to vector<2x32xf32>
    %401 = arith.addf %400, %399 : vector<2x32xf32>
    %402 = arith.divf %400, %401 : vector<2x32xf32>
    %403 = arith.index_cast %c5_i32 : i32 to index
    %c0_120 = arith.constant 0 : index
    %c0_121 = arith.constant 0 : index
    %404 = vector.load %arg34[%403, %c0_120, %c0_121] : memref<8x2x32xf32, #tpu.memory_space<vmem>>, vector<1x2x32xf32>
    %405 = vector.shape_cast %404 : vector<1x2x32xf32> to vector<2x32xf32>
    %406 = arith.mulf %393, %384 : vector<2x32xf32>
    %407 = arith.addf %405, %406 : vector<2x32xf32>
    %408 = math.tanh %407 : vector<2x32xf32>
    %cst_122 = arith.constant 1.000000e+00 : f32
    %409 = vector.broadcast %cst_122 : f32 to vector<2x32xf32>
    %410 = arith.subf %409, %402 : vector<2x32xf32>
    %411 = arith.mulf %410, %408 : vector<2x32xf32>
    %412 = arith.mulf %402, %363 : vector<2x32xf32>
    %413 = arith.addf %411, %412 : vector<2x32xf32>
    %414 = arith.index_cast %c5_i32 : i32 to index
    %c0_123 = arith.constant 0 : index
    %c0_124 = arith.constant 0 : index
    %415 = vector.load %arg2[%414, %c0_123, %c0_124] : memref<8x2x1xf32, #tpu.memory_space<vmem>>, vector<1x2x1xf32>
    %416 = vector.shape_cast %415 : vector<1x2x1xf32> to vector<2x1xf32>
    %417 = vector.broadcast %416 : vector<2x1xf32> to vector<2x32xf32>
    %418 = arith.mulf %413, %417 : vector<2x32xf32>
    %419 = arith.index_cast %c5_i32 : i32 to index
    %c0_125 = arith.constant 0 : index
    %c0_126 = arith.constant 0 : index
    %420 = vector.load %arg31[%419, %c0_125, %c0_126] : memref<8x2x32xf32, #tpu.memory_space<vmem>>, vector<1x2x32xf32>
    %421 = vector.shape_cast %420 : vector<1x2x32xf32> to vector<2x32xf32>
    %422 = vector.shape_cast %418 : vector<2x32xf32> to vector<1x2x32xf32>
    tpu.vector_store %arg31[%419, %c0_125, %c0_126], %422 {strides = array<i32>} : memref<8x2x32xf32, #tpu.memory_space<vmem>>, vector<1x2x32xf32>,
    %423 = vector.broadcast %416 : vector<2x1xf32> to vector<2x32xf32>
    %424 = arith.mulf %423, %413 : vector<2x32xf32>
    %cst_127 = arith.constant 1.000000e+00 : f32
    %425 = vector.broadcast %cst_127 : f32 to vector<2x1xf32>
    %426 = arith.subf %425, %416 : vector<2x1xf32>
    %427 = vector.broadcast %426 : vector<2x1xf32> to vector<2x32xf32>
    %428 = arith.mulf %427, %363 : vector<2x32xf32>
    %429 = arith.addf %424, %428 : vector<2x32xf32>
    %c6_i32 = arith.constant 6 : i32
    %430 = vector.extract_strided_slice %31 {offsets = [0, 0, 0], sizes = [1, 32, 32], strides = [1, 1, 1]} : vector<3x32x32xf32> to vector<1x32x32xf32>
    %431 = vector.shape_cast %430 : vector<1x32x32xf32> to vector<32x32xf32>
    %cst_128 = arith.constant dense<0.000000e+00> : vector<2x32xf32>
    %432 = tpu.matmul %429, %431, %cst_128 {dimension_numbers = #tpu.dot_dimension_numbers<[1], [0], [0], [1], [0, 0, 1, 1], [], []>} : vector<2x32xf32>, vector<32x32xf32>, vector<2x32xf32> -> vector<2x32xf32>
    %433 = vector.extract_strided_slice %32 {offsets = [0, 0, 0], sizes = [1, 1, 32], strides = [1, 1, 1]} : vector<3x1x32xf32> to vector<1x1x32xf32>
    %434 = vector.shape_cast %433 : vector<1x1x32xf32> to vector<1x32xf32>
    %435 = vector.broadcast %434 : vector<1x32xf32> to vector<2x32xf32>
    %436 = arith.addf %432, %435 : vector<2x32xf32>
    %437 = vector.extract_strided_slice %31 {offsets = [1, 0, 0], sizes = [1, 32, 32], strides = [1, 1, 1]} : vector<3x32x32xf32> to vector<1x32x32xf32>
    %438 = vector.shape_cast %437 : vector<1x32x32xf32> to vector<32x32xf32>
    %cst_129 = arith.constant dense<0.000000e+00> : vector<2x32xf32>
    %439 = tpu.matmul %429, %438, %cst_129 {dimension_numbers = #tpu.dot_dimension_numbers<[1], [0], [0], [1], [0, 0, 1, 1], [], []>} : vector<2x32xf32>, vector<32x32xf32>, vector<2x32xf32> -> vector<2x32xf32>
    %440 = vector.extract_strided_slice %32 {offsets = [1, 0, 0], sizes = [1, 1, 32], strides = [1, 1, 1]} : vector<3x1x32xf32> to vector<1x1x32xf32>
    %441 = vector.shape_cast %440 : vector<1x1x32xf32> to vector<1x32xf32>
    %442 = vector.broadcast %441 : vector<1x32xf32> to vector<2x32xf32>
    %443 = arith.addf %439, %442 : vector<2x32xf32>
    %444 = vector.extract_strided_slice %31 {offsets = [2, 0, 0], sizes = [1, 32, 32], strides = [1, 1, 1]} : vector<3x32x32xf32> to vector<1x32x32xf32>
    %445 = vector.shape_cast %444 : vector<1x32x32xf32> to vector<32x32xf32>
    %cst_130 = arith.constant dense<0.000000e+00> : vector<2x32xf32>
    %446 = tpu.matmul %429, %445, %cst_130 {dimension_numbers = #tpu.dot_dimension_numbers<[1], [0], [0], [1], [0, 0, 1, 1], [], []>} : vector<2x32xf32>, vector<32x32xf32>, vector<2x32xf32> -> vector<2x32xf32>
    %447 = vector.extract_strided_slice %32 {offsets = [2, 0, 0], sizes = [1, 1, 32], strides = [1, 1, 1]} : vector<3x1x32xf32> to vector<1x1x32xf32>
    %448 = vector.shape_cast %447 : vector<1x1x32xf32> to vector<1x32xf32>
    %449 = vector.broadcast %448 : vector<1x32xf32> to vector<2x32xf32>
    %450 = arith.addf %446, %449 : vector<2x32xf32>
    %451 = arith.index_cast %c6_i32 : i32 to index
    %c0_131 = arith.constant 0 : index
    %c0_132 = arith.constant 0 : index
    %452 = vector.load %arg32[%451, %c0_131, %c0_132] : memref<8x2x32xf32, #tpu.memory_space<vmem>>, vector<1x2x32xf32>
    %453 = vector.shape_cast %452 : vector<1x2x32xf32> to vector<2x32xf32>
    %454 = arith.addf %453, %436 : vector<2x32xf32>
    %455 = arith.negf %454 : vector<2x32xf32>
    %456 = math.exp %455 : vector<2x32xf32>
    %cst_133 = arith.constant 1.000000e+00 : f32
    %457 = vector.broadcast %cst_133 : f32 to vector<2x32xf32>
    %458 = arith.addf %457, %456 : vector<2x32xf32>
    %459 = arith.divf %457, %458 : vector<2x32xf32>
    %460 = arith.index_cast %c6_i32 : i32 to index
    %c0_134 = arith.constant 0 : index
    %c0_135 = arith.constant 0 : index
    %461 = vector.load %arg33[%460, %c0_134, %c0_135] : memref<8x2x32xf32, #tpu.memory_space<vmem>>, vector<1x2x32xf32>
    %462 = vector.shape_cast %461 : vector<1x2x32xf32> to vector<2x32xf32>
    %463 = arith.addf %462, %443 : vector<2x32xf32>
    %464 = arith.negf %463 : vector<2x32xf32>
    %465 = math.exp %464 : vector<2x32xf32>
    %cst_136 = arith.constant 1.000000e+00 : f32
    %466 = vector.broadcast %cst_136 : f32 to vector<2x32xf32>
    %467 = arith.addf %466, %465 : vector<2x32xf32>
    %468 = arith.divf %466, %467 : vector<2x32xf32>
    %469 = arith.index_cast %c6_i32 : i32 to index
    %c0_137 = arith.constant 0 : index
    %c0_138 = arith.constant 0 : index
    %470 = vector.load %arg34[%469, %c0_137, %c0_138] : memref<8x2x32xf32, #tpu.memory_space<vmem>>, vector<1x2x32xf32>
    %471 = vector.shape_cast %470 : vector<1x2x32xf32> to vector<2x32xf32>
    %472 = arith.mulf %459, %450 : vector<2x32xf32>
    %473 = arith.addf %471, %472 : vector<2x32xf32>
    %474 = math.tanh %473 : vector<2x32xf32>
    %cst_139 = arith.constant 1.000000e+00 : f32
    %475 = vector.broadcast %cst_139 : f32 to vector<2x32xf32>
    %476 = arith.subf %475, %468 : vector<2x32xf32>
    %477 = arith.mulf %476, %474 : vector<2x32xf32>
    %478 = arith.mulf %468, %429 : vector<2x32xf32>
    %479 = arith.addf %477, %478 : vector<2x32xf32>
    %480 = arith.index_cast %c6_i32 : i32 to index
    %c0_140 = arith.constant 0 : index
    %c0_141 = arith.constant 0 : index
    %481 = vector.load %arg2[%480, %c0_140, %c0_141] : memref<8x2x1xf32, #tpu.memory_space<vmem>>, vector<1x2x1xf32>
    %482 = vector.shape_cast %481 : vector<1x2x1xf32> to vector<2x1xf32>
    %483 = vector.broadcast %482 : vector<2x1xf32> to vector<2x32xf32>
    %484 = arith.mulf %479, %483 : vector<2x32xf32>
    %485 = arith.index_cast %c6_i32 : i32 to index
    %c0_142 = arith.constant 0 : index
    %c0_143 = arith.constant 0 : index
    %486 = vector.load %arg31[%485, %c0_142, %c0_143] : memref<8x2x32xf32, #tpu.memory_space<vmem>>, vector<1x2x32xf32>
    %487 = vector.shape_cast %486 : vector<1x2x32xf32> to vector<2x32xf32>
    %488 = vector.shape_cast %484 : vector<2x32xf32> to vector<1x2x32xf32>
    tpu.vector_store %arg31[%485, %c0_142, %c0_143], %488 {strides = array<i32>} : memref<8x2x32xf32, #tpu.memory_space<vmem>>, vector<1x2x32xf32>,
    %489 = vector.broadcast %482 : vector<2x1xf32> to vector<2x32xf32>
    %490 = arith.mulf %489, %479 : vector<2x32xf32>
    %cst_144 = arith.constant 1.000000e+00 : f32
    %491 = vector.broadcast %cst_144 : f32 to vector<2x1xf32>
    %492 = arith.subf %491, %482 : vector<2x1xf32>
    %493 = vector.broadcast %492 : vector<2x1xf32> to vector<2x32xf32>
    %494 = arith.mulf %493, %429 : vector<2x32xf32>
    %495 = arith.addf %490, %494 : vector<2x32xf32>
    %c7_i32 = arith.constant 7 : i32
    %496 = vector.extract_strided_slice %31 {offsets = [0, 0, 0], sizes = [1, 32, 32], strides = [1, 1, 1]} : vector<3x32x32xf32> to vector<1x32x32xf32>
    %497 = vector.shape_cast %496 : vector<1x32x32xf32> to vector<32x32xf32>
    %cst_145 = arith.constant dense<0.000000e+00> : vector<2x32xf32>
    %498 = tpu.matmul %495, %497, %cst_145 {dimension_numbers = #tpu.dot_dimension_numbers<[1], [0], [0], [1], [0, 0, 1, 1], [], []>} : vector<2x32xf32>, vector<32x32xf32>, vector<2x32xf32> -> vector<2x32xf32>
    %499 = vector.extract_strided_slice %32 {offsets = [0, 0, 0], sizes = [1, 1, 32], strides = [1, 1, 1]} : vector<3x1x32xf32> to vector<1x1x32xf32>
    %500 = vector.shape_cast %499 : vector<1x1x32xf32> to vector<1x32xf32>
    %501 = vector.broadcast %500 : vector<1x32xf32> to vector<2x32xf32>
    %502 = arith.addf %498, %501 : vector<2x32xf32>
    %503 = vector.extract_strided_slice %31 {offsets = [1, 0, 0], sizes = [1, 32, 32], strides = [1, 1, 1]} : vector<3x32x32xf32> to vector<1x32x32xf32>
    %504 = vector.shape_cast %503 : vector<1x32x32xf32> to vector<32x32xf32>
    %cst_146 = arith.constant dense<0.000000e+00> : vector<2x32xf32>
    %505 = tpu.matmul %495, %504, %cst_146 {dimension_numbers = #tpu.dot_dimension_numbers<[1], [0], [0], [1], [0, 0, 1, 1], [], []>} : vector<2x32xf32>, vector<32x32xf32>, vector<2x32xf32> -> vector<2x32xf32>
    %506 = vector.extract_strided_slice %32 {offsets = [1, 0, 0], sizes = [1, 1, 32], strides = [1, 1, 1]} : vector<3x1x32xf32> to vector<1x1x32xf32>
    %507 = vector.shape_cast %506 : vector<1x1x32xf32> to vector<1x32xf32>
    %508 = vector.broadcast %507 : vector<1x32xf32> to vector<2x32xf32>
    %509 = arith.addf %505, %508 : vector<2x32xf32>
    %510 = vector.extract_strided_slice %31 {offsets = [2, 0, 0], sizes = [1, 32, 32], strides = [1, 1, 1]} : vector<3x32x32xf32> to vector<1x32x32xf32>
    %511 = vector.shape_cast %510 : vector<1x32x32xf32> to vector<32x32xf32>
    %cst_147 = arith.constant dense<0.000000e+00> : vector<2x32xf32>
    %512 = tpu.matmul %495, %511, %cst_147 {dimension_numbers = #tpu.dot_dimension_numbers<[1], [0], [0], [1], [0, 0, 1, 1], [], []>} : vector<2x32xf32>, vector<32x32xf32>, vector<2x32xf32> -> vector<2x32xf32>
    %513 = vector.extract_strided_slice %32 {offsets = [2, 0, 0], sizes = [1, 1, 32], strides = [1, 1, 1]} : vector<3x1x32xf32> to vector<1x1x32xf32>
    %514 = vector.shape_cast %513 : vector<1x1x32xf32> to vector<1x32xf32>
    %515 = vector.broadcast %514 : vector<1x32xf32> to vector<2x32xf32>
    %516 = arith.addf %512, %515 : vector<2x32xf32>
    %517 = arith.index_cast %c7_i32 : i32 to index
    %c0_148 = arith.constant 0 : index
    %c0_149 = arith.constant 0 : index
    %518 = vector.load %arg32[%517, %c0_148, %c0_149] : memref<8x2x32xf32, #tpu.memory_space<vmem>>, vector<1x2x32xf32>
    %519 = vector.shape_cast %518 : vector<1x2x32xf32> to vector<2x32xf32>
    %520 = arith.addf %519, %502 : vector<2x32xf32>
    %521 = arith.negf %520 : vector<2x32xf32>
    %522 = math.exp %521 : vector<2x32xf32>
    %cst_150 = arith.constant 1.000000e+00 : f32
    %523 = vector.broadcast %cst_150 : f32 to vector<2x32xf32>
    %524 = arith.addf %523, %522 : vector<2x32xf32>
    %525 = arith.divf %523, %524 : vector<2x32xf32>
    %526 = arith.index_cast %c7_i32 : i32 to index
    %c0_151 = arith.constant 0 : index
    %c0_152 = arith.constant 0 : index
    %527 = vector.load %arg33[%526, %c0_151, %c0_152] : memref<8x2x32xf32, #tpu.memory_space<vmem>>, vector<1x2x32xf32>
    %528 = vector.shape_cast %527 : vector<1x2x32xf32> to vector<2x32xf32>
    %529 = arith.addf %528, %509 : vector<2x32xf32>
    %530 = arith.negf %529 : vector<2x32xf32>
    %531 = math.exp %530 : vector<2x32xf32>
    %cst_153 = arith.constant 1.000000e+00 : f32
    %532 = vector.broadcast %cst_153 : f32 to vector<2x32xf32>
    %533 = arith.addf %532, %531 : vector<2x32xf32>
    %534 = arith.divf %532, %533 : vector<2x32xf32>
    %535 = arith.index_cast %c7_i32 : i32 to index
    %c0_154 = arith.constant 0 : index
    %c0_155 = arith.constant 0 : index
    %536 = vector.load %arg34[%535, %c0_154, %c0_155] : memref<8x2x32xf32, #tpu.memory_space<vmem>>, vector<1x2x32xf32>
    %537 = vector.shape_cast %536 : vector<1x2x32xf32> to vector<2x32xf32>
    %538 = arith.mulf %525, %516 : vector<2x32xf32>
    %539 = arith.addf %537, %538 : vector<2x32xf32>
    %540 = math.tanh %539 : vector<2x32xf32>
    %cst_156 = arith.constant 1.000000e+00 : f32
    %541 = vector.broadcast %cst_156 : f32 to vector<2x32xf32>
    %542 = arith.subf %541, %534 : vector<2x32xf32>
    %543 = arith.mulf %542, %540 : vector<2x32xf32>
    %544 = arith.mulf %534, %495 : vector<2x32xf32>
    %545 = arith.addf %543, %544 : vector<2x32xf32>
    %546 = arith.index_cast %c7_i32 : i32 to index
    %c0_157 = arith.constant 0 : index
    %c0_158 = arith.constant 0 : index
    %547 = vector.load %arg2[%546, %c0_157, %c0_158] : memref<8x2x1xf32, #tpu.memory_space<vmem>>, vector<1x2x1xf32>
    %548 = vector.shape_cast %547 : vector<1x2x1xf32> to vector<2x1xf32>
    %549 = vector.broadcast %548 : vector<2x1xf32> to vector<2x32xf32>
    %550 = arith.mulf %545, %549 : vector<2x32xf32>
    %551 = arith.index_cast %c7_i32 : i32 to index
    %c0_159 = arith.constant 0 : index
    %c0_160 = arith.constant 0 : index
    %552 = vector.load %arg31[%551, %c0_159, %c0_160] : memref<8x2x32xf32, #tpu.memory_space<vmem>>, vector<1x2x32xf32>
    %553 = vector.shape_cast %552 : vector<1x2x32xf32> to vector<2x32xf32>
    %554 = vector.shape_cast %550 : vector<2x32xf32> to vector<1x2x32xf32>
    tpu.vector_store %arg31[%551, %c0_159, %c0_160], %554 {strides = array<i32>} : memref<8x2x32xf32, #tpu.memory_space<vmem>>, vector<1x2x32xf32>,
    %555 = vector.broadcast %548 : vector<2x1xf32> to vector<2x32xf32>
    %556 = arith.mulf %555, %545 : vector<2x32xf32>
    %cst_161 = arith.constant 1.000000e+00 : f32
    %557 = vector.broadcast %cst_161 : f32 to vector<2x1xf32>
    %558 = arith.subf %557, %548 : vector<2x1xf32>
    %559 = vector.broadcast %558 : vector<2x1xf32> to vector<2x32xf32>
    %560 = arith.mulf %559, %495 : vector<2x32xf32>
    %561 = arith.addf %556, %560 : vector<2x32xf32>
    %c8_i32 = arith.constant 8 : i32
    %c0_162 = arith.constant 0 : index
    %c0_163 = arith.constant 0 : index
    %c0_164 = arith.constant 0 : index
    %562 = vector.load %arg31[%c0_162, %c0_163, %c0_164] : memref<8x2x32xf32, #tpu.memory_space<vmem>>, vector<8x2x32xf32>
    %563 = vector.extract_strided_slice %562 {offsets = [0, 0, 0], sizes = [8, 1, 32], strides = [1, 1, 1]} : vector<8x2x32xf32> to vector<8x1x32xf32>
    %564 = vector.shape_cast %563 : vector<8x1x32xf32> to vector<8x32xf32>
    %565 = vector.extract_strided_slice %562 {offsets = [0, 1, 0], sizes = [8, 1, 32], strides = [1, 1, 1]} : vector<8x2x32xf32> to vector<8x1x32xf32>
    %566 = vector.shape_cast %565 : vector<8x1x32xf32> to vector<8x32xf32>
    %567 = vector.shape_cast %564 : vector<8x32xf32> to vector<1x8x32xf32>
    %568 = vector.shape_cast %566 : vector<8x32xf32> to vector<1x8x32xf32>
    %569 = tpu.concatenate %567, %568 in 0 : vector<1x8x32xf32>, vector<1x8x32xf32> -> vector<2x8x32xf32>
    %570 = vector.shape_cast %569 : vector<2x8x32xf32> to vector<16x32xf32>
    %c0_165 = arith.constant 0 : index
    %c0_166 = arith.constant 0 : index
    %571 = vector.load %arg18[%c0_165, %c0_166] : memref<32x32xf32, #tpu.memory_space<vmem>>, vector<32x32xf32>
    %cst_167 = arith.constant dense<0.000000e+00> : vector<16x32xf32>
    %572 = tpu.matmul %570, %571, %cst_167 {dimension_numbers = #tpu.dot_dimension_numbers<[1], [0], [0], [1], [0, 0, 1, 1], [], []>} : vector<16x32xf32>, vector<32x32xf32>, vector<16x32xf32> -> vector<16x32xf32>
    %573 = vector.shape_cast %572 : vector<16x32xf32> to vector<2x8x32xf32>
    %c0_168 = arith.constant 0 : index
    %c0_169 = arith.constant 0 : index
    %c0_170 = arith.constant 0 : index
    %c0_171 = arith.constant 0 : index
    %574 = vector.load %arg5[%c0_168, %c0_169, %c0_170, %c0_171] : memref<3x2x3x32xf32, #tpu.memory_space<vmem>>, vector<3x2x3x32xf32>
    %575 = vector.shape_cast %574 : vector<3x2x3x32xf32> to vector<18x32xf32>
    %c0_172 = arith.constant 0 : index
    %c0_173 = arith.constant 0 : index
    %c0_174 = arith.constant 0 : index
    %576 = vector.load %arg13[%c0_172, %c0_173, %c0_174] : memref<3x32x32xf32, #tpu.memory_space<vmem>>, vector<3x32x32xf32>
    %c0_175 = arith.constant 0 : index
    %c0_176 = arith.constant 0 : index
    %c0_177 = arith.constant 0 : index
    %577 = vector.load %arg15[%c0_175, %c0_176, %c0_177] : memref<3x1x32xf32, #tpu.memory_space<vmem>>, vector<3x1x32xf32>
    %578 = vector.extract_strided_slice %576 {offsets = [0, 0, 0], sizes = [1, 32, 32], strides = [1, 1, 1]} : vector<3x32x32xf32> to vector<1x32x32xf32>
    %579 = vector.shape_cast %578 : vector<1x32x32xf32> to vector<32x32xf32>
    %cst_178 = arith.constant dense<0.000000e+00> : vector<18x32xf32>
    %580 = tpu.matmul %575, %579, %cst_178 {dimension_numbers = #tpu.dot_dimension_numbers<[1], [0], [0], [1], [0, 0, 1, 1], [], []>} : vector<18x32xf32>, vector<32x32xf32>, vector<18x32xf32> -> vector<18x32xf32>
    %581 = vector.extract_strided_slice %577 {offsets = [0, 0, 0], sizes = [1, 1, 32], strides = [1, 1, 1]} : vector<3x1x32xf32> to vector<1x1x32xf32>
    %582 = vector.shape_cast %581 : vector<1x1x32xf32> to vector<1x32xf32>
    %583 = vector.broadcast %582 : vector<1x32xf32> to vector<18x32xf32>
    %584 = arith.addf %580, %583 : vector<18x32xf32>
    %585 = vector.shape_cast %584 : vector<18x32xf32> to vector<3x2x3x32xf32>
    %c0_179 = arith.constant 0 : index
    %c0_180 = arith.constant 0 : index
    %c0_181 = arith.constant 0 : index
    %c0_182 = arith.constant 0 : index
    %586 = vector.load %arg35[%c0_179, %c0_180, %c0_181, %c0_182] : memref<3x2x3x32xf32, #tpu.memory_space<vmem>>, vector<3x2x3x32xf32>
    tpu.vector_store %arg35[%c0_179, %c0_180, %c0_181, %c0_182], %585 {strides = array<i32>} : memref<3x2x3x32xf32, #tpu.memory_space<vmem>>, vector<3x2x3x32xf32>,
    %587 = vector.extract_strided_slice %576 {offsets = [1, 0, 0], sizes = [1, 32, 32], strides = [1, 1, 1]} : vector<3x32x32xf32> to vector<1x32x32xf32>
    %588 = vector.shape_cast %587 : vector<1x32x32xf32> to vector<32x32xf32>
    %cst_183 = arith.constant dense<0.000000e+00> : vector<18x32xf32>
    %589 = tpu.matmul %575, %588, %cst_183 {dimension_numbers = #tpu.dot_dimension_numbers<[1], [0], [0], [1], [0, 0, 1, 1], [], []>} : vector<18x32xf32>, vector<32x32xf32>, vector<18x32xf32> -> vector<18x32xf32>
    %590 = vector.extract_strided_slice %577 {offsets = [1, 0, 0], sizes = [1, 1, 32], strides = [1, 1, 1]} : vector<3x1x32xf32> to vector<1x1x32xf32>
    %591 = vector.shape_cast %590 : vector<1x1x32xf32> to vector<1x32xf32>
    %592 = vector.broadcast %591 : vector<1x32xf32> to vector<18x32xf32>
    %593 = arith.addf %589, %592 : vector<18x32xf32>
    %594 = vector.shape_cast %593 : vector<18x32xf32> to vector<3x2x3x32xf32>
    %c0_184 = arith.constant 0 : index
    %c0_185 = arith.constant 0 : index
    %c0_186 = arith.constant 0 : index
    %c0_187 = arith.constant 0 : index
    %595 = vector.load %arg36[%c0_184, %c0_185, %c0_186, %c0_187] : memref<3x2x3x32xf32, #tpu.memory_space<vmem>>, vector<3x2x3x32xf32>
    tpu.vector_store %arg36[%c0_184, %c0_185, %c0_186, %c0_187], %594 {strides = array<i32>} : memref<3x2x3x32xf32, #tpu.memory_space<vmem>>, vector<3x2x3x32xf32>,
    %596 = vector.extract_strided_slice %576 {offsets = [2, 0, 0], sizes = [1, 32, 32], strides = [1, 1, 1]} : vector<3x32x32xf32> to vector<1x32x32xf32>
    %597 = vector.shape_cast %596 : vector<1x32x32xf32> to vector<32x32xf32>
    %cst_188 = arith.constant dense<0.000000e+00> : vector<18x32xf32>
    %598 = tpu.matmul %575, %597, %cst_188 {dimension_numbers = #tpu.dot_dimension_numbers<[1], [0], [0], [1], [0, 0, 1, 1], [], []>} : vector<18x32xf32>, vector<32x32xf32>, vector<18x32xf32> -> vector<18x32xf32>
    %599 = vector.extract_strided_slice %577 {offsets = [2, 0, 0], sizes = [1, 1, 32], strides = [1, 1, 1]} : vector<3x1x32xf32> to vector<1x1x32xf32>
    %600 = vector.shape_cast %599 : vector<1x1x32xf32> to vector<1x32xf32>
    %601 = vector.broadcast %600 : vector<1x32xf32> to vector<18x32xf32>
    %602 = arith.addf %598, %601 : vector<18x32xf32>
    %603 = vector.shape_cast %602 : vector<18x32xf32> to vector<3x2x3x32xf32>
    %c0_189 = arith.constant 0 : index
    %c0_190 = arith.constant 0 : index
    %c0_191 = arith.constant 0 : index
    %c0_192 = arith.constant 0 : index
    %604 = vector.load %arg37[%c0_189, %c0_190, %c0_191, %c0_192] : memref<3x2x3x32xf32, #tpu.memory_space<vmem>>, vector<3x2x3x32xf32>
    tpu.vector_store %arg37[%c0_189, %c0_190, %c0_191, %c0_192], %603 {strides = array<i32>} : memref<3x2x3x32xf32, #tpu.memory_space<vmem>>, vector<3x2x3x32xf32>,
    %c0_193 = arith.constant 0 : index
    %c0_194 = arith.constant 0 : index
    %605 = vector.load %arg17[%c0_193, %c0_194] : memref<32x1xf32, #tpu.memory_space<vmem>>, vector<32x1xf32>
    %cst_195 = arith.constant dense<0.000000e+00> : vector<18x1xf32>
    %606 = tpu.matmul %575, %605, %cst_195 {dimension_numbers = #tpu.dot_dimension_numbers<[1], [0], [0], [1], [0, 0, 1, 1], [], []>} : vector<18x32xf32>, vector<32x1xf32>, vector<18x1xf32> -> vector<18x1xf32>
    %607 = vector.shape_cast %606 : vector<18x1xf32> to vector<3x6x1xf32>
    %c0_196 = arith.constant 0 : index
    %c0_197 = arith.constant 0 : index
    %c0_198 = arith.constant 0 : index
    %608 = vector.load %arg38[%c0_196, %c0_197, %c0_198] : memref<3x6x1xf32, #tpu.memory_space<vmem>>, vector<3x6x1xf32>
    tpu.vector_store %arg38[%c0_196, %c0_197, %c0_198], %607 {strides = array<i32>} : memref<3x6x1xf32, #tpu.memory_space<vmem>>, vector<3x6x1xf32>,
    %c0_199 = arith.constant 0 : index
    %c0_200 = arith.constant 0 : index
    %609 = vector.load %arg8[%c0_199, %c0_200] : memref<3x32xf32, #tpu.memory_space<vmem>>, vector<3x32xf32>
    %c0_201 = arith.constant 0 : index
    %c0_202 = arith.constant 0 : index
    %610 = vector.load %arg20[%c0_201, %c0_202] : memref<32x32xf32, #tpu.memory_space<vmem>>, vector<32x32xf32>
    %cst_203 = arith.constant dense<0.000000e+00> : vector<3x32xf32>
    %611 = tpu.matmul %609, %610, %cst_203 {dimension_numbers = #tpu.dot_dimension_numbers<[1], [0], [0], [1], [0, 0, 1, 1], [], []>} : vector<3x32xf32>, vector<32x32xf32>, vector<3x32xf32> -> vector<3x32xf32>
    %c0_204 = arith.constant 0 : index
    %c0_205 = arith.constant 0 : index
    %612 = vector.load %arg22[%c0_204, %c0_205] : memref<1x32xf32, #tpu.memory_space<vmem>>, vector<1x32xf32>
    %613 = vector.broadcast %612 : vector<1x32xf32> to vector<3x32xf32>
    %614 = arith.addf %611, %613 : vector<3x32xf32>
    %c0_206 = arith.constant 0 : index
    %c0_207 = arith.constant 0 : index
    %615 = vector.load %arg19[%c0_206, %c0_207] : memref<1x32xf32, #tpu.memory_space<vmem>>, vector<1x32xf32>
    %616 = vector.shape_cast %615 : vector<1x32xf32> to vector<1x1x1x32xf32>
    %c0_208 = arith.constant 0 : index
    %c0_209 = arith.constant 0 : index
    %617 = vector.load %arg23[%c0_208, %c0_209] : memref<1x32xf32, #tpu.memory_space<vmem>>, vector<1x32xf32>
    %618 = vector.shape_cast %617 : vector<1x32xf32> to vector<1x1x1x32xf32>
    %c0_210 = arith.constant 0 : index
    %c0_211 = arith.constant 0 : index
    %619 = vector.load %arg3[%c0_210, %c0_211] : memref<2x8xf32, #tpu.memory_space<vmem>>, vector<2x8xf32>
    %c0_212 = arith.constant 0 : index
    %c0_213 = arith.constant 0 : index
    %620 = vector.load %arg4[%c0_212, %c0_213] : memref<2x8xi32, #tpu.memory_space<vmem>>, vector<2x8xi32>
    %621 = vector.shape_cast %620 : vector<2x8xi32> to vector<2x8x1xi32>
    %622 = tpu.iota {dimensions = array<i32: 2>} : vector<2x8x128xi32>
    %623 = vector.broadcast %621 : vector<2x8x1xi32> to vector<2x8x128xi32>
    %624 = arith.cmpi eq, %623, %622 : vector<2x8x128xi32>
    %625 = arith.extui %624 : vector<2x8x128xi1> to vector<2x8x128xi32>
    %626 = arith.sitofp %625 : vector<2x8x128xi32> to vector<2x8x128xf32>
    %c0_214 = arith.constant 0 : index
    %c0_215 = arith.constant 0 : index
    %c0_216 = arith.constant 0 : index
    %627 = vector.load %arg14[%c0_214, %c0_215, %c0_216] : memref<3x32x32xf32, #tpu.memory_space<vmem>>, vector<3x32x32xf32>
    %c0_217 = arith.constant 0 : index
    %c0_218 = arith.constant 0 : index
    %c0_219 = arith.constant 0 : index
    %628 = vector.load %arg16[%c0_217, %c0_218, %c0_219] : memref<3x1x32xf32, #tpu.memory_space<vmem>>, vector<3x1x32xf32>
    %c0_220 = arith.constant 0 : index
    %c0_221 = arith.constant 0 : index
    %629 = vector.load %arg24[%c0_220, %c0_221] : memref<32x161xf32, #tpu.memory_space<vmem>>, vector<32x161xf32>
    %c0_222 = arith.constant 0 : index
    %c0_223 = arith.constant 0 : index
    %630 = vector.load %arg25[%c0_222, %c0_223] : memref<1x161xf32, #tpu.memory_space<vmem>>, vector<1x161xf32>
    %c0_224 = arith.constant 0 : index
    %c0_225 = arith.constant 0 : index
    %631 = vector.load %arg26[%c0_224, %c0_225] : memref<32x129xf32, #tpu.memory_space<vmem>>, vector<32x129xf32>
    %632 = vector.shape_cast %561 : vector<2x32xf32> to vector<2x1x32xf32>
    %633 = vector.shape_cast %632 : vector<2x1x32xf32> to vector<2x1x32xf32>
    %634 = vector.broadcast %633 : vector<2x1x32xf32> to vector<2x3x32xf32>
    %635 = vector.shape_cast %634 : vector<2x3x32xf32> to vector<6x32xf32>
    %636 = vector.extract_strided_slice %627 {offsets = [0, 0, 0], sizes = [1, 32, 32], strides = [1, 1, 1]} : vector<3x32x32xf32> to vector<1x32x32xf32>
    %637 = vector.shape_cast %636 : vector<1x32x32xf32> to vector<32x32xf32>
    %cst_226 = arith.constant dense<0.000000e+00> : vector<6x32xf32>
    %638 = tpu.matmul %635, %637, %cst_226 {dimension_numbers = #tpu.dot_dimension_numbers<[1], [0], [0], [1], [0, 0, 1, 1], [], []>} : vector<6x32xf32>, vector<32x32xf32>, vector<6x32xf32> -> vector<6x32xf32>
    %639 = vector.extract_strided_slice %628 {offsets = [0, 0, 0], sizes = [1, 1, 32], strides = [1, 1, 1]} : vector<3x1x32xf32> to vector<1x1x32xf32>
    %640 = vector.shape_cast %639 : vector<1x1x32xf32> to vector<1x32xf32>
    %641 = vector.broadcast %640 : vector<1x32xf32> to vector<6x32xf32>
    %642 = arith.addf %638, %641 : vector<6x32xf32>
    %643 = vector.extract_strided_slice %627 {offsets = [1, 0, 0], sizes = [1, 32, 32], strides = [1, 1, 1]} : vector<3x32x32xf32> to vector<1x32x32xf32>
    %644 = vector.shape_cast %643 : vector<1x32x32xf32> to vector<32x32xf32>
    %cst_227 = arith.constant dense<0.000000e+00> : vector<6x32xf32>
    %645 = tpu.matmul %635, %644, %cst_227 {dimension_numbers = #tpu.dot_dimension_numbers<[1], [0], [0], [1], [0, 0, 1, 1], [], []>} : vector<6x32xf32>, vector<32x32xf32>, vector<6x32xf32> -> vector<6x32xf32>
    %646 = vector.extract_strided_slice %628 {offsets = [1, 0, 0], sizes = [1, 1, 32], strides = [1, 1, 1]} : vector<3x1x32xf32> to vector<1x1x32xf32>
    %647 = vector.shape_cast %646 : vector<1x1x32xf32> to vector<1x32xf32>
    %648 = vector.broadcast %647 : vector<1x32xf32> to vector<6x32xf32>
    %649 = arith.addf %645, %648 : vector<6x32xf32>
    %650 = vector.extract_strided_slice %627 {offsets = [2, 0, 0], sizes = [1, 32, 32], strides = [1, 1, 1]} : vector<3x32x32xf32> to vector<1x32x32xf32>
    %651 = vector.shape_cast %650 : vector<1x32x32xf32> to vector<32x32xf32>
    %cst_228 = arith.constant dense<0.000000e+00> : vector<6x32xf32>
    %652 = tpu.matmul %635, %651, %cst_228 {dimension_numbers = #tpu.dot_dimension_numbers<[1], [0], [0], [1], [0, 0, 1, 1], [], []>} : vector<6x32xf32>, vector<32x32xf32>, vector<6x32xf32> -> vector<6x32xf32>
    %653 = vector.extract_strided_slice %628 {offsets = [2, 0, 0], sizes = [1, 1, 32], strides = [1, 1, 1]} : vector<3x1x32xf32> to vector<1x1x32xf32>
    %654 = vector.shape_cast %653 : vector<1x1x32xf32> to vector<1x32xf32>
    %655 = vector.broadcast %654 : vector<1x32xf32> to vector<6x32xf32>
    %656 = arith.addf %652, %655 : vector<6x32xf32>
    %c0_229 = arith.constant 0 : index
    %c0_230 = arith.constant 0 : index
    %c0_231 = arith.constant 0 : index
    %c0_232 = arith.constant 0 : index
    %657 = vector.load %arg35[%c0_229, %c0_230, %c0_231, %c0_232] : memref<3x2x3x32xf32, #tpu.memory_space<vmem>>, vector<1x2x3x32xf32>
    %658 = vector.shape_cast %657 : vector<1x2x3x32xf32> to vector<2x3x32xf32>
    %659 = vector.shape_cast %658 : vector<2x3x32xf32> to vector<6x32xf32>
    %660 = arith.addf %659, %642 : vector<6x32xf32>
    %661 = arith.negf %660 : vector<6x32xf32>
    %662 = math.exp %661 : vector<6x32xf32>
    %cst_233 = arith.constant 1.000000e+00 : f32
    %663 = vector.broadcast %cst_233 : f32 to vector<6x32xf32>
    %664 = arith.addf %663, %662 : vector<6x32xf32>
    %665 = arith.divf %663, %664 : vector<6x32xf32>
    %c0_234 = arith.constant 0 : index
    %c0_235 = arith.constant 0 : index
    %c0_236 = arith.constant 0 : index
    %c0_237 = arith.constant 0 : index
    %666 = vector.load %arg36[%c0_234, %c0_235, %c0_236, %c0_237] : memref<3x2x3x32xf32, #tpu.memory_space<vmem>>, vector<1x2x3x32xf32>
    %667 = vector.shape_cast %666 : vector<1x2x3x32xf32> to vector<2x3x32xf32>
    %668 = vector.shape_cast %667 : vector<2x3x32xf32> to vector<6x32xf32>
    %669 = arith.addf %668, %649 : vector<6x32xf32>
    %670 = arith.negf %669 : vector<6x32xf32>
    %671 = math.exp %670 : vector<6x32xf32>
    %cst_238 = arith.constant 1.000000e+00 : f32
    %672 = vector.broadcast %cst_238 : f32 to vector<6x32xf32>
    %673 = arith.addf %672, %671 : vector<6x32xf32>
    %674 = arith.divf %672, %673 : vector<6x32xf32>
    %c0_239 = arith.constant 0 : index
    %c0_240 = arith.constant 0 : index
    %c0_241 = arith.constant 0 : index
    %c0_242 = arith.constant 0 : index
    %675 = vector.load %arg37[%c0_239, %c0_240, %c0_241, %c0_242] : memref<3x2x3x32xf32, #tpu.memory_space<vmem>>, vector<1x2x3x32xf32>
    %676 = vector.shape_cast %675 : vector<1x2x3x32xf32> to vector<2x3x32xf32>
    %677 = vector.shape_cast %676 : vector<2x3x32xf32> to vector<6x32xf32>
    %678 = arith.mulf %665, %656 : vector<6x32xf32>
    %679 = arith.addf %677, %678 : vector<6x32xf32>
    %680 = math.tanh %679 : vector<6x32xf32>
    %cst_243 = arith.constant 1.000000e+00 : f32
    %681 = vector.broadcast %cst_243 : f32 to vector<6x32xf32>
    %682 = arith.subf %681, %674 : vector<6x32xf32>
    %683 = arith.mulf %682, %680 : vector<6x32xf32>
    %684 = arith.mulf %674, %635 : vector<6x32xf32>
    %685 = arith.addf %683, %684 : vector<6x32xf32>
    %cst_244 = arith.constant dense<0.000000e+00> : vector<6x161xf32>
    %686 = tpu.matmul %685, %629, %cst_244 {dimension_numbers = #tpu.dot_dimension_numbers<[1], [0], [0], [1], [0, 0, 1, 1], [], []>} : vector<6x32xf32>, vector<32x161xf32>, vector<6x161xf32> -> vector<6x161xf32>
    %687 = vector.broadcast %630 : vector<1x161xf32> to vector<6x161xf32>
    %688 = arith.addf %686, %687 : vector<6x161xf32>
    %689 = vector.extract_strided_slice %688 {offsets = [0, 0], sizes = [6, 128], strides = [1, 1]} : vector<6x161xf32> to vector<6x128xf32>
    %690 = vector.shape_cast %689 : vector<6x128xf32> to vector<2x3x128xf32>
    %691 = vector.extract_strided_slice %688 {offsets = [0, 128], sizes = [6, 32], strides = [1, 1]} : vector<6x161xf32> to vector<6x32xf32>
    %692 = vector.shape_cast %691 : vector<6x32xf32> to vector<2x3x32xf32>
    %693 = vector.extract_strided_slice %688 {offsets = [0, 160], sizes = [6, 1], strides = [1, 1]} : vector<6x161xf32> to vector<6x1xf32>
    %694 = vector.shape_cast %573 : vector<2x8x32xf32> to vector<2x1x8x32xf32>
    %695 = vector.shape_cast %692 : vector<2x3x32xf32> to vector<2x3x1x32xf32>
    %696 = vector.broadcast %694 : vector<2x1x8x32xf32> to vector<2x3x8x32xf32>
    %697 = vector.broadcast %695 : vector<2x3x1x32xf32> to vector<2x3x8x32xf32>
    %698 = arith.addf %696, %697 : vector<2x3x8x32xf32>
    %699 = math.tanh %698 : vector<2x3x8x32xf32>
    %700 = vector.broadcast %616 : vector<1x1x1x32xf32> to vector<2x3x8x32xf32>
    %701 = arith.mulf %699, %700 : vector<2x3x8x32xf32>
    %cst_245 = arith.constant dense<0.000000e+00> : vector<2x3x8xf32>
    %702 = vector.multi_reduction <add>, %701, %cst_245 [3] : vector<2x3x8x32xf32> to vector<2x3x8xf32>
    %703 = vector.shape_cast %619 : vector<2x8xf32> to vector<2x1x8xf32>
    %cst_246 = arith.constant 0.000000e+00 : f32
    %704 = vector.broadcast %cst_246 : f32 to vector<2x1x8xf32>
    %705 = arith.cmpf ogt, %703, %704 : vector<2x1x8xf32>
    %cst_247 = arith.constant -1.000000e+30 : f32
    %706 = vector.shape_cast %705 : vector<2x1x8xi1> to vector<2x1x8xi1>
    %707 = vector.broadcast %706 : vector<2x1x8xi1> to vector<2x3x8xi1>
    %708 = vector.broadcast %cst_247 : f32 to vector<2x3x8xf32>
    %709 = arith.select %707, %702, %708 : vector<2x3x8xi1>, vector<2x3x8xf32>
    %cst_248 = arith.constant dense<0xFF800000> : vector<2x3xf32>
    %710 = vector.multi_reduction <maximumf>, %709, %cst_248 [2] : vector<2x3x8xf32> to vector<2x3xf32>
    %711 = vector.shape_cast %710 : vector<2x3xf32> to vector<2x3x1xf32>
    %712 = vector.broadcast %711 : vector<2x3x1xf32> to vector<2x3x8xf32>
    %713 = arith.subf %709, %712 : vector<2x3x8xf32>
    %714 = math.exp %713 : vector<2x3x8xf32>
    %cst_249 = arith.constant dense<0.000000e+00> : vector<2x3xf32>
    %715 = vector.multi_reduction <add>, %714, %cst_249 [2] : vector<2x3x8xf32> to vector<2x3xf32>
    %716 = vector.shape_cast %715 : vector<2x3xf32> to vector<2x3x1xf32>
    %717 = tpu.reciprocal %716 {approx = true} : vector<2x3x1xf32> -> vector<2x3x1xf32>
    %718 = vector.broadcast %717 : vector<2x3x1xf32> to vector<2x3x8xf32>
    %719 = arith.mulf %714, %718 : vector<2x3x8xf32>
    "tpu.trace_start"() <{level = 10 : i32, message = "bds,bsh->bdh"}> : () -> ()
    %cst_250 = arith.constant dense<0.000000e+00> : vector<2x3x32xf32>
    %720 = tpu.matmul %719, %569, %cst_250 {dimension_numbers = #tpu.dot_dimension_numbers<[2], [1], [1], [2], [0, 0, 0, 1, 1, 2], [0], [0]>} : vector<2x3x8xf32>, vector<2x8x32xf32>, vector<2x3x32xf32> -> vector<2x3x32xf32>
    "tpu.trace_stop"() : () -> ()
    %721 = vector.shape_cast %720 : vector<2x3x32xf32> to vector<6x32xf32>
    %cst_251 = arith.constant dense<0.000000e+00> : vector<6x129xf32>
    %722 = tpu.matmul %721, %631, %cst_251 {dimension_numbers = #tpu.dot_dimension_numbers<[1], [0], [0], [1], [0, 0, 1, 1], [], []>} : vector<6x32xf32>, vector<32x129xf32>, vector<6x129xf32> -> vector<6x129xf32>
    %723 = vector.extract_strided_slice %722 {offsets = [0, 0], sizes = [6, 128], strides = [1, 1]} : vector<6x129xf32> to vector<6x128xf32>
    %724 = vector.shape_cast %723 : vector<6x128xf32> to vector<2x3x128xf32>
    %725 = vector.extract_strided_slice %722 {offsets = [0, 128], sizes = [6, 1], strides = [1, 1]} : vector<6x129xf32> to vector<6x1xf32>
    %726 = arith.addf %690, %724 : vector<2x3x128xf32>
    %cst_252 = arith.constant dense<0xFF800000> : vector<2x3xf32>
    %727 = vector.multi_reduction <maximumf>, %726, %cst_252 [2] : vector<2x3x128xf32> to vector<2x3xf32>
    %728 = vector.shape_cast %727 : vector<2x3xf32> to vector<2x3x1xf32>
    %729 = vector.broadcast %728 : vector<2x3x1xf32> to vector<2x3x128xf32>
    %730 = arith.subf %726, %729 : vector<2x3x128xf32>
    %731 = math.exp %730 : vector<2x3x128xf32>
    %cst_253 = arith.constant dense<0.000000e+00> : vector<2x3xf32>
    %732 = vector.multi_reduction <add>, %731, %cst_253 [2] : vector<2x3x128xf32> to vector<2x3xf32>
    %733 = vector.shape_cast %732 : vector<2x3xf32> to vector<2x3x1xf32>
    %734 = tpu.reciprocal %733 {approx = true} : vector<2x3x1xf32> -> vector<2x3x1xf32>
    %735 = vector.broadcast %734 : vector<2x3x1xf32> to vector<2x3x128xf32>
    %736 = arith.mulf %731, %735 : vector<2x3x128xf32>
    %737 = arith.addf %693, %725 : vector<6x1xf32>
    %c0_254 = arith.constant 0 : index
    %c0_255 = arith.constant 0 : index
    %c0_256 = arith.constant 0 : index
    %738 = vector.load %arg38[%c0_254, %c0_255, %c0_256] : memref<3x6x1xf32, #tpu.memory_space<vmem>>, vector<1x6x1xf32>
    %739 = vector.shape_cast %738 : vector<1x6x1xf32> to vector<6x1xf32>
    %740 = arith.addf %737, %739 : vector<6x1xf32>
    %741 = arith.negf %740 : vector<6x1xf32>
    %742 = math.exp %741 : vector<6x1xf32>
    %cst_257 = arith.constant 1.000000e+00 : f32
    %743 = vector.broadcast %cst_257 : f32 to vector<6x1xf32>
    %744 = arith.addf %743, %742 : vector<6x1xf32>
    %745 = arith.divf %743, %744 : vector<6x1xf32>
    %746 = vector.shape_cast %745 : vector<6x1xf32> to vector<2x3x1xf32>
    %c0_258 = arith.constant 0 : index
    %c0_259 = arith.constant 0 : index
    %747 = vector.load %arg21[%c0_258, %c0_259] : memref<32x32xf32, #tpu.memory_space<vmem>>, vector<32x32xf32>
    %cst_260 = arith.constant dense<0.000000e+00> : vector<6x32xf32>
    %748 = tpu.matmul %685, %747, %cst_260 {dimension_numbers = #tpu.dot_dimension_numbers<[1], [0], [0], [1], [0, 0, 1, 1], [], []>} : vector<6x32xf32>, vector<32x32xf32>, vector<6x32xf32> -> vector<6x32xf32>
    %749 = vector.shape_cast %748 : vector<6x32xf32> to vector<2x3x32xf32>
    %750 = vector.shape_cast %614 : vector<3x32xf32> to vector<1x1x3x32xf32>
    %751 = vector.shape_cast %749 : vector<2x3x32xf32> to vector<2x3x1x32xf32>
    %752 = vector.broadcast %750 : vector<1x1x3x32xf32> to vector<2x3x3x32xf32>
    %753 = vector.broadcast %751 : vector<2x3x1x32xf32> to vector<2x3x3x32xf32>
    %754 = arith.addf %752, %753 : vector<2x3x3x32xf32>
    %755 = math.tanh %754 : vector<2x3x3x32xf32>
    %756 = vector.broadcast %618 : vector<1x1x1x32xf32> to vector<2x3x3x32xf32>
    %757 = arith.mulf %755, %756 : vector<2x3x3x32xf32>
    %cst_261 = arith.constant dense<0.000000e+00> : vector<2x3x3xf32>
    %758 = vector.multi_reduction <add>, %757, %cst_261 [3] : vector<2x3x3x32xf32> to vector<2x3x3xf32>
    %cst_262 = arith.constant dense<0xFF800000> : vector<2x3xf32>
    %759 = vector.multi_reduction <maximumf>, %758, %cst_262 [2] : vector<2x3x3xf32> to vector<2x3xf32>
    %760 = vector.shape_cast %759 : vector<2x3xf32> to vector<2x3x1xf32>
    %761 = vector.broadcast %760 : vector<2x3x1xf32> to vector<2x3x3xf32>
    %762 = arith.subf %758, %761 : vector<2x3x3xf32>
    %763 = math.exp %762 : vector<2x3x3xf32>
    %c0_263 = arith.constant 0 : index
    %c0_264 = arith.constant 0 : index
    %c0_265 = arith.constant 0 : index
    %764 = vector.load %arg7[%c0_263, %c0_264, %c0_265] : memref<2x3x3xf32, #tpu.memory_space<vmem>>, vector<2x3x3xf32>
    %765 = arith.mulf %763, %764 : vector<2x3x3xf32>
    %cst_266 = arith.constant dense<0.000000e+00> : vector<2x3xf32>
    %766 = vector.multi_reduction <add>, %765, %cst_266 [2] : vector<2x3x3xf32> to vector<2x3xf32>
    %767 = vector.shape_cast %766 : vector<2x3xf32> to vector<2x3x1xf32>
    %cst_267 = arith.constant 9.99999982E-14 : f32
    %768 = vector.broadcast %cst_267 : f32 to vector<2x3x1xf32>
    %769 = arith.addf %767, %768 : vector<2x3x1xf32>
    %770 = tpu.reciprocal %769 {approx = true} : vector<2x3x1xf32> -> vector<2x3x1xf32>
    %771 = vector.broadcast %770 : vector<2x3x1xf32> to vector<2x3x3xf32>
    %772 = arith.mulf %765, %771 : vector<2x3x3xf32>
    %773 = vector.shape_cast %720 : vector<2x3x32xf32> to vector<6x32xf32>
    %c0_268 = arith.constant 0 : index
    %c0_269 = arith.constant 0 : index
    %774 = vector.load %arg27[%c0_268, %c0_269] : memref<32x4xf32, #tpu.memory_space<vmem>>, vector<32x4xf32>
    %cst_270 = arith.constant dense<0.000000e+00> : vector<6x4xf32>
    %775 = tpu.matmul %773, %774, %cst_270 {dimension_numbers = #tpu.dot_dimension_numbers<[1], [0], [0], [1], [0, 0, 1, 1], [], []>} : vector<6x32xf32>, vector<32x4xf32>, vector<6x4xf32> -> vector<6x4xf32>
    %c0_271 = arith.constant 0 : index
    %c0_272 = arith.constant 0 : index
    %776 = vector.load %arg28[%c0_271, %c0_272] : memref<1x4xf32, #tpu.memory_space<vmem>>, vector<1x4xf32>
    %777 = vector.broadcast %776 : vector<1x4xf32> to vector<6x4xf32>
    %778 = arith.addf %775, %777 : vector<6x4xf32>
    %779 = vector.extract_strided_slice %778 {offsets = [0, 0], sizes = [6, 1], strides = [1, 1]} : vector<6x4xf32> to vector<6x1xf32>
    %780 = arith.negf %779 : vector<6x1xf32>
    %781 = math.exp %780 : vector<6x1xf32>
    %cst_273 = arith.constant 1.000000e+00 : f32
    %782 = vector.broadcast %cst_273 : f32 to vector<6x1xf32>
    %783 = arith.addf %782, %781 : vector<6x1xf32>
    %784 = arith.divf %782, %783 : vector<6x1xf32>
    %785 = vector.shape_cast %784 : vector<6x1xf32> to vector<2x3x1xf32>
    %786 = vector.extract_strided_slice %778 {offsets = [0, 1], sizes = [6, 3], strides = [1, 1]} : vector<6x4xf32> to vector<6x3xf32>
    %787 = vector.shape_cast %786 : vector<6x3xf32> to vector<2x3x3xf32>
    %c0_274 = arith.constant 0 : index
    %c0_275 = arith.constant 0 : index
    %c0_276 = arith.constant 0 : index
    %788 = vector.load %arg30[%c0_274, %c0_275, %c0_276] : memref<2x3x3xf32, #tpu.memory_space<vmem>>, vector<2x3x3xf32>
    tpu.vector_store %arg30[%c0_274, %c0_275, %c0_276], %787 {strides = array<i32>} : memref<2x3x3xf32, #tpu.memory_space<vmem>>, vector<2x3x3xf32>,
    %cst_277 = arith.constant 1.000000e+00 : f32
    %789 = vector.broadcast %cst_277 : f32 to vector<2x3x1xf32>
    %790 = arith.subf %789, %785 : vector<2x3x1xf32>
    %791 = vector.broadcast %785 : vector<2x3x1xf32> to vector<2x3x3xf32>
    %792 = arith.mulf %791, %772 : vector<2x3x3xf32>
    %793 = arith.mulf %790, %746 : vector<2x3x1xf32>
    %794 = vector.broadcast %793 : vector<2x3x1xf32> to vector<2x3x128xf32>
    %795 = arith.mulf %794, %736 : vector<2x3x128xf32>
    %cst_278 = arith.constant 1.000000e+00 : f32
    %796 = vector.broadcast %cst_278 : f32 to vector<2x3x1xf32>
    %797 = arith.subf %796, %746 : vector<2x3x1xf32>
    %798 = arith.mulf %790, %797 : vector<2x3x1xf32>
    %799 = vector.broadcast %798 : vector<2x3x1xf32> to vector<2x3x8xf32>
    %800 = arith.mulf %799, %719 : vector<2x3x8xf32>
    "tpu.trace_start"() <{level = 10 : i32, message = "bds,bsv->bdv"}> : () -> ()
    %cst_279 = arith.constant dense<0.000000e+00> : vector<2x3x128xf32>
    %801 = tpu.matmul %800, %626, %cst_279 {dimension_numbers = #tpu.dot_dimension_numbers<[2], [1], [1], [2], [0, 0, 0, 1, 1, 2], [0], [0]>} : vector<2x3x8xf32>, vector<2x8x128xf32>, vector<2x3x128xf32> -> vector<2x3x128xf32>
    "tpu.trace_stop"() : () -> ()
    %802 = arith.addf %795, %801 : vector<2x3x128xf32>
    %c0_280 = arith.constant 0 : index
    %c0_281 = arith.constant 0 : index
    %c0_282 = arith.constant 0 : index
    %803 = vector.load %arg6[%c0_280, %c0_281, %c0_282] : memref<3x2x3xi32, #tpu.memory_space<vmem>>, vector<1x2x3xi32>
    %804 = vector.shape_cast %803 : vector<1x2x3xi32> to vector<2x3xi32>
    %805 = vector.shape_cast %804 : vector<2x3xi32> to vector<2x3x1xi32>
    %806 = tpu.iota {dimensions = array<i32: 2>} : vector<2x3x128xi32>
    %807 = vector.broadcast %805 : vector<2x3x1xi32> to vector<2x3x128xi32>
    %808 = arith.cmpi eq, %807, %806 : vector<2x3x128xi32>
    %809 = arith.extui %808 : vector<2x3x128xi1> to vector<2x3x128xi32>
    %810 = arith.sitofp %809 : vector<2x3x128xi32> to vector<2x3x128xf32>
    "tpu.trace_start"() <{level = 10 : i32, message = "bdk,bkv->bdv"}> : () -> ()
    %cst_283 = arith.constant dense<0.000000e+00> : vector<2x3x128xf32>
    %811 = tpu.matmul %792, %810, %cst_283 {dimension_numbers = #tpu.dot_dimension_numbers<[2], [1], [1], [2], [0, 0, 0, 1, 1, 2], [0], [0]>} : vector<2x3x3xf32>, vector<2x3x128xf32>, vector<2x3x128xf32> -> vector<2x3x128xf32>
    "tpu.trace_stop"() : () -> ()
    %812 = arith.addf %802, %811 : vector<2x3x128xf32>
    %c0_284 = arith.constant 0 : index
    %c0_285 = arith.constant 0 : index
    %c0_286 = arith.constant 0 : index
    %c0_287 = arith.constant 0 : index
    %813 = vector.load %arg29[%c0_284, %c0_285, %c0_286, %c0_287] : memref<3x2x3x128xf32, #tpu.memory_space<vmem>>, vector<1x2x3x128xf32>
    %814 = vector.shape_cast %813 : vector<1x2x3x128xf32> to vector<2x3x128xf32>
    %815 = vector.shape_cast %812 : vector<2x3x128xf32> to vector<1x2x3x128xf32>
    tpu.vector_store %arg29[%c0_284, %c0_285, %c0_286, %c0_287], %815 {strides = array<i32>} : memref<3x2x3x128xf32, #tpu.memory_space<vmem>>, vector<1x2x3x128xf32>,
    %c1_i32_288 = arith.constant 1 : i32
    %816 = vector.extract_strided_slice %627 {offsets = [0, 0, 0], sizes = [1, 32, 32], strides = [1, 1, 1]} : vector<3x32x32xf32> to vector<1x32x32xf32>
    %817 = vector.shape_cast %816 : vector<1x32x32xf32> to vector<32x32xf32>
    %cst_289 = arith.constant dense<0.000000e+00> : vector<6x32xf32>
    %818 = tpu.matmul %685, %817, %cst_289 {dimension_numbers = #tpu.dot_dimension_numbers<[1], [0], [0], [1], [0, 0, 1, 1], [], []>} : vector<6x32xf32>, vector<32x32xf32>, vector<6x32xf32> -> vector<6x32xf32>
    %819 = vector.extract_strided_slice %628 {offsets = [0, 0, 0], sizes = [1, 1, 32], strides = [1, 1, 1]} : vector<3x1x32xf32> to vector<1x1x32xf32>
    %820 = vector.shape_cast %819 : vector<1x1x32xf32> to vector<1x32xf32>
    %821 = vector.broadcast %820 : vector<1x32xf32> to vector<6x32xf32>
    %822 = arith.addf %818, %821 : vector<6x32xf32>
    %823 = vector.extract_strided_slice %627 {offsets = [1, 0, 0], sizes = [1, 32, 32], strides = [1, 1, 1]} : vector<3x32x32xf32> to vector<1x32x32xf32>
    %824 = vector.shape_cast %823 : vector<1x32x32xf32> to vector<32x32xf32>
    %cst_290 = arith.constant dense<0.000000e+00> : vector<6x32xf32>
    %825 = tpu.matmul %685, %824, %cst_290 {dimension_numbers = #tpu.dot_dimension_numbers<[1], [0], [0], [1], [0, 0, 1, 1], [], []>} : vector<6x32xf32>, vector<32x32xf32>, vector<6x32xf32> -> vector<6x32xf32>
    %826 = vector.extract_strided_slice %628 {offsets = [1, 0, 0], sizes = [1, 1, 32], strides = [1, 1, 1]} : vector<3x1x32xf32> to vector<1x1x32xf32>
    %827 = vector.shape_cast %826 : vector<1x1x32xf32> to vector<1x32xf32>
    %828 = vector.broadcast %827 : vector<1x32xf32> to vector<6x32xf32>
    %829 = arith.addf %825, %828 : vector<6x32xf32>
    %830 = vector.extract_strided_slice %627 {offsets = [2, 0, 0], sizes = [1, 32, 32], strides = [1, 1, 1]} : vector<3x32x32xf32> to vector<1x32x32xf32>
    %831 = vector.shape_cast %830 : vector<1x32x32xf32> to vector<32x32xf32>
    %cst_291 = arith.constant dense<0.000000e+00> : vector<6x32xf32>
    %832 = tpu.matmul %685, %831, %cst_291 {dimension_numbers = #tpu.dot_dimension_numbers<[1], [0], [0], [1], [0, 0, 1, 1], [], []>} : vector<6x32xf32>, vector<32x32xf32>, vector<6x32xf32> -> vector<6x32xf32>
    %833 = vector.extract_strided_slice %628 {offsets = [2, 0, 0], sizes = [1, 1, 32], strides = [1, 1, 1]} : vector<3x1x32xf32> to vector<1x1x32xf32>
    %834 = vector.shape_cast %833 : vector<1x1x32xf32> to vector<1x32xf32>
    %835 = vector.broadcast %834 : vector<1x32xf32> to vector<6x32xf32>
    %836 = arith.addf %832, %835 : vector<6x32xf32>
    %837 = arith.index_cast %c1_i32_288 : i32 to index
    %c0_292 = arith.constant 0 : index
    %c0_293 = arith.constant 0 : index
    %c0_294 = arith.constant 0 : index
    %838 = vector.load %arg35[%837, %c0_292, %c0_293, %c0_294] : memref<3x2x3x32xf32, #tpu.memory_space<vmem>>, vector<1x2x3x32xf32>
    %839 = vector.shape_cast %838 : vector<1x2x3x32xf32> to vector<2x3x32xf32>
    %840 = vector.shape_cast %839 : vector<2x3x32xf32> to vector<6x32xf32>
    %841 = arith.addf %840, %822 : vector<6x32xf32>
    %842 = arith.negf %841 : vector<6x32xf32>
    %843 = math.exp %842 : vector<6x32xf32>
    %cst_295 = arith.constant 1.000000e+00 : f32
    %844 = vector.broadcast %cst_295 : f32 to vector<6x32xf32>
    %845 = arith.addf %844, %843 : vector<6x32xf32>
    %846 = arith.divf %844, %845 : vector<6x32xf32>
    %847 = arith.index_cast %c1_i32_288 : i32 to index
    %c0_296 = arith.constant 0 : index
    %c0_297 = arith.constant 0 : index
    %c0_298 = arith.constant 0 : index
    %848 = vector.load %arg36[%847, %c0_296, %c0_297, %c0_298] : memref<3x2x3x32xf32, #tpu.memory_space<vmem>>, vector<1x2x3x32xf32>
    %849 = vector.shape_cast %848 : vector<1x2x3x32xf32> to vector<2x3x32xf32>
    %850 = vector.shape_cast %849 : vector<2x3x32xf32> to vector<6x32xf32>
    %851 = arith.addf %850, %829 : vector<6x32xf32>
    %852 = arith.negf %851 : vector<6x32xf32>
    %853 = math.exp %852 : vector<6x32xf32>
    %cst_299 = arith.constant 1.000000e+00 : f32
    %854 = vector.broadcast %cst_299 : f32 to vector<6x32xf32>
    %855 = arith.addf %854, %853 : vector<6x32xf32>
    %856 = arith.divf %854, %855 : vector<6x32xf32>
    %857 = arith.index_cast %c1_i32_288 : i32 to index
    %c0_300 = arith.constant 0 : index
    %c0_301 = arith.constant 0 : index
    %c0_302 = arith.constant 0 : index
    %858 = vector.load %arg37[%857, %c0_300, %c0_301, %c0_302] : memref<3x2x3x32xf32, #tpu.memory_space<vmem>>, vector<1x2x3x32xf32>
    %859 = vector.shape_cast %858 : vector<1x2x3x32xf32> to vector<2x3x32xf32>
    %860 = vector.shape_cast %859 : vector<2x3x32xf32> to vector<6x32xf32>
    %861 = arith.mulf %846, %836 : vector<6x32xf32>
    %862 = arith.addf %860, %861 : vector<6x32xf32>
    %863 = math.tanh %862 : vector<6x32xf32>
    %cst_303 = arith.constant 1.000000e+00 : f32
    %864 = vector.broadcast %cst_303 : f32 to vector<6x32xf32>
    %865 = arith.subf %864, %856 : vector<6x32xf32>
    %866 = arith.mulf %865, %863 : vector<6x32xf32>
    %867 = arith.mulf %856, %685 : vector<6x32xf32>
    %868 = arith.addf %866, %867 : vector<6x32xf32>
    %cst_304 = arith.constant dense<0.000000e+00> : vector<6x161xf32>
    %869 = tpu.matmul %868, %629, %cst_304 {dimension_numbers = #tpu.dot_dimension_numbers<[1], [0], [0], [1], [0, 0, 1, 1], [], []>} : vector<6x32xf32>, vector<32x161xf32>, vector<6x161xf32> -> vector<6x161xf32>
    %870 = vector.broadcast %630 : vector<1x161xf32> to vector<6x161xf32>
    %871 = arith.addf %869, %870 : vector<6x161xf32>
    %872 = vector.extract_strided_slice %871 {offsets = [0, 0], sizes = [6, 128], strides = [1, 1]} : vector<6x161xf32> to vector<6x128xf32>
    %873 = vector.shape_cast %872 : vector<6x128xf32> to vector<2x3x128xf32>
    %874 = vector.extract_strided_slice %871 {offsets = [0, 128], sizes = [6, 32], strides = [1, 1]} : vector<6x161xf32> to vector<6x32xf32>
    %875 = vector.shape_cast %874 : vector<6x32xf32> to vector<2x3x32xf32>
    %876 = vector.extract_strided_slice %871 {offsets = [0, 160], sizes = [6, 1], strides = [1, 1]} : vector<6x161xf32> to vector<6x1xf32>
    %877 = vector.shape_cast %573 : vector<2x8x32xf32> to vector<2x1x8x32xf32>
    %878 = vector.shape_cast %875 : vector<2x3x32xf32> to vector<2x3x1x32xf32>
    %879 = vector.broadcast %877 : vector<2x1x8x32xf32> to vector<2x3x8x32xf32>
    %880 = vector.broadcast %878 : vector<2x3x1x32xf32> to vector<2x3x8x32xf32>
    %881 = arith.addf %879, %880 : vector<2x3x8x32xf32>
    %882 = math.tanh %881 : vector<2x3x8x32xf32>
    %883 = vector.broadcast %616 : vector<1x1x1x32xf32> to vector<2x3x8x32xf32>
    %884 = arith.mulf %882, %883 : vector<2x3x8x32xf32>
    %cst_305 = arith.constant dense<0.000000e+00> : vector<2x3x8xf32>
    %885 = vector.multi_reduction <add>, %884, %cst_305 [3] : vector<2x3x8x32xf32> to vector<2x3x8xf32>
    %886 = vector.shape_cast %619 : vector<2x8xf32> to vector<2x1x8xf32>
    %cst_306 = arith.constant 0.000000e+00 : f32
    %887 = vector.broadcast %cst_306 : f32 to vector<2x1x8xf32>
    %888 = arith.cmpf ogt, %886, %887 : vector<2x1x8xf32>
    %cst_307 = arith.constant -1.000000e+30 : f32
    %889 = vector.shape_cast %888 : vector<2x1x8xi1> to vector<2x1x8xi1>
    %890 = vector.broadcast %889 : vector<2x1x8xi1> to vector<2x3x8xi1>
    %891 = vector.broadcast %cst_307 : f32 to vector<2x3x8xf32>
    %892 = arith.select %890, %885, %891 : vector<2x3x8xi1>, vector<2x3x8xf32>
    %cst_308 = arith.constant dense<0xFF800000> : vector<2x3xf32>
    %893 = vector.multi_reduction <maximumf>, %892, %cst_308 [2] : vector<2x3x8xf32> to vector<2x3xf32>
    %894 = vector.shape_cast %893 : vector<2x3xf32> to vector<2x3x1xf32>
    %895 = vector.broadcast %894 : vector<2x3x1xf32> to vector<2x3x8xf32>
    %896 = arith.subf %892, %895 : vector<2x3x8xf32>
    %897 = math.exp %896 : vector<2x3x8xf32>
    %cst_309 = arith.constant dense<0.000000e+00> : vector<2x3xf32>
    %898 = vector.multi_reduction <add>, %897, %cst_309 [2] : vector<2x3x8xf32> to vector<2x3xf32>
    %899 = vector.shape_cast %898 : vector<2x3xf32> to vector<2x3x1xf32>
    %900 = tpu.reciprocal %899 {approx = true} : vector<2x3x1xf32> -> vector<2x3x1xf32>
    %901 = vector.broadcast %900 : vector<2x3x1xf32> to vector<2x3x8xf32>
    %902 = arith.mulf %897, %901 : vector<2x3x8xf32>
    "tpu.trace_start"() <{level = 10 : i32, message = "bds,bsh->bdh"}> : () -> ()
    %cst_310 = arith.constant dense<0.000000e+00> : vector<2x3x32xf32>
    %903 = tpu.matmul %902, %569, %cst_310 {dimension_numbers = #tpu.dot_dimension_numbers<[2], [1], [1], [2], [0, 0, 0, 1, 1, 2], [0], [0]>} : vector<2x3x8xf32>, vector<2x8x32xf32>, vector<2x3x32xf32> -> vector<2x3x32xf32>
    "tpu.trace_stop"() : () -> ()
    %904 = vector.shape_cast %903 : vector<2x3x32xf32> to vector<6x32xf32>
    %cst_311 = arith.constant dense<0.000000e+00> : vector<6x129xf32>
    %905 = tpu.matmul %904, %631, %cst_311 {dimension_numbers = #tpu.dot_dimension_numbers<[1], [0], [0], [1], [0, 0, 1, 1], [], []>} : vector<6x32xf32>, vector<32x129xf32>, vector<6x129xf32> -> vector<6x129xf32>
    %906 = vector.extract_strided_slice %905 {offsets = [0, 0], sizes = [6, 128], strides = [1, 1]} : vector<6x129xf32> to vector<6x128xf32>
    %907 = vector.shape_cast %906 : vector<6x128xf32> to vector<2x3x128xf32>
    %908 = vector.extract_strided_slice %905 {offsets = [0, 128], sizes = [6, 1], strides = [1, 1]} : vector<6x129xf32> to vector<6x1xf32>
    %909 = arith.addf %873, %907 : vector<2x3x128xf32>
    %cst_312 = arith.constant dense<0xFF800000> : vector<2x3xf32>
    %910 = vector.multi_reduction <maximumf>, %909, %cst_312 [2] : vector<2x3x128xf32> to vector<2x3xf32>
    %911 = vector.shape_cast %910 : vector<2x3xf32> to vector<2x3x1xf32>
    %912 = vector.broadcast %911 : vector<2x3x1xf32> to vector<2x3x128xf32>
    %913 = arith.subf %909, %912 : vector<2x3x128xf32>
    %914 = math.exp %913 : vector<2x3x128xf32>
    %cst_313 = arith.constant dense<0.000000e+00> : vector<2x3xf32>
    %915 = vector.multi_reduction <add>, %914, %cst_313 [2] : vector<2x3x128xf32> to vector<2x3xf32>
    %916 = vector.shape_cast %915 : vector<2x3xf32> to vector<2x3x1xf32>
    %917 = tpu.reciprocal %916 {approx = true} : vector<2x3x1xf32> -> vector<2x3x1xf32>
    %918 = vector.broadcast %917 : vector<2x3x1xf32> to vector<2x3x128xf32>
    %919 = arith.mulf %914, %918 : vector<2x3x128xf32>
    %920 = arith.addf %876, %908 : vector<6x1xf32>
    %921 = arith.index_cast %c1_i32_288 : i32 to index
    %c0_314 = arith.constant 0 : index
    %c0_315 = arith.constant 0 : index
    %922 = vector.load %arg38[%921, %c0_314, %c0_315] : memref<3x6x1xf32, #tpu.memory_space<vmem>>, vector<1x6x1xf32>
    %923 = vector.shape_cast %922 : vector<1x6x1xf32> to vector<6x1xf32>
    %924 = arith.addf %920, %923 : vector<6x1xf32>
    %925 = arith.negf %924 : vector<6x1xf32>
    %926 = math.exp %925 : vector<6x1xf32>
    %cst_316 = arith.constant 1.000000e+00 : f32
    %927 = vector.broadcast %cst_316 : f32 to vector<6x1xf32>
    %928 = arith.addf %927, %926 : vector<6x1xf32>
    %929 = arith.divf %927, %928 : vector<6x1xf32>
    %930 = vector.shape_cast %929 : vector<6x1xf32> to vector<2x3x1xf32>
    %931 = arith.mulf %790, %930 : vector<2x3x1xf32>
    %932 = vector.broadcast %931 : vector<2x3x1xf32> to vector<2x3x128xf32>
    %933 = arith.mulf %932, %919 : vector<2x3x128xf32>
    %cst_317 = arith.constant 1.000000e+00 : f32
    %934 = vector.broadcast %cst_317 : f32 to vector<2x3x1xf32>
    %935 = arith.subf %934, %930 : vector<2x3x1xf32>
    %936 = arith.mulf %790, %935 : vector<2x3x1xf32>
    %937 = vector.broadcast %936 : vector<2x3x1xf32> to vector<2x3x8xf32>
    %938 = arith.mulf %937, %902 : vector<2x3x8xf32>
    "tpu.trace_start"() <{level = 10 : i32, message = "bds,bsv->bdv"}> : () -> ()
    %cst_318 = arith.constant dense<0.000000e+00> : vector<2x3x128xf32>
    %939 = tpu.matmul %938, %626, %cst_318 {dimension_numbers = #tpu.dot_dimension_numbers<[2], [1], [1], [2], [0, 0, 0, 1, 1, 2], [0], [0]>} : vector<2x3x8xf32>, vector<2x8x128xf32>, vector<2x3x128xf32> -> vector<2x3x128xf32>
    "tpu.trace_stop"() : () -> ()
    %940 = arith.addf %933, %939 : vector<2x3x128xf32>
    %941 = arith.index_cast %c1_i32_288 : i32 to index
    %c0_319 = arith.constant 0 : index
    %c0_320 = arith.constant 0 : index
    %942 = vector.load %arg6[%941, %c0_319, %c0_320] : memref<3x2x3xi32, #tpu.memory_space<vmem>>, vector<1x2x3xi32>
    %943 = vector.shape_cast %942 : vector<1x2x3xi32> to vector<2x3xi32>
    %944 = vector.shape_cast %943 : vector<2x3xi32> to vector<2x3x1xi32>
    %945 = tpu.iota {dimensions = array<i32: 2>} : vector<2x3x128xi32>
    %946 = vector.broadcast %944 : vector<2x3x1xi32> to vector<2x3x128xi32>
    %947 = arith.cmpi eq, %946, %945 : vector<2x3x128xi32>
    %948 = arith.extui %947 : vector<2x3x128xi1> to vector<2x3x128xi32>
    %949 = arith.sitofp %948 : vector<2x3x128xi32> to vector<2x3x128xf32>
    "tpu.trace_start"() <{level = 10 : i32, message = "bdk,bkv->bdv"}> : () -> ()
    %cst_321 = arith.constant dense<0.000000e+00> : vector<2x3x128xf32>
    %950 = tpu.matmul %792, %949, %cst_321 {dimension_numbers = #tpu.dot_dimension_numbers<[2], [1], [1], [2], [0, 0, 0, 1, 1, 2], [0], [0]>} : vector<2x3x3xf32>, vector<2x3x128xf32>, vector<2x3x128xf32> -> vector<2x3x128xf32>
    "tpu.trace_stop"() : () -> ()
    %951 = arith.addf %940, %950 : vector<2x3x128xf32>
    %952 = arith.index_cast %c1_i32_288 : i32 to index
    %c0_322 = arith.constant 0 : index
    %c0_323 = arith.constant 0 : index
    %c0_324 = arith.constant 0 : index
    %953 = vector.load %arg29[%952, %c0_322, %c0_323, %c0_324] : memref<3x2x3x128xf32, #tpu.memory_space<vmem>>, vector<1x2x3x128xf32>
    %954 = vector.shape_cast %953 : vector<1x2x3x128xf32> to vector<2x3x128xf32>
    %955 = vector.shape_cast %951 : vector<2x3x128xf32> to vector<1x2x3x128xf32>
    tpu.vector_store %arg29[%952, %c0_322, %c0_323, %c0_324], %955 {strides = array<i32>} : memref<3x2x3x128xf32, #tpu.memory_space<vmem>>, vector<1x2x3x128xf32>,
    %c2_i32_325 = arith.constant 2 : i32
    %956 = vector.extract_strided_slice %627 {offsets = [0, 0, 0], sizes = [1, 32, 32], strides = [1, 1, 1]} : vector<3x32x32xf32> to vector<1x32x32xf32>
    %957 = vector.shape_cast %956 : vector<1x32x32xf32> to vector<32x32xf32>
    %cst_326 = arith.constant dense<0.000000e+00> : vector<6x32xf32>
    %958 = tpu.matmul %868, %957, %cst_326 {dimension_numbers = #tpu.dot_dimension_numbers<[1], [0], [0], [1], [0, 0, 1, 1], [], []>} : vector<6x32xf32>, vector<32x32xf32>, vector<6x32xf32> -> vector<6x32xf32>
    %959 = vector.extract_strided_slice %628 {offsets = [0, 0, 0], sizes = [1, 1, 32], strides = [1, 1, 1]} : vector<3x1x32xf32> to vector<1x1x32xf32>
    %960 = vector.shape_cast %959 : vector<1x1x32xf32> to vector<1x32xf32>
    %961 = vector.broadcast %960 : vector<1x32xf32> to vector<6x32xf32>
    %962 = arith.addf %958, %961 : vector<6x32xf32>
    %963 = vector.extract_strided_slice %627 {offsets = [1, 0, 0], sizes = [1, 32, 32], strides = [1, 1, 1]} : vector<3x32x32xf32> to vector<1x32x32xf32>
    %964 = vector.shape_cast %963 : vector<1x32x32xf32> to vector<32x32xf32>
    %cst_327 = arith.constant dense<0.000000e+00> : vector<6x32xf32>
    %965 = tpu.matmul %868, %964, %cst_327 {dimension_numbers = #tpu.dot_dimension_numbers<[1], [0], [0], [1], [0, 0, 1, 1], [], []>} : vector<6x32xf32>, vector<32x32xf32>, vector<6x32xf32> -> vector<6x32xf32>
    %966 = vector.extract_strided_slice %628 {offsets = [1, 0, 0], sizes = [1, 1, 32], strides = [1, 1, 1]} : vector<3x1x32xf32> to vector<1x1x32xf32>
    %967 = vector.shape_cast %966 : vector<1x1x32xf32> to vector<1x32xf32>
    %968 = vector.broadcast %967 : vector<1x32xf32> to vector<6x32xf32>
    %969 = arith.addf %965, %968 : vector<6x32xf32>
    %970 = vector.extract_strided_slice %627 {offsets = [2, 0, 0], sizes = [1, 32, 32], strides = [1, 1, 1]} : vector<3x32x32xf32> to vector<1x32x32xf32>
    %971 = vector.shape_cast %970 : vector<1x32x32xf32> to vector<32x32xf32>
    %cst_328 = arith.constant dense<0.000000e+00> : vector<6x32xf32>
    %972 = tpu.matmul %868, %971, %cst_328 {dimension_numbers = #tpu.dot_dimension_numbers<[1], [0], [0], [1], [0, 0, 1, 1], [], []>} : vector<6x32xf32>, vector<32x32xf32>, vector<6x32xf32> -> vector<6x32xf32>
    %973 = vector.extract_strided_slice %628 {offsets = [2, 0, 0], sizes = [1, 1, 32], strides = [1, 1, 1]} : vector<3x1x32xf32> to vector<1x1x32xf32>
    %974 = vector.shape_cast %973 : vector<1x1x32xf32> to vector<1x32xf32>
    %975 = vector.broadcast %974 : vector<1x32xf32> to vector<6x32xf32>
    %976 = arith.addf %972, %975 : vector<6x32xf32>
    %977 = arith.index_cast %c2_i32_325 : i32 to index
    %c0_329 = arith.constant 0 : index
    %c0_330 = arith.constant 0 : index
    %c0_331 = arith.constant 0 : index
    %978 = vector.load %arg35[%977, %c0_329, %c0_330, %c0_331] : memref<3x2x3x32xf32, #tpu.memory_space<vmem>>, vector<1x2x3x32xf32>
    %979 = vector.shape_cast %978 : vector<1x2x3x32xf32> to vector<2x3x32xf32>
    %980 = vector.shape_cast %979 : vector<2x3x32xf32> to vector<6x32xf32>
    %981 = arith.addf %980, %962 : vector<6x32xf32>
    %982 = arith.negf %981 : vector<6x32xf32>
    %983 = math.exp %982 : vector<6x32xf32>
    %cst_332 = arith.constant 1.000000e+00 : f32
    %984 = vector.broadcast %cst_332 : f32 to vector<6x32xf32>
    %985 = arith.addf %984, %983 : vector<6x32xf32>
    %986 = arith.divf %984, %985 : vector<6x32xf32>
    %987 = arith.index_cast %c2_i32_325 : i32 to index
    %c0_333 = arith.constant 0 : index
    %c0_334 = arith.constant 0 : index
    %c0_335 = arith.constant 0 : index
    %988 = vector.load %arg36[%987, %c0_333, %c0_334, %c0_335] : memref<3x2x3x32xf32, #tpu.memory_space<vmem>>, vector<1x2x3x32xf32>
    %989 = vector.shape_cast %988 : vector<1x2x3x32xf32> to vector<2x3x32xf32>
    %990 = vector.shape_cast %989 : vector<2x3x32xf32> to vector<6x32xf32>
    %991 = arith.addf %990, %969 : vector<6x32xf32>
    %992 = arith.negf %991 : vector<6x32xf32>
    %993 = math.exp %992 : vector<6x32xf32>
    %cst_336 = arith.constant 1.000000e+00 : f32
    %994 = vector.broadcast %cst_336 : f32 to vector<6x32xf32>
    %995 = arith.addf %994, %993 : vector<6x32xf32>
    %996 = arith.divf %994, %995 : vector<6x32xf32>
    %997 = arith.index_cast %c2_i32_325 : i32 to index
    %c0_337 = arith.constant 0 : index
    %c0_338 = arith.constant 0 : index
    %c0_339 = arith.constant 0 : index
    %998 = vector.load %arg37[%997, %c0_337, %c0_338, %c0_339] : memref<3x2x3x32xf32, #tpu.memory_space<vmem>>, vector<1x2x3x32xf32>
    %999 = vector.shape_cast %998 : vector<1x2x3x32xf32> to vector<2x3x32xf32>
    %1000 = vector.shape_cast %999 : vector<2x3x32xf32> to vector<6x32xf32>
    %1001 = arith.mulf %986, %976 : vector<6x32xf32>
    %1002 = arith.addf %1000, %1001 : vector<6x32xf32>
    %1003 = math.tanh %1002 : vector<6x32xf32>
    %cst_340 = arith.constant 1.000000e+00 : f32
    %1004 = vector.broadcast %cst_340 : f32 to vector<6x32xf32>
    %1005 = arith.subf %1004, %996 : vector<6x32xf32>
    %1006 = arith.mulf %1005, %1003 : vector<6x32xf32>
    %1007 = arith.mulf %996, %868 : vector<6x32xf32>
    %1008 = arith.addf %1006, %1007 : vector<6x32xf32>
    %cst_341 = arith.constant dense<0.000000e+00> : vector<6x161xf32>
    %1009 = tpu.matmul %1008, %629, %cst_341 {dimension_numbers = #tpu.dot_dimension_numbers<[1], [0], [0], [1], [0, 0, 1, 1], [], []>} : vector<6x32xf32>, vector<32x161xf32>, vector<6x161xf32> -> vector<6x161xf32>
    %1010 = vector.broadcast %630 : vector<1x161xf32> to vector<6x161xf32>
    %1011 = arith.addf %1009, %1010 : vector<6x161xf32>
    %1012 = vector.extract_strided_slice %1011 {offsets = [0, 0], sizes = [6, 128], strides = [1, 1]} : vector<6x161xf32> to vector<6x128xf32>
    %1013 = vector.shape_cast %1012 : vector<6x128xf32> to vector<2x3x128xf32>
    %1014 = vector.extract_strided_slice %1011 {offsets = [0, 128], sizes = [6, 32], strides = [1, 1]} : vector<6x161xf32> to vector<6x32xf32>
    %1015 = vector.shape_cast %1014 : vector<6x32xf32> to vector<2x3x32xf32>
    %1016 = vector.extract_strided_slice %1011 {offsets = [0, 160], sizes = [6, 1], strides = [1, 1]} : vector<6x161xf32> to vector<6x1xf32>
    %1017 = vector.shape_cast %573 : vector<2x8x32xf32> to vector<2x1x8x32xf32>
    %1018 = vector.shape_cast %1015 : vector<2x3x32xf32> to vector<2x3x1x32xf32>
    %1019 = vector.broadcast %1017 : vector<2x1x8x32xf32> to vector<2x3x8x32xf32>
    %1020 = vector.broadcast %1018 : vector<2x3x1x32xf32> to vector<2x3x8x32xf32>
    %1021 = arith.addf %1019, %1020 : vector<2x3x8x32xf32>
    %1022 = math.tanh %1021 : vector<2x3x8x32xf32>
    %1023 = vector.broadcast %616 : vector<1x1x1x32xf32> to vector<2x3x8x32xf32>
    %1024 = arith.mulf %1022, %1023 : vector<2x3x8x32xf32>
    %cst_342 = arith.constant dense<0.000000e+00> : vector<2x3x8xf32>
    %1025 = vector.multi_reduction <add>, %1024, %cst_342 [3] : vector<2x3x8x32xf32> to vector<2x3x8xf32>
    %1026 = vector.shape_cast %619 : vector<2x8xf32> to vector<2x1x8xf32>
    %cst_343 = arith.constant 0.000000e+00 : f32
    %1027 = vector.broadcast %cst_343 : f32 to vector<2x1x8xf32>
    %1028 = arith.cmpf ogt, %1026, %1027 : vector<2x1x8xf32>
    %cst_344 = arith.constant -1.000000e+30 : f32
    %1029 = vector.shape_cast %1028 : vector<2x1x8xi1> to vector<2x1x8xi1>
    %1030 = vector.broadcast %1029 : vector<2x1x8xi1> to vector<2x3x8xi1>
    %1031 = vector.broadcast %cst_344 : f32 to vector<2x3x8xf32>
    %1032 = arith.select %1030, %1025, %1031 : vector<2x3x8xi1>, vector<2x3x8xf32>
    %cst_345 = arith.constant dense<0xFF800000> : vector<2x3xf32>
    %1033 = vector.multi_reduction <maximumf>, %1032, %cst_345 [2] : vector<2x3x8xf32> to vector<2x3xf32>
    %1034 = vector.shape_cast %1033 : vector<2x3xf32> to vector<2x3x1xf32>
    %1035 = vector.broadcast %1034 : vector<2x3x1xf32> to vector<2x3x8xf32>
    %1036 = arith.subf %1032, %1035 : vector<2x3x8xf32>
    %1037 = math.exp %1036 : vector<2x3x8xf32>
    %cst_346 = arith.constant dense<0.000000e+00> : vector<2x3xf32>
    %1038 = vector.multi_reduction <add>, %1037, %cst_346 [2] : vector<2x3x8xf32> to vector<2x3xf32>
    %1039 = vector.shape_cast %1038 : vector<2x3xf32> to vector<2x3x1xf32>
    %1040 = tpu.reciprocal %1039 {approx = true} : vector<2x3x1xf32> -> vector<2x3x1xf32>
    %1041 = vector.broadcast %1040 : vector<2x3x1xf32> to vector<2x3x8xf32>
    %1042 = arith.mulf %1037, %1041 : vector<2x3x8xf32>
    "tpu.trace_start"() <{level = 10 : i32, message = "bds,bsh->bdh"}> : () -> ()
    %cst_347 = arith.constant dense<0.000000e+00> : vector<2x3x32xf32>
    %1043 = tpu.matmul %1042, %569, %cst_347 {dimension_numbers = #tpu.dot_dimension_numbers<[2], [1], [1], [2], [0, 0, 0, 1, 1, 2], [0], [0]>} : vector<2x3x8xf32>, vector<2x8x32xf32>, vector<2x3x32xf32> -> vector<2x3x32xf32>
    "tpu.trace_stop"() : () -> ()
    %1044 = vector.shape_cast %1043 : vector<2x3x32xf32> to vector<6x32xf32>
    %cst_348 = arith.constant dense<0.000000e+00> : vector<6x129xf32>
    %1045 = tpu.matmul %1044, %631, %cst_348 {dimension_numbers = #tpu.dot_dimension_numbers<[1], [0], [0], [1], [0, 0, 1, 1], [], []>} : vector<6x32xf32>, vector<32x129xf32>, vector<6x129xf32> -> vector<6x129xf32>
    %1046 = vector.extract_strided_slice %1045 {offsets = [0, 0], sizes = [6, 128], strides = [1, 1]} : vector<6x129xf32> to vector<6x128xf32>
    %1047 = vector.shape_cast %1046 : vector<6x128xf32> to vector<2x3x128xf32>
    %1048 = vector.extract_strided_slice %1045 {offsets = [0, 128], sizes = [6, 1], strides = [1, 1]} : vector<6x129xf32> to vector<6x1xf32>
    %1049 = arith.addf %1013, %1047 : vector<2x3x128xf32>
    %cst_349 = arith.constant dense<0xFF800000> : vector<2x3xf32>
    %1050 = vector.multi_reduction <maximumf>, %1049, %cst_349 [2] : vector<2x3x128xf32> to vector<2x3xf32>
    %1051 = vector.shape_cast %1050 : vector<2x3xf32> to vector<2x3x1xf32>
    %1052 = vector.broadcast %1051 : vector<2x3x1xf32> to vector<2x3x128xf32>
    %1053 = arith.subf %1049, %1052 : vector<2x3x128xf32>
    %1054 = math.exp %1053 : vector<2x3x128xf32>
    %cst_350 = arith.constant dense<0.000000e+00> : vector<2x3xf32>
    %1055 = vector.multi_reduction <add>, %1054, %cst_350 [2] : vector<2x3x128xf32> to vector<2x3xf32>
    %1056 = vector.shape_cast %1055 : vector<2x3xf32> to vector<2x3x1xf32>
    %1057 = tpu.reciprocal %1056 {approx = true} : vector<2x3x1xf32> -> vector<2x3x1xf32>
    %1058 = vector.broadcast %1057 : vector<2x3x1xf32> to vector<2x3x128xf32>
    %1059 = arith.mulf %1054, %1058 : vector<2x3x128xf32>
    %1060 = arith.addf %1016, %1048 : vector<6x1xf32>
    %1061 = arith.index_cast %c2_i32_325 : i32 to index
    %c0_351 = arith.constant 0 : index
    %c0_352 = arith.constant 0 : index
    %1062 = vector.load %arg38[%1061, %c0_351, %c0_352] : memref<3x6x1xf32, #tpu.memory_space<vmem>>, vector<1x6x1xf32>
    %1063 = vector.shape_cast %1062 : vector<1x6x1xf32> to vector<6x1xf32>
    %1064 = arith.addf %1060, %1063 : vector<6x1xf32>
    %1065 = arith.negf %1064 : vector<6x1xf32>
    %1066 = math.exp %1065 : vector<6x1xf32>
    %cst_353 = arith.constant 1.000000e+00 : f32
    %1067 = vector.broadcast %cst_353 : f32 to vector<6x1xf32>
    %1068 = arith.addf %1067, %1066 : vector<6x1xf32>
    %1069 = arith.divf %1067, %1068 : vector<6x1xf32>
    %1070 = vector.shape_cast %1069 : vector<6x1xf32> to vector<2x3x1xf32>
    %1071 = arith.mulf %790, %1070 : vector<2x3x1xf32>
    %1072 = vector.broadcast %1071 : vector<2x3x1xf32> to vector<2x3x128xf32>
    %1073 = arith.mulf %1072, %1059 : vector<2x3x128xf32>
    %cst_354 = arith.constant 1.000000e+00 : f32
    %1074 = vector.broadcast %cst_354 : f32 to vector<2x3x1xf32>
    %1075 = arith.subf %1074, %1070 : vector<2x3x1xf32>
    %1076 = arith.mulf %790, %1075 : vector<2x3x1xf32>
    %1077 = vector.broadcast %1076 : vector<2x3x1xf32> to vector<2x3x8xf32>
    %1078 = arith.mulf %1077, %1042 : vector<2x3x8xf32>
    "tpu.trace_start"() <{level = 10 : i32, message = "bds,bsv->bdv"}> : () -> ()
    %cst_355 = arith.constant dense<0.000000e+00> : vector<2x3x128xf32>
    %1079 = tpu.matmul %1078, %626, %cst_355 {dimension_numbers = #tpu.dot_dimension_numbers<[2], [1], [1], [2], [0, 0, 0, 1, 1, 2], [0], [0]>} : vector<2x3x8xf32>, vector<2x8x128xf32>, vector<2x3x128xf32> -> vector<2x3x128xf32>
    "tpu.trace_stop"() : () -> ()
    %1080 = arith.addf %1073, %1079 : vector<2x3x128xf32>
    %1081 = arith.index_cast %c2_i32_325 : i32 to index
    %c0_356 = arith.constant 0 : index
    %c0_357 = arith.constant 0 : index
    %1082 = vector.load %arg6[%1081, %c0_356, %c0_357] : memref<3x2x3xi32, #tpu.memory_space<vmem>>, vector<1x2x3xi32>
    %1083 = vector.shape_cast %1082 : vector<1x2x3xi32> to vector<2x3xi32>
    %1084 = vector.shape_cast %1083 : vector<2x3xi32> to vector<2x3x1xi32>
    %1085 = tpu.iota {dimensions = array<i32: 2>} : vector<2x3x128xi32>
    %1086 = vector.broadcast %1084 : vector<2x3x1xi32> to vector<2x3x128xi32>
    %1087 = arith.cmpi eq, %1086, %1085 : vector<2x3x128xi32>
    %1088 = arith.extui %1087 : vector<2x3x128xi1> to vector<2x3x128xi32>
    %1089 = arith.sitofp %1088 : vector<2x3x128xi32> to vector<2x3x128xf32>
    "tpu.trace_start"() <{level = 10 : i32, message = "bdk,bkv->bdv"}> : () -> ()
    %cst_358 = arith.constant dense<0.000000e+00> : vector<2x3x128xf32>
    %1090 = tpu.matmul %792, %1089, %cst_358 {dimension_numbers = #tpu.dot_dimension_numbers<[2], [1], [1], [2], [0, 0, 0, 1, 1, 2], [0], [0]>} : vector<2x3x3xf32>, vector<2x3x128xf32>, vector<2x3x128xf32> -> vector<2x3x128xf32>
    "tpu.trace_stop"() : () -> ()
    %1091 = arith.addf %1080, %1090 : vector<2x3x128xf32>
    %1092 = arith.index_cast %c2_i32_325 : i32 to index
    %c0_359 = arith.constant 0 : index
    %c0_360 = arith.constant 0 : index
    %c0_361 = arith.constant 0 : index
    %1093 = vector.load %arg29[%1092, %c0_359, %c0_360, %c0_361] : memref<3x2x3x128xf32, #tpu.memory_space<vmem>>, vector<1x2x3x128xf32>
    %1094 = vector.shape_cast %1093 : vector<1x2x3x128xf32> to vector<2x3x128xf32>
    %1095 = vector.shape_cast %1091 : vector<2x3x128xf32> to vector<1x2x3x128xf32>
    tpu.vector_store %arg29[%1092, %c0_359, %c0_360, %c0_361], %1095 {strides = array<i32>} : memref<3x2x3x128xf32, #tpu.memory_space<vmem>>, vector<1x2x3x128xf32>,
    %c2_i32_362 = arith.constant 2 : i32
    return
  }
  func.func @transform_0(%arg0: i32) -> (i32, i32, i32) {
    %c0_i32 = arith.constant 0 : i32
    %c0_i32_0 = arith.constant 0 : i32
    %c0_i32_1 = arith.constant 0 : i32
    %c0_i32_2 = arith.constant 0 : i32
    return %c0_i32, %c0_i32_0, %c0_i32_1 : i32, i32, i32
  }
  func.func @transform_1(%arg0: i32) -> (i32, i32, i32) {
    %c0_i32 = arith.constant 0 : i32
    %c0_i32_0 = arith.constant 0 : i32
    %c0_i32_1 = arith.constant 0 : i32
    %c0_i32_2 = arith.constant 0 : i32
    return %c0_i32, %c0_i32_0, %c0_i32_1 : i32, i32, i32
  }
  func.func @transform_2(%arg0: i32) -> (i32, i32) {
    %c0_i32 = arith.constant 0 : i32
    %c0_i32_0 = arith.constant 0 : i32
    %c0_i32_1 = arith.constant 0 : i32
    return %c0_i32, %c0_i32_0 : i32, i32
  }
  func.func @transform_3(%arg0: i32) -> (i32, i32) {
    %c0_i32 = arith.constant 0 : i32
    %c0_i32_0 = arith.constant 0 : i32
    %c0_i32_1 = arith.constant 0 : i32
    return %c0_i32, %c0_i32_0 : i32, i32
  }
  func.func @transform_4(%arg0: i32) -> (i32, i32, i32, i32) {
    %c0_i32 = arith.constant 0 : i32
    %c0_i32_0 = arith.constant 0 : i32
    %c0_i32_1 = arith.constant 0 : i32
    %c0_i32_2 = arith.constant 0 : i32
    %c0_i32_3 = arith.constant 0 : i32
    return %c0_i32, %c0_i32_0, %c0_i32_1, %c0_i32_2 : i32, i32, i32, i32
  }
  func.func @transform_5(%arg0: i32) -> (i32, i32, i32) {
    %c0_i32 = arith.constant 0 : i32
    %c0_i32_0 = arith.constant 0 : i32
    %c0_i32_1 = arith.constant 0 : i32
    %c0_i32_2 = arith.constant 0 : i32
    return %c0_i32, %c0_i32_0, %c0_i32_1 : i32, i32, i32
  }
  func.func @transform_6(%arg0: i32) -> (i32, i32, i32) {
    %c0_i32 = arith.constant 0 : i32
    %c0_i32_0 = arith.constant 0 : i32
    %c0_i32_1 = arith.constant 0 : i32
    %c0_i32_2 = arith.constant 0 : i32
    return %c0_i32, %c0_i32_0, %c0_i32_1 : i32, i32, i32
  }
  func.func @transform_7(%arg0: i32) -> (i32, i32) {
    %c0_i32 = arith.constant 0 : i32
    %c0_i32_0 = arith.constant 0 : i32
    %c0_i32_1 = arith.constant 0 : i32
    return %c0_i32, %c0_i32_0 : i32, i32
  }
  func.func @transform_8(%arg0: i32) -> (i32, i32, i32) {
    %c0_i32 = arith.constant 0 : i32
    %c0_i32_0 = arith.constant 0 : i32
    %c0_i32_1 = arith.constant 0 : i32
    %c0_i32_2 = arith.constant 0 : i32
    return %c0_i32, %c0_i32_0, %c0_i32_1 : i32, i32, i32
  }
  func.func @transform_9(%arg0: i32) -> (i32, i32, i32) {
    %c0_i32 = arith.constant 0 : i32
    %c0_i32_0 = arith.constant 0 : i32
    %c0_i32_1 = arith.constant 0 : i32
    %c0_i32_2 = arith.constant 0 : i32
    return %c0_i32, %c0_i32_0, %c0_i32_1 : i32, i32, i32
  }
  func.func @transform_10(%arg0: i32) -> (i32, i32, i32) {
    %c0_i32 = arith.constant 0 : i32
    %c0_i32_0 = arith.constant 0 : i32
    %c0_i32_1 = arith.constant 0 : i32
    %c0_i32_2 = arith.constant 0 : i32
    return %c0_i32, %c0_i32_0, %c0_i32_1 : i32, i32, i32
  }
  func.func @transform_11(%arg0: i32) -> (i32, i32, i32) {
    %c0_i32 = arith.constant 0 : i32
    %c0_i32_0 = arith.constant 0 : i32
    %c0_i32_1 = arith.constant 0 : i32
    %c0_i32_2 = arith.constant 0 : i32
    return %c0_i32, %c0_i32_0, %c0_i32_1 : i32, i32, i32
  }
  func.func @transform_12(%arg0: i32) -> (i32, i32, i32) {
    %c0_i32 = arith.constant 0 : i32
    %c0_i32_0 = arith.constant 0 : i32
    %c0_i32_1 = arith.constant 0 : i32
    %c0_i32_2 = arith.constant 0 : i32
    return %c0_i32, %c0_i32_0, %c0_i32_1 : i32, i32, i32
  }
  func.func @transform_13(%arg0: i32) -> (i32, i32, i32) {
    %c0_i32 = arith.constant 0 : i32
    %c0_i32_0 = arith.constant 0 : i32
    %c0_i32_1 = arith.constant 0 : i32
    %c0_i32_2 = arith.constant 0 : i32
    return %c0_i32, %c0_i32_0, %c0_i32_1 : i32, i32, i32
  }
  func.func @transform_14(%arg0: i32) -> (i32, i32, i32) {
    %c0_i32 = arith.constant 0 : i32
    %c0_i32_0 = arith.constant 0 : i32
    %c0_i32_1 = arith.constant 0 : i32
    %c0_i32_2 = arith.constant 0 : i32
    return %c0_i32, %c0_i32_0, %c0_i32_1 : i32, i32, i32
  }
  func.func @transform_15(%arg0: i32) -> (i32, i32, i32) {
    %c0_i32 = arith.constant 0 : i32
    %c0_i32_0 = arith.constant 0 : i32
    %c0_i32_1 = arith.constant 0 : i32
    %c0_i32_2 = arith.constant 0 : i32
    return %c0_i32, %c0_i32_0, %c0_i32_1 : i32, i32, i32
  }
  func.func @transform_16(%arg0: i32) -> (i32, i32) {
    %c0_i32 = arith.constant 0 : i32
    %c0_i32_0 = arith.constant 0 : i32
    %c0_i32_1 = arith.constant 0 : i32
    return %c0_i32, %c0_i32_0 : i32, i32
  }
  func.func @transform_17(%arg0: i32) -> (i32, i32) {
    %c0_i32 = arith.constant 0 : i32
    %c0_i32_0 = arith.constant 0 : i32
    %c0_i32_1 = arith.constant 0 : i32
    return %c0_i32, %c0_i32_0 : i32, i32
  }
  func.func @transform_18(%arg0: i32) -> (i32, i32) {
    %c0_i32 = arith.constant 0 : i32
    %c0_i32_0 = arith.constant 0 : i32
    %c0_i32_1 = arith.constant 0 : i32
    return %c0_i32, %c0_i32_0 : i32, i32
  }
  func.func @transform_19(%arg0: i32) -> (i32, i32) {
    %c0_i32 = arith.constant 0 : i32
    %c0_i32_0 = arith.constant 0 : i32
    %c0_i32_1 = arith.constant 0 : i32
    return %c0_i32, %c0_i32_0 : i32, i32
  }
  func.func @transform_20(%arg0: i32) -> (i32, i32) {
    %c0_i32 = arith.constant 0 : i32
    %c0_i32_0 = arith.constant 0 : i32
    %c0_i32_1 = arith.constant 0 : i32
    return %c0_i32, %c0_i32_0 : i32, i32
  }
  func.func @transform_21(%arg0: i32) -> (i32, i32) {
    %c0_i32 = arith.constant 0 : i32
    %c0_i32_0 = arith.constant 0 : i32
    %c0_i32_1 = arith.constant 0 : i32
    return %c0_i32, %c0_i32_0 : i32, i32
  }
  func.func @transform_22(%arg0: i32) -> (i32, i32) {
    %c0_i32 = arith.constant 0 : i32
    %c0_i32_0 = arith.constant 0 : i32
    %c0_i32_1 = arith.constant 0 : i32
    return %c0_i32, %c0_i32_0 : i32, i32
  }
  func.func @transform_23(%arg0: i32) -> (i32, i32) {
    %c0_i32 = arith.constant 0 : i32
    %c0_i32_0 = arith.constant 0 : i32
    %c0_i32_1 = arith.constant 0 : i32
    return %c0_i32, %c0_i32_0 : i32, i32
  }
  func.func @transform_24(%arg0: i32) -> (i32, i32) {
    %c0_i32 = arith.constant 0 : i32
    %c0_i32_0 = arith.constant 0 : i32
    %c0_i32_1 = arith.constant 0 : i32
    return %c0_i32, %c0_i32_0 : i32, i32
  }
  func.func @transform_25(%arg0: i32) -> (i32, i32) {
    %c0_i32 = arith.constant 0 : i32
    %c0_i32_0 = arith.constant 0 : i32
    %c0_i32_1 = arith.constant 0 : i32
    return %c0_i32, %c0_i32_0 : i32, i32
  }
  func.func @transform_26(%arg0: i32) -> (i32, i32) {
    %c0_i32 = arith.constant 0 : i32
    %c0_i32_0 = arith.constant 0 : i32
    %c0_i32_1 = arith.constant 0 : i32
    return %c0_i32, %c0_i32_0 : i32, i32
  }
  func.func @transform_27(%arg0: i32) -> (i32, i32) {
    %c0_i32 = arith.constant 0 : i32
    %c0_i32_0 = arith.constant 0 : i32
    %c0_i32_1 = arith.constant 0 : i32
    return %c0_i32, %c0_i32_0 : i32, i32
  }
  func.func @transform_28(%arg0: i32) -> (i32, i32, i32, i32) {
    %c0_i32 = arith.constant 0 : i32
    %c0_i32_0 = arith.constant 0 : i32
    %c0_i32_1 = arith.constant 0 : i32
    %c0_i32_2 = arith.constant 0 : i32
    %c0_i32_3 = arith.constant 0 : i32
    return %c0_i32, %c0_i32_0, %c0_i32_1, %c0_i32_2 : i32, i32, i32, i32
  }
  func.func @transform_29(%arg0: i32) -> (i32, i32, i32) {
    %c0_i32 = arith.constant 0 : i32
    %c0_i32_0 = arith.constant 0 : i32
    %c0_i32_1 = arith.constant 0 : i32
    %c0_i32_2 = arith.constant 0 : i32
    return %c0_i32, %c0_i32_0, %c0_i32_1 : i32, i32, i32
  }
}

</mosaic_0001>

<bundles_post_ra>
// kernel: _forward_device.1
= control target key start
LH: loop header
LB: loop body
LE: loop exit
PB: predicated region body
PF: predicated region fallthrough
CT: control target
= control target key end

     0   :  { %v163_v0 = vlaneseq  ;;  %s14867_s3 = smov 8   ;;  %v14868_v1 = vmov 1983009808   ;;  %v14869_v3 = vmov 0   ;;  %s14870_s10 = smov 9   ;;  %vm192_vm0 = vcmask 261120   ;;  %s17636_s0 = inlined_call_operand.smem [shape: u32[30], index: -1, kind: input, shape index: {}] }
   0x1   :  { %s14913_s6 = sld [smem:[%s17636_s0 + %s14867_s3]]   ;;  %v161_v2 = vunpack.c.l.s4 %v14868_v1  ;;  %14374 = vset.pattern.permute.xlu0 %v14869_v3  ;;  %14375 = vset.pattern.permute.xlu1 %v14869_v3  ;;  %v17637_v34 = vmov 0.0   ;;  %s14872_s14 = smov 1   ;;  %vm14873_vm1 = vmmov 0   ;;  %vm316_vm2 = vcmask 254976  }
   0x2   :  { %s14918_s9 = sld [smem:[%s17636_s0]]   ;;  %v14923_v5 = vshrl.u32 %v163_v0, 7  ;;  %s14874_s18 = smov 10   ;;  %vm2712_vm3 = vcmask 1041409   ;;  %vm2715_vm4 = vcmask 1042434   ;;  %vm2718_vm5 = vcmask 1043459  }
   0x3   :  { %v162_v4 = vunpack.c.0.s8 %v161_v2  ;;  %s14936_s13 = sld [smem:[%s17636_s0 + %s14870_s10]]   ;;  %s14875_s22 = smov 11   ;;  %vm2721_vm6 = vcmask 1044484   ;;  %vm2724_vm7 = vcmask 1045509   ;;  %vm2727_vm8 = vcmask 1046534  }
   0x4   :  { %s14989_s17 = sld [smem:[%s17636_s0 + %s14872_s14]]   ;;  %s14877_s26 = smov 4   ;;  %vm2729_vm9 = vcmask 1047559   ;;  %vm3461_vm10 = vcmask 256000   ;;  %vm4365_vm11 = vcmask 5120   ;;  %vm5702_vm15 = vcmask 59392  }
   0x5   :  { %v14931_v11 = vsub.s32 %v162_v4, %v14923_v5  ;;  %s13228_s21 = sld [smem:[%s17636_s0 + %s14874_s18]]   ;;  %s14878_s30 = smov 12  }
   0x6   :  { %s15073_s25 = sld [smem:[%s17636_s0 + %s14875_s22]]   ;;  %s14879_s4 = smov 17  }
   0x7   :  { %v132_v6 = vld [vmem:[%s14913_s6 + $0x18] sm:$0xff]  ;;  %v131_v7 = vld [vmem:[%s14913_s6 + $0x10] sm:$0xff]  ;;  %v130_v9 = vld [vmem:[%s14913_s6 + $0x8] sm:$0xff]  ;;  %s13222_s29 = sld [smem:[%s17636_s0 + %s14877_s26]]   ;;  %s14880_s8 = smov 19  }
   0x8   :  { %v136_v8 = vld [vmem:[%s14913_s6 + $0x38] sm:$0xff]  ;;  %13738 = vmatprep.subr.mxu0 %v132_v6  ;;  %v135_v10 = vld [vmem:[%s14913_s6 + $0x30] sm:$0xff]  ;;  %v129_v12 = vld [vmem:[%s14913_s6] sm:$0xff]  ;;  %s15434_s3 = sld [smem:[%s17636_s0 + %s14878_s30]]   ;;  %s14881_s12 = smov 7  }
   0x9   :  { %13749 = vmatprep.subr.mxu1 %v136_v8  ;;  %13739 = vmatpush3.msra.mxu0 %v132_v6  ;;  %v134_v13 = vld [vmem:[%s14913_s6 + $0x28] sm:$0xff]  ;;  %v121_v14 = vld [vmem:[%s14918_s9] sm:$0x3]  ;;  %v122_v15 = vld [vmem:[%s14918_s9 + $0x2] sm:$0x3]  ;;  %s13235_s7 = sld [smem:[%s17636_s0 + %s14879_s4]]   ;;  %s14882_s16 = smov 13  }
   0xa   :  { %13750 = vmatpush3.msra.mxu1 %v136_v8  ;;  %13740 = vmatprep.subr.mxu0 %v131_v7  ;;  %v123_v16 = vld [vmem:[%s14918_s9 + $0x4] sm:$0x3]  ;;  %v124_v17 = vld [vmem:[%s14918_s9 + $0x6] sm:$0x3]  ;;  %v158_v18 = vcombine.low %v121_v14, %v122_v15  ;;  %v125_v19 = vld [vmem:[%s14918_s9 + $0x8] sm:$0x3]  ;;  %s15495_s11 = sld [smem:[%s17636_s0 + %s14880_s8]]  }
   0xb   :  { %13751 = vmatprep.subr.mxu1 %v135_v10  ;;  %13741 = vmatpush3.msra.mxu0 %v131_v7  ;;  %v159_v20 = vcombine.low %v123_v16, %v124_v17  ;;  %v126_v21 = vld [vmem:[%s14918_s9 + $0xa] sm:$0x3]  ;;  %v127_v22 = vld [vmem:[%s14918_s9 + $0xc] sm:$0x3]  ;;  %v128_v23 = vld [vmem:[%s14918_s9 + $0xe] sm:$0x3]  ;;  %s13225_s15 = sld [smem:[%s17636_s0 + %s14881_s12]]  }
   0xc   :  { %13752 = vmatpush3.msra.mxu1 %v135_v10  ;;  %13742 = vmatprep.subr.mxu0 %v130_v9  ;;  %v166_v24 = vrot.slane %v158_v18, %v14931_v11  ;;  %v175_v25 = vcombine.low %v125_v19, %v126_v21  ;;  %v176_v26 = vcombine.low %v127_v22, %v128_v23  ;;  %v133_v27 = vld [vmem:[%s14913_s6 + $0x20] sm:$0xff]  ;;  %v140_v29 = vld [vmem:[%s14913_s6 + $0x58] sm:$0xff]  ;;  %v139_v36 = vld [vmem:[%s14913_s6 + $0x50] sm:$0xff]  ;;  %s15519_s19 = sld [smem:[%s17636_s0 + %s14882_s16]]   ;;  %s14883_s20 = smov 16  }
   0xd   :  { %13753 = vmatprep.subr.mxu1 %v134_v13  ;;  %13743 = vmatpush3.msra.mxu0 %v130_v9  ;;  %v173_v28 = vrot.slane %v159_v20, %v14931_v11  ;;  %v14956_v35 = vld [vmem:[%s14936_s13 + $0x18] sm:$0xff]  ;;  %v14964_v37 = vld [vmem:[%s14936_s13 + $0x10] sm:$0xff]  ;;  %v138_v38 = vld [vmem:[%s14913_s6 + $0x48] sm:$0xff]  ;;  %s15578_s23 = sld [smem:[%s17636_s0 + %s14883_s20]]   ;;  %s14884_s24 = smov 14  }
   0xe   :  { %13754 = vmatpush3.msra.mxu1 %v134_v13  ;;  %13744 = vmatprep.subr.mxu0 %v129_v12  ;;  %v183_v30 = vrot.slane %v175_v25, %v14931_v11  ;;  %v190_v31 = vrot.slane %v176_v26, %v14931_v11  ;;  %v14970_v39 = vld [vmem:[%s14936_s13 + $0x8] sm:$0xff]  ;;  %v137_v40 = vld [vmem:[%s14913_s6 + $0x40] sm:$0xff]  ;;  %v14982_v42 = vld [vmem:[%s14936_s13 + $0x38] sm:$0xff]  ;;  %s15678_s27 = sld [smem:[%s17636_s0 + %s14884_s24]]   ;;  %s14885_s28 = smov 23  }
   0xf   :  { %13755 = vmatprep.subr.mxu1 %v133_v27  ;;  %13745 = vmatpush3.msra.mxu0 %v129_v12  ;;  %v174_v32 = vcombine.low %v166_v24, %v173_v28  ;;  %v14978_v41 = vld [vmem:[%s14936_s13] sm:$0xff]  ;;  %v14995_v43 = vld [vmem:[%s14936_s13 + $0x30] sm:$0xff]  ;;  %v15000_v44 = vld [vmem:[%s14936_s13 + $0x58] sm:$0xff]  ;;  %s15771_s1 = sld [smem:[%s17636_s0 + %s14885_s28]]   ;;  %s14886_s2 = smov 15  }
  0x10   :  { %13756 = vmatpush3.msra.mxu1 %v133_v27  ;;  %v191_v33 = vcombine.low %v183_v30, %v190_v31  ;;  %13760 = vmatprep.subr.mxu0 %v140_v29  ;;  %v15004_v45 = vld [vmem:[%s14936_s13 + $0x28] sm:$0xff]  ;;  %v15011_v46 = vld [vmem:[%s14936_s13 + $0x50] sm:$0xff]  ;;  %v15015_v47 = vld [vmem:[%s14936_s13 + $0x20] sm:$0xff]  ;;  %s15829_s5 = sld [smem:[%s17636_s0 + %s14886_s2]]   ;;  %s14887_s6 = smov 24  }
  0x11   :  { %13771 = vmatprep.subr.mxu1 %v17637_v34  ;;  %13746 = vmatprep.mubr.msk.f32.mxu0 %vm192_vm0, %v174_v32  ;;  %v15021_v48 = vld [vmem:[%s14936_s13 + $0x48] sm:$0xff]  ;;  %v15028_v49 = vld [vmem:[%s14936_s13 + $0x40] sm:$0xff]  ;;  %s13242_s9 = sld [smem:[%s17636_s0 + %s14887_s6]]   ;;  %s14888_s10 = smov 18  }
  0x12   :  { %13757 = vmatprep.mubr.msk.f32.mxu1 %vm192_vm0, %v174_v32  ;;  %13747 = vmatmul.mubr.msk.f32.vlgmr.msra.gmra.mxu0 %vm192_vm0, %v191_v33  ;;  %v861_v50 = vld [vmem:[%s14989_s17] sm:$0x3]  ;;  %v13267_v51 = vld [vmem:[%s14989_s17 + $0x2] sm:$0x3]  ;;  %v13273_v54 = vld [vmem:[%s14989_s17 + $0x4] sm:$0x3] }
  0x13   :  { %13758 = vmatmul.mubr.msk.f32.vlgmr.msra.gmra.mxu1 %vm192_vm0, %v191_v33  ;;  %13761 = vmatpush3.msra.mxu0 %v140_v29  ;;  %v869_v52 = vsub.f32 1.0, %v861_v50  ;;  %v1127_v53 = vsub.f32 1.0, %v13267_v51  ;;  %v1385_v55 = vsub.f32 1.0, %v13273_v54  ;;  %v13279_v56 = vld [vmem:[%s14989_s17 + $0x6] sm:$0x3]  ;;  %s14889_s14 = smov 2  }
  0x14   :  { %13772 = vmatpush3.msra.mxu1 %v14956_v35  ;;  %13762 = vmatprep.subr.mxu0 %v139_v36  ;;  %v1643_v57 = vsub.f32 1.0, %v13279_v56  ;;  %v13285_v58 = vld [vmem:[%s14989_s17 + $0x8] sm:$0x3]  ;;  %v13291_v60 = vld [vmem:[%s14989_s17 + $0xa] sm:$0x3]  ;;  %s14890_s18 = smov 20  }
  0x15   :  { %13773 = vmatprep.subr.mxu1 %v17637_v34  ;;  %13763 = vmatpush3.msra.mxu0 %v139_v36  ;;  %v1901_v59 = vsub.f32 1.0, %v13285_v58  ;;  %v2159_v61 = vsub.f32 1.0, %v13291_v60  ;;  %v13297_v62 = vld [vmem:[%s14989_s17 + $0xc] sm:$0x3]  ;;  %v13303_v1 = vld [vmem:[%s14989_s17 + $0xe] sm:$0x3]  ;;  %s13220_s17 = sld [smem:[%s17636_s0 + %s14889_s14]]  }
  0x16   :  { %13774 = vmatpush3.msra.mxu1 %v14964_v37  ;;  %13764 = vmatprep.subr.mxu0 %v138_v38  ;;  %v2417_v63 = vsub.f32 1.0, %v13297_v62  ;;  %v2675_v2 = vsub.f32 1.0, %v13303_v1  ;;  %v13248_v4 = vld [vmem:[%s13228_s21] ss:$0 sm:$0xff]  ;;  %v13251_v6 = vld [vmem:[%s13228_s21 + $0x1] ss:$0 sm:$0xff]  ;;  %s13238_s22 = sld [smem:[%s17636_s0 + %s14890_s18]]  }
  0x17   :  { %13775 = vmatprep.subr.mxu1 %v17637_v34  ;;  %13765 = vmatpush3.msra.mxu0 %v138_v38  ;;  %v13254_v28 = vld [vmem:[%s13228_s21 + $0x2] ss:$0 sm:$0xff]  ;;  %v15092_v38 = vld [vmem:[%s15073_s25] ss:$0 sm:$0xff]  ;;  %s14893_s2 = smov 26   ;;  %s14896_s16 = smov 32  }
  0x18   :  { %13776 = vmatpush3.msra.mxu1 %v14970_v39  ;;  %13766 = vmatprep.subr.mxu0 %v137_v40  ;;  %s16065_s6 = sld [smem:[%s17636_s0 + %s14893_s2]]   ;;  %s14900_s28 = smov 3  }
  0x19   :  { %13768 = vmatprep.mubr.msk.f32.mxu0 %vm192_vm0, %v174_v32  ;;  %13767 = vmatpush3.msra.mxu0 %v137_v40  ;;  %s13221_s2 = sld [smem:[%s17636_s0 + %s14900_s28]]  }
  0x1a   :  { %13777 = vmatprep.subr.mxu1 %v17637_v34  ;;  %13782 = vmatprep.subr.mxu0 %v17637_v34 }
  0x1b   :  { %13769 = vmatmul.mubr.msk.f32.vlgmr.msra.gmra.mxu0 %vm192_vm0, %v191_v33  ;;  %13778 = vmatpush3.msra.mxu1 %v14978_v41 }
  0x1c   :  { %13779 = vmatprep.mubr.msk.f32.mxu1 %vm14873_vm1, %v17637_v34  ;;  %13783 = vmatpush3.msra.mxu0 %v14982_v42 }
  0x1d   :  { %13780 = vmatmul.mubr.f32.vlgmr.msra.gmra.mxu1 %v17637_v34  ;;  %13784 = vmatprep.subr.mxu0 %v17637_v34 }
  0x1e   :  { %13790 = vmatprep.mubr.msk.f32.mxu0 %vm14873_vm1, %v17637_v34  ;;  %13785 = vmatpush3.msra.mxu0 %v14995_v43 }
  0x1f   :  { %13793 = vmatprep.subr.mxu1 %v17637_v34  ;;  %13786 = vmatprep.subr.mxu0 %v17637_v34 }
  0x20   :  { %13794 = vmatpush3.msra.mxu1 %v15000_v44  ;;  %13787 = vmatpush3.msra.mxu0 %v15004_v45 }
  0x21   :  { %13795 = vmatprep.subr.mxu1 %v17637_v34  ;;  %13788 = vmatprep.subr.mxu0 %v17637_v34 }
  0x22   :  { %13796 = vmatpush3.msra.mxu1 %v15011_v46  ;;  %13789 = vmatpush3.msra.mxu0 %v15015_v47 }
  0x23   :  { %13797 = vmatprep.subr.mxu1 %v17637_v34  ;;  %13791 = vmatmul.mubr.f32.vlgmr.msra.gmra.mxu0 %v17637_v34 }
  0x24   :  { %13798 = vmatpush3.msra.mxu1 %v15021_v48  ;;  %13801 = vmatprep.mubr.msk.f32.mxu1 %vm14873_vm1, %v17637_v34 }
  0x25   :  { %13799 = vmatprep.subr.mxu1 %v17637_v34  ;;  %864 = vperm.xlu0 %14374, %v861_v50  }
  0x26   :  { %13800 = vmatpush3.msra.mxu1 %v15028_v49  ;;  %1121 = vperm.xlu1 %14375, %v13267_v51  }
  0x27   :  { %13802 = vmatmul.mubr.f32.vlgmr.msra.gmra.mxu1 %v17637_v34  ;;  %13804 = vmatprep.subr.mxu0 %v17637_v34 }
  0x28   :  { %13815 = vmatprep.subr.mxu1 %v17637_v34  ;;  %13805 = vmatpush3.msra.mxu0 %v14956_v35 }
  0x29   :  { %13816 = vmatpush3.msra.mxu1 %v14982_v42  ;;  %872 = vperm.xlu0 %14374, %v869_v52  }
  0x2a   :  { %13806 = vmatprep.subr.mxu0 %v17637_v34  ;;  %1130 = vperm.xlu1 %14375, %v1127_v53  }
  0x2b   :  { %13807 = vmatpush3.msra.mxu0 %v14964_v37  ;;  %13817 = vmatprep.subr.mxu1 %v17637_v34 }
  0x2c   :  { %13808 = vmatprep.subr.mxu0 %v17637_v34  ;;  %13818 = vmatpush3.msra.mxu1 %v14995_v43 }
  0x2d   :  { %13809 = vmatpush3.msra.mxu0 %v14970_v39  ;;  %1379 = vperm.xlu0 %14374, %v13273_v54  }
  0x2e   :  { %13819 = vmatprep.subr.mxu1 %v17637_v34  ;;  %13810 = vmatprep.subr.mxu0 %v17637_v34 }
  0x2f   :  { %13820 = vmatpush3.msra.mxu1 %v15004_v45  ;;  %13811 = vmatpush3.msra.mxu0 %v14978_v41 }
  0x30   :  { %13821 = vmatprep.subr.mxu1 %v17637_v34  ;;  %13812 = vmatprep.mubr.msk.f32.mxu0 %vm14873_vm1, %v17637_v34 }
  0x31   :  { %13822 = vmatpush3.msra.mxu1 %v15015_v47  ;;  %1637 = vperm.xlu0 %14374, %v13279_v56  }
  0x32   :  { %13823 = vmatprep.mubr.msk.f32.mxu1 %vm14873_vm1, %v17637_v34  ;;  %13826 = vmatprep.subr.mxu0 %v17637_v34 }
  0x33   :  { %1388 = vperm.xlu1 %14375, %v1385_v55   ;;  %13837 = vmatprep.subr.mxu1 %v17637_v34 }
  0x35   :  { %1895 = vperm.xlu0 %14374, %v13285_v58  }
  0x37   :  { %1646 = vperm.xlu1 %14375, %v1643_v57  }
  0x39   :  { %2153 = vperm.xlu0 %14374, %v13291_v60  }
  0x3b   :  { %1904 = vperm.xlu1 %14375, %v1901_v59  }
  0x3d   :  { %2411 = vperm.xlu0 %14374, %v13297_v62  }
  0x3f   :  { %2162 = vperm.xlu1 %14375, %v2159_v61  }
  0x41   :  { %2669 = vperm.xlu0 %14374, %v13303_v1  }
  0x43   :  { %2420 = vperm.xlu1 %14375, %v2417_v63  }
  0x47   :  { %2678 = vperm.xlu1 %14375, %v2675_v2  }
  0xd2   :  { %v13748_v7 = vpop.f32.mrf.mxu0 }
  0xd3   :  { %v13759_v8 = vpop.f32.mrf.mxu1  ;;  %v269_v9 = vadd.f32 %v13748_v7, %v13248_v4 }
  0xd4   :  { %v403_v10 = vadd.f32 %v13759_v8, %v13251_v6  ;;  %v263_v12 = vpop.f32.mrf.mxu0  ;;  %v15112_v8 = vld [vmem:[%s15073_s25 + $0x1] ss:$0 sm:$0xff] }
  0xd5   :  { %v397_v13 = vpop.f32.mrf.mxu1  ;;  %v291_v14 = vcombine.high %v269_v9, %v269_v9  ;;  %v298_v15 = vrot.slane %v269_v9, %v14931_v11  ;;  %v264_v16 = vadd.f32 %v13248_v4, %v263_v12 }
  0xd6   :  { %v425_v17 = vcombine.high %v403_v10, %v403_v10  ;;  %v432_v18 = vrot.slane %v403_v10, %v14931_v11  ;;  %v398_v19 = vadd.f32 %v13251_v6, %v397_v13 }
  0xd7   :  { %v305_v20 = vrot.slane %v291_v14, %v14931_v11  ;;  %v306_v21 = vcombine.high %v298_v15, %v298_v15  ;;  %321 = vst.msk [vmem:[#allocation3 + $0x8] sm:$0x3] %vm316_vm2, %v298_v15  ;;  %v274_v22 = vcombine.high %v264_v16, %v264_v16  ;;  %v281_v23 = vrot.slane %v264_v16, %v14931_v11 }
  0xd8   :  { %v439_v24 = vrot.slane %v425_v17, %v14931_v11  ;;  %v440_v25 = vcombine.high %v432_v18, %v432_v18  ;;  %454 = vst.msk [vmem:[#allocation4 + $0x8] sm:$0x3] %vm316_vm2, %v432_v18  ;;  %v408_v26 = vcombine.high %v398_v19, %v398_v19  ;;  %v415_v27 = vrot.slane %v398_v19, %v14931_v11 }
  0xd9   :  { %v307_v29 = vcombine.high %v305_v20, %v305_v20  ;;  %322 = vst.msk [vmem:[#allocation3 + $0xa] sm:$0x3] %vm316_vm2, %v306_v21  ;;  %323 = vst.msk [vmem:[#allocation3 + $0xc] sm:$0x3] %vm316_vm2, %v305_v20  ;;  %v288_v30 = vrot.slane %v274_v22, %v14931_v11  ;;  %v289_v31 = vcombine.high %v281_v23, %v281_v23 }
  0xda   :  { %317 = vst.msk [vmem:[#allocation3] sm:$0x3] %vm316_vm2, %v281_v23  ;;  %v441_v32 = vcombine.high %v439_v24, %v439_v24  ;;  %455 = vst.msk [vmem:[#allocation4 + $0xa] sm:$0x3] %vm316_vm2, %v440_v25  ;;  %v422_v33 = vrot.slane %v408_v26, %v14931_v11  ;;  %v423_v36 = vcombine.high %v415_v27, %v415_v27  ;;  %v15120_v23 = vld [vmem:[%s15073_s25 + $0x2] ss:$0 sm:$0xff] }
  0xdb   :  { %456 = vst.msk [vmem:[#allocation4 + $0xc] sm:$0x3] %vm316_vm2, %v439_v24  ;;  %450 = vst.msk [vmem:[#allocation4] sm:$0x3] %vm316_vm2, %v415_v27  ;;  %v13770_v40 = vpop.f32.mrf.mxu0  ;;  %v290_v50 = vcombine.high %v288_v30, %v288_v30 }
  0xdc   :  { %324 = vst.msk [vmem:[#allocation3 + $0xe] sm:$0x3] %vm316_vm2, %v307_v29  ;;  %318 = vst.msk [vmem:[#allocation3 + $0x2] sm:$0x3] %vm316_vm2, %v289_v31  ;;  %v536_v51 = vadd.f32 %v13770_v40, %v13254_v28  ;;  %v424_v52 = vcombine.high %v422_v33, %v422_v33  ;;  %v865_v31 = vpop.permute.xlu0 %864 }
  0xdd   :  { %319 = vst.msk [vmem:[#allocation3 + $0x4] sm:$0x3] %vm316_vm2, %v288_v30  ;;  %457 = vst.msk [vmem:[#allocation4 + $0xe] sm:$0x3] %vm316_vm2, %v441_v32  ;;  %v681_v53 = vpop.f32.mrf.mxu1  ;;  %v530_v54 = vpop.f32.mrf.mxu0 }
  0xde   :  { %451 = vst.msk [vmem:[#allocation4 + $0x2] sm:$0x3] %vm316_vm2, %v423_v36  ;;  %452 = vst.msk [vmem:[#allocation4 + $0x4] sm:$0x3] %vm316_vm2, %v422_v33  ;;  %v682_v55 = vadd.f32 %v15092_v38, %v681_v53  ;;  %v558_v56 = vcombine.high %v536_v51, %v536_v51  ;;  %v565_v57 = vrot.slane %v536_v51, %v14931_v11 }
  0xdf   :  { %320 = vst.msk [vmem:[#allocation3 + $0x6] sm:$0x3] %vm316_vm2, %v290_v50  ;;  %v531_v58 = vadd.f32 %v13254_v28, %v530_v54  ;;  %453 = vst.msk [vmem:[#allocation4 + $0x6] sm:$0x3] %vm316_vm2, %v424_v52  ;;  %v13781_v59 = vpop.f32.mrf.mxu1 }
  0xe0   :  { %v572_v60 = vrot.slane %v558_v56, %v14931_v11  ;;  %v573_v61 = vcombine.high %v565_v57, %v565_v57  ;;  %587 = vst.msk [vmem:[#allocation5 + $0x8] sm:$0x3] %vm316_vm2, %v565_v57  ;;  %v873_v51 = vpop.permute.xlu0 %872 }
  0xe1   :  { %v541_v62 = vcombine.high %v531_v58, %v531_v58  ;;  %v548_v63 = vrot.slane %v531_v58, %v14931_v11  ;;  %v837_v1 = vld [vmem:[#allocation3] sm:$0x3]  ;;  %v875_v52 = vmul.f32 0.0, %v873_v51 }
  0xe2   :  { %v838_v2 = vadd.f32 %v837_v1, %v682_v55  ;;  %v574_v4 = vcombine.high %v572_v60, %v572_v60  ;;  %588 = vst.msk [vmem:[#allocation5 + $0xa] sm:$0x3] %vm316_vm2, %v573_v61  ;;  %589 = vst.msk [vmem:[#allocation5 + $0xc] sm:$0x3] %vm316_vm2, %v572_v60  ;;  %v845_v14 = vld [vmem:[#allocation4] sm:$0x3] }
  0xe3   :  { %v555_v6 = vrot.slane %v541_v62, %v14931_v11  ;;  %v556_v7 = vcombine.high %v548_v63, %v548_v63  ;;  %583 = vst.msk [vmem:[#allocation5] sm:$0x3] %vm316_vm2, %v548_v63  ;;  %v757_v12 = vpop.f32.mrf.mxu0  ;;  %v1091_v58 = vld [vmem:[#allocation3 + $0x2] sm:$0x3] }
  0xe4   :  { %v13260_v9 = vmul.f32 -1.442695, %v838_v2  ;;  %590 = vst.msk [vmem:[#allocation5 + $0xe] sm:$0x3] %vm316_vm2, %v574_v4  ;;  %v758_v13 = vadd.f32 %v15112_v8, %v757_v12 }
  0xe5   :  { %v557_v10 = vcombine.high %v555_v6, %v555_v6  ;;  %584 = vst.msk [vmem:[#allocation5 + $0x2] sm:$0x3] %vm316_vm2, %v556_v7  ;;  %585 = vst.msk [vmem:[#allocation5 + $0x4] sm:$0x3] %vm316_vm2, %v555_v6  ;;  %v13792_v15 = vpop.f32.mrf.mxu0  ;;  %v1100_v1 = vld [vmem:[#allocation4 + $0x2] sm:$0x3] }
  0xe6   :  { %14376 = vpow2.f32 %v13260_v9  ;;  %v846_v17 = vadd.f32 %v845_v14, %v758_v13 }
  0xe7   :  { %586 = vst.msk [vmem:[#allocation5 + $0x6] sm:$0x3] %vm316_vm2, %v557_v10  ;;  %v833_v16 = vpop.f32.mrf.mxu1 }
  0xe8   :  { %v13261_v19 = vmul.f32 -1.442695, %v846_v17  ;;  %v834_v25 = vadd.f32 %v15120_v23, %v833_v16 }
  0xe9   :  { %v13803_v18 = vpop.f32.mrf.mxu1 }
  0xea   :  { %14378 = vpow2.f32 %v13261_v19  ;;  %v853_v28 = vld [vmem:[#allocation5] sm:$0x3] }
  0xec   :  { %v1109_v17 = vld [vmem:[#allocation5 + $0x2] sm:$0x3] }
  0xf3   :  { %v14377_v20 = vpop.eup %14376 }
  0xf4   :  { %v842_v21 = vadd.f32 1.0, %v14377_v20  ;;  %v1122_v20 = vpop.permute.xlu1 %1121 }
  0xf6   :  { %14380 = vrcp.f32 %v842_v21 }
  0xf7   :  { %v14379_v22 = vpop.eup %14378 }
  0xf8   :  { %v850_v24 = vadd.f32 1.0, %v14379_v22 }
  0xfa   :  { %14382 = vrcp.f32 %v850_v24 }
 0x103   :  { %v14381_v26 = vpop.eup %14380 }
 0x104   :  { %v854_v27 = vmul.f32 %v14381_v26, %v834_v25  ;;  %v1131_v26 = vpop.permute.xlu1 %1130 }
 0x106   :  { %v855_v29 = vadd.f32 %v854_v27, %v853_v28 }
 0x107   :  { %v14383_v30 = vpop.eup %14382 }
 0x108   :  { %14384 = vtanh.f32 %v855_v29  ;;  %v857_v32 = vsub.f32 1.0, %v14383_v30  ;;  %v859_v40 = vmul.f32 0.0, %v14383_v30 }
 0x115   :  { %v14385_v33 = vpop.eup %14384 }
 0x116   :  { %v858_v36 = vmul.f32 %v14385_v33, %v857_v32 }
 0x118   :  { %v860_v50 = vadd.f32 %v859_v40, %v858_v36  ;;  %v1349_v36 = vld [vmem:[#allocation3 + $0x4] sm:$0x3] }
 0x11a   :  { %v867_v53 = vmul.f32 %v865_v31, %v860_v50 }
 0x11c   :  { %868 = vst.msk [vmem:[#allocation2] sm:$0x3] %vm316_vm2, %v867_v53  ;;  %v15124_v54 = vadd.f32 %v875_v52, %v867_v53 }
 0x11e   :  { %13813 = vmatmul.mubr.msk.f32.vlgmr.msra.gmra.mxu0 %vm192_vm0, %v15124_v54  ;;  %13824 = vmatmul.mubr.msk.f32.vlgmr.msra.gmra.mxu1 %vm192_vm0, %v15124_v54  ;;  %v1133_v28 = vmul.f32 %v1131_v26, %v15124_v54 }
 0x11f   :  { %13827 = vmatpush3.msra.mxu0 %v15000_v44  ;;  %13834 = vmatprep.mubr.msk.f32.mxu0 %vm14873_vm1, %v17637_v34 }
 0x120   :  { %13828 = vmatprep.subr.mxu0 %v17637_v34  ;;  %13838 = vmatpush3.msra.mxu1 %v14956_v35 }
 0x121   :  { %13829 = vmatpush3.msra.mxu0 %v15011_v46  ;;  %13839 = vmatprep.subr.mxu1 %v17637_v34 }
 0x122   :  { %13830 = vmatprep.subr.mxu0 %v17637_v34  ;;  %13840 = vmatpush3.msra.mxu1 %v14964_v37 }
 0x123   :  { %13831 = vmatpush3.msra.mxu0 %v15021_v48  ;;  %13841 = vmatprep.subr.mxu1 %v17637_v34 }
 0x124   :  { %13832 = vmatprep.subr.mxu0 %v17637_v34  ;;  %13842 = vmatpush3.msra.mxu1 %v14970_v39 }
 0x125   :  { %13833 = vmatpush3.msra.mxu0 %v15028_v49  ;;  %13843 = vmatprep.subr.mxu1 %v17637_v34 }
 0x126   :  { %13835 = vmatmul.mubr.msk.f32.vlgmr.msra.gmra.mxu0 %vm192_vm0, %v15124_v54  ;;  %13848 = vmatprep.subr.mxu0 %v17637_v34 }
 0x127   :  { %13849 = vmatpush3.msra.mxu0 %v14982_v42  ;;  %13844 = vmatpush3.msra.mxu1 %v14978_v41 }
 0x128   :  { %13850 = vmatprep.subr.mxu0 %v17637_v34  ;;  %13845 = vmatprep.mubr.msk.f32.mxu1 %vm14873_vm1, %v17637_v34 }
 0x129   :  { %13851 = vmatpush3.msra.mxu0 %v14995_v43  ;;  %13856 = vmatprep.mubr.msk.f32.mxu0 %vm14873_vm1, %v17637_v34 }
 0x12a   :  { %13852 = vmatprep.subr.mxu0 %v17637_v34  ;;  %13859 = vmatprep.subr.mxu1 %v17637_v34 }
 0x12b   :  { %13853 = vmatpush3.msra.mxu0 %v15004_v45 }
 0x12c   :  { %13854 = vmatprep.subr.mxu0 %v17637_v34 }
 0x12d   :  { %13855 = vmatpush3.msra.mxu0 %v15015_v47 }
 0x12e   :  { %13870 = vmatprep.subr.mxu0 %v17637_v34 }
 0x1de   :  { %v946_v55 = vpop.f32.mrf.mxu0  ;;  %v1016_v56 = vpop.f32.mrf.mxu1 }
 0x1df   :  { %v947_v57 = vadd.f32 %v15092_v38, %v946_v55  ;;  %v1017_v63 = vadd.f32 %v15112_v8, %v1016_v56 }
 0x1e0   :  { %v13814_v59 = vpop.f32.mrf.mxu0  ;;  %v13825_v60 = vpop.f32.mrf.mxu1 }
 0x1e1   :  { %v1092_v61 = vadd.f32 %v1091_v58, %v947_v57  ;;  %v1101_v4 = vadd.f32 %v1100_v1, %v1017_v63 }
 0x1e3   :  { %v13265_v62 = vmul.f32 -1.442695, %v1092_v61  ;;  %v13266_v7 = vmul.f32 -1.442695, %v1101_v4  ;;  %v1367_v4 = vld [vmem:[#allocation5 + $0x4] sm:$0x3] }
 0x1e5   :  { %14386 = vpow2.f32 %v13265_v62 }
 0x1e6   :  { %v1086_v2 = vpop.f32.mrf.mxu0  ;;  %14388 = vpow2.f32 %v13266_v7 }
 0x1e7   :  { %v1087_v14 = vadd.f32 %v15120_v23, %v1086_v2 }
 0x1e8   :  { %v13836_v6 = vpop.f32.mrf.mxu0 }
 0x1f2   :  { %v14387_v9 = vpop.eup %14386 }
 0x1f3   :  { %v1096_v10 = vadd.f32 1.0, %v14387_v9  ;;  %v14389_v12 = vpop.eup %14388 }
 0x1f4   :  { %v1105_v13 = vadd.f32 1.0, %v14389_v12 }
 0x1f5   :  { %14390 = vrcp.f32 %v1096_v10 }
 0x1f6   :  { %14392 = vrcp.f32 %v1105_v13 }
 0x202   :  { %v14391_v15 = vpop.eup %14390 }
 0x203   :  { %v1110_v16 = vmul.f32 %v14391_v15, %v1087_v14  ;;  %v14393_v19 = vpop.eup %14392  ;;  %v1380_v15 = vpop.permute.xlu0 %1379 }
 0x204   :  { %v1113_v21 = vsub.f32 1.0, %v14393_v19  ;;  %v1115_v25 = vmul.f32 %v14393_v19, %v15124_v54  ;;  %v1358_v54 = vld [vmem:[#allocation4 + $0x4] sm:$0x3] }
 0x205   :  { %v1111_v18 = vadd.f32 %v1110_v16, %v1109_v17  ;;  %v1389_v16 = vpop.permute.xlu1 %1388 }
 0x207   :  { %14394 = vtanh.f32 %v1111_v18 }
 0x214   :  { %v14395_v22 = vpop.eup %14394 }
 0x215   :  { %v1114_v24 = vmul.f32 %v14395_v22, %v1113_v21 }
 0x217   :  { %v1116_v27 = vadd.f32 %v1115_v25, %v1114_v24  ;;  %v1607_v24 = vld [vmem:[#allocation3 + $0x6] sm:$0x3] }
 0x219   :  { %v1124_v29 = vmul.f32 %v1122_v20, %v1116_v27 }
 0x21b   :  { %1126 = vst.msk [vmem:[#allocation2 + $0x2] sm:$0x3] %vm316_vm2, %v1124_v29  ;;  %v15168_v30 = vadd.f32 %v1133_v28, %v1124_v29 }
 0x21d   :  { %13846 = vmatmul.mubr.msk.f32.vlgmr.msra.gmra.mxu1 %vm192_vm0, %v15168_v30  ;;  %13857 = vmatmul.mubr.msk.f32.vlgmr.msra.gmra.mxu0 %vm192_vm0, %v15168_v30  ;;  %v1391_v17 = vmul.f32 %v1389_v16, %v15168_v30 }
 0x21e   :  { %13860 = vmatpush3.msra.mxu1 %v15000_v44  ;;  %13867 = vmatprep.mubr.msk.f32.mxu1 %vm14873_vm1, %v17637_v34 }
 0x21f   :  { %13861 = vmatprep.subr.mxu1 %v17637_v34  ;;  %13871 = vmatpush3.msra.mxu0 %v14956_v35 }
 0x220   :  { %13862 = vmatpush3.msra.mxu1 %v15011_v46  ;;  %13872 = vmatprep.subr.mxu0 %v17637_v34 }
 0x221   :  { %13863 = vmatprep.subr.mxu1 %v17637_v34  ;;  %13873 = vmatpush3.msra.mxu0 %v14964_v37 }
 0x222   :  { %13864 = vmatpush3.msra.mxu1 %v15021_v48  ;;  %13874 = vmatprep.subr.mxu0 %v17637_v34 }
 0x223   :  { %13865 = vmatprep.subr.mxu1 %v17637_v34  ;;  %13875 = vmatpush3.msra.mxu0 %v14970_v39 }
 0x224   :  { %13866 = vmatpush3.msra.mxu1 %v15028_v49  ;;  %13876 = vmatprep.subr.mxu0 %v17637_v34 }
 0x225   :  { %13868 = vmatmul.mubr.msk.f32.vlgmr.msra.gmra.mxu1 %vm192_vm0, %v15168_v30  ;;  %13881 = vmatprep.subr.mxu1 %v17637_v34 }
 0x226   :  { %13882 = vmatpush3.msra.mxu1 %v14982_v42  ;;  %13877 = vmatpush3.msra.mxu0 %v14978_v41 }
 0x227   :  { %13883 = vmatprep.subr.mxu1 %v17637_v34  ;;  %13878 = vmatprep.mubr.msk.f32.mxu0 %vm14873_vm1, %v17637_v34 }
 0x228   :  { %13884 = vmatpush3.msra.mxu1 %v14995_v43  ;;  %13889 = vmatprep.mubr.msk.f32.mxu1 %vm14873_vm1, %v17637_v34 }
 0x229   :  { %13885 = vmatprep.subr.mxu1 %v17637_v34  ;;  %13892 = vmatprep.subr.mxu0 %v17637_v34 }
 0x22a   :  { %13886 = vmatpush3.msra.mxu1 %v15004_v45 }
 0x22b   :  { %13887 = vmatprep.subr.mxu1 %v17637_v34 }
 0x22c   :  { %13888 = vmatpush3.msra.mxu1 %v15015_v47 }
 0x22d   :  { %13903 = vmatprep.subr.mxu1 %v17637_v34 }
 0x2dd   :  { %v1204_v31 = vpop.f32.mrf.mxu1  ;;  %v1274_v32 = vpop.f32.mrf.mxu0 }
 0x2de   :  { %v1205_v33 = vadd.f32 %v15092_v38, %v1204_v31  ;;  %v1275_v53 = vadd.f32 %v15112_v8, %v1274_v32 }
 0x2df   :  { %v13847_v40 = vpop.f32.mrf.mxu1  ;;  %v13858_v50 = vpop.f32.mrf.mxu0 }
 0x2e0   :  { %v1350_v51 = vadd.f32 %v1349_v36, %v1205_v33  ;;  %v1359_v56 = vadd.f32 %v1358_v54, %v1275_v53 }
 0x2e2   :  { %v13271_v52 = vmul.f32 -1.442695, %v1350_v51  ;;  %v13272_v58 = vmul.f32 -1.442695, %v1359_v56  ;;  %v1625_v56 = vld [vmem:[#allocation5 + $0x6] sm:$0x3] }
 0x2e4   :  { %14396 = vpow2.f32 %v13271_v52 }
 0x2e5   :  { %v1344_v55 = vpop.f32.mrf.mxu1  ;;  %14398 = vpow2.f32 %v13272_v58 }
 0x2e6   :  { %v1345_v63 = vadd.f32 %v15120_v23, %v1344_v55 }
 0x2e7   :  { %v13869_v57 = vpop.f32.mrf.mxu1 }
 0x2f1   :  { %v14397_v59 = vpop.eup %14396 }
 0x2f2   :  { %v1354_v60 = vadd.f32 1.0, %v14397_v59  ;;  %v14399_v61 = vpop.eup %14398 }
 0x2f3   :  { %v1363_v62 = vadd.f32 1.0, %v14399_v61 }
 0x2f4   :  { %14400 = vrcp.f32 %v1354_v60 }
 0x2f5   :  { %14402 = vrcp.f32 %v1363_v62 }
 0x301   :  { %v14401_v1 = vpop.eup %14400 }
 0x302   :  { %v1368_v2 = vmul.f32 %v14401_v1, %v1345_v63  ;;  %v14403_v7 = vpop.eup %14402  ;;  %v1638_v1 = vpop.permute.xlu0 %1637 }
 0x303   :  { %v1371_v9 = vsub.f32 1.0, %v14403_v7  ;;  %v1373_v13 = vmul.f32 %v14403_v7, %v15168_v30  ;;  %v1616_v30 = vld [vmem:[#allocation4 + $0x6] sm:$0x3] }
 0x304   :  { %v1369_v6 = vadd.f32 %v1368_v2, %v1367_v4  ;;  %v1647_v2 = vpop.permute.xlu1 %1646 }
 0x306   :  { %14404 = vtanh.f32 %v1369_v6 }
 0x313   :  { %v14405_v10 = vpop.eup %14404 }
 0x314   :  { %v1372_v12 = vmul.f32 %v14405_v10, %v1371_v9  ;;  %v1865_v10 = vld [vmem:[#allocation3 + $0x8] sm:$0x3] }
 0x316   :  { %v1374_v14 = vadd.f32 %v1373_v13, %v1372_v12 }
 0x318   :  { %v1382_v18 = vmul.f32 %v1380_v15, %v1374_v14 }
 0x31a   :  { %1384 = vst.msk [vmem:[#allocation2 + $0x4] sm:$0x3] %vm316_vm2, %v1382_v18  ;;  %v15212_v19 = vadd.f32 %v1391_v17, %v1382_v18  ;;  %v1874_v17 = vld [vmem:[#allocation4 + $0x8] sm:$0x3] }
 0x31c   :  { %13879 = vmatmul.mubr.msk.f32.vlgmr.msra.gmra.mxu0 %vm192_vm0, %v15212_v19  ;;  %13890 = vmatmul.mubr.msk.f32.vlgmr.msra.gmra.mxu1 %vm192_vm0, %v15212_v19  ;;  %v1649_v6 = vmul.f32 %v1647_v2, %v15212_v19 }
 0x31d   :  { %13893 = vmatpush3.msra.mxu0 %v15000_v44  ;;  %13900 = vmatprep.mubr.msk.f32.mxu0 %vm14873_vm1, %v17637_v34 }
 0x31e   :  { %13894 = vmatprep.subr.mxu0 %v17637_v34  ;;  %13904 = vmatpush3.msra.mxu1 %v14956_v35 }
 0x31f   :  { %13895 = vmatpush3.msra.mxu0 %v15011_v46  ;;  %13905 = vmatprep.subr.mxu1 %v17637_v34 }
 0x320   :  { %13896 = vmatprep.subr.mxu0 %v17637_v34  ;;  %13906 = vmatpush3.msra.mxu1 %v14964_v37 }
 0x321   :  { %13897 = vmatpush3.msra.mxu0 %v15021_v48  ;;  %13907 = vmatprep.subr.mxu1 %v17637_v34 }
 0x322   :  { %13898 = vmatprep.subr.mxu0 %v17637_v34  ;;  %13908 = vmatpush3.msra.mxu1 %v14970_v39 }
 0x323   :  { %13899 = vmatpush3.msra.mxu0 %v15028_v49  ;;  %13909 = vmatprep.subr.mxu1 %v17637_v34 }
 0x324   :  { %13901 = vmatmul.mubr.msk.f32.vlgmr.msra.gmra.mxu0 %vm192_vm0, %v15212_v19  ;;  %13914 = vmatprep.subr.mxu0 %v17637_v34 }
 0x325   :  { %13915 = vmatpush3.msra.mxu0 %v14982_v42  ;;  %13910 = vmatpush3.msra.mxu1 %v14978_v41 }
 0x326   :  { %13916 = vmatprep.subr.mxu0 %v17637_v34  ;;  %13911 = vmatprep.mubr.msk.f32.mxu1 %vm14873_vm1, %v17637_v34 }
 0x327   :  { %13917 = vmatpush3.msra.mxu0 %v14995_v43  ;;  %13922 = vmatprep.mubr.msk.f32.mxu0 %vm14873_vm1, %v17637_v34 }
 0x328   :  { %13918 = vmatprep.subr.mxu0 %v17637_v34  ;;  %13925 = vmatprep.subr.mxu1 %v17637_v34 }
 0x329   :  { %13919 = vmatpush3.msra.mxu0 %v15004_v45 }
 0x32a   :  { %13920 = vmatprep.subr.mxu0 %v17637_v34 }
 0x32b   :  { %13921 = vmatpush3.msra.mxu0 %v15015_v47 }
 0x32c   :  { %13936 = vmatprep.subr.mxu0 %v17637_v34 }
 0x3dc   :  { %v1462_v20 = vpop.f32.mrf.mxu0  ;;  %v1532_v21 = vpop.f32.mrf.mxu1 }
 0x3dd   :  { %v1463_v22 = vadd.f32 %v15092_v38, %v1462_v20  ;;  %v1533_v29 = vadd.f32 %v15112_v8, %v1532_v21 }
 0x3de   :  { %v13880_v25 = vpop.f32.mrf.mxu0  ;;  %v13891_v26 = vpop.f32.mrf.mxu1 }
 0x3df   :  { %v1608_v27 = vadd.f32 %v1607_v24, %v1463_v22  ;;  %v1617_v32 = vadd.f32 %v1616_v30, %v1533_v29  ;;  %v1883_v30 = vld [vmem:[#allocation5 + $0x8] sm:$0x3] }
 0x3e1   :  { %v13277_v28 = vmul.f32 -1.442695, %v1608_v27  ;;  %v13278_v36 = vmul.f32 -1.442695, %v1617_v32 }
 0x3e3   :  { %14406 = vpow2.f32 %v13277_v28 }
 0x3e4   :  { %v1602_v31 = vpop.f32.mrf.mxu0  ;;  %14408 = vpow2.f32 %v13278_v36 }
 0x3e5   :  { %v1603_v53 = vadd.f32 %v15120_v23, %v1602_v31 }
 0x3e6   :  { %v13902_v33 = vpop.f32.mrf.mxu0 }
 0x3f0   :  { %v14407_v40 = vpop.eup %14406 }
 0x3f1   :  { %v1612_v50 = vadd.f32 1.0, %v14407_v40  ;;  %v14409_v51 = vpop.eup %14408 }
 0x3f2   :  { %v1621_v52 = vadd.f32 1.0, %v14409_v51 }
 0x3f3   :  { %14410 = vrcp.f32 %v1612_v50 }
 0x3f4   :  { %14412 = vrcp.f32 %v1621_v52  ;;  %v1896_v52 = vpop.permute.xlu0 %1895 }
 0x400   :  { %v14411_v54 = vpop.eup %14410 }
 0x401   :  { %v1626_v55 = vmul.f32 %v14411_v54, %v1603_v53  ;;  %v14413_v58 = vpop.eup %14412  ;;  %v1905_v53 = vpop.permute.xlu1 %1904 }
 0x402   :  { %v1629_v59 = vsub.f32 1.0, %v14413_v58  ;;  %v1631_v62 = vmul.f32 %v14413_v58, %v15212_v19  ;;  %v15318_v58 = vld [vmem:[%s14936_s13 + $0x10] sm:$0xff] }
 0x403   :  { %v1627_v57 = vadd.f32 %v1626_v55, %v1625_v56 }
 0x405   :  { %14414 = vtanh.f32 %v1627_v57  ;;  %v15311_v57 = vld [vmem:[%s14936_s13 + $0x18] sm:$0xff] }
 0x412   :  { %v14415_v60 = vpop.eup %14414 }
 0x413   :  { %v1630_v61 = vmul.f32 %v14415_v60, %v1629_v59  ;;  %v2132_v60 = vld [vmem:[#allocation4 + $0xa] sm:$0x3] }
 0x415   :  { %v1632_v63 = vadd.f32 %v1631_v62, %v1630_v61 }
 0x417   :  { %v1640_v4 = vmul.f32 %v1638_v1, %v1632_v63 }
 0x419   :  { %1642 = vst.msk [vmem:[#allocation2 + $0x6] sm:$0x3] %vm316_vm2, %v1640_v4  ;;  %v15256_v7 = vadd.f32 %v1649_v6, %v1640_v4 }
 0x41b   :  { %13912 = vmatmul.mubr.msk.f32.vlgmr.msra.gmra.mxu1 %vm192_vm0, %v15256_v7  ;;  %13923 = vmatmul.mubr.msk.f32.vlgmr.msra.gmra.mxu0 %vm192_vm0, %v15256_v7  ;;  %v1907_v55 = vmul.f32 %v1905_v53, %v15256_v7 }
 0x41c   :  { %13926 = vmatpush3.msra.mxu1 %v15000_v44  ;;  %13933 = vmatprep.mubr.msk.f32.mxu1 %vm14873_vm1, %v17637_v34 }
 0x41d   :  { %13927 = vmatprep.subr.mxu1 %v17637_v34  ;;  %13937 = vmatpush3.msra.mxu0 %v14956_v35 }
 0x41e   :  { %13928 = vmatpush3.msra.mxu1 %v15011_v46  ;;  %13938 = vmatprep.subr.mxu0 %v17637_v34 }
 0x41f   :  { %13929 = vmatprep.subr.mxu1 %v17637_v34  ;;  %13939 = vmatpush3.msra.mxu0 %v14964_v37 }
 0x420   :  { %13930 = vmatpush3.msra.mxu1 %v15021_v48  ;;  %13940 = vmatprep.subr.mxu0 %v17637_v34 }
 0x421   :  { %13931 = vmatprep.subr.mxu1 %v17637_v34  ;;  %13941 = vmatpush3.msra.mxu0 %v14970_v39 }
 0x422   :  { %13932 = vmatpush3.msra.mxu1 %v15028_v49  ;;  %13942 = vmatprep.subr.mxu0 %v17637_v34 }
 0x423   :  { %13934 = vmatmul.mubr.msk.f32.vlgmr.msra.gmra.mxu1 %vm192_vm0, %v15256_v7  ;;  %13947 = vmatprep.subr.mxu1 %v17637_v34 }
 0x424   :  { %13948 = vmatpush3.msra.mxu1 %v14982_v42  ;;  %13943 = vmatpush3.msra.mxu0 %v14978_v41 }
 0x425   :  { %13949 = vmatprep.subr.mxu1 %v17637_v34  ;;  %13944 = vmatprep.mubr.msk.f32.mxu0 %vm14873_vm1, %v17637_v34 }
 0x426   :  { %13950 = vmatpush3.msra.mxu1 %v14995_v43  ;;  %13955 = vmatprep.mubr.msk.f32.mxu1 %vm14873_vm1, %v17637_v34 }
 0x427   :  { %13951 = vmatprep.subr.mxu1 %v17637_v34  ;;  %13958 = vmatprep.subr.mxu0 %v17637_v34 }
 0x428   :  { %13952 = vmatpush3.msra.mxu1 %v15004_v45 }
 0x429   :  { %13953 = vmatprep.subr.mxu1 %v17637_v34 }
 0x42a   :  { %13954 = vmatpush3.msra.mxu1 %v15015_v47 }
 0x42b   :  { %13969 = vmatprep.subr.mxu1 %v17637_v34 }
 0x4db   :  { %v1720_v35 = vpop.f32.mrf.mxu1  ;;  %v1790_v37 = vpop.f32.mrf.mxu0 }
 0x4dc   :  { %v1721_v9 = vadd.f32 %v15092_v38, %v1720_v35  ;;  %v1791_v16 = vadd.f32 %v15112_v8, %v1790_v37  ;;  %v2141_v37 = vld [vmem:[#allocation5 + $0xa] sm:$0x3] }
 0x4dd   :  { %v13913_v12 = vpop.f32.mrf.mxu1  ;;  %v13924_v13 = vpop.f32.mrf.mxu0 }
 0x4de   :  { %v1866_v14 = vadd.f32 %v1865_v10, %v1721_v9  ;;  %v1875_v19 = vadd.f32 %v1874_v17, %v1791_v16  ;;  %v2154_v17 = vpop.permute.xlu0 %2153 }
 0x4e0   :  { %v13283_v15 = vmul.f32 -1.442695, %v1866_v14  ;;  %v13284_v21 = vmul.f32 -1.442695, %v1875_v19 }
 0x4e2   :  { %14416 = vpow2.f32 %v13283_v15 }
 0x4e3   :  { %v1860_v18 = vpop.f32.mrf.mxu1  ;;  %14418 = vpow2.f32 %v13284_v21 }
 0x4e4   :  { %v1861_v27 = vadd.f32 %v15120_v23, %v1860_v18  ;;  %v2163_v18 = vpop.permute.xlu1 %2162 }
 0x4e5   :  { %v13935_v20 = vpop.f32.mrf.mxu1 }
 0x4ef   :  { %v14417_v22 = vpop.eup %14416 }
 0x4f0   :  { %v1870_v24 = vadd.f32 1.0, %v14417_v22  ;;  %v14419_v25 = vpop.eup %14418  ;;  %v15357_v22 = vld [vmem:[%s14936_s13 + $0x58] sm:$0xff] }
 0x4f1   :  { %v1879_v26 = vadd.f32 1.0, %v14419_v25  ;;  %v15372_v25 = vld [vmem:[%s14936_s13 + $0x48] sm:$0xff] }
 0x4f2   :  { %14420 = vrcp.f32 %v1870_v24  ;;  %v15365_v24 = vld [vmem:[%s14936_s13 + $0x50] sm:$0xff] }
 0x4f3   :  { %14422 = vrcp.f32 %v1879_v26  ;;  %v14793_v26 = vld [vmem:[%s14936_s13 + $0x8] sm:$0xff] }
 0x4ff   :  { %v14421_v28 = vpop.eup %14420 }
 0x500   :  { %v1884_v29 = vmul.f32 %v14421_v28, %v1861_v27  ;;  %v14423_v32 = vpop.eup %14422  ;;  %v15379_v27 = vld [vmem:[%s14936_s13 + $0x40] sm:$0xff]  ;;  %v14795_v28 = vld [vmem:[%s14936_s13 + $0x38] sm:$0xff] }
 0x501   :  { %v1887_v33 = vsub.f32 1.0, %v14423_v32  ;;  %v1889_v50 = vmul.f32 %v14423_v32, %v15256_v7  ;;  %v14799_v32 = vld [vmem:[%s14936_s13 + $0x20] sm:$0xff] }
 0x502   :  { %v1885_v31 = vadd.f32 %v1884_v29, %v1883_v30  ;;  %v14796_v29 = vld [vmem:[%s14936_s13] sm:$0xff]  ;;  %v14797_v30 = vld [vmem:[%s14936_s13 + $0x30] sm:$0xff] }
 0x504   :  { %14424 = vtanh.f32 %v1885_v31  ;;  %v14798_v31 = vld [vmem:[%s14936_s13 + $0x28] sm:$0xff]  ;;  %s15962_s13 = sld [smem:[%s17636_s0 + %s14888_s10]]  }
 0x511   :  { %v14425_v36 = vpop.eup %14424 }
 0x512   :  { %v1888_v40 = vmul.f32 %v14425_v36, %v1887_v33 }
 0x514   :  { %v1890_v51 = vadd.f32 %v1889_v50, %v1888_v40  ;;  %v2381_v50 = vld [vmem:[#allocation3 + $0xc] sm:$0x3] }
 0x516   :  { %v1898_v54 = vmul.f32 %v1896_v52, %v1890_v51 }
 0x518   :  { %1900 = vst.msk [vmem:[#allocation2 + $0x8] sm:$0x3] %vm316_vm2, %v1898_v54  ;;  %v15300_v56 = vadd.f32 %v1907_v55, %v1898_v54 }
 0x51a   :  { %13945 = vmatmul.mubr.msk.f32.vlgmr.msra.gmra.mxu0 %vm192_vm0, %v15300_v56  ;;  %13956 = vmatmul.mubr.msk.f32.vlgmr.msra.gmra.mxu1 %vm192_vm0, %v15300_v56  ;;  %v2165_v20 = vmul.f32 %v2163_v18, %v15300_v56 }
 0x51b   :  { %13959 = vmatpush3.msra.mxu0 %v15000_v44  ;;  %13966 = vmatprep.mubr.msk.f32.mxu0 %vm14873_vm1, %v17637_v34 }
 0x51c   :  { %13960 = vmatprep.subr.mxu0 %v17637_v34  ;;  %13970 = vmatpush3.msra.mxu1 %v15311_v57 }
 0x51d   :  { %13961 = vmatpush3.msra.mxu0 %v15011_v46  ;;  %13971 = vmatprep.subr.mxu1 %v17637_v34 }
 0x51e   :  { %13962 = vmatprep.subr.mxu0 %v17637_v34  ;;  %13972 = vmatpush3.msra.mxu1 %v15318_v58 }
 0x51f   :  { %13963 = vmatpush3.msra.mxu0 %v15021_v48  ;;  %13973 = vmatprep.subr.mxu1 %v17637_v34 }
 0x520   :  { %13964 = vmatprep.subr.mxu0 %v17637_v34  ;;  %13974 = vmatpush3.msra.mxu1 %v14970_v39 }
 0x521   :  { %13965 = vmatpush3.msra.mxu0 %v15028_v49  ;;  %13975 = vmatprep.subr.mxu1 %v17637_v34 }
 0x522   :  { %13967 = vmatmul.mubr.msk.f32.vlgmr.msra.gmra.mxu0 %vm192_vm0, %v15300_v56  ;;  %13980 = vmatprep.subr.mxu0 %v17637_v34 }
 0x523   :  { %13981 = vmatpush3.msra.mxu0 %v14982_v42  ;;  %13976 = vmatpush3.msra.mxu1 %v14978_v41 }
 0x524   :  { %13982 = vmatprep.subr.mxu0 %v17637_v34  ;;  %13977 = vmatprep.mubr.msk.f32.mxu1 %vm14873_vm1, %v17637_v34 }
 0x525   :  { %13983 = vmatpush3.msra.mxu0 %v14995_v43  ;;  %13988 = vmatprep.mubr.msk.f32.mxu0 %vm14873_vm1, %v17637_v34  ;;  %v2123_v43 = vld [vmem:[#allocation3 + $0xa] sm:$0x3] }
 0x526   :  { %13984 = vmatprep.subr.mxu0 %v17637_v34  ;;  %13991 = vmatprep.subr.mxu1 %v17637_v34 }
 0x527   :  { %13985 = vmatpush3.msra.mxu0 %v15004_v45 }
 0x528   :  { %13986 = vmatprep.subr.mxu0 %v17637_v34 }
 0x529   :  { %13987 = vmatpush3.msra.mxu0 %v15015_v47 }
 0x52a   :  { %14002 = vmatprep.subr.mxu0 %v17637_v34 }
 0x5da   :  { %v1978_v39 = vpop.f32.mrf.mxu0  ;;  %v2048_v41 = vpop.f32.mrf.mxu1 }
 0x5db   :  { %v1979_v42 = vadd.f32 %v15092_v38, %v1978_v39  ;;  %v2049_v59 = vadd.f32 %v15112_v8, %v2048_v41 }
 0x5dc   :  { %v13946_v44 = vpop.f32.mrf.mxu0  ;;  %v13957_v46 = vpop.f32.mrf.mxu1 }
 0x5dd   :  { %v2124_v48 = vadd.f32 %v2123_v43, %v1979_v42  ;;  %v2133_v61 = vadd.f32 %v2132_v60, %v2049_v59  ;;  %v2399_v59 = vld [vmem:[#allocation5 + $0xc] sm:$0x3] }
 0x5df   :  { %v13289_v49 = vmul.f32 -1.442695, %v2124_v48  ;;  %v13290_v63 = vmul.f32 -1.442695, %v2133_v61 }
 0x5e1   :  { %14426 = vpow2.f32 %v13289_v49 }
 0x5e2   :  { %v2118_v45 = vpop.f32.mrf.mxu0  ;;  %14428 = vpow2.f32 %v13290_v63 }
 0x5e3   :  { %v2119_v6 = vadd.f32 %v15120_v23, %v2118_v45 }
 0x5e4   :  { %v13968_v62 = vpop.f32.mrf.mxu0 }
 0x5ee   :  { %v14427_v47 = vpop.eup %14426 }
 0x5ef   :  { %v2128_v1 = vadd.f32 1.0, %v14427_v47  ;;  %v14429_v2 = vpop.eup %14428 }
 0x5f0   :  { %v2137_v4 = vadd.f32 1.0, %v14429_v2  ;;  %v2421_v2 = vpop.permute.xlu1 %2420 }
 0x5f1   :  { %14430 = vrcp.f32 %v2128_v1  ;;  %v2412_v1 = vpop.permute.xlu0 %2411 }
 0x5f2   :  { %14432 = vrcp.f32 %v2137_v4 }
 0x5fe   :  { %v14431_v7 = vpop.eup %14430 }
 0x5ff   :  { %v2142_v35 = vmul.f32 %v14431_v7, %v2119_v6  ;;  %v14433_v10 = vpop.eup %14432  ;;  %v14876_v7 = vmov 1966171168  }
 0x600   :  { %v2145_v12 = vsub.f32 1.0, %v14433_v10  ;;  %v2147_v15 = vmul.f32 %v14433_v10, %v15300_v56  ;;  %v2390_v56 = vld [vmem:[#allocation4 + $0xc] sm:$0x3] }
 0x601   :  { %v2143_v9 = vadd.f32 %v2142_v35, %v2141_v37  ;;  %v2845_v35 = vunpack.c.l.s4 %v14876_v7  ;;  %v13312_v10 = vld.sshfl [vmem:[%s13222_s29] sm:$0x13 pattern:$0x75316420] }
 0x603   :  { %14434 = vtanh.f32 %v2143_v9  ;;  %v2846_v37 = vunpack.c.0.s8 %v2845_v35 }
 0x605   :  { %v15429_v9 = vsub.s32 %v2846_v37, %v14923_v5 }
 0x610   :  { %v14435_v13 = vpop.eup %14434 }
 0x611   :  { %v2146_v14 = vmul.f32 %v14435_v13, %v2145_v12  ;;  %v13313_v12 = vld.sshfl [vmem:[%s13222_s29 + $0x4] sm:$0x13 pattern:$0x75316420]  ;;  %v2843_v13 = vcombine.high %v13312_v10, %v13312_v10 }
 0x613   :  { %v2148_v16 = vadd.f32 %v2147_v15, %v2146_v14  ;;  %v2850_v14 = vrot.slane %v13312_v10, %v15429_v9  ;;  %v13314_v15 = vld.sshfl [vmem:[%s13222_s29 + $0x8] sm:$0x13 pattern:$0x75316420]  ;;  %v2857_v18 = vrot.slane %v2843_v13, %v15429_v9 }
 0x615   :  { %v2156_v19 = vmul.f32 %v2154_v17, %v2148_v16  ;;  %v2866_v16 = vcombine.high %v13313_v12, %v13313_v12  ;;  %v2873_v17 = vrot.slane %v13313_v12, %v15429_v9 }
 0x617   :  { %2158 = vst.msk [vmem:[#allocation2 + $0xa] sm:$0x3] %vm316_vm2, %v2156_v19  ;;  %v15350_v21 = vadd.f32 %v2165_v20, %v2156_v19  ;;  %v2858_v19 = vcombine.high %v2850_v14, %v2850_v14  ;;  %v2889_v20 = vcombine.high %v13314_v15, %v13314_v15 }
 0x619   :  { %13978 = vmatmul.mubr.msk.f32.vlgmr.msra.gmra.mxu1 %vm192_vm0, %v15350_v21  ;;  %13989 = vmatmul.mubr.msk.f32.vlgmr.msra.gmra.mxu0 %vm192_vm0, %v15350_v21  ;;  %v2423_v6 = vmul.f32 %v2421_v2, %v15350_v21 }
 0x61a   :  { %13992 = vmatpush3.msra.mxu1 %v15357_v22  ;;  %13999 = vmatprep.mubr.msk.f32.mxu1 %vm14873_vm1, %v17637_v34 }
 0x61b   :  { %13993 = vmatprep.subr.mxu1 %v17637_v34  ;;  %14003 = vmatpush3.msra.mxu0 %v15311_v57 }
 0x61c   :  { %13994 = vmatpush3.msra.mxu1 %v15365_v24  ;;  %14004 = vmatprep.subr.mxu0 %v17637_v34 }
 0x61d   :  { %13995 = vmatprep.subr.mxu1 %v17637_v34  ;;  %14005 = vmatpush3.msra.mxu0 %v15318_v58 }
 0x61e   :  { %13996 = vmatpush3.msra.mxu1 %v15372_v25  ;;  %14006 = vmatprep.subr.mxu0 %v17637_v34 }
 0x61f   :  { %13997 = vmatprep.subr.mxu1 %v17637_v34  ;;  %14007 = vmatpush3.msra.mxu0 %v14793_v26  ;;  %v2903_v26 = vrot.slane %v2889_v20, %v15429_v9  ;;  %v2710_v20 = vld [vmem:[%s13235_s7 + $0x18] sm:$0xff] }
 0x620   :  { %13998 = vmatpush3.msra.mxu1 %v15379_v27  ;;  %14008 = vmatprep.subr.mxu0 %v17637_v34 }
 0x621   :  { %14000 = vmatmul.mubr.msk.f32.vlgmr.msra.gmra.mxu1 %vm192_vm0, %v15350_v21  ;;  %14013 = vmatprep.subr.mxu1 %v17637_v34 }
 0x622   :  { %14014 = vmatpush3.msra.mxu1 %v14795_v28  ;;  %14009 = vmatpush3.msra.mxu0 %v14796_v29  ;;  %v2996_v28 = vcombine.low %v2858_v19, %v2873_v17  ;;  %v13316_v29 = vld.sshfl [vmem:[%s13222_s29 + $0x10] sm:$0x13 pattern:$0x75316420]  ;;  %v2983_v19 = vld [vmem:[%s15434_s3 + $0x48] sm:$0xff] }
 0x623   :  { %14015 = vmatprep.subr.mxu1 %v17637_v34  ;;  %14010 = vmatprep.mubr.msk.f32.mxu0 %vm14873_vm1, %v17637_v34 }
 0x624   :  { %14016 = vmatpush3.msra.mxu1 %v14797_v30  ;;  %14021 = vmatprep.mubr.msk.f32.mxu1 %vm14873_vm1, %v17637_v34 }
 0x625   :  { %14017 = vmatprep.subr.mxu1 %v17637_v34  ;;  %14024 = vmatprep.subr.mxu0 %v17637_v34 }
 0x626   :  { %14018 = vmatpush3.msra.mxu1 %v14798_v31 }
 0x627   :  { %14019 = vmatprep.subr.mxu1 %v17637_v34 }
 0x628   :  { %14020 = vmatpush3.msra.mxu1 %v14799_v32  ;;  %v13317_v32 = vld.sshfl [vmem:[%s13222_s29 + $0x14] sm:$0x13 pattern:$0x75316420] }
 0x629   :  { %v2958_v2 = vcombine.high %v13317_v32, %v13317_v32  ;;  %14035 = vmatprep.subr.mxu1 %v2710_v20 }
 0x62b   :  { %v2972_v35 = vrot.slane %v2958_v2, %v15429_v9 }
 0x6d9   :  { %v2236_v33 = vpop.f32.mrf.mxu1  ;;  %v2306_v36 = vpop.f32.mrf.mxu0 }
 0x6da   :  { %v2237_v40 = vadd.f32 %v15092_v38, %v2236_v33  ;;  %v2307_v55 = vadd.f32 %v15112_v8, %v2306_v36  ;;  %v2935_v36 = vcombine.high %v13316_v29, %v13316_v29 }
 0x6db   :  { %v13979_v51 = vpop.f32.mrf.mxu1  ;;  %v13990_v52 = vpop.f32.mrf.mxu0 }
 0x6dc   :  { %v2382_v53 = vadd.f32 %v2381_v50, %v2237_v40  ;;  %v2391_v58 = vadd.f32 %v2390_v56, %v2307_v55  ;;  %v2942_v40 = vrot.slane %v13316_v29, %v15429_v9  ;;  %v2977_v50 = vld [vmem:[%s15434_s3 + $0x18] sm:$0xff]  ;;  %v4370_v29 = vld [vmem:[%s15495_s11] sm:$0xff] }
 0x6de   :  { %v13295_v54 = vmul.f32 -1.442695, %v2382_v53  ;;  %v13296_v41 = vmul.f32 -1.442695, %v2391_v58  ;;  %v3012_v53 = vrot.slane %v2996_v28, %v15429_v9  ;;  %v2949_v58 = vrot.slane %v2935_v36, %v15429_v9  ;;  %v4371_v28 = vld [vmem:[%s15495_s11 + $0x8] sm:$0xff]  ;;  %v4484_v36 = vld [vmem:[%s15519_s19 + $0x20] sm:$0xff] }
 0x6e0   :  { %14436 = vpow2.f32 %v13295_v54 }
 0x6e1   :  { %v2376_v57 = vpop.f32.mrf.mxu1  ;;  %14438 = vpow2.f32 %v13296_v41 }
 0x6e2   :  { %v2377_v38 = vadd.f32 %v15120_v23, %v2376_v57 }
 0x6e3   :  { %v14001_v39 = vpop.f32.mrf.mxu1 }
 0x6e4   :  { %v2976_v39 = vld [vmem:[%s15434_s3 + $0x10] sm:$0xff] }
 0x6ed   :  { %v14437_v42 = vpop.eup %14436 }
 0x6ee   :  { %v2386_v43 = vadd.f32 1.0, %v14437_v42  ;;  %v14439_v44 = vpop.eup %14438 }
 0x6ef   :  { %v2395_v46 = vadd.f32 1.0, %v14439_v44  ;;  %v2965_v44 = vrot.slane %v13317_v32, %v15429_v9  ;;  %v4486_v32 = vld [vmem:[%s15519_s19 + $0x30] sm:$0xff] }
 0x6f0   :  { %14440 = vrcp.f32 %v2386_v43  ;;  %v2950_v43 = vcombine.high %v2942_v40, %v2942_v40 }
 0x6f1   :  { %14442 = vrcp.f32 %v2395_v46  ;;  %v2973_v37 = vcombine.high %v2965_v44, %v2965_v44 }
 0x6f3   :  { %v3093_v13 = vcombine.low %v2972_v35, %v2973_v37  ;;  %v2684_v35 = vld [vmem:[#allocation2 + $0x2] sm:$0x3] }
 0x6fd   :  { %v14441_v48 = vpop.eup %14440 }
 0x6fe   :  { %v2400_v49 = vmul.f32 %v14441_v48, %v2377_v38  ;;  %v14443_v8 = vpop.eup %14442  ;;  %v3046_v48 = vcombine.low %v2942_v40, %v2949_v58  ;;  %v14801_v58 = vld [vmem:[%s15073_s25 + $0x1] ss:$0 sm:$0xff] }
 0x6ff   :  { %v2403_v45 = vsub.f32 1.0, %v14443_v8  ;;  %v2405_v63 = vmul.f32 %v14443_v8, %v15350_v21  ;;  %v2896_v21 = vrot.slane %v13314_v15, %v15429_v9  ;;  %v3047_v8 = vcombine.low %v2950_v43, %v2965_v44  ;;  %v2985_v15 = vld [vmem:[%s15434_s3 + $0x58] sm:$0xff] }
 0x700   :  { %v2401_v60 = vadd.f32 %v2400_v49, %v2399_v59  ;;  %v2975_v49 = vld [vmem:[%s15434_s3 + $0x8] sm:$0xff] }
 0x701   :  { %v2998_v51 = vcombine.low %v2896_v21, %v2903_v26  ;;  %v2904_v54 = vcombine.high %v2896_v21, %v2896_v21  ;;  %v2982_v21 = vld [vmem:[%s15434_s3 + $0x40] sm:$0xff]  ;;  %v4373_v26 = vld [vmem:[%s15495_s11 + $0x18] sm:$0xff] }
 0x702   :  { %14444 = vtanh.f32 %v2401_v60 }
 0x703   :  { %v3026_v41 = vrot.slane %v2998_v51, %v15429_v9  ;;  %v14800_v51 = vld [vmem:[%s15073_s25] ss:$0 sm:$0xff] }
 0x70f   :  { %v14445_v61 = vpop.eup %14444 }
 0x710   :  { %v2404_v62 = vmul.f32 %v14445_v61, %v2403_v45 }
 0x712   :  { %v2406_v47 = vadd.f32 %v2405_v63, %v2404_v62  ;;  %v3068_v62 = vrot.slane %v3046_v48, %v15429_v9  ;;  %v2974_v63 = vld [vmem:[%s15434_s3] sm:$0xff] }
 0x714   :  { %v2414_v4 = vmul.f32 %v2412_v1, %v2406_v47  ;;  %v3075_v1 = vrot.slane %v3047_v8, %v15429_v9 }
 0x716   :  { %2416 = vst.msk [vmem:[#allocation2 + $0xc] sm:$0x3] %vm316_vm2, %v2414_v4  ;;  %v15405_v23 = vadd.f32 %v2423_v6, %v2414_v4  ;;  %v3077_v7 = vcombine.low %v3068_v62, %v3075_v1  ;;  %v2657_v62 = vld [vmem:[#allocation5 + $0xe] sm:$0x3] }
 0x718   :  { %14011 = vmatmul.mubr.msk.f32.vlgmr.msra.gmra.mxu0 %vm192_vm0, %v15405_v23  ;;  %14022 = vmatmul.mubr.msk.f32.vlgmr.msra.gmra.mxu1 %vm192_vm0, %v15405_v23  ;;  %v3091_v12 = vrot.slane %v3077_v7, %v15429_v9 }
 0x719   :  { %14025 = vmatpush3.msra.mxu0 %v15357_v22  ;;  %14032 = vmatprep.mubr.msk.f32.mxu0 %vm14873_vm1, %v17637_v34  ;;  %v2880_v22 = vrot.slane %v2866_v16, %v15429_v9  ;;  %v3100_v16 = vrot.slane %v3093_v13, %v15429_v9  ;;  %v2670_v13 = vpop.permute.xlu0 %2669 }
 0x71a   :  { %14026 = vmatprep.subr.mxu0 %v17637_v34  ;;  %14036 = vmatpush3.msra.mxu1 %v2710_v20  ;;  %v2711_v20 = vrot.slane %v2684_v35, 7 }
 0x71b   :  { %14027 = vmatpush3.msra.mxu0 %v15365_v24  ;;  %v2881_v24 = vcombine.high %v2873_v17, %v2873_v17  ;;  %v2984_v17 = vld [vmem:[%s15434_s3 + $0x50] sm:$0xff] }
 0x71c   :  { %14028 = vmatprep.subr.mxu0 %v17637_v34 }
 0x71d   :  { %14029 = vmatpush3.msra.mxu0 %v15372_v25  ;;  %v13315_v25 = vld.sshfl [vmem:[%s13222_s29 + $0xc] sm:$0x13 pattern:$0x75316420]  ;;  %v2997_v31 = vcombine.low %v2880_v22, %v2881_v24  ;;  %v2709_v22 = vld [vmem:[%s13235_s7 + $0x10] sm:$0xff] }
 0x71e   :  { %14030 = vmatprep.subr.mxu0 %v17637_v34  ;;  %v2912_v30 = vcombine.high %v13315_v25, %v13315_v25  ;;  %v2919_v33 = vrot.slane %v13315_v25, %v15429_v9  ;;  %v2708_v24 = vld [vmem:[%s13235_s7 + $0x8] sm:$0xff]  ;;  %14037 = vmatprep.subr.mxu1 %v2709_v22  ;;  %v2707_v25 = vld [vmem:[%s13235_s7] sm:$0xff]  ;;  %s14894_s7 = smov 22  }
 0x71f   :  { %14031 = vmatpush3.msra.mxu0 %v15379_v27  ;;  %v2995_v27 = vcombine.low %v2850_v14, %v2857_v18  ;;  %v3019_v55 = vrot.slane %v2997_v31, %v15429_v9  ;;  %v15486_v18 = vrot.slane %v3100_v16, %v15429_v9  ;;  %14038 = vmatpush3.msra.mxu1 %v2709_v22  ;;  %v4487_v31 = vld [vmem:[%s15519_s19 + $0x38] sm:$0xff]  ;;  %s13240_s10 = sld [smem:[%s17636_s0 + %s14894_s7]]  }
 0x720   :  { %14033 = vmatmul.mubr.msk.f32.vlgmr.msra.gmra.mxu0 %vm192_vm0, %v15405_v23  ;;  %14046 = vmatprep.subr.mxu0 %v17637_v34  ;;  %v2926_v56 = vrot.slane %v2912_v30, %v15429_v9  ;;  %v2927_v57 = vcombine.high %v2919_v33, %v2919_v33  ;;  %v3044_v46 = vcombine.low %v2904_v54, %v2919_v33  ;;  %v4369_v30 = vld [vmem:[%s13225_s15] sm:$0x7]  ;;  %v4485_v33 = vld [vmem:[%s15519_s19 + $0x28] sm:$0xff] }
 0x721   :  { %14054 = vmatprep.mubr.msk.f32.mxu0 %vm14873_vm1, %v17637_v34  ;;  %v3005_v52 = vrot.slane %v2995_v27, %v15429_v9  ;;  %14047 = vmatpush3.msra.mxu0 %v2977_v50  ;;  %v3028_v59 = vcombine.low %v3019_v55, %v3026_v41  ;;  %v4372_v27 = vld [vmem:[%s15495_s11 + $0x10] sm:$0xff]  ;;  %v2648_v41 = vld [vmem:[#allocation4 + $0xe] sm:$0x3]  ;;  %s14895_s11 = smov 6  }
 0x722   :  { %14048 = vmatprep.subr.mxu0 %v17637_v34  ;;  %v3045_v38 = vcombine.low %v2926_v56, %v2927_v57  ;;  %v3054_v45 = vrot.slane %v3044_v46, %v15429_v9  ;;  %14039 = vmatprep.subr.mxu1 %v2708_v24  ;;  %s13224_s15 = sld [smem:[%s17636_s0 + %s14895_s11]]  }
 0x723   :  { %v3027_v42 = vcombine.low %v3005_v52, %v3012_v53  ;;  %14049 = vmatpush3.msra.mxu0 %v2976_v39  ;;  %v3042_v47 = vrot.slane %v3028_v59, %v15429_v9  ;;  %14040 = vmatpush3.msra.mxu1 %v2708_v24  ;;  %v2639_v53 = vld [vmem:[#allocation3 + $0xe] sm:$0x3] }
 0x724   :  { %14050 = vmatprep.subr.mxu0 %v17637_v34  ;;  %v3061_v61 = vrot.slane %v3045_v38, %v15429_v9  ;;  %14041 = vmatprep.subr.mxu1 %v2707_v25 }
 0x725   :  { %v3035_v60 = vrot.slane %v3027_v42, %v15429_v9  ;;  %14051 = vmatpush3.msra.mxu0 %v2975_v49  ;;  %14042 = vmatpush3.msra.mxu1 %v2707_v25 }
 0x726   :  { %14052 = vmatprep.subr.mxu0 %v17637_v34  ;;  %v3076_v4 = vcombine.low %v3054_v45, %v3061_v61  ;;  %14063 = vmatprep.subr.mxu1 %v17637_v34 }
 0x727   :  { %14053 = vmatpush3.msra.mxu0 %v2974_v63  ;;  %v15464_v6 = vcombine.low %v3035_v60, %v3042_v47  ;;  %v14802_v60 = vld [vmem:[%s15073_s25 + $0x2] ss:$0 sm:$0xff] }
 0x728   :  { %14080 = vmatprep.subr.mxu0 %v17637_v34  ;;  %v3084_v10 = vrot.slane %v3076_v4, %v15429_v9 }
 0x729   :  { %14055 = vmatmul.mubr.msk.f32.vlgmr.msra.gmra.mxu0 %vm192_vm0, %v15464_v6 }
 0x72a   :  { %14057 = vmatprep.mubr.msk.f32.mxu0 %vm14873_vm1, %v17637_v34  ;;  %v15474_v14 = vcombine.low %v3084_v10, %v3091_v12  ;;  %14081 = vmatpush3.msra.mxu0 %v2985_v15  ;;  %v2683_v10 = vld [vmem:[#allocation2] sm:$0x3]  ;;  %v2685_v12 = vld [vmem:[#allocation2 + $0x4] sm:$0x3]  ;;  %v2679_v15 = vpop.permute.xlu1 %2678 }
 0x72b   :  { %14082 = vmatprep.subr.mxu0 %v17637_v34  ;;  %v2681_v16 = vmul.f32 %v2679_v15, %v15405_v23  ;;  %v2714_v22 = vrot.slane %v2685_v12, 6  ;;  %v13305_v24 = vrot.slane %v2685_v12, 7  ;;  %v2979_v15 = vld [vmem:[%s15434_s3 + $0x28] sm:$0xff] }
 0x72c   :  { %14083 = vmatpush3.msra.mxu0 %v2984_v17 }
 0x72d   :  { %14058 = vmatmul.mubr.msk.f32.gmra.mxu0 %vm192_vm0, %v15474_v14  ;;  %14084 = vmatprep.subr.mxu0 %v17637_v34 }
 0x72e   :  { %14060 = vmatprep.mubr.msk.f32.mxu0 %vm14873_vm1, %v17637_v34  ;;  %14085 = vmatpush3.msra.mxu0 %v2983_v19  ;;  %v2686_v19 = vld [vmem:[#allocation2 + $0x6] sm:$0x3] }
 0x72f   :  { %14086 = vmatprep.subr.mxu0 %v17637_v34 }
 0x730   :  { %14087 = vmatpush3.msra.mxu0 %v2982_v21  ;;  %v2699_v21 = vrot.slane %v2683_v10, 1 }
 0x731   :  { %14061 = vmatmul.mubr.msk.f32.gmra.mxu0 %vm192_vm0, %v15486_v18  ;;  %14114 = vmatprep.subr.mxu0 %v17637_v34 }
 0x732   :  { %14088 = vmatprep.mubr.msk.f32.mxu0 %vm14873_vm1, %v17637_v34 }
 0x735   :  { %14089 = vmatmul.mubr.msk.f32.vlgmr.msra.gmra.mxu0 %vm192_vm0, %v15464_v6 }
 0x736   :  { %14091 = vmatprep.mubr.msk.f32.mxu0 %vm14873_vm1, %v17637_v34  ;;  %14115 = vmatpush3.msra.mxu0 %v4373_v26  ;;  %v2687_v26 = vld [vmem:[#allocation2 + $0x8] sm:$0x3] }
 0x737   :  { %14116 = vmatprep.subr.mxu0 %v17637_v34 }
 0x738   :  { %14117 = vmatpush3.msra.mxu0 %v4372_v27  ;;  %v15550_v27 = vsub.s32 0, %v14923_v5 }
 0x739   :  { %14092 = vmatmul.mubr.msk.f32.gmra.mxu0 %vm192_vm0, %v15474_v14  ;;  %14118 = vmatprep.subr.mxu0 %v17637_v34 }
 0x73a   :  { %14094 = vmatprep.mubr.msk.f32.mxu0 %vm14873_vm1, %v17637_v34  ;;  %14119 = vmatpush3.msra.mxu0 %v4371_v28  ;;  %v2688_v28 = vld [vmem:[#allocation2 + $0xa] sm:$0x3] }
 0x73b   :  { %14120 = vmatprep.subr.mxu0 %v17637_v34 }
 0x73c   :  { %14121 = vmatpush3.msra.mxu0 %v4370_v29  ;;  %v2717_v29 = vrot.slane %v2686_v19, 5 }
 0x73d   :  { %14095 = vmatmul.mubr.msk.f32.gmra.mxu0 %vm192_vm0, %v15486_v18  ;;  %14136 = vmatprep.subr.mxu0 %v17637_v34 }
 0x73e   :  { %14122 = vmatprep.mubr.msk.f32.mxu0 %vm14873_vm1, %v17637_v34 }
 0x741   :  { %14123 = vmatmul.mubr.msk.f32.vlgmr.msra.gmra.mxu0 %vm192_vm0, %v4369_v30  ;;  %v2732_v30 = vsel %vm2712_vm3, %v2684_v35, %v2699_v21  ;;  %v2978_v21 = vld [vmem:[%s15434_s3 + $0x20] sm:$0xff] }
 0x742   :  { %14137 = vmatpush3.msra.mxu0 %v4487_v31  ;;  %14144 = vmatprep.mubr.msk.f32.mxu0 %vm14873_vm1, %v17637_v34  ;;  %v2689_v31 = vld [vmem:[#allocation2 + $0xc] sm:$0x3] }
 0x743   :  { %14138 = vmatprep.subr.mxu0 %v17637_v34 }
 0x744   :  { %14139 = vmatpush3.msra.mxu0 %v4486_v32  ;;  %v2713_v32 = vsel %vm2712_vm3, %v2711_v20, %v2683_v10 }
 0x745   :  { %14140 = vmatprep.subr.mxu0 %v17637_v34 }
 0x746   :  { %14141 = vmatpush3.msra.mxu0 %v4485_v33  ;;  %v13306_v33 = vrot.slane %v2686_v19, 6 }
 0x747   :  { %14142 = vmatprep.subr.mxu0 %v17637_v34 }
 0x748   :  { %14143 = vmatpush3.msra.mxu0 %v4484_v36  ;;  %v2716_v36 = vsel %vm2715_vm4, %v2714_v22, %v2713_v32  ;;  %v4187_v32 = vld [vmem:[%s15578_s23 + $0x8] sm:$0xff] }
 0x7d8   :  { %v2494_v40 = vpop.f32.mrf.mxu0  ;;  %v2564_v50 = vpop.f32.mrf.mxu1 }
 0x7d9   :  { %v2495_v52 = vadd.f32 %v14800_v51, %v2494_v40  ;;  %v2565_v39 = vadd.f32 %v14801_v58, %v2564_v50  ;;  %v2720_v40 = vrot.slane %v2687_v26, 4  ;;  %v13307_v50 = vrot.slane %v2687_v26, 5 }
 0x7da   :  { %v14012_v54 = vpop.f32.mrf.mxu0  ;;  %v14023_v55 = vpop.f32.mrf.mxu1  ;;  %v2734_v51 = vsel %vm2715_vm4, %v13305_v24, %v2732_v30 }
 0x7db   :  { %v2640_v56 = vadd.f32 %v2639_v53, %v2495_v52  ;;  %v2649_v43 = vadd.f32 %v2648_v41, %v2565_v39  ;;  %v2723_v54 = vrot.slane %v2688_v28, 3  ;;  %v2719_v55 = vsel %vm2718_vm5, %v2717_v29, %v2716_v36  ;;  %v4483_v36 = vld [vmem:[%s15519_s19 + $0x18] sm:$0xff] }
 0x7dc   :  { %v2736_v58 = vsel %vm2718_vm5, %v13306_v33, %v2734_v51  ;;  %v4186_v33 = vld [vmem:[%s15578_s23] sm:$0xff]  ;;  %vm5726_vm5 = vcmask 64512  }
 0x7dd   :  { %v13301_v57 = vmul.f32 -1.442695, %v2640_v56  ;;  %v13302_v46 = vmul.f32 -1.442695, %v2649_v43  ;;  %v2726_v56 = vrot.slane %v2689_v31, 2  ;;  %v2722_v43 = vsel %vm2721_vm6, %v2720_v40, %v2719_v55  ;;  %v4482_v40 = vld [vmem:[%s15519_s19 + $0x10] sm:$0xff] }
 0x7de   :  { %v4480_v51 = vld [vmem:[%s15519_s19] sm:$0xff] }
 0x7df   :  { %14446 = vpow2.f32 %v13301_v57  ;;  %v13308_v57 = vrot.slane %v2688_v28, 4 }
 0x7e0   :  { %v2634_v42 = vpop.f32.mrf.mxu0  ;;  %14448 = vpow2.f32 %v13302_v46  ;;  %v2738_v46 = vsel %vm2721_vm6, %v13307_v50, %v2736_v58  ;;  %v4481_v50 = vld [vmem:[%s15519_s19 + $0x8] sm:$0xff]  ;;  %vm6607_vm6 = vcmask 18432  }
 0x7e1   :  { %v2635_v8 = vadd.f32 %v14802_v60, %v2634_v42 }
 0x7e2   :  { %v14034_v44 = vpop.f32.mrf.mxu0 }
 0x7e3   :  { %v13309_v44 = vrot.slane %v2689_v31, 3 }
 0x7ec   :  { %v14447_v38 = vpop.eup %14446 }
 0x7ed   :  { %v2644_v48 = vadd.f32 1.0, %v14447_v38  ;;  %v14449_v49 = vpop.eup %14448 }
 0x7ee   :  { %v2653_v59 = vadd.f32 1.0, %v14449_v49 }
 0x7ef   :  { %14450 = vrcp.f32 %v2644_v48  ;;  %v2725_v48 = vsel %vm2724_vm7, %v2723_v54, %v2722_v43  ;;  %v3180_v54 = vpop.f32.mrf.mxu0 }
 0x7f0   :  { %14452 = vrcp.f32 %v2653_v59  ;;  %v2728_v60 = vsel %vm2727_vm8, %v2726_v56, %v2725_v48 }
 0x7f1   :  { %v14056_v56 = vpop.f32.mrf.mxu0 }
 0x7fc   :  { %v14451_v45 = vpop.eup %14450 }
 0x7fd   :  { %v2658_v61 = vmul.f32 %v14451_v45, %v2635_v8  ;;  %v14453_v47 = vpop.eup %14452  ;;  %v2740_v8 = vsel %vm2724_vm7, %v13308_v57, %v2738_v46 }
 0x7fe   :  { %v2661_v1 = vsub.f32 1.0, %v14453_v47  ;;  %v2663_v4 = vmul.f32 %v14453_v47, %v15405_v23  ;;  %v2742_v47 = vsel %vm2727_vm8, %v13309_v44, %v2740_v8  ;;  %vm6149_vm8 = vcmask 1042432  }
 0x7ff   :  { %v2659_v63 = vadd.f32 %v2658_v61, %v2657_v62 }
 0x801   :  { %14454 = vtanh.f32 %v2659_v63 }
 0x80e   :  { %v14455_v2 = vpop.eup %14454 }
 0x80f   :  { %v2662_v7 = vmul.f32 %v14455_v2, %v2661_v1  ;;  %v2981_v1 = vld [vmem:[%s15434_s3 + $0x38] sm:$0xff] }
 0x811   :  { %v2664_v37 = vadd.f32 %v2663_v4, %v2662_v7 }
 0x813   :  { %v2672_v17 = vmul.f32 %v2670_v13, %v2664_v37  ;;  %v2980_v37 = vld [vmem:[%s15434_s3 + $0x30] sm:$0xff]  ;;  %s14904_s3 = smov 29  }
 0x814   :  { %s17549_s7 = sld [smem:[%s17636_s0 + %s14904_s3]]  }
 0x815   :  { %2674 = vst.msk [vmem:[#allocation2 + $0xe] sm:$0x3] %vm316_vm2, %v2672_v17  ;;  %v2682_v25 = vadd.f32 %v2681_v16, %v2672_v17 }
 0x817   :  { %v4519_v23 = vrot.slane %v2682_v25, %v15429_v9  ;;  %v4189_v25 = vld [vmem:[%s15578_s23 + $0x18] sm:$0xff] }
 0x819   :  { %v4520_v52 = vcombine.high %v4519_v23, %v4519_v23  ;;  %v4527_v53 = vrot.slane %v4519_v23, %v15429_v9  ;;  %v4188_v23 = vld [vmem:[%s15578_s23 + $0x10] sm:$0xff]  ;;  %s14891_s23 = smov 25  }
 0x81a   :  { %s16042_s26 = sld [smem:[%s17636_s0 + %s14891_s23]]   ;;  %s14899_s23 = smov 5  }
 0x81b   :  { %v4534_v39 = vrot.slane %v4520_v52, %v15429_v9  ;;  %v4538_v41 = vrot.slane %v4527_v53, %v15550_v27  ;;  %v4489_v52 = vld [vmem:[%s15519_s19 + $0x48] sm:$0xff]  ;;  %v13318_v53 = vld [vmem:[%s15678_s27] ss:$0 sm:$0xff] }
 0x81c   :  { %v2690_v42 = vld [vmem:[#allocation2 + $0xe] sm:$0x3]  ;;  %v3181_v55 = vadd.f32 %v13318_v53, %v3180_v54  ;;  %v13328_v54 = vld [vmem:[%s15678_s27 + $0x2] ss:$0 sm:$0xff] }
 0x81d   :  { %v2706_v38 = vrot.slane %v2690_v42, 1  ;;  %v4542_v49 = vrot.slane %v4534_v39, %v15550_v27  ;;  %v4549_v59 = vrot.slane %v4538_v41, %v15429_v9  ;;  %v3185_v39 = vpop.f32.mrf.mxu0 }
 0x81e   :  { %v3197_v57 = vcombine.high %v3181_v55, %v3181_v55  ;;  %v3204_v58 = vrot.slane %v3181_v55, %v15429_v9  ;;  %v3186_v44 = vadd.f32 %v13318_v53, %v3185_v39 }
 0x81f   :  { %v15566_v45 = vsel %vm2729_vm9, %v2706_v38, %v2728_v60  ;;  %v2743_v61 = vrot.slane %v2706_v38, 1  ;;  %v4550_v62 = vcombine.high %v4549_v59, %v4549_v59  ;;  %v15569_v63 = vrot.slane %v4549_v59, %v15429_v9  ;;  %v14059_v46 = vpop.f32.mrf.mxu0 }
 0x820   :  { %14043 = vmatprep.mubr.msk.f32.mxu1 %vm192_vm0, %v15566_v45  ;;  %v4572_v2 = vrot.slane %v4542_v49, %v15429_v9  ;;  %v3211_v41 = vrot.slane %v3197_v57, %v15429_v9  ;;  %v3212_v42 = vcombine.high %v3204_v58, %v3204_v58  ;;  %v3220_v43 = vrot.slane %v3204_v58, %v15429_v9 }
 0x821   :  { %v15582_v4 = vsel %vm2729_vm9, %v2743_v61, %v2742_v47  ;;  %v15585_v7 = vrot.slane %v4550_v62, %v15429_v9  ;;  %v15589_v35 = vcombine.high %v15569_v63, %v15569_v63  ;;  %v3246_v60 = vcombine.high %v3186_v44, %v3186_v44  ;;  %v3190_v61 = vpop.f32.mrf.mxu0 }
 0x822   :  { %14044 = vmatmul.mubr.msk.f32.vlgmr.msra.gmra.mxu1 %vm192_vm0, %v15582_v4  ;;  %v4573_v10 = vcombine.high %v4572_v2, %v4572_v2  ;;  %v15595_v12 = vrot.slane %v4572_v2, %v15429_v9  ;;  %v3213_v38 = vcombine.high %v3211_v41, %v3211_v41  ;;  %v3227_v48 = vrot.slane %v3211_v41, %v15429_v9 }
 0x823   :  { %14064 = vmatpush3.msra.mxu1 %v2981_v1  ;;  %14071 = vmatprep.mubr.msk.f32.mxu1 %vm14873_vm1, %v17637_v34  ;;  %v4601_v13 = vcombine.low %v15569_v63, %v15585_v7  ;;  %v3234_v49 = vrot.slane %v3212_v42, %v15429_v9  ;;  %v3242_v59 = vcombine.high %v3220_v43, %v3220_v43  ;;  %vm8042_vm9 = vcmask 23552  }
 0x824   :  { %14065 = vmatprep.subr.mxu1 %v17637_v34  ;;  %v15604_v16 = vrot.slane %v4573_v10, %v15429_v9  ;;  %v15608_v17 = vcombine.high %v15595_v12, %v15595_v12  ;;  %v4602_v19 = vcombine.low %v15589_v35, %v15595_v12  ;;  %v3253_v8 = vrot.slane %v3186_v44, %v15429_v9 }
 0x825   :  { %14066 = vmatpush3.msra.mxu1 %v2980_v37  ;;  %v4610_v20 = vrot.slane %v4601_v13, %v15429_v9  ;;  %v3241_v62 = vrot.slane %v3213_v38, %v15429_v9  ;;  %v3244_v47 = vcombine.high %v3234_v49, %v3234_v49  ;;  %v3317_v1 = vcombine.low %v3220_v43, %v3234_v49 }
 0x826   :  { %14067 = vmatprep.subr.mxu1 %v17637_v34  ;;  %v4603_v22 = vcombine.low %v15604_v16, %v15608_v17  ;;  %v4617_v24 = vrot.slane %v4602_v19, %v15429_v9  ;;  %v3331_v2 = vrot.slane %v3242_v59, %v15429_v9  ;;  %v3260_v37 = vrot.slane %v3246_v60, %v15429_v9  ;;  %v14062_v19 = vpop.f32.mrf.mxu0 }
 0x827   :  { %14068 = vmatpush3.msra.mxu1 %v2979_v15  ;;  %v3261_v10 = vcombine.high %v3253_v8, %v3253_v8  ;;  %v3269_v13 = vrot.slane %v3253_v8, %v15429_v9  ;;  %v3191_v15 = vadd.f32 %v13318_v53, %v3190_v61 }
 0x828   :  { %14069 = vmatprep.subr.mxu1 %v17637_v34  ;;  %v4624_v26 = vrot.slane %v4603_v22, %v15429_v9  ;;  %v4625_v28 = vcombine.low %v4610_v20, %v4617_v24  ;;  %v3324_v20 = vrot.slane %v3317_v1, %v15429_v9  ;;  %v3354_v22 = vrot.slane %v3241_v62, %v15429_v9 }
 0x829   :  { %14070 = vmatpush3.msra.mxu1 %v2978_v21  ;;  %v3340_v21 = vcombine.low %v3244_v47, %v3227_v48  ;;  %v13322_v24 = vcombine.high %v3227_v48, %v3241_v62  ;;  %v3301_v53 = vrot.slane %v3191_v15, %v15429_v9 }
 0x82a   :  { %14072 = vmatmul.mubr.msk.f32.vlgmr.msra.gmra.mxu1 %vm192_vm0, %v15464_v6  ;;  %14097 = vmatprep.subr.mxu1 %v17637_v34  ;;  %v4632_v29 = vrot.slane %v4625_v28, %v15429_v9  ;;  %v4639_v30 = vrot.slane %v4624_v26, %v15429_v9  ;;  %v3276_v26 = vrot.slane %v3260_v37, %v15429_v9 }
 0x82b   :  { %14098 = vmatpush3.msra.mxu1 %v4189_v25  ;;  %14074 = vmatprep.mubr.msk.f32.mxu1 %vm14873_vm1, %v17637_v34  ;;  %v3262_v25 = vcombine.high %v3260_v37, %v3260_v37  ;;  %v3283_v28 = vrot.slane %v3261_v10, %v15429_v9  ;;  %v3302_v44 = vcombine.high %v3301_v53, %v3301_v53 }
 0x82c   :  { %14099 = vmatprep.subr.mxu1 %v17637_v34  ;;  %v4640_v31 = vcombine.low %v4632_v29, %v4639_v30  ;;  %v3291_v29 = vcombine.high %v3269_v13, %v3269_v13  ;;  %v3899_v30 = vpop.f32.mrf.mxu0  ;;  %v3309_v48 = vrot.slane %v3301_v53, %v15429_v9 }
 0x82d   :  { %14100 = vmatpush3.msra.mxu1 %v4188_v23  ;;  %v3332_v23 = vcombine.low %v3324_v20, %v3331_v2  ;;  %v3900_v49 = vadd.f32 %v13328_v54, %v3899_v30  ;;  %v3316_v60 = vrot.slane %v3302_v44, %v15429_v9 }
 0x82e   :  { %14075 = vmatmul.mubr.msk.f32.gmra.mxu1 %vm192_vm0, %v15474_v14  ;;  %14145 = vmatmul.mubr.msk.f32.vlgmr.msra.gmra.mxu0 %vm192_vm0, %v4640_v31 }
 0x82f   :  { %14077 = vmatprep.mubr.msk.f32.mxu1 %vm14873_vm1, %v17637_v34  ;;  %14101 = vmatprep.subr.mxu1 %v17637_v34  ;;  %v3916_v1 = vcombine.high %v3900_v49, %v3900_v49  ;;  %v3446_v37 = vrot.slane %v3316_v60, %v15429_v9  ;;  %v3923_v10 = vrot.slane %v3900_v49, %v15429_v9 }
 0x830   :  { %14102 = vmatpush3.msra.mxu1 %v4187_v32  ;;  %5444 = vmatprep.mubr.f32.mxu0 %v17637_v34  ;;  %v3370_v32 = vrot.slane %v13322_v24, %v15429_v9 }
 0x831   :  { %14103 = vmatprep.subr.mxu1 %v17637_v34 }
 0x832   :  { %14078 = vmatmul.mubr.msk.f32.gmra.mxu1 %vm192_vm0, %v15486_v18 }
 0x833   :  { %14104 = vmatpush3.msra.mxu1 %v4186_v33  ;;  %14105 = vmatprep.mubr.msk.f32.mxu1 %vm14873_vm1, %v17637_v34  ;;  %v3377_v33 = vrot.slane %v3269_v13, %v15429_v9 }
 0x834   :  { %14125 = vmatprep.subr.mxu1 %v17637_v34 }
 0x836   :  { %14106 = vmatmul.mubr.msk.f32.vlgmr.msra.gmra.mxu1 %vm192_vm0, %v15464_v6  ;;  %v4491_v6 = vld [vmem:[%s15519_s19 + $0x58] sm:$0xff] }
 0x837   :  { %14126 = vmatpush3.msra.mxu1 %v4483_v36  ;;  %14108 = vmatprep.mubr.msk.f32.mxu1 %vm14873_vm1, %v17637_v34  ;;  %v3290_v36 = vrot.slane %v3262_v25, %v15429_v9  ;;  %v3931_v25 = vcombine.high %v3923_v10, %v3923_v10 }
 0x838   :  { %14127 = vmatprep.subr.mxu1 %v17637_v34 }
 0x839   :  { %14128 = vmatpush3.msra.mxu1 %v4482_v40  ;;  %v3292_v40 = vcombine.high %v3276_v26, %v3276_v26  ;;  %v3409_v57 = vcombine.low %v3276_v26, %v3290_v36  ;;  %v3294_v43 = vcombine.high %v3290_v36, %v3290_v36  ;;  %v3939_v26 = vrot.slane %v3923_v10, %v15429_v9 }
 0x83a   :  { %14109 = vmatmul.mubr.msk.f32.gmra.mxu1 %vm192_vm0, %v15474_v14  ;;  %14129 = vmatprep.subr.mxu1 %v17637_v34  ;;  %v4490_v14 = vld [vmem:[%s15519_s19 + $0x50] sm:$0xff] }
 0x83b   :  { %14111 = vmatprep.mubr.msk.f32.mxu1 %vm14873_vm1, %v17637_v34  ;;  %14130 = vmatpush3.msra.mxu1 %v4481_v50  ;;  %v3293_v50 = vcombine.high %v3283_v28, %v3283_v28  ;;  %v3423_v58 = vrot.slane %v3292_v40, %v15429_v9  ;;  %v3416_v38 = vrot.slane %v3409_v57, %v15429_v9 }
 0x83c   :  { %14131 = vmatprep.subr.mxu1 %v17637_v34  ;;  %v3432_v47 = vcombine.low %v3294_v43, %v3309_v48  ;;  %v3961_v36 = vcombine.high %v3939_v26, %v3939_v26 }
 0x83d   :  { %14132 = vmatpush3.msra.mxu1 %v4480_v51  ;;  %v3386_v51 = vcombine.low %v3283_v28, %v3291_v29  ;;  %v3400_v56 = vrot.slane %v3293_v50, %v15429_v9  ;;  %v3424_v62 = vcombine.low %v3416_v38, %v3423_v58 }
 0x83e   :  { %14112 = vmatmul.mubr.msk.f32.gmra.mxu1 %vm192_vm0, %v15486_v18  ;;  %14147 = vmatprep.subr.mxu1 %v17637_v34  ;;  %v4488_v18 = vld [vmem:[%s15519_s19 + $0x40] sm:$0xff]  ;;  %v3439_v20 = vrot.slane %v3432_v47, %v15429_v9 }
 0x83f   :  { %14133 = vmatprep.mubr.msk.f32.mxu1 %vm14873_vm1, %v17637_v34  ;;  %v3393_v55 = vrot.slane %v3386_v51, %v15429_v9  ;;  %v3431_v19 = vrot.slane %v3424_v62, %v15429_v9 }
 0x840   :  { %v3447_v30 = vcombine.low %v3439_v20, %v3446_v37 }
 0x841   :  { %v3401_v46 = vcombine.low %v3393_v55, %v3400_v56  ;;  %3466 = vst.msk [vmem:[#allocation6 + $0x10] sm:$0x7] %vm3461_vm10, %v3431_v19  ;;  %v4050_v55 = vrot.slane %v3961_v36, %v15429_v9  ;;  %v4501_v36 = vld [vmem:[%s15771_s1 + $0x30] sm:$0xff] }
 0x842   :  { %14134 = vmatmul.mubr.msk.f32.vlgmr.msra.gmra.mxu1 %vm192_vm0, %v4640_v31  ;;  %v3454_v51 = vrot.slane %v3447_v30, %v15429_v9 }
 0x843   :  { %14148 = vmatpush3.msra.mxu1 %v4491_v6  ;;  %14155 = vmatprep.mubr.msk.f32.mxu1 %vm14873_vm1, %v17637_v34  ;;  %v14090_v6 = vpop.f32.mrf.mxu0  ;;  %v3408_v61 = vrot.slane %v3401_v46, %v15429_v9 }
 0x844   :  { %14149 = vmatprep.subr.mxu1 %v17637_v34  ;;  %3467 = vst.msk [vmem:[#allocation6 + $0x14] sm:$0x7] %vm3461_vm10, %v3454_v51  ;;  %v4498_v51 = vld [vmem:[%s15771_s1 + $0x18] sm:$0xff] }
 0x845   :  { %14150 = vmatpush3.msra.mxu1 %v4490_v14  ;;  %v3339_v14 = vrot.slane %v3332_v23, %v15429_v9  ;;  %v3904_v39 = vpop.f32.mrf.mxu0  ;;  %3465 = vst.msk [vmem:[#allocation6 + $0xc] sm:$0x7] %vm3461_vm10, %v3408_v61 }
 0x846   :  { %14151 = vmatprep.subr.mxu1 %v17637_v34  ;;  %v3905_v8 = vadd.f32 %v13328_v54, %v3904_v39 }
 0x847   :  { %14152 = vmatpush3.msra.mxu1 %v4489_v52  ;;  %3462 = vst.msk [vmem:[#allocation6] sm:$0x7] %vm3461_vm10, %v3339_v14  ;;  %v14093_v59 = vpop.f32.mrf.mxu0 }
 0x848   :  { %14153 = vmatprep.subr.mxu1 %v17637_v34  ;;  %v3965_v13 = vcombine.high %v3905_v8, %v3905_v8  ;;  %v3972_v15 = vrot.slane %v3905_v8, %v15429_v9 }
 0x849   :  { %14154 = vmatpush3.msra.mxu1 %v4488_v18  ;;  %v3378_v18 = vcombine.low %v3370_v32, %v3377_v33  ;;  %v3909_v2 = vpop.f32.mrf.mxu0  ;;  %v3953_v33 = vrot.slane %v3931_v25, %v15429_v9 }
 0x84a   :  { %14156 = vmatmul.mubr.msk.f32.vlgmr.msra.gmra.mxu1 %vm192_vm0, %v4640_v31  ;;  %14158 = vmatprep.subr.mxu1 %v17637_v34  ;;  %v3347_v31 = vrot.slane %v3340_v21, %v15429_v9  ;;  %v3930_v21 = vrot.slane %v3916_v1, %v15429_v9  ;;  %v3979_v28 = vrot.slane %v3965_v13, %v15429_v9 }
 0x84b   :  { %14159 = vmatpush3.msra.mxu1 %v15566_v45  ;;  %14160 = vmatprep.mubr.msk.f32.mxu1 %vm14873_vm1, %v17637_v34  ;;  %v3385_v42 = vrot.slane %v3378_v18, %v15429_v9  ;;  %v14096_v24 = vpop.f32.mrf.mxu0  ;;  %v3980_v29 = vcombine.high %v3972_v15, %v3972_v15  ;;  %v3988_v32 = vrot.slane %v3972_v15, %v15429_v9 }
 0x84c   :  { %14163 = vmatprep.subr.mxu1 %v17637_v34  ;;  %v3355_v52 = vcombine.low %v3347_v31, %v3354_v22  ;;  %v3910_v22 = vadd.f32 %v13328_v54, %v3909_v2  ;;  %v3932_v23 = vcombine.high %v3930_v21, %v3930_v21  ;;  %v3946_v31 = vrot.slane %v3930_v21, %v15429_v9 }
 0x84d   :  { %3464 = vst.msk [vmem:[#allocation6 + $0x8] sm:$0x7] %vm3461_vm10, %v3385_v42  ;;  %v3981_v40 = vcombine.high %v3979_v28, %v3979_v28  ;;  %v3995_v50 = vrot.slane %v3979_v28, %v15429_v9  ;;  %v4002_v14 = vrot.slane %v3980_v29, %v15429_v9  ;;  %v15737_v18 = vpop.f32.mrf.mxu0  ;;  %v3963_v53 = vcombine.high %v3953_v33, %v3953_v33 }
 0x84e   :  { %v3362_v41 = vrot.slane %v3355_v52, %v15429_v9  ;;  %v3960_v6 = vrot.slane %v3932_v23, %v15429_v9  ;;  %v4010_v52 = vcombine.high %v3988_v32, %v3988_v32  ;;  %v4036_v54 = vcombine.low %v3939_v26, %v3953_v33  ;;  %v4502_v33 = vld [vmem:[%s15771_s1 + $0x38] sm:$0xff] }
 0x84f   :  { %v4009_v56 = vrot.slane %v3981_v40, %v15429_v9  ;;  %v4011_v39 = vcombine.high %v3995_v50, %v3995_v50  ;;  %v14124_v42 = vpop.f32.mrf.mxu0  ;;  %v4059_v44 = vcombine.low %v3963_v53, %v3946_v31  ;;  %v4096_v46 = vrot.slane %v3988_v32, %v15429_v9  ;;  %v4500_v40 = vld [vmem:[%s15771_s1 + $0x28] sm:$0xff]  ;;  %5404 = vmatprep.subr.mxu0 %v4502_v33 }
 0x850   :  { %3463 = vst.msk [vmem:[#allocation6 + $0x4] sm:$0x7] %vm3461_vm10, %v3362_v41  ;;  %v4073_v57 = vrot.slane %v3960_v6, %v15429_v9  ;;  %v13332_v58 = vcombine.high %v3946_v31, %v3960_v6  ;;  %v4012_v41 = vcombine.high %v4002_v14, %v4002_v14  ;;  %v4043_v43 = vrot.slane %v4036_v54, %v15429_v9  ;;  %v4497_v6 = vld [vmem:[%s15771_s1 + $0x10] sm:$0xff] }
 0x851   :  { %v4105_v38 = vcombine.low %v4002_v14, %v4010_v52  ;;  %v4128_v59 = vcombine.low %v3995_v50, %v4009_v56  ;;  %v4142_v60 = vrot.slane %v4011_v39, %v15429_v9  ;;  %v4066_v61 = vrot.slane %v4059_v44, %v15429_v9  ;;  %v4499_v50 = vld [vmem:[%s15771_s1 + $0x20] sm:$0xff]  ;;  %5405 = vmatpush1.msra.mxu0 %v4501_v36  ;;  %v4496_v14 = vld [vmem:[%s15771_s1 + $0x8] sm:$0xff] }
 0x852   :  { %v4089_v48 = vrot.slane %v13332_v58, %v15429_v9  ;;  %v4119_v49 = vrot.slane %v4012_v41, %v15429_v9  ;;  %v4051_v8 = vcombine.low %v4043_v43, %v4050_v55  ;;  %v4013_v2 = vcombine.high %v4009_v56, %v4009_v56  ;;  %5406 = vmatprep.subr.mxu0 %v4500_v40  ;;  %v4495_v52 = vld [vmem:[%s15771_s1] sm:$0xff] }
 0x853   :  { %v4112_v62 = vrot.slane %v4105_v38, %v15429_v9  ;;  %v4135_v1 = vrot.slane %v4128_v59, %v15429_v9  ;;  %v4020_v37 = vrot.slane %v3910_v22, %v15429_v9  ;;  %v4074_v13 = vcombine.low %v4066_v61, %v4073_v57  ;;  %5407 = vmatpush1.msra.mxu0 %v4499_v50  ;;  %v15786_v55 = vld [vmem:[%s15678_s27 + $0x1] ss:$0 sm:$0xff]  ;;  %s14892_s27 = smov 21  }
 0x854   :  { %v4097_v47 = vcombine.low %v4089_v48, %v4096_v46  ;;  %v4058_v10 = vrot.slane %v4051_v8, %v15429_v9  ;;  %5408 = vmatprep.subr.mxu0 %v4498_v51  ;;  %s13239_s30 = sld [smem:[%s17636_s0 + %s14892_s27]]  }
 0x855   :  { %v4120_v15 = vcombine.low %v4112_v62, %v4119_v49  ;;  %v4143_v20 = vcombine.low %v4135_v1, %v4142_v60  ;;  %v4021_v21 = vcombine.high %v4020_v37, %v4020_v37  ;;  %v4028_v24 = vrot.slane %v4020_v37, %v15429_v9  ;;  %5409 = vmatpush1.msra.mxu0 %v4497_v6  ;;  %s16354_s27 = sld [smem:[%s17636_s0 + %s14899_s23]]  }
 0x856   :  { %v4104_v19 = vrot.slane %v4097_v47, %v15429_v9  ;;  %v4081_v25 = vrot.slane %v4074_v13, %v15429_v9  ;;  %4180 = vst.msk [vmem:[#allocation8] sm:$0x7] %vm3461_vm10, %v4058_v10  ;;  %5410 = vmatprep.subr.mxu0 %v4496_v14 }
 0x857   :  { %v4127_v26 = vrot.slane %v4120_v15, %v15429_v9  ;;  %v4150_v28 = vrot.slane %v4143_v20, %v15429_v9  ;;  %v4035_v22 = vrot.slane %v4021_v21, %v15429_v9  ;;  %v4151_v29 = vcombine.low %v4013_v2, %v4028_v24  ;;  %5411 = vmatpush1.msra.mxu0 %v4495_v52 }
 0x858   :  { %4182 = vst.msk [vmem:[#allocation8 + $0x8] sm:$0x7] %vm3461_vm10, %v4104_v19  ;;  %4181 = vst.msk [vmem:[#allocation8 + $0x4] sm:$0x7] %vm3461_vm10, %v4081_v25 }
 0x859   :  { %4183 = vst.msk [vmem:[#allocation8 + $0xc] sm:$0x7] %vm3461_vm10, %v4127_v26  ;;  %4184 = vst.msk [vmem:[#allocation8 + $0x10] sm:$0x7] %vm3461_vm10, %v4150_v28  ;;  %v4158_v30 = vrot.slane %v4151_v29, %v15429_v9  ;;  %v4165_v23 = vrot.slane %v4035_v22, %v15429_v9 }
 0x85b   :  { %v4166_v31 = vcombine.low %v4158_v30, %v4165_v23 }
 0x85d   :  { %v4173_v32 = vrot.slane %v4166_v31, %v15429_v9 }
 0x85f   :  { %4185 = vst.msk [vmem:[#allocation8 + $0x14] sm:$0x7] %vm3461_vm10, %v4173_v32 }
 0x8e2   :  { %v15781_v53 = vpop.f32.mrf.mxu1 }
 0x8e4   :  { %v15783_v54 = vpop.f32.mrf.mxu1 }
 0x8ea   :  { %v3540_v56 = vpop.f32.mrf.mxu1 }
 0x8eb   :  { %v3541_v57 = vadd.f32 %v15786_v55, %v3540_v56 }
 0x8ec   :  { %v14073_v58 = vpop.f32.mrf.mxu1 }
 0x8ed   :  { %v3557_v39 = vcombine.high %v3541_v57, %v3541_v57  ;;  %v3564_v41 = vrot.slane %v3541_v57, %v15429_v9 }
 0x8ee   :  { %v3545_v42 = vpop.f32.mrf.mxu1  ;;  %v15790_v43 = vpop.f32.mrf.mxu0 }
 0x8ef   :  { %v3571_v44 = vrot.slane %v3557_v39, %v15429_v9  ;;  %v3572_v46 = vcombine.high %v3564_v41, %v3564_v41  ;;  %v3580_v38 = vrot.slane %v3564_v41, %v15429_v9  ;;  %v3546_v48 = vadd.f32 %v15786_v55, %v3545_v42 }
 0x8f0   :  { %v14076_v49 = vpop.f32.mrf.mxu1  ;;  %v14146_v59 = vpop.f32.mrf.mxu0 }
 0x8f1   :  { %v3573_v60 = vcombine.high %v3571_v44, %v3571_v44  ;;  %v3594_v8 = vrot.slane %v3572_v46, %v15429_v9  ;;  %v3602_v61 = vcombine.high %v3580_v38, %v3580_v38  ;;  %v3606_v62 = vcombine.high %v3546_v48, %v3546_v48 }
 0x8f2   :  { %v3613_v47 = vrot.slane %v3546_v48, %v15429_v9  ;;  %v3550_v1 = vpop.f32.mrf.mxu1  ;;  %v3587_v2 = vrot.slane %v3571_v44, %v15429_v9 }
 0x8f3   :  { %v3601_v37 = vrot.slane %v3573_v60, %v15429_v9  ;;  %v3604_v10 = vcombine.high %v3594_v8, %v3594_v8  ;;  %v3677_v13 = vcombine.low %v3580_v38, %v3594_v8  ;;  %v3691_v15 = vrot.slane %v3602_v61, %v15429_v9 }
 0x8f4   :  { %v3620_v19 = vrot.slane %v3606_v62, %v15429_v9  ;;  %v3621_v20 = vcombine.high %v3613_v47, %v3613_v47  ;;  %v3629_v21 = vrot.slane %v3613_v47, %v15429_v9  ;;  %v14079_v24 = vpop.f32.mrf.mxu1  ;;  %v3551_v61 = vadd.f32 %v15786_v55, %v3550_v1 }
 0x8f5   :  { %v3684_v25 = vrot.slane %v3677_v13, %v15429_v9  ;;  %v3700_v26 = vcombine.low %v3604_v10, %v3587_v2  ;;  %v3714_v28 = vrot.slane %v3601_v37, %v15429_v9  ;;  %v13327_v22 = vcombine.high %v3587_v2, %v3601_v37 }
 0x8f6   :  { %v3622_v29 = vcombine.high %v3620_v19, %v3620_v19  ;;  %v3636_v30 = vrot.slane %v3620_v19, %v15429_v9  ;;  %v3643_v23 = vrot.slane %v3621_v20, %v15429_v9  ;;  %v3651_v31 = vcombine.high %v3629_v21, %v3629_v21  ;;  %v4256_v32 = vpop.f32.mrf.mxu1 }
 0x8f7   :  { %v3692_v33 = vcombine.low %v3684_v25, %v3691_v15  ;;  %v3707_v36 = vrot.slane %v3700_v26, %v15429_v9  ;;  %v3730_v40 = vrot.slane %v13327_v22, %v15429_v9  ;;  %v3737_v50 = vrot.slane %v3629_v21, %v15429_v9 }
 0x8f8   :  { %v3650_v51 = vrot.slane %v3622_v29, %v15429_v9  ;;  %v3652_v6 = vcombine.high %v3636_v30, %v3636_v30  ;;  %v3653_v14 = vcombine.high %v3643_v23, %v3643_v23  ;;  %v3746_v52 = vcombine.low %v3643_v23, %v3651_v31  ;;  %v14107_v56 = vpop.f32.mrf.mxu1 }
 0x8f9   :  { %v3699_v57 = vrot.slane %v3692_v33, %v15429_v9  ;;  %v3715_v58 = vcombine.low %v3707_v36, %v3714_v28  ;;  %v3738_v39 = vcombine.low %v3730_v40, %v3737_v50  ;;  %v4273_v2 = vcombine.high %v4256_v32, %v4256_v32 }
 0x8fa   :  { %v3753_v41 = vrot.slane %v3746_v52, %v15429_v9  ;;  %v3760_v42 = vrot.slane %v3653_v14, %v15429_v9  ;;  %v3769_v44 = vcombine.low %v3636_v30, %v3650_v51  ;;  %v4261_v46 = vpop.f32.mrf.mxu1  ;;  %v3783_v60 = vrot.slane %v3652_v6, %v15429_v9  ;;  %v13342_v52 = vld [vmem:[%s15829_s5 + $0x1] ss:$0 sm:$0xff] }
 0x8fb   :  { %v3722_v38 = vrot.slane %v3715_v58, %v15429_v9  ;;  %3821 = vst.msk [vmem:[#allocation7] sm:$0x7] %vm3461_vm10, %v3699_v57  ;;  %v3745_v48 = vrot.slane %v3738_v39, %v15429_v9  ;;  %v3654_v10 = vcombine.high %v3650_v51, %v3650_v51  ;;  %v3661_v13 = vrot.slane %v3551_v61, %v15429_v9  ;;  %v13346_v39 = vld.sshfl [vmem:[#allocation6] sm:$0x13 pattern:$0x75316420] }
 0x8fc   :  { %v3761_v49 = vcombine.low %v3753_v41, %v3760_v42  ;;  %v3776_v59 = vrot.slane %v3769_v44, %v15429_v9  ;;  %v14110_v8 = vpop.f32.mrf.mxu1  ;;  %v4280_v15 = vrot.slane %v4256_v32, %v14931_v11  ;;  %v4290_v19 = vcombine.high %v4261_v46, %v4261_v46  ;;  %v13340_v42 = vld [vmem:[%s15829_s5] ss:$0 sm:$0xff]  ;;  %v13347_v61 = vld.sshfl [vmem:[#allocation6 + $0x4] sm:$0x13 pattern:$0x75316420] }
 0x8fd   :  { %3822 = vst.msk [vmem:[#allocation7 + $0x4] sm:$0x7] %vm3461_vm10, %v3722_v38  ;;  %3823 = vst.msk [vmem:[#allocation7 + $0x8] sm:$0x7] %vm3461_vm10, %v3745_v48  ;;  %v4287_v55 = vrot.slane %v4273_v2, %v14931_v11  ;;  %v4297_v1 = vrot.slane %v4261_v46, %v14931_v11  ;;  %v3662_v24 = vcombine.high %v3661_v13, %v3661_v13 }
 0x8fe   :  { %v3768_v62 = vrot.slane %v3761_v49, %v15429_v9  ;;  %v3784_v47 = vcombine.low %v3776_v59, %v3783_v60  ;;  %v4266_v37 = vpop.f32.mrf.mxu1  ;;  %v3669_v25 = vrot.slane %v3661_v13, %v15429_v9  ;;  %v4288_v26 = vcombine.high %v4280_v15, %v4280_v15 }
 0x8ff   :  { %v4289_v28 = vcombine.high %v4287_v55, %v4287_v55  ;;  %v3676_v29 = vrot.slane %v3662_v24, %v15429_v9  ;;  %v4304_v23 = vrot.slane %v4290_v19, %v14931_v11  ;;  %v4305_v32 = vcombine.high %v4297_v1, %v4297_v1 }
 0x900   :  { %v3791_v20 = vrot.slane %v3784_v47, %v15429_v9  ;;  %3824 = vst.msk [vmem:[#allocation7 + $0xc] sm:$0x7] %vm3461_vm10, %v3768_v62  ;;  %v14113_v21 = vpop.f32.mrf.mxu1  ;;  %v3792_v30 = vcombine.low %v3654_v10, %v3669_v25  ;;  %v4314_v31 = vcombine.low %v4280_v15, %v4288_v26  ;;  %v4328_v36 = vrot.slane %v4287_v55, %v14931_v11 }
 0x901   :  { %v3806_v50 = vrot.slane %v3676_v29, %v15429_v9  ;;  %v4330_v6 = vcombine.low %v4289_v28, %v4297_v1  ;;  %v4306_v14 = vcombine.high %v4304_v23, %v4304_v23  ;;  %v4344_v58 = vrot.slane %v4305_v32, %v14931_v11 }
 0x902   :  { %3825 = vst.msk [vmem:[#allocation7 + $0x10] sm:$0x7] %vm3461_vm10, %v3791_v20  ;;  %v4709_v22 = vpop.f32.mrf.mxu1  ;;  %v3799_v40 = vrot.slane %v3792_v30, %v15429_v9  ;;  %v4321_v51 = vrot.slane %v4314_v31, %v14931_v11  ;;  %v4313_v41 = vrot.slane %v4266_v37, %v14931_v11  ;;  %v4786_v48 = vadd.f32 %v13342_v52, %v15790_v43  ;;  %v13354_v25 = vld.sshfl [vmem:[#allocation7] sm:$0x13 pattern:$0x75316420] }
 0x903   :  { %v4337_v46 = vrot.slane %v4330_v6, %v14931_v11  ;;  %v4346_v49 = vcombine.low %v4304_v23, %v4306_v14  ;;  %v4876_v59 = vcombine.high %v13346_v39, %v13346_v39  ;;  %v4710_v8 = vadd.f32 %v13340_v42, %v4709_v22 }
 0x904   :  { %v14135_v33 = vpop.f32.mrf.mxu1  ;;  %v3807_v56 = vcombine.low %v3799_v40, %v3806_v50  ;;  %v4329_v57 = vcombine.low %v4321_v51, %v4328_v36  ;;  %v4883_v62 = vrot.slane %v13346_v39, %v15429_v9  ;;  %v4360_v37 = vrot.slane %v4313_v41, %v14931_v11 }
 0x905   :  { %v4345_v60 = vcombine.low %v4337_v46, %v4344_v58  ;;  %v4353_v2 = vrot.slane %v4346_v49, %v14931_v11  ;;  %v4922_v10 = vcombine.high %v4710_v8, %v4710_v8  ;;  %v4929_v13 = vrot.slane %v4710_v8, %v15429_v9  ;;  %v13355_v58 = vld.sshfl [vmem:[#allocation7 + $0x4] sm:$0x13 pattern:$0x75316420] }
 0x906   :  { %v3814_v44 = vrot.slane %v3807_v56, %v15429_v9  ;;  %4366 = vst.msk [vmem:[#allocation9] sm:$0x3f] %vm4365_vm11, %v4329_v57  ;;  %v5081_v43 = vrot.slane %v4786_v48, %v15429_v9  ;;  %v4890_v19 = vrot.slane %v4876_v59, %v15429_v9  ;;  %v4899_v20 = vcombine.high %v13347_v61, %v13347_v61 }
 0x907   :  { %4367 = vst.msk [vmem:[#allocation9 + $0x8] sm:$0x3f] %vm4365_vm11, %v4345_v60  ;;  %v4361_v15 = vcombine.low %v4353_v2, %v4360_v37  ;;  %v4891_v55 = vcombine.high %v4883_v62, %v4883_v62  ;;  %v4936_v1 = vrot.slane %v4922_v10, %v15429_v9  ;;  %v4937_v21 = vcombine.high %v4929_v13, %v4929_v13 }
 0x908   :  { %3826 = vst.msk [vmem:[#allocation7 + $0x14] sm:$0x7] %vm3461_vm10, %v3814_v44  ;;  %v4945_v24 = vrot.slane %v4929_v13, %v15429_v9  ;;  %v4906_v11 = vrot.slane %v13347_v61, %v15429_v9  ;;  %v5089_v29 = vcombine.high %v5081_v43, %v5081_v43  ;;  %v4913_v30 = vrot.slane %v4899_v20, %v15429_v9 }
 0x909   :  { %4368 = vst.msk [vmem:[#allocation9 + $0x10] sm:$0x3f] %vm4365_vm11, %v4361_v15  ;;  %v4938_v26 = vcombine.high %v4936_v1, %v4936_v1  ;;  %v4959_v28 = vrot.slane %v4937_v21, %v15429_v9  ;;  %v5028_v31 = vcombine.high %v13354_v25, %v13354_v25  ;;  %v5035_v40 = vrot.slane %v13354_v25, %v15429_v9 }
 0x90a   :  { %v15848_v38 = vpop.f32.mrf.mxu1  ;;  %v4967_v22 = vcombine.high %v4945_v24, %v4945_v24  ;;  %v4975_v23 = vadd.f32 %v4945_v24, %v4883_v62  ;;  %v4914_v50 = vcombine.high %v4906_v11, %v4906_v11  ;;  %v4952_v51 = vrot.slane %v4936_v1, %v15429_v9 }
 0x90b   :  { %v4968_v32 = vcombine.high %v4959_v28, %v4959_v28  ;;  %v4976_v33 = vadd.f32 %v4959_v28, %v4890_v19  ;;  %v5074_v14 = vcombine.high %v4786_v48, %v4786_v48  ;;  %v4966_v52 = vrot.slane %v4938_v26, %v15429_v9 }
 0x90c   :  { %v14157_v47 = vpop.f32.mrf.mxu1  ;;  %v4977_v36 = vadd.f32 %v4967_v22, %v4891_v55  ;;  %v13348_v6 = vmul.f32 -1.442695, %v4975_v23  ;;  %v5097_v39 = vrot.slane %v5081_v43, %v15429_v9  ;;  %v5042_v41 = vrot.slane %v5028_v31, %v15429_v9  ;;  %v13344_v31 = vld [vmem:[%s15829_s5 + $0x2] ss:$0 sm:$0xff] }
 0x90d   :  { %v13349_v56 = vmul.f32 -1.442695, %v4976_v33  ;;  %v5111_v42 = vrot.slane %v5089_v29, %v15429_v9  ;;  %v4978_v44 = vadd.f32 %v4968_v32, %v4906_v11  ;;  %v5043_v46 = vcombine.high %v5035_v40, %v5035_v40 }
 0x90e   :  { %v13350_v57 = vmul.f32 -1.442695, %v4977_v36  ;;  %14456 = vpow2.f32 %v13348_v6  ;;  %v4979_v49 = vadd.f32 %v4952_v51, %v4913_v30  ;;  %v5058_v59 = vrot.slane %v13355_v58, %v15429_v9 }
 0x90f   :  { %14458 = vpow2.f32 %v13349_v56  ;;  %v5088_v48 = vrot.slane %v5074_v14, %v15429_v9  ;;  %v4980_v60 = vadd.f32 %v4966_v52, %v4914_v50  ;;  %v5051_v8 = vcombine.high %v13355_v58, %v13355_v58 }
 0x910   :  { %14460 = vpow2.f32 %v13350_v57  ;;  %v5119_v61 = vcombine.high %v5097_v39, %v5097_v39  ;;  %v5127_v62 = vadd.f32 %v5097_v39, %v5035_v40  ;;  %v5120_v47 = vcombine.high %v5111_v42, %v5111_v42  ;;  %v13362_v39 = vld.sshfl [vmem:[#allocation8] sm:$0x13 pattern:$0x75316420] }
 0x911   :  { %v5128_v2 = vadd.f32 %v5111_v42, %v5042_v41  ;;  %v13351_v37 = vmul.f32 -1.442695, %v4978_v44  ;;  %v13352_v13 = vmul.f32 -1.442695, %v4979_v49  ;;  %v5090_v43 = vcombine.high %v5088_v48, %v5088_v48 }
 0x912   :  { %v5129_v10 = vadd.f32 %v5119_v61, %v5043_v46  ;;  %v5130_v15 = vadd.f32 %v5120_v47, %v5058_v59  ;;  %v13353_v19 = vmul.f32 -1.442695, %v4980_v60  ;;  %v5065_v20 = vrot.slane %v5051_v8, %v15429_v9 }
 0x913   :  { %v13356_v55 = vmul.f32 -1.442695, %v5127_v62  ;;  %v5066_v1 = vcombine.high %v5058_v59, %v5058_v59  ;;  %v13357_v21 = vmul.f32 -1.442695, %v5128_v2  ;;  %14462 = vpow2.f32 %v13351_v37 }
 0x914   :  { %v5104_v24 = vrot.slane %v5088_v48, %v15429_v9  ;;  %v13358_v25 = vmul.f32 -1.442695, %v5129_v10  ;;  %14464 = vpow2.f32 %v13352_v13  ;;  %v5118_v11 = vrot.slane %v5090_v43, %v15429_v9 }
 0x915   :  { %v13359_v26 = vmul.f32 -1.442695, %v5130_v15  ;;  %14466 = vpow2.f32 %v13353_v19  ;;  %v4862_v51 = vadd.f32 %v13344_v31, %v15848_v38  ;;  %v5180_v59 = vcombine.high %v13362_v39, %v13362_v39 }
 0x916   :  { %v5131_v28 = vadd.f32 %v5104_v24, %v5065_v20  ;;  %14468 = vpow2.f32 %v13356_v55  ;;  %v5132_v29 = vadd.f32 %v5118_v11, %v5066_v1  ;;  %v5187_v62 = vrot.slane %v13362_v39, %v15429_v9  ;;  %v13363_v24 = vld.sshfl [vmem:[#allocation8 + $0x4] sm:$0x13 pattern:$0x75316420] }
 0x917   :  { %14470 = vpow2.f32 %v13357_v21  ;;  %v5233_v6 = vrot.slane %v4862_v51, %v15429_v9  ;;  %v5226_v48 = vcombine.high %v4862_v51, %v4862_v51  ;;  %v5194_v15 = vrot.slane %v5180_v59, %v15429_v9 }
 0x918   :  { %14472 = vpow2.f32 %v13358_v25  ;;  %v13360_v36 = vmul.f32 -1.442695, %v5131_v28  ;;  %v13361_v50 = vmul.f32 -1.442695, %v5132_v29  ;;  %v5195_v25 = vcombine.high %v5187_v62, %v5187_v62 }
 0x919   :  { %14474 = vpow2.f32 %v13359_v26  ;;  %v5241_v44 = vcombine.high %v5233_v6, %v5233_v6  ;;  %v5249_v49 = vrot.slane %v5233_v6, %v15429_v9  ;;  %v5240_v19 = vrot.slane %v5226_v48, %v15429_v9 }
 0x91a   :  { %v5203_v31 = vcombine.high %v13363_v24, %v13363_v24 }
 0x91b   :  { %v14457_v22 = vpop.eup %14456  ;;  %v5263_v47 = vrot.slane %v5241_v44, %v15429_v9  ;;  %v5271_v10 = vcombine.high %v5249_v49, %v5249_v49  ;;  %v5242_v29 = vcombine.high %v5240_v19, %v5240_v19 }
 0x91c   :  { %v14459_v30 = vpop.eup %14458  ;;  %v4999_v23 = vadd.f32 1.0, %v14457_v22 }
 0x91d   :  { %v14461_v32 = vpop.eup %14460  ;;  %v5000_v33 = vadd.f32 1.0, %v14459_v30  ;;  %v5270_v6 = vrot.slane %v5242_v29, %v15429_v9 }
 0x91e   :  { %v5001_v40 = vadd.f32 1.0, %v14461_v32  ;;  %14476 = vrcp.f32 %v4999_v23 }
 0x91f   :  { %14478 = vrcp.f32 %v5000_v33  ;;  %v5210_v33 = vrot.slane %v13363_v24, %v15429_v9 }
 0x920   :  { %14480 = vrcp.f32 %v5001_v40  ;;  %v14463_v14 = vpop.eup %14462 }
 0x921   :  { %14482 = vpow2.f32 %v13360_v36  ;;  %v14465_v52 = vpop.eup %14464  ;;  %v5002_v56 = vadd.f32 1.0, %v14463_v14  ;;  %v5272_v36 = vcombine.high %v5263_v47, %v5263_v47 }
 0x922   :  { %14484 = vpow2.f32 %v13361_v50  ;;  %v14467_v57 = vpop.eup %14466  ;;  %v5003_v58 = vadd.f32 1.0, %v14465_v52  ;;  %v5256_v50 = vrot.slane %v5240_v19, %v15429_v9 }
 0x923   :  { %v14469_v41 = vpop.eup %14468  ;;  %v5004_v42 = vadd.f32 1.0, %v14467_v57  ;;  %14486 = vrcp.f32 %v5002_v56  ;;  %v5217_v56 = vrot.slane %v5203_v31, %v15429_v9 }
 0x924   :  { %v14471_v46 = vpop.eup %14470  ;;  %14488 = vrcp.f32 %v5003_v58  ;;  %v5151_v37 = vadd.f32 1.0, %v14469_v41  ;;  %v5218_v58 = vcombine.high %v5210_v33, %v5210_v33 }
 0x925   :  { %v14473_v38 = vpop.eup %14472  ;;  %14490 = vrcp.f32 %v5004_v42  ;;  %v5152_v61 = vadd.f32 1.0, %v14471_v46 }
 0x926   :  { %v14475_v60 = vpop.eup %14474  ;;  %v5153_v55 = vadd.f32 1.0, %v14473_v38 }
 0x927   :  { %14492 = vrcp.f32 %v5152_v61  ;;  %v5154_v22 = vadd.f32 1.0, %v14475_v60 }
 0x928   :  { %14494 = vrcp.f32 %v5151_v37 }
 0x92b   :  { %v14477_v8 = vpop.eup %14476 }
 0x92c   :  { %v14479_v2 = vpop.eup %14478  ;;  %v5279_v13 = vmul.f32 %v14477_v8, %v5249_v49 }
 0x92d   :  { %v14481_v43 = vpop.eup %14480  ;;  %v5280_v20 = vmul.f32 %v14479_v2, %v5263_v47 }
 0x92e   :  { %v5281_v1 = vmul.f32 %v14481_v43, %v5271_v10  ;;  %v14483_v21 = vpop.eup %14482  ;;  %v5285_v11 = vadd.f32 %v5279_v13, %v5187_v62 }
 0x92f   :  { %v5286_v26 = vadd.f32 %v5280_v20, %v5194_v15  ;;  %v14485_v28 = vpop.eup %14484  ;;  %v5155_v23 = vadd.f32 1.0, %v14483_v21 }
 0x930   :  { %v5287_v30 = vadd.f32 %v5281_v1, %v5195_v25  ;;  %v5156_v32 = vadd.f32 1.0, %v14485_v28  ;;  %v14487_v40 = vpop.eup %14486 }
 0x931   :  { %14496 = vtanh.f32 %v5286_v26  ;;  %v14489_v51 = vpop.eup %14488  ;;  %v5282_v14 = vmul.f32 %v14487_v40, %v5272_v36 }
 0x932   :  { %14498 = vrcp.f32 %v5153_v55  ;;  %v14491_v52 = vpop.eup %14490  ;;  %v5283_v57 = vmul.f32 %v14489_v51, %v5256_v50 }
 0x933   :  { %14500 = vtanh.f32 %v5285_v11  ;;  %v5284_v39 = vmul.f32 %v14491_v52, %v5270_v6  ;;  %v5288_v41 = vadd.f32 %v5282_v14, %v5210_v33 }
 0x934   :  { %14502 = vrcp.f32 %v5154_v22  ;;  %v5289_v42 = vadd.f32 %v5283_v57, %v5217_v56  ;;  %v14493_v46 = vpop.eup %14492  ;;  %v15926_v56 = vsub.s32 1, %v14923_v5  ;;  %v15928_v57 = vld [vmem:[%s13242_s9] sm:$0x3] }
 0x935   :  { %14504 = vtanh.f32 %v5287_v30  ;;  %v5290_v44 = vadd.f32 %v5284_v39, %v5218_v58  ;;  %v14495_v49 = vpop.eup %14494  ;;  %v5298_v48 = vsub.f32 1.0, %v14493_v46  ;;  %v5310_v13 = vmul.f32 %v14493_v46, %v15585_v7 }
 0x936   :  { %14506 = vrcp.f32 %v5155_v23  ;;  %v5297_v61 = vsub.f32 1.0, %v14495_v49  ;;  %v5309_v20 = vmul.f32 %v14495_v49, %v15569_v63  ;;  %v15932_v58 = vrot.slane %v15928_v57, %v15926_v56 }
 0x937   :  { %14508 = vrcp.f32 %v5156_v32 }
 0x938   :  { %14510 = vtanh.f32 %v5288_v41 }
 0x939   :  { %14512 = vtanh.f32 %v5289_v42 }
 0x93a   :  { %14514 = vtanh.f32 %v5290_v44 }
 0x93e   :  { %v14497_v38 = vpop.eup %14496 }
 0x93f   :  { %v14499_v59 = vpop.eup %14498  ;;  %v5304_v62 = vmul.f32 %v14497_v38, %v5298_v48 }
 0x940   :  { %v14501_v60 = vpop.eup %14500  ;;  %v5299_v10 = vsub.f32 1.0, %v14499_v59  ;;  %v5311_v24 = vmul.f32 %v14499_v59, %v15589_v35 }
 0x941   :  { %v14503_v8 = vpop.eup %14502  ;;  %v5303_v37 = vmul.f32 %v14501_v60, %v5297_v61  ;;  %v15890_v55 = vadd.f32 %v5310_v13, %v5304_v62 }
 0x942   :  { %v14505_v47 = vpop.eup %14504  ;;  %v5300_v15 = vsub.f32 1.0, %v14503_v8  ;;  %v5312_v28 = vmul.f32 %v14503_v8, %v15595_v12 }
 0x943   :  { %v14507_v2 = vpop.eup %14506  ;;  %v5305_v19 = vmul.f32 %v14505_v47, %v5299_v10  ;;  %v15894_v22 = vadd.f32 %v5309_v20, %v5303_v37 }
 0x944   :  { %v14509_v43 = vpop.eup %14508  ;;  %v5301_v21 = vsub.f32 1.0, %v14507_v2  ;;  %v5313_v30 = vmul.f32 %v14507_v2, %v15604_v16 }
 0x945   :  { %v14511_v1 = vpop.eup %14510  ;;  %v5302_v11 = vsub.f32 1.0, %v14509_v43  ;;  %v5314_v23 = vmul.f32 %v14509_v43, %v15608_v17  ;;  %v15898_v31 = vadd.f32 %v5311_v24, %v5305_v19  ;;  %v5338_v35 = vcombine.low %v15894_v22, %v15890_v55 }
 0x946   :  { %v14513_v25 = vpop.eup %14512  ;;  %v5306_v26 = vmul.f32 %v14511_v1, %v5300_v15 }
 0x947   :  { %v14515_v29 = vpop.eup %14514  ;;  %v5307_v7 = vmul.f32 %v14513_v25, %v5301_v21  ;;  %v5347_v17 = vrot.slane %v5338_v35, %v15429_v9 }
 0x948   :  { %v5308_v63 = vmul.f32 %v14515_v29, %v5302_v11  ;;  %v15900_v32 = vadd.f32 %v5312_v28, %v5306_v26  ;;  %v13365_v11 = vld [vmem:[%s15962_s13] ss:$0 sm:$0xff] }
 0x949   :  { %v15904_v33 = vadd.f32 %v5313_v30, %v5307_v7 }
 0x94a   :  { %v15906_v36 = vadd.f32 %v5314_v23, %v5308_v63  ;;  %v5339_v12 = vcombine.low %v15898_v31, %v15900_v32 }
 0x94c   :  { %v5340_v16 = vcombine.low %v15904_v33, %v15906_v36  ;;  %v5354_v40 = vrot.slane %v5339_v12, %v15429_v9 }
 0x94e   :  { %v5361_v50 = vrot.slane %v5340_v16, %v15429_v9  ;;  %v5362_v51 = vcombine.low %v5347_v17, %v5354_v40 }
 0x950   :  { %v5369_v6 = vrot.slane %v5362_v51, %v15429_v9  ;;  %v5376_v14 = vrot.slane %v5361_v50, %v15429_v9 }
 0x952   :  { %v15917_v52 = vcombine.low %v5369_v6, %v5376_v14 }
 0x954   :  { %13364 = vmatmul.mubr.msk.f32.vlgmr.msra.gmra.mxu0 %vm192_vm0, %v15917_v52 }
 0x955   :  { %6028 = vmatprep.mubr.f32.mxu0 %v17637_v34 }
 0xa14   :  { %v15934_v39 = vpop.f32.mrf.mxu0 }
 0xa16   :  { %v5448_v41 = vpop.f32.mrf.mxu0 }
 0xa17   :  { %v15937_v42 = vadd.f32 %v5448_v41, %v15932_v58 }
 0xa19   :  { %v5506_v44 = vcombine.high %v15937_v42, %v15937_v42  ;;  %v5513_v46 = vrot.slane %v15937_v42, %v15429_v9 }
 0xa1b   :  { %v5520_v49 = vrot.slane %v5506_v44, %v15429_v9  ;;  %v5521_v38 = vcombine.high %v5513_v46, %v5513_v46  ;;  %v5529_v59 = vrot.slane %v5513_v46, %v15429_v9  ;;  %v13366_v46 = vld.sshfl [vmem:[%s13220_s17] sm:$0x11 pattern:$0x75316420]  ;;  %s14897_s17 = smov 27  }
 0xa1c   :  { %s13245_s21 = sld [smem:[%s17636_s0 + %s14897_s17]]  }
 0xa1d   :  { %v5522_v48 = vcombine.high %v5520_v49, %v5520_v49  ;;  %v5536_v60 = vrot.slane %v5520_v49, %v15429_v9  ;;  %v5543_v8 = vrot.slane %v5521_v38, %v15429_v9  ;;  %v5551_v61 = vcombine.high %v5529_v59, %v5529_v59 }
 0xa1e   :  { %v5556_v62 = vrot.slane %v5529_v59, %v15550_v27  ;;  %v5640_v49 = vrot.slane %v13366_v46, %v15429_v9  ;;  %v15977_v38 = vand.u32 127, %v163_v0  ;;  %v5633_v59 = vcombine.high %v13366_v46, %v13366_v46 }
 0xa1f   :  { %v5550_v47 = vrot.slane %v5522_v48, %v15429_v9  ;;  %v5552_v2 = vcombine.high %v5543_v8, %v5543_v8  ;;  %v5560_v37 = vrot.slane %v5543_v8, %v15550_v27  ;;  %v5564_v10 = vrot.slane %v5551_v61, %v15550_v27 }
 0xa20   :  { %v5572_v13 = vrot.slane %v5536_v60, %v15550_v27  ;;  %v5583_v43 = vadd.f32 %v5556_v62, %v15783_v54  ;;  %vm5650_vm12 = vcmp.gt.f32.partialorder %v5640_v49, 0.0  ;;  %v15981_v48 = vsub.s32 %v15977_v38, %v14923_v5 }
 0xa21   :  { %v5568_v15 = vrot.slane %v5552_v2, %v15550_v27  ;;  %v5584_v19 = vadd.f32 %v5560_v37, %v15783_v54  ;;  %v5585_v20 = vadd.f32 %v5564_v10, %v15783_v54  ;;  %v5576_v1 = vrot.slane %v5550_v47, %v15550_v27 }
 0xa22   :  { %v5587_v21 = vadd.f32 %v15781_v53, %v5572_v13  ;;  %14516 = vtanh.f32 %v5583_v43  ;;  %v5652_v60 = vsel %vm5650_vm12, 1, %v14869_v3  ;;  %v5647_v8 = vrot.slane %v5633_v59, %v15429_v9 }
 0xa23   :  { %v5586_v24 = vadd.f32 %v15781_v53, %v5568_v15  ;;  %14518 = vtanh.f32 %v5584_v19  ;;  %v5588_v25 = vadd.f32 %v15781_v53, %v5576_v1  ;;  %v5657_v47 = vrot.slane %v5652_v60, %v15550_v27 }
 0xa24   :  { %14520 = vtanh.f32 %v5585_v20  ;;  %vm5651_vm13 = vcmp.gt.f32.partialorder %v5647_v8, 0.0 }
 0xa25   :  { %14522 = vtanh.f32 %v5586_v24  ;;  %vm15990_vm14 = vcmp.eq.s32.totalorder %v5657_v47, 1  ;;  %v5653_v15 = vsel %vm5651_vm13, 1, %v14869_v3  ;;  %v6378_v47 = vld [vmem:[%s13238_s22 + $0x8] sm:$0xff] }
 0xa26   :  { %14524 = vtanh.f32 %v5587_v21 }
 0xa27   :  { %14526 = vtanh.f32 %v5588_v25  ;;  %v5661_v25 = vrot.slane %v5653_v15, %v15550_v27  ;;  %v4507_v15 = vld [vmem:[%s16042_s26 + $0x18] sm:$0xff] }
 0xa29   :  { %vm16003_vm2 = vcmp.eq.s32.totalorder %v5661_v25, 1 }
 0xa2f   :  { %v14517_v26 = vpop.eup %14516 }
 0xa30   :  { %v14519_v28 = vpop.eup %14518  ;;  %v5601_v29 = vmul.f32 %v14517_v26, %v13365_v11 }
 0xa31   :  { %v14521_v7 = vpop.eup %14520  ;;  %v5602_v30 = vmul.f32 %v14519_v28, %v13365_v11 }
 0xa32   :  { %v14523_v23 = vpop.eup %14522  ;;  %v5607_v63 = vsel %vm192_vm0, %v5601_v29, 0.0  ;;  %v5603_v35 = vmul.f32 %v14521_v7, %v13365_v11 }
 0xa33   :  { %v14525_v12 = vpop.eup %14524  ;;  %5608 = vadd.xlane.f32.xlu0 %v5607_v63  ;;  %v5610_v16 = vsel %vm192_vm0, %v5602_v30, 0.0  ;;  %v5604_v50 = vmul.f32 %v14523_v23, %v13365_v11 }
 0xa34   :  { %5611 = vadd.xlane.f32.xlu1 %v5610_v16  ;;  %v5605_v17 = vmul.f32 %v14525_v12, %v13365_v11  ;;  %v5613_v40 = vsel %vm192_vm0, %v5603_v35, 0.0  ;;  %v14527_v51 = vpop.eup %14526 }
 0xa35   :  { %v5616_v14 = vsel %vm192_vm0, %v5604_v50, 0.0  ;;  %v5606_v41 = vmul.f32 %v14527_v51, %v13365_v11 }
 0xa36   :  { %v5619_v6 = vsel %vm192_vm0, %v5605_v17, 0.0 }
 0xa37   :  { %5614 = vadd.xlane.f32.xlu0 %v5613_v40  ;;  %v5622_v44 = vsel %vm192_vm0, %v5606_v41, 0.0 }
 0xa38   :  { %5620 = vadd.xlane.f32.xlu1 %v5619_v6 }
 0xa3b   :  { %5617 = vadd.xlane.f32.xlu0 %v5616_v14 }
 0xa3f   :  { %5623 = vadd.xlane.f32.xlu0 %v5622_v44 }
 0xabc   :  { %v5609_v61 = vpop.xlane.xlu0 %5608 }
 0xabd   :  { %v5612_v62 = vpop.xlane.xlu1 %5611  ;;  %v5673_v2 = vrot.slane %v5609_v61, %v15981_v48  ;;  %v6380_v61 = vld [vmem:[%s13238_s22 + $0x18] sm:$0xff] }
 0xabe   :  { %v5677_v37 = vrot.slane %v5612_v62, %v15981_v48  ;;  %v6379_v62 = vld [vmem:[%s13238_s22 + $0x10] sm:$0xff] }
 0xac0   :  { %v5615_v0 = vpop.xlane.xlu0 %5614  ;;  %v5694_v10 = vsel %vm2712_vm3, %v5677_v37, %v5673_v2  ;;  %v6377_v2 = vld [vmem:[%s13238_s22] sm:$0xff]  ;;  %v4511_v37 = vld [vmem:[%s16042_s26 + $0x38] sm:$0xff]  ;;  %s14898_s22 = smov 96  }
 0xac1   :  { %v5681_v13 = vrot.slane %v5615_v0, %v15981_v48  ;;  %v5621_v21 = vpop.xlane.xlu1 %5620  ;;  %5988 = vmatprep.subr.mxu0 %v4511_v37  ;;  %v4510_v0 = vld [vmem:[%s16042_s26 + $0x30] sm:$0xff] }
 0xac2   :  { %v5689_v26 = vrot.slane %v5621_v21, %v15981_v48  ;;  %5989 = vmatpush1.msra.mxu0 %v4510_v0 }
 0xac3   :  { %v5695_v19 = vsel %vm2715_vm4, %v5681_v13, %v5694_v10  ;;  %v4509_v10 = vld [vmem:[%s16042_s26 + $0x28] sm:$0xff]  ;;  %v4508_v13 = vld [vmem:[%s16042_s26 + $0x20] sm:$0xff] }
 0xac4   :  { %v5618_v20 = vpop.xlane.xlu0 %5617  ;;  %v5700_v1 = vsel %vm15990_vm14, %v5695_v19, -1e+30  ;;  %5990 = vmatprep.subr.mxu0 %v4509_v10  ;;  %v4506_v19 = vld [vmem:[%s16042_s26 + $0x10] sm:$0xff] }
 0xac5   :  { %v5703_v24 = vsel %vm5702_vm15, %v5700_v1, -inf  ;;  %v5685_v11 = vrot.slane %v5618_v20, %v15981_v48  ;;  %5991 = vmatpush1.msra.mxu0 %v4508_v13  ;;  %v4505_v20 = vld [vmem:[%s16042_s26 + $0x8] sm:$0xff] }
 0xac6   :  { %5704 = vmax.xlane.f32.xlu1 %v5703_v24  ;;  %5992 = vmatprep.subr.mxu0 %v4507_v15 }
 0xac7   :  { %v5696_v7 = vsel %vm2712_vm3, %v5689_v26, %v5685_v11  ;;  %5993 = vmatpush1.msra.mxu0 %v4506_v19 }
 0xac8   :  { %v5624_v28 = vpop.xlane.xlu0 %5623  ;;  %5994 = vmatprep.subr.mxu0 %v4505_v20  ;;  %v6827_v20 = vld [vmem:[%s16065_s6 + $0x18] sm:$0xff] }
 0xac9   :  { %v5693_v29 = vrot.slane %v5624_v28, %v15981_v48 }
 0xacb   :  { %v5697_v30 = vsel %vm2715_vm4, %v5693_v29, %v5696_v7 }
 0xacc   :  { %v5701_v23 = vsel %vm16003_vm2, %v5697_v30, -1e+30 }
 0xacd   :  { %v5706_v63 = vsel %vm5702_vm15, %v5701_v23, -inf }
 0xace   :  { %5707 = vmax.xlane.f32.xlu0 %v5706_v63 }
 0xb4f   :  { %v5705_v35 = vpop.xlane.xlu1 %5704 }
 0xb50   :  { %v5709_v12 = vsub.f32 %v5700_v1, %v5705_v35  ;;  %v4504_v1 = vld [vmem:[%s16042_s26] sm:$0xff] }
 0xb51   :  { %5995 = vmatpush1.msra.mxu0 %v4504_v1 }
 0xb52   :  { %v5711_v16 = vmul.f32 1.442695, %v5709_v12  ;;  %14179 = vmatprep.subr.mxu0 %v17637_v34 }
 0xb54   :  { %14528 = vpow2.f32 %v5711_v16 }
 0xb57   :  { %v5708_v17 = vpop.xlane.xlu0 %5707 }
 0xb58   :  { %v5710_v40 = vsub.f32 %v5701_v23, %v5708_v17 }
 0xb5a   :  { %v5713_v50 = vmul.f32 1.442695, %v5710_v40 }
 0xb5c   :  { %14530 = vpow2.f32 %v5713_v50 }
 0xb61   :  { %v14529_v51 = vpop.eup %14528 }
 0xb62   :  { %v5715_v6 = vsel %vm5702_vm15, %v14529_v51, 0.0 }
 0xb63   :  { %5716 = vadd.xlane.f32.xlu1 %v5715_v6 }
 0xb69   :  { %v14531_v14 = vpop.eup %14530 }
 0xb6a   :  { %v5718_v41 = vsel %vm5702_vm15, %v14531_v14, 0.0 }
 0xb6b   :  { %5719 = vadd.xlane.f32.xlu0 %v5718_v41 }
 0xbec   :  { %v5717_v44 = vpop.xlane.xlu1 %5716 }
 0xbed   :  { %14532 = vrcp.f32 %v5717_v44 }
 0xbf4   :  { %v5720_v46 = vpop.xlane.xlu0 %5719 }
 0xbf5   :  { %14534 = vrcp.f32 %v5720_v46 }
 0xbfa   :  { %v14533_v49 = vpop.eup %14532 }
 0xbfb   :  { %v16014_v59 = vmul.f32 %v14533_v49, %v14529_v51 }
 0xbfd   :  { %14161 = vmatmul.mubr.msk.f32.vlgmr.msra.gmra.mxu1 %vm5726_vm5, %v16014_v59 }
 0xbfe   :  { %14164 = vmatpush3.msra.mxu1 %v15582_v4  ;;  %14165 = vmatprep.mubr.msk.f32.mxu1 %vm14873_vm1, %v17637_v34 }
 0xbff   :  { %14168 = vmatprep.subr.mxu1 %v17637_v34 }
 0xc02   :  { %v14535_v60 = vpop.eup %14534 }
 0xc03   :  { %v16025_v8 = vmul.f32 %v14535_v60, %v14531_v14 }
 0xc05   :  { %14166 = vmatmul.mubr.msk.f32.vlgmr.msra.gmra.mxu1 %vm5726_vm5, %v16025_v8 }
 0xc06   :  { %14169 = vmatpush3.msra.mxu1 %v6380_v61  ;;  %14176 = vmatprep.mubr.msk.f32.mxu1 %vm14873_vm1, %v17637_v34  ;;  %v13336_v61 = vld [vmem:[%s13239_s30] ss:$0 sm:$0xff] }
 0xc07   :  { %14170 = vmatprep.subr.mxu1 %v17637_v34  ;;  %v4451_v1 = vadd.f32 %v13336_v61, %v15737_v18 }
 0xc08   :  { %14171 = vmatpush3.msra.mxu1 %v6379_v62 }
 0xc09   :  { %14172 = vmatprep.subr.mxu1 %v17637_v34 }
 0xc0a   :  { %14173 = vmatpush3.msra.mxu1 %v6378_v47 }
 0xc0b   :  { %14174 = vmatprep.subr.mxu1 %v17637_v34 }
 0xc0c   :  { %14175 = vmatpush3.msra.mxu1 %v6377_v2 }
 0xc0d   :  { %14177 = vmatmul.mubr.msk.f32.vlgmr.msra.gmra.mxu1 %vm192_vm0, %v15917_v52  ;;  %14190 = vmatprep.subr.mxu1 %v17637_v34 }
 0xc0e   :  { %14192 = vmatprep.mubr.msk.f32.mxu1 %vm14873_vm1, %v17637_v34 }
 0xcbd   :  { %v5796_v21 = vpop.f32.mrf.mxu1 }
 0xcbe   :  { %v5882_v24 = vrot.slane %v5796_v21, %v15429_v9 }
 0xcbf   :  { %v14162_v25 = vpop.f32.mrf.mxu1 }
 0xcc0   :  { %v5883_v11 = vcombine.high %v5882_v24, %v5882_v24  ;;  %v5890_v26 = vrot.slane %v5882_v24, %v15429_v9 }
 0xcc2   :  { %v5897_v28 = vrot.slane %v5883_v11, %v15429_v9  ;;  %v5898_v23 = vcombine.high %v5890_v26, %v5890_v26 }
 0xcc4   :  { %v5922_v63 = vcombine.low %v5890_v26, %v5897_v28 }
 0xcc5   :  { %v5870_v29 = vpop.f32.mrf.mxu1 }
 0xcc6   :  { %v5905_v7 = vrot.slane %v5870_v29, %v15429_v9  ;;  %v5931_v50 = vrot.slane %v5922_v63, %v15429_v9  ;;  %v6826_v29 = vld [vmem:[%s16065_s6 + $0x10] sm:$0xff] }
 0xcc7   :  { %v14167_v30 = vpop.f32.mrf.mxu1 }
 0xcc8   :  { %v5906_v35 = vcombine.high %v5905_v7, %v5905_v7  ;;  %v5913_v12 = vrot.slane %v5905_v7, %v15429_v9 }
 0xcca   :  { %v5920_v16 = vrot.slane %v5906_v35, %v15429_v9  ;;  %v5921_v17 = vcombine.high %v5913_v12, %v5913_v12  ;;  %v5923_v40 = vcombine.low %v5898_v23, %v5913_v12  ;;  %v6825_v35 = vld [vmem:[%s16065_s6 + $0x8] sm:$0xff] }
 0xccc   :  { %v5924_v51 = vcombine.low %v5920_v16, %v5921_v17  ;;  %v5938_v6 = vrot.slane %v5923_v40, %v15429_v9 }
 0xccd   :  { %v6447_v14 = vpop.f32.mrf.mxu1 }
 0xcce   :  { %v5945_v41 = vrot.slane %v5924_v51, %v15429_v9  ;;  %v5946_v44 = vcombine.low %v5931_v50, %v5938_v6  ;;  %v6452_v46 = vcombine.high %v6447_v14, %v6447_v14  ;;  %v6459_v49 = vrot.slane %v6447_v14, %v15429_v9  ;;  %v6824_v50 = vld [vmem:[%s16065_s6] sm:$0xff] }
 0xccf   :  { %v14178_v60 = vpop.f32.mrf.mxu1  ;;  %v13372_v51 = vld [vmem:[%s13240_s10] ss:$0 sm:$0xff] }
 0xcd0   :  { %v5953_v62 = vrot.slane %v5946_v44, %v15429_v9  ;;  %v5960_v47 = vrot.slane %v5945_v41, %v15429_v9  ;;  %v6466_v2 = vrot.slane %v6452_v46, %v15429_v9  ;;  %v6467_v37 = vcombine.high %v6459_v49, %v6459_v49 }
 0xcd1   :  { %v6475_v0 = vrot.slane %v6459_v49, %v15429_v9 }
 0xcd2   :  { %v6468_v10 = vcombine.high %v6466_v2, %v6466_v2  ;;  %v6482_v13 = vrot.slane %v6466_v2, %v15429_v9  ;;  %v6489_v15 = vrot.slane %v6467_v37, %v15429_v9  ;;  %v5961_v19 = vcombine.low %v5953_v62, %v5960_v47 }
 0xcd3   :  { %v6497_v21 = vcombine.high %v6475_v0, %v6475_v0  ;;  %v6502_v24 = vrot.slane %v6475_v0, %v15550_v27 }
 0xcd4   :  { %v6496_v25 = vrot.slane %v6468_v10, %v15429_v9  ;;  %v6498_v11 = vcombine.high %v6489_v15, %v6489_v15  ;;  %v6506_v26 = vrot.slane %v6489_v15, %v15550_v27  ;;  %v6518_v28 = vrot.slane %v6482_v13, %v15550_v27  ;;  %13369 = vmatmul.mubr.msk.f32.vlgmr.msra.gmra.mxu0 %vm192_vm0, %v5961_v19 }
 0xcd5   :  { %v6510_v7 = vrot.slane %v6497_v21, %v15550_v27  ;;  %v6529_v30 = vadd.f32 %v6502_v24, %v4451_v1  ;;  %14180 = vmatpush3.msra.mxu0 %v6827_v20  ;;  %14187 = vmatprep.mubr.msk.f32.mxu0 %vm14873_vm1, %v17637_v34 }
 0xcd6   :  { %v6514_v18 = vrot.slane %v6498_v11, %v15550_v27  ;;  %v6522_v23 = vrot.slane %v6496_v25, %v15550_v27  ;;  %v6530_v63 = vadd.f32 %v6506_v26, %v4451_v1  ;;  %14181 = vmatprep.subr.mxu0 %v17637_v34  ;;  %v6533_v16 = vadd.f32 %v6518_v28, %v4451_v1 }
 0xcd7   :  { %v6531_v12 = vadd.f32 %v6510_v7, %v4451_v1  ;;  %14536 = vtanh.f32 %v6529_v30  ;;  %14182 = vmatpush3.msra.mxu0 %v6826_v29 }
 0xcd8   :  { %v6532_v17 = vadd.f32 %v6514_v18, %v4451_v1  ;;  %v6534_v40 = vadd.f32 %v6522_v23, %v4451_v1  ;;  %14538 = vtanh.f32 %v6530_v63  ;;  %14183 = vmatprep.subr.mxu0 %v17637_v34  ;;  %v6664_v1 = vld [vmem:[%s13224_s15] sm:$0x7] }
 0xcd9   :  { %14540 = vtanh.f32 %v6531_v12  ;;  %14184 = vmatpush3.msra.mxu0 %v6825_v35  ;;  %v6671_v21 = vrot.slane %v6664_v1, %v15550_v27 }
 0xcda   :  { %14542 = vtanh.f32 %v6532_v17  ;;  %14185 = vmatprep.subr.mxu0 %v17637_v34 }
 0xcdb   :  { %14544 = vtanh.f32 %v6533_v16  ;;  %14186 = vmatpush3.msra.mxu0 %v6824_v50 }
 0xcdc   :  { %14546 = vtanh.f32 %v6534_v40  ;;  %14188 = vmatmul.mubr.msk.f32.vlgmr.msra.gmra.mxu0 %vm192_vm0, %v5961_v19  ;;  %14200 = vmatprep.subr.mxu0 %v17637_v34 }
 0xcdd   :  { %14202 = vmatprep.mubr.msk.f32.mxu0 %vm14873_vm1, %v17637_v34 }
 0xce4   :  { %v14537_v6 = vpop.eup %14536 }
 0xce5   :  { %v14539_v14 = vpop.eup %14538  ;;  %v6547_v41 = vmul.f32 %v14537_v6, %v13372_v51  ;;  %v16143_v6 = vsub.s32 2, %v14923_v5 }
 0xce6   :  { %v14541_v44 = vpop.eup %14540  ;;  %v6548_v46 = vmul.f32 %v14539_v14, %v13372_v51  ;;  %v16147_v14 = vrot.slane %v15928_v57, %v15550_v27 }
 0xce7   :  { %v14543_v49 = vpop.eup %14542  ;;  %v6553_v60 = vsel %vm3461_vm10, %v6547_v41, 0.0  ;;  %v6549_v61 = vmul.f32 %v14541_v44, %v13372_v51  ;;  %17669 = vst [vmem:[#allocation10_spill] sm:$0xff] %v16143_v6  ;;  %v6685_v41 = vrot.slane %v6664_v1, %v16143_v6  ;;  %v6665_v44 = vld [vmem:[%s13224_s15 + $0x4] sm:$0x7] }
 0xce8   :  { %v14545_v62 = vpop.eup %14544  ;;  %6554 = vadd.xlane.f32.xlu1 %v6553_v60  ;;  %v6556_v47 = vsel %vm3461_vm10, %v6548_v46, 0.0  ;;  %v6550_v2 = vmul.f32 %v14543_v49, %v13372_v51  ;;  %v5447_v46 = vadd.f32 %v15934_v39, %v16147_v14  ;;  %v6692_v49 = vrot.slane %v6665_v44, %v15550_v27 }
 0xce9   :  { %v14547_v37 = vpop.eup %14546  ;;  %6557 = vadd.xlane.f32.xlu0 %v6556_v47  ;;  %v6559_v0 = vsel %vm3461_vm10, %v6549_v61, 0.0  ;;  %v6551_v10 = vmul.f32 %v14545_v62, %v13372_v51  ;;  %v6706_v61 = vrot.slane %v6665_v44, %v16143_v6  ;;  %v6678_v62 = vrot.slane %v6664_v1, %v15926_v56 }
 0xcea   :  { %v6562_v13 = vsel %vm3461_vm10, %v6550_v2, 0.0  ;;  %v6552_v15 = vmul.f32 %v14547_v37, %v13372_v51  ;;  %v5459_v60 = vrot.slane %v5447_v46, %v15429_v9  ;;  %v5452_v5 = vcombine.high %v5447_v46, %v5447_v46 }
 0xceb   :  { %v6565_v19 = vsel %vm3461_vm10, %v6551_v10, 0.0  ;;  %v6699_v10 = vrot.slane %v6665_v44, %v15926_v56 }
 0xcec   :  { %6560 = vadd.xlane.f32.xlu1 %v6559_v0  ;;  %v6568_v20 = vsel %vm3461_vm10, %v6552_v15, 0.0  ;;  %v5467_v47 = vcombine.high %v5459_v60, %v5459_v60  ;;  %v5466_v57 = vrot.slane %v5452_v5, %v15429_v9  ;;  %v5475_v2 = vrot.slane %v5459_v60, %v15429_v9 }
 0xced   :  { %6563 = vadd.xlane.f32.xlu0 %v6562_v13 }
 0xcee   :  { %v5489_v13 = vrot.slane %v5467_v47, %v15429_v9  ;;  %v5468_v1 = vcombine.high %v5466_v57, %v5466_v57 }
 0xcf0   :  { %6566 = vadd.xlane.f32.xlu1 %v6565_v19 }
 0xcf1   :  { %6569 = vadd.xlane.f32.xlu0 %v6568_v20 }
 0xd01   :  { %6673 = vbcast.lane.b32.xlu1 %v6671_v21, 256  ;;  %v5497_v21 = vcombine.high %v5475_v2, %v5475_v2 }
 0xd71   :  { %v16112_v24 = vpop.xlane.xlu1 %6554 }
 0xd72   :  { %v16114_v25 = vpop.xlane.xlu0 %6557  ;;  %v6580_v11 = vrot.slane %v16112_v24, %v15981_v48 }
 0xd73   :  { %v6584_v26 = vrot.slane %v16114_v25, %v15981_v48 }
 0xd75   :  { %v16120_v28 = vpop.xlane.xlu1 %6560  ;;  %v6601_v29 = vsel %vm2712_vm3, %v6584_v26, %v6580_v11 }
 0xd76   :  { %v6588_v7 = vrot.slane %v16120_v28, %v15981_v48  ;;  %v16125_v30 = vpop.xlane.xlu0 %6563 }
 0xd77   :  { %v6592_v35 = vrot.slane %v16125_v30, %v15981_v48 }
 0xd78   :  { %v6602_v18 = vsel %vm2715_vm4, %v6588_v7, %v6601_v29 }
 0xd79   :  { %v16128_v23 = vpop.xlane.xlu1 %6566  ;;  %v6608_v63 = vsel %vm6607_vm6, %v6602_v18, -inf  ;;  %v5482_v18 = vrot.slane %v5466_v57, %v15429_v9 }
 0xd7a   :  { %v6596_v12 = vrot.slane %v16128_v23, %v15981_v48  ;;  %6609 = vmax.xlane.f32.xlu1 %v6608_v63  ;;  %v16135_v16 = vpop.xlane.xlu0 %6569  ;;  %v5498_v63 = vcombine.high %v5489_v13, %v5489_v13 }
 0xd7b   :  { %v6600_v17 = vrot.slane %v16135_v16, %v15981_v48 }
 0xd7c   :  { %v6603_v40 = vsel %vm2712_vm3, %v6596_v12, %v6592_v35 }
 0xd7d   :  { %v6604_v50 = vsel %vm2715_vm4, %v6600_v17, %v6603_v40  ;;  %v6674_v5 = vpop.permute.xlu1 %6673 }
 0xd7e   :  { %v6611_v51 = vsel %vm6607_vm6, %v6604_v50, -inf }
 0xd7f   :  { %6612 = vmax.xlane.f32.xlu0 %v6611_v51 }
 0xd8b   :  { %6687 = vbcast.lane.b32.xlu1 %v6685_v41, 256  ;;  %v5496_v41 = vrot.slane %v5468_v1, %v15429_v9 }
 0xd8f   :  { %6694 = vbcast.lane.b32.xlu1 %v6692_v49, 256 }
 0xd93   :  { %6708 = vbcast.lane.b32.xlu1 %v6706_v61, 256 }
 0xd94   :  { %v6030_v37 = vpop.f32.mrf.mxu0 }
 0xd95   :  { %v6036_v0 = vcombine.high %v6030_v37, %v6030_v37  ;;  %v6043_v39 = vrot.slane %v6030_v37, %v15429_v9  ;;  %6680 = vbcast.lane.b32.xlu0 %v6678_v62, 256 }
 0xd96   :  { %v6032_v12 = vpop.f32.mrf.mxu0 }
 0xd97   :  { %v6050_v15 = vrot.slane %v6036_v0, %v15429_v9  ;;  %v6051_v19 = vcombine.high %v6043_v39, %v6043_v39  ;;  %v6059_v20 = vrot.slane %v6043_v39, %v15429_v9 }
 0xd99   :  { %v6052_v11 = vcombine.high %v6050_v15, %v6050_v15  ;;  %v6066_v26 = vrot.slane %v6050_v15, %v15429_v9  ;;  %v6073_v29 = vrot.slane %v6051_v19, %v15429_v9  ;;  %v6081_v7 = vcombine.high %v6059_v20, %v6059_v20  ;;  %6701 = vbcast.lane.b32.xlu0 %v6699_v10, 256 }
 0xd9a   :  { %v16166_v35 = vadd.f32 %v6059_v20, %v5475_v2 }
 0xd9b   :  { %v6080_v17 = vrot.slane %v6052_v11, %v15429_v9  ;;  %v6082_v40 = vcombine.high %v6073_v29, %v6073_v29  ;;  %v16169_v50 = vadd.f32 %v6073_v29, %v5489_v13  ;;  %v16171_v51 = vadd.f32 %v6081_v7, %v5497_v21 }
 0xd9c   :  { %v16174_v44 = vadd.f32 %v6066_v26, %v5482_v18  ;;  %v16176_v46 = vpop.f32.mrf.mxu0 }
 0xd9d   :  { %v16178_v49 = vadd.f32 %v6082_v40, %v5498_v63  ;;  %v16180_v61 = vadd.f32 %v6080_v17, %v5496_v41 }
 0xd9e   :  { %17670 = vst [vmem:[#allocation11_spill] sm:$0xff] %v16174_v44  ;;  %v14189_v60 = vpop.f32.mrf.mxu0 }
 0xd9f   :  { %17671 = vst [vmem:[#allocation12_spill] sm:$0xff] %v16178_v49  ;;  %17672 = vst [vmem:[#allocation13_spill] sm:$0xff] %v16180_v61 }
 0xe03   :  { %v6610_v62 = vpop.xlane.xlu1 %6609 }
 0xe04   :  { %v6619_v47 = vrot.slane %v6610_v62, %v15550_v27  ;;  %v6623_v57 = vrot.slane %v6610_v62, %v15926_v56  ;;  %v6627_v2 = vrot.slane %v6610_v62, %v16143_v6 }
 0xe06   :  { %v6646_v37 = vsub.f32 %v16112_v24, %v6619_v47  ;;  %v6647_v0 = vsub.f32 %v16114_v25, %v6623_v57  ;;  %v6648_v39 = vsub.f32 %v16120_v28, %v6627_v2 }
 0xe07   :  { %v6688_v7 = vpop.permute.xlu1 %6687 }
 0xe08   :  { %v6652_v10 = vmul.f32 1.442695, %v6646_v37  ;;  %v6654_v13 = vmul.f32 1.442695, %v6647_v0  ;;  %v6656_v15 = vmul.f32 1.442695, %v6648_v39  ;;  %v6613_v19 = vpop.xlane.xlu0 %6612 }
 0xe09   :  { %v6631_v20 = vrot.slane %v6613_v19, %v15550_v27  ;;  %v6635_v1 = vrot.slane %v6613_v19, %v15926_v56  ;;  %v6639_v21 = vrot.slane %v6613_v19, %v16143_v6  ;;  %v6311_v39 = vld [vmem:[#allocation9] sm:$0x3f] }
 0xe0a   :  { %14548 = vpow2.f32 %v6652_v10 }
 0xe0b   :  { %14550 = vpow2.f32 %v6654_v13  ;;  %v6649_v11 = vsub.f32 %v16125_v30, %v6631_v20  ;;  %v6650_v24 = vsub.f32 %v16128_v23, %v6635_v1  ;;  %v6651_v25 = vsub.f32 %v16135_v16, %v6639_v21  ;;  %v6695_v40 = vpop.permute.xlu1 %6694 }
 0xe0c   :  { %14552 = vpow2.f32 %v6656_v15  ;;  %v6681_v18 = vpop.permute.xlu0 %6680 }
 0xe0d   :  { %v6658_v28 = vmul.f32 1.442695, %v6649_v11  ;;  %v6660_v26 = vmul.f32 1.442695, %v6650_v24  ;;  %v6662_v29 = vmul.f32 1.442695, %v6651_v25 }
 0xe0f   :  { %14554 = vpow2.f32 %v6658_v28  ;;  %v6709_v37 = vpop.permute.xlu1 %6708 }
 0xe10   :  { %14556 = vpow2.f32 %v6660_v26  ;;  %v6702_v57 = vpop.permute.xlu0 %6701 }
 0xe11   :  { %14558 = vpow2.f32 %v6662_v29 }
 0xe17   :  { %v14549_v63 = vpop.eup %14548 }
 0xe18   :  { %v14551_v17 = vpop.eup %14550  ;;  %v16194_v41 = vmul.f32 %v14549_v63, %v6674_v5 }
 0xe19   :  { %v14553_v60 = vpop.eup %14552  ;;  %v16196_v30 = vmul.f32 %v14551_v17, %v6681_v18 }
 0xe1a   :  { %6729 = vperm.xlu0 %14374, %v16194_v41   ;;  %v16200_v16 = vmul.f32 %v14553_v60, %v6688_v7  ;;  %v13373_v7 = vld [vmem:[%s13245_s21] ss:$0 sm:$0xff] }
 0xe1b   :  { %6732 = vperm.xlu1 %14375, %v16196_v30   ;;  %v16229_v60 = vadd.f32 %v13373_v7, %v16176_v46 }
 0xe1c   :  { %v14555_v23 = vpop.eup %14554 }
 0xe1d   :  { %v14557_v62 = vpop.eup %14556  ;;  %v16202_v47 = vmul.f32 %v14555_v23, %v6695_v40  ;;  %17673 = vst [vmem:[#allocation14_spill] sm:$0xff] %v16229_v60 }
 0xe1e   :  { %v14559_v2 = vpop.eup %14558  ;;  %6735 = vperm.xlu0 %14374, %v16200_v16   ;;  %v16206_v5 = vmul.f32 %v14557_v62, %v6702_v57 }
 0xe1f   :  { %6738 = vperm.xlu1 %14375, %v16202_v47   ;;  %v16208_v0 = vmul.f32 %v14559_v2, %v6709_v37  ;;  %v13375_v37 = vmul.f32 -1.442695, %v16229_v60 }
 0xe22   :  { %6741 = vperm.xlu0 %14374, %v16206_v5  }
 0xe23   :  { %6744 = vperm.xlu1 %14375, %v16208_v0  }
 0xe26   :  { %6307 = vrot.lane.b32.xlu0 %v6032_v12, %s14896_s16 }
 0xe27   :  { %6313 = vrot.lane.b32.xlu1 %v6311_v39, %s14896_s16 }
 0xe95   :  { %v6730_v10 = vpop.permute.xlu0 %6729 }
 0xe96   :  { %v6733_v13 = vpop.permute.xlu1 %6732  ;;  %v6749_v19 = vrot.slane %v6730_v10, %v15981_v48 }
 0xe97   :  { %v6753_v15 = vrot.slane %v6733_v13, %v15981_v48 }
 0xe99   :  { %v6736_v20 = vpop.permute.xlu0 %6735  ;;  %v6770_v12 = vsel %vm2712_vm3, %v6753_v15, %v6749_v19 }
 0xe9a   :  { %v6757_v1 = vrot.slane %v6736_v20, %v15981_v48  ;;  %v6739_v21 = vpop.permute.xlu1 %6738 }
 0xe9b   :  { %v6761_v28 = vrot.slane %v6739_v21, %v15981_v48 }
 0xe9c   :  { %v6771_v11 = vsel %vm2715_vm4, %v6757_v1, %v6770_v12 }
 0xe9d   :  { %v6742_v24 = vpop.permute.xlu0 %6741  ;;  %v6776_v25 = vsel %vm6607_vm6, %v6771_v11, 0.0 }
 0xe9e   :  { %v6765_v26 = vrot.slane %v6742_v24, %v15981_v48  ;;  %6777 = vadd.xlane.f32.xlu0 %v6776_v25  ;;  %v6745_v29 = vpop.permute.xlu1 %6744 }
 0xe9f   :  { %v6769_v18 = vrot.slane %v6745_v29, %v15981_v48 }
 0xea0   :  { %v6772_v63 = vsel %vm2712_vm3, %v6765_v26, %v6761_v28 }
 0xea1   :  { %v6308_v17 = vpop.permute.xlu0 %6307  ;;  %v6773_v40 = vsel %vm2715_vm4, %v6769_v18, %v6772_v63 }
 0xea2   :  { %v6310_v23 = vadd.f32 %v6308_v17, %v15937_v42  ;;  %v6314_v62 = vpop.permute.xlu1 %6313  ;;  %v6779_v57 = vsel %vm6607_vm6, %v6773_v40, 0.0 }
 0xea3   :  { %6780 = vadd.xlane.f32.xlu1 %v6779_v57 }
 0xea4   :  { %v6316_v2 = vadd.f32 %v6314_v62, %v6310_v23 }
 0xea6   :  { %v13370_v39 = vmul.f32 -1.442695, %v6316_v2 }
 0xea8   :  { %14560 = vpow2.f32 %v13370_v39 }
 0xea9   :  { %14562 = vpow2.f32 %v13375_v37 }
 0xeb5   :  { %v14561_v10 = vpop.eup %14560 }
 0xeb6   :  { %v6320_v13 = vadd.f32 1.0, %v14561_v10  ;;  %v14563_v15 = vpop.eup %14562 }
 0xeb7   :  { %v6908_v19 = vadd.f32 1.0, %v14563_v15 }
 0xeb8   :  { %14564 = vrcp.f32 %v6320_v13 }
 0xeb9   :  { %14566 = vrcp.f32 %v6908_v19 }
 0xec5   :  { %v14565_v46 = vpop.eup %14564 }
 0xec6   :  { %v6331_v20 = vrot.slane %v14565_v46, %v15429_v9  ;;  %v6324_v42 = vcombine.high %v14565_v46, %v14565_v46  ;;  %v16247_v28 = vpop.eup %14566 }
 0xec7   :  { %v6919_v17 = vrot.slane %v16247_v28, %v15429_v9 }
 0xec8   :  { %v16236_v1 = vrot.slane %v6331_v20, %v15429_v9  ;;  %v6339_v21 = vcombine.high %v6331_v20, %v6331_v20  ;;  %v6338_v12 = vrot.slane %v6324_v42, %v15429_v9 }
 0xec9   :  { %v6927_v57 = vcombine.high %v6919_v17, %v6919_v17  ;;  %v16277_v39 = vrot.slane %v6919_v17, %v15429_v9 }
 0xeca   :  { %17674 = vst [vmem:[#allocation15_spill] sm:$0xff] %v16236_v1  ;;  %v7591_v11 = vsub.f32 1.0, %v16236_v1  ;;  %v16241_v24 = vrot.slane %v6339_v21, %v15429_v9  ;;  %v16245_v25 = vcombine.high %v16236_v1, %v16236_v1  ;;  %v6340_v7 = vcombine.high %v6338_v12, %v6338_v12 }
 0xecb   :  { %v16258_v63 = vrot.slane %v6338_v12, %v15429_v9  ;;  %v16273_v37 = vrot.slane %v6927_v57, %v15429_v9  ;;  %v16282_v10 = vcombine.high %v16277_v39, %v16277_v39 }
 0xecc   :  { %17675 = vst [vmem:[#allocation16_spill] sm:$0xff] %v16241_v24  ;;  %17676 = vst [vmem:[#allocation17_spill] sm:$0xff] %v16245_v25  ;;  %7603 = vrot.lane.b32.xlu0 %v7591_v11, %s14898_s22  ;;  %v7592_v26 = vsub.f32 1.0, %v16241_v24  ;;  %v16253_v29 = vcombine.high %v16241_v24, %v16241_v24  ;;  %v7593_v18 = vsub.f32 1.0, %v16245_v25  ;;  %v16265_v23 = vrot.slane %v6340_v7, %v15429_v9 }
 0xecd   :  { %17678 = vst [vmem:[#allocation19_spill] sm:$0xff] %v16258_v63  ;;  %v7595_v62 = vsub.f32 1.0, %v16258_v63 }
 0xece   :  { %17677 = vst [vmem:[#allocation18_spill] sm:$0xff] %v16253_v29  ;;  %7605 = vrot.lane.b32.xlu1 %v7592_v26, %s14898_s22  ;;  %v7594_v40 = vsub.f32 1.0, %v16253_v29  ;;  %17679 = vst [vmem:[#allocation20_spill] sm:$0xff] %v16265_v23  ;;  %v7596_v2 = vsub.f32 1.0, %v16265_v23 }
 0xed0   :  { %7607 = vrot.lane.b32.xlu0 %v7593_v18, %s14898_s22 }
 0xed2   :  { %7609 = vrot.lane.b32.xlu1 %v7594_v40, %s14898_s22 }
 0xed4   :  { %7611 = vrot.lane.b32.xlu0 %v7595_v62, %s14898_s22 }
 0xed6   :  { %7613 = vrot.lane.b32.xlu1 %v7596_v2, %s14898_s22 }
 0xed8   :  { %7082 = vperm.xlu0 %14374, %v16273_v37  }
 0xeda   :  { %7074 = vperm.xlu1 %14375, %v16277_v39  }
 0xede   :  { %7090 = vperm.xlu1 %14375, %v16282_v10  }
 0xf27   :  { %v6778_v13 = vpop.xlane.xlu0 %6777 }
 0xf28   :  { %v6782_v15 = vadd.f32 1e-13, %v6778_v13 }
 0xf2a   :  { %14568 = vrcp.f32 %v6782_v15 }
 0xf2c   :  { %v6781_v19 = vpop.xlane.xlu1 %6780 }
 0xf2d   :  { %v6783_v46 = vadd.f32 1e-13, %v6781_v19 }
 0xf2f   :  { %14570 = vrcp.f32 %v6783_v46 }
 0xf37   :  { %v14569_v20 = vpop.eup %14568 }
 0xf38   :  { %v6795_v42 = vrot.slane %v14569_v20, %v15926_v56  ;;  %v6791_v21 = vrot.slane %v14569_v20, %v15550_v27  ;;  %v6799_v12 = vrot.slane %v14569_v20, %v16143_v6 }
 0xf3a   :  { %v6819_v11 = vmul.f32 %v6795_v42, %v16196_v30  ;;  %v6818_v26 = vmul.f32 %v6791_v21, %v16194_v41  ;;  %v6820_v7 = vmul.f32 %v6799_v12, %v16200_v16 }
 0xf3c   :  { %v14571_v18 = vpop.eup %14570  ;;  %v7156_v17 = vrot.slane %v6819_v11, %v15429_v9  ;;  %v7133_v40 = vrot.slane %v6818_v26, %v15429_v9  ;;  %v7179_v62 = vrot.slane %v6820_v7, %v15429_v9 }
 0xf3d   :  { %v6803_v57 = vrot.slane %v14571_v18, %v15550_v27  ;;  %v6807_v46 = vrot.slane %v14571_v18, %v15926_v56  ;;  %v6811_v7 = vrot.slane %v14571_v18, %v16143_v6 }
 0xf3e   :  { %v7157_v2 = vcombine.high %v7156_v17, %v7156_v17  ;;  %v7164_v13 = vrot.slane %v7156_v17, %v15429_v9  ;;  %v7134_v15 = vcombine.high %v7133_v40, %v7133_v40  ;;  %v7141_v19 = vrot.slane %v7133_v40, %v15429_v9 }
 0xf3f   :  { %v7180_v30 = vcombine.high %v7179_v62, %v7179_v62  ;;  %v7187_v41 = vrot.slane %v7179_v62, %v15429_v9  ;;  %v6821_v16 = vmul.f32 %v6803_v57, %v16202_v47  ;;  %v6822_v23 = vmul.f32 %v6807_v46, %v16206_v5 }
 0xf40   :  { %v7171_v20 = vrot.slane %v7157_v2, %v15429_v9  ;;  %v7172_v42 = vcombine.high %v7164_v13, %v7164_v13  ;;  %v7148_v21 = vrot.slane %v7134_v15, %v15429_v9  ;;  %v7149_v12 = vcombine.high %v7141_v19, %v7141_v19 }
 0xf41   :  { %v7194_v11 = vrot.slane %v7180_v30, %v15429_v9  ;;  %v7202_v26 = vrot.slane %v6821_v16, %v15429_v9  ;;  %v7195_v34 = vcombine.high %v7187_v41, %v7187_v41  ;;  %v6912_v30 = vcombine.high %v16247_v28, %v16247_v28  ;;  %v7604_v16 = vpop.permute.xlu0 %7603 }
 0xf42   :  { %v7288_v17 = vcombine.low %v7164_v13, %v7171_v20  ;;  %v7265_v40 = vcombine.low %v7141_v19, %v7148_v21  ;;  %v7302_v62 = vrot.slane %v7172_v42, %v15429_v9  ;;  %v7279_v15 = vrot.slane %v7149_v12, %v15429_v9 }
 0xf43   :  { %v7311_v47 = vcombine.low %v7187_v41, %v7194_v11  ;;  %v7203_v57 = vcombine.high %v7202_v26, %v7202_v26  ;;  %v6823_v13 = vmul.f32 %v6811_v7, %v16208_v0  ;;  %v7325_v41 = vrot.slane %v7195_v34, %v15429_v9  ;;  %v7606_v11 = vpop.permute.xlu1 %7605 }
 0xf44   :  { %v7295_v60 = vrot.slane %v7288_v17, %v15429_v9  ;;  %v7272_v2 = vrot.slane %v7265_v40, %v15429_v9  ;;  %v7225_v42 = vrot.slane %v6822_v23, %v15429_v9  ;;  %v16321_v40 = vsub.f32 1.0, %v16273_v37 }
 0xf45   :  { %v7318_v18 = vrot.slane %v7311_v47, %v15429_v9  ;;  %v7217_v21 = vrot.slane %v7203_v57, %v15429_v9  ;;  %v7248_v12 = vrot.slane %v6823_v13, %v15429_v9  ;;  %v6926_v0 = vrot.slane %v6912_v30, %v15429_v9  ;;  %v7608_v47 = vpop.permute.xlu0 %7607 }
 0xf46   :  { %v7303_v19 = vcombine.low %v7295_v60, %v7302_v62  ;;  %v7280_v20 = vcombine.low %v7272_v2, %v7279_v15  ;;  %v7226_v17 = vcombine.high %v7225_v42, %v7225_v42  ;;  %v7210_v34 = vrot.slane %v7202_v26, %v15429_v9 }
 0xf47   :  { %v7326_v46 = vcombine.low %v7318_v18, %v7325_v41  ;;  %v7233_v60 = vrot.slane %v7225_v42, %v15429_v9  ;;  %v7249_v7 = vcombine.high %v7248_v12, %v7248_v12  ;;  %v7622_v62 = vmul.f32 %v7606_v11, %v16321_v40 }
 0xf48   :  { %v7310_v5 = vrot.slane %v7303_v19, %v15429_v9  ;;  %v7287_v28 = vrot.slane %v7280_v20, %v15429_v9  ;;  %v7240_v23 = vrot.slane %v7226_v17, %v15429_v9  ;;  %v7334_v2 = vcombine.low %v7210_v34, %v7217_v21 }
 0xf49   :  { %v7333_v57 = vrot.slane %v7326_v46, %v15429_v9  ;;  %v7263_v18 = vrot.slane %v7249_v7, %v15429_v9  ;;  %v6958_v30 = vcombine.high %v16273_v37, %v16273_v37  ;;  %v16333_v26 = vsub.f32 1.0, %v16277_v39 }
 0xf4a   :  { %7407 = vperm.xlu1 %14375, %v7310_v5   ;;  %7404 = vperm.xlu0 %14374, %v7287_v28   ;;  %v7357_v15 = vcombine.low %v7233_v60, %v7240_v23  ;;  %v6942_v13 = vrot.slane %v6926_v0, %v15429_v9  ;;  %v16337_v19 = vsub.f32 1.0, %v16282_v10  ;;  %v7218_v20 = vcombine.high %v7210_v34, %v7210_v34  ;;  %v7610_v5 = vpop.permute.xlu1 %7609  ;;  %v7612_v10 = vpop.permute.xlu0 %7611 }
 0xf4b   :  { %v7241_v41 = vcombine.high %v7233_v60, %v7233_v60  ;;  %v7256_v42 = vrot.slane %v7248_v12, %v15429_v9  ;;  %v7621_v21 = vmul.f32 %v7604_v16, %v16333_v26  ;;  %v7341_v37 = vrot.slane %v7334_v2, %v15429_v9 }
 0xf4c   :  { %v7623_v11 = vmul.f32 %v7608_v47, %v16337_v19  ;;  %v7364_v39 = vrot.slane %v7357_v15, %v15429_v9  ;;  %v16344_v46 = vsub.f32 1.0, %v6958_v30  ;;  %v6928_v17 = vcombine.high %v6926_v0, %v6926_v0 }
 0xf4d   :  { %v7380_v28 = vcombine.low %v7256_v42, %v7263_v18  ;;  %v16346_v23 = vsub.f32 1.0, %v6942_v13  ;;  %v7348_v12 = vrot.slane %v7218_v20, %v15429_v9  ;;  %v7371_v16 = vrot.slane %v7241_v41, %v15429_v9 }
 0xf4e   :  { %7638 = vperm.xlu1 %14375, %v7622_v62   ;;  %7410 = vperm.xlu0 %14374, %v7333_v57   ;;  %v7264_v34 = vcombine.high %v7256_v42, %v7256_v42  ;;  %v7624_v60 = vmul.f32 %v7610_v5, %v16344_v46  ;;  %v6956_v57 = vrot.slane %v6928_v17, %v15429_v9  ;;  %v7614_v41 = vpop.permute.xlu1 %7613 }
 0xf4f   :  { %v7625_v7 = vmul.f32 %v7612_v10, %v16346_v23  ;;  %v7349_v0 = vcombine.low %v7341_v37, %v7348_v12  ;;  %v7372_v62 = vcombine.low %v7364_v39, %v7371_v16  ;;  %v7387_v47 = vrot.slane %v7380_v28, %v15429_v9  ;;  %v4457_v39 = vld [vmem:[%s13221_s2] sm:$0x3] }
 0xf50   :  { %v7394_v2 = vrot.slane %v7264_v34, %v15429_v9  ;;  %v16365_v42 = vsub.f32 1.0, %v6956_v57  ;;  %v4461_v28 = vrot.slane %v4457_v39, %v15550_v27  ;;  %v4468_v17 = vrot.slane %v4457_v39, %v15926_v56 }
 0xf51   :  { %v7356_v15 = vrot.slane %v7349_v0, %v15429_v9  ;;  %v7379_v18 = vrot.slane %v7372_v62, %v15429_v9 }
 0xf52   :  { %7629 = vperm.xlu0 %14374, %v7621_v21   ;;  %7647 = vperm.xlu1 %14375, %v7623_v11   ;;  %v7395_v20 = vcombine.low %v7387_v47, %v7394_v2  ;;  %v7995_v21 = vld [vmem:[%s16354_s27] sm:$0x3]  ;;  %v7626_v11 = vmul.f32 %v7614_v41, %v16365_v42 }
 0xf53   :  { %v7999_v37 = vrot.slane %v7995_v21, %v15550_v27  ;;  %v8006_v10 = vrot.slane %v7995_v21, %v15926_v56  ;;  %v7083_v16 = vpop.permute.xlu0 %7082 }
 0xf54   :  { %v7402_v5 = vrot.slane %v7395_v20, %v15429_v9 }
 0xf55   :  { %v7075_v12 = vpop.permute.xlu1 %7074 }
 0xf56   :  { %7656 = vperm.xlu0 %14374, %v7624_v60   ;;  %7665 = vperm.xlu1 %14375, %v7625_v7  }
 0xf59   :  { %v7091_v34 = vpop.permute.xlu1 %7090 }
 0xf5a   :  { %7413 = vperm.xlu0 %14374, %v7356_v15   ;;  %7416 = vperm.xlu1 %14375, %v7379_v18  }
 0xf5e   :  { %7419 = vperm.xlu0 %14374, %v7402_v5   ;;  %7674 = vperm.xlu1 %14375, %v7626_v11  }
 0xf62   :  { %8001 = vbcast.lane.b32.xlu0 %v7999_v37, 256  ;;  %7106 = vperm.xlu1 %14375, %v6942_v13  }
 0xf66   :  { %7098 = vperm.xlu0 %14374, %v6958_v30   ;;  %4463 = vbcast.lane.b32.xlu1 %v4461_v28, 256  ;;  %v7687_v30 = vrot.slane %v16014_v59, %v15429_v9 }
 0xf68   :  { %v7688_v15 = vcombine.high %v7687_v30, %v7687_v30  ;;  %v7695_v5 = vrot.slane %v7687_v30, %v15429_v9 }
 0xf6a   :  { %7114 = vperm.xlu0 %14374, %v6956_v57   ;;  %8008 = vbcast.lane.b32.xlu1 %v8006_v10, 256  ;;  %v7702_v28 = vrot.slane %v7688_v15, %v15429_v9 }
 0xf6e   :  { %4470 = vbcast.lane.b32.xlu0 %v4468_v17, 256  ;;  %v7710_v17 = vrot.slane %v16025_v8, %v15429_v9 }
 0xf70   :  { %v7711_v6 = vcombine.high %v7710_v17, %v7710_v17  ;;  %v7718_v63 = vrot.slane %v7710_v17, %v15429_v9 }
 0xfc5   :  { %v7408_v60 = vpop.permute.xlu1 %7407  ;;  %v7405_v7 = vpop.permute.xlu0 %7404 }
 0xfc6   :  { %v7428_v0 = vrot.slane %v7408_v60, %v15981_v48  ;;  %v7424_v13 = vrot.slane %v7405_v7, %v15981_v48  ;;  %v7088_v60 = vrot.slane %v7083_v16, %v15550_v27  ;;  %v7080_v7 = vrot.slane %v7075_v12, %v15550_v27 }
 0xfc8   :  { %v7445_v2 = vsel %vm2712_vm3, %v7428_v0, %v7424_v13 }
 0xfc9   :  { %v7639_v62 = vpop.permute.xlu1 %7638  ;;  %v7411_v47 = vpop.permute.xlu0 %7410 }
 0xfca   :  { %v7432_v57 = vrot.slane %v7411_v47, %v15981_v48  ;;  %v7644_v11 = vrot.slane %v7639_v62, %v15550_v27 }
 0xfcc   :  { %v7446_v18 = vsel %vm2715_vm4, %v7432_v57, %v7445_v2  ;;  %v7734_v47 = vmul.f32 %v7702_v28, %v7644_v11  ;;  %v7096_v2 = vrot.slane %v7091_v34, %v15550_v27 }
 0xfcd   :  { %v7455_v20 = vrot.slane %v7446_v18, %v15429_v9  ;;  %v7648_v41 = vpop.permute.xlu1 %7647  ;;  %v7630_v21 = vpop.permute.xlu0 %7629 }
 0xfce   :  { %v7635_v37 = vrot.slane %v7630_v21, %v15550_v27  ;;  %v7653_v57 = vrot.slane %v7648_v41, %v15550_v27 }
 0xfcf   :  { %v7456_v59 = vcombine.high %v7455_v20, %v7455_v20  ;;  %v7463_v39 = vrot.slane %v7455_v20, %v15429_v9  ;;  %v7703_v20 = vcombine.high %v7695_v5, %v7695_v5 }
 0xfd0   :  { %v7733_v10 = vmul.f32 %v7695_v5, %v7635_v37 }
 0xfd1   :  { %v7470_v0 = vrot.slane %v7456_v59, %v15429_v9  ;;  %v7471_v13 = vcombine.high %v7463_v39, %v7463_v39  ;;  %v7666_v62 = vpop.permute.xlu1 %7665  ;;  %v7657_v30 = vpop.permute.xlu0 %7656  ;;  %v7501_v18 = vmul.f32 %v7463_v39, %v7080_v7  ;;  %v7735_v12 = vmul.f32 %v7703_v20, %v7653_v57 }
 0xfd2   :  { %v7742_v21 = vcombine.low %v7733_v10, %v7734_v47  ;;  %v7671_v59 = vrot.slane %v7666_v62, %v15550_v27  ;;  %v7662_v41 = vrot.slane %v7657_v30, %v15550_v27  ;;  %v7725_v10 = vrot.slane %v7711_v6, %v15429_v9 }
 0xfd3   :  { %v7502_v15 = vmul.f32 %v7470_v0, %v7088_v60  ;;  %v7503_v37 = vmul.f32 %v7471_v13, %v7096_v2  ;;  %v7756_v0 = vrot.slane %v7735_v12, %v15429_v9  ;;  %v7726_v13 = vcombine.high %v7718_v63, %v7718_v63 }
 0xfd4   :  { %v7749_v5 = vrot.slane %v7742_v21, %v15429_v9  ;;  %v7737_v30 = vmul.f32 %v7725_v10, %v7671_v59  ;;  %v7736_v47 = vmul.f32 %v7718_v63, %v7662_v41 }
 0xfd5   :  { %v8019_v8 = vcombine.low %v7501_v18, %v7502_v15  ;;  %v7417_v16 = vpop.permute.xlu1 %7416  ;;  %v7414_v25 = vpop.permute.xlu0 %7413  ;;  %v8033_v28 = vrot.slane %v7503_v37, %v15429_v9 }
 0xfd6   :  { %v7440_v34 = vrot.slane %v7417_v16, %v15981_v48  ;;  %v7436_v39 = vrot.slane %v7414_v25, %v15981_v48  ;;  %v7757_v2 = vcombine.low %v7749_v5, %v7756_v0  ;;  %v7840_v37 = vcombine.low %v7736_v47, %v7737_v30 }
 0xfd7   :  { %v8026_v11 = vrot.slane %v8019_v8, %v15429_v9  ;;  %v17680_v16 = vmov 0.0  }
 0xfd8   :  { %v7447_v57 = vsel %vm2712_vm3, %v7440_v34, %v7436_v39  ;;  %v7764_v59 = vrot.slane %v7757_v2, %v15429_v9 }
 0xfd9   :  { %v7675_v60 = vpop.permute.xlu1 %7674  ;;  %v7420_v7 = vpop.permute.xlu0 %7419  ;;  %v8034_v25 = vcombine.low %v8026_v11, %v8033_v28 }
 0xfda   :  { %v7680_v17 = vrot.slane %v7675_v60, %v15550_v27  ;;  %v7444_v62 = vrot.slane %v7420_v7, %v15981_v48  ;;  %v14803_v60 = vld [vmem:[%s15519_s19 + $0x18] sm:$0xff]  ;;  %v7847_v7 = vrot.slane %v7840_v37, %v15429_v9 }
 0xfdb   :  { %v16412_v12 = vrot.slane %v8034_v25, %v15429_v9 }
 0xfdc   :  { %v7448_v18 = vsel %vm2715_vm4, %v7444_v62, %v7447_v57  ;;  %v7738_v15 = vmul.f32 %v7726_v13, %v7680_v17  ;;  %v17646_v13 = vmov 1.0   ;;  %v14804_v62 = vld [vmem:[%s15519_s19 + $0x10] sm:$0xff] }
 0xfdd   :  { %v7478_v6 = vrot.slane %v7448_v18, %v15429_v9  ;;  %v7107_v20 = vpop.permute.xlu1 %7106  ;;  %v8002_v21 = vpop.permute.xlu0 %8001  ;;  %17681 = vst [vmem:[#allocation21_spill] sm:$0xff] %v16412_v12 }
 0xfde   :  { %vm8010_vm7 = vcmp.eq.s32.totalorder %v8002_v21, %v15977_v38  ;;  %v7854_v11 = vrot.slane %v7738_v15, %v15429_v9  ;;  %v7112_v41 = vrot.slane %v7107_v20, %v15550_v27  ;;  %v14805_v15 = vld [vmem:[%s15519_s19 + $0x8] sm:$0xff]  ;;  %v14806_v20 = vld [vmem:[%s15519_s19] sm:$0xff] }
 0xfdf   :  { %v7479_v8 = vcombine.high %v7478_v6, %v7478_v6  ;;  %v13380_v63 = vsel %vm8010_vm7, 1.0, %v17680_v16  ;;  %v7486_v28 = vrot.slane %v7478_v6, %v15429_v9 }
 0xfe0   :  { %14201 = vmatpush3.msk.msra.mxu0 %vm6149_vm8, %v13380_v63  ;;  %v7855_v30 = vcombine.low %v7847_v7, %v7854_v11  ;;  %v14812_v7 = vld [vmem:[%s15519_s19 + $0x30] sm:$0xff] }
 0xfe1   :  { %v7493_v34 = vrot.slane %v7479_v8, %v15429_v9  ;;  %v16419_v39 = vpop.permute.xlu1 %4463  ;;  %14203 = vmatmul.mubr.msk.f32.vlgmr.msra.gmra.mxu0 %vm8042_vm9, %v16412_v12  ;;  %14210 = vmatprep.subr.mxu0 %v17680_v16  ;;  %v7099_v5 = vpop.permute.xlu0 %7098  ;;  %v7494_v2 = vcombine.high %v7486_v28, %v7486_v28 }
 0xfe2   :  { %vm4474_vm10 = vcmp.eq.s32.totalorder %v16419_v39, %v15977_v38  ;;  %v7104_v10 = vrot.slane %v7099_v5, %v15550_v27  ;;  %14211 = vmatpush3.msra.mxu0 %v14803_v60  ;;  %14218 = vmatprep.mubr.msk.f32.mxu0 %vm14873_vm1, %v17680_v16  ;;  %v7862_v21 = vrot.slane %v7855_v30, %v15429_v9  ;;  %v14811_v60 = vld [vmem:[%s15519_s19 + $0x40] sm:$0xff]  ;;  %v14816_v30 = vld [vmem:[%s15771_s1 + $0x38] sm:$0xff] }
 0xfe3   :  { %v7505_v0 = vmul.f32 %v7493_v34, %v7112_v41  ;;  %14191 = vmatpush3.msk.msra.mxu1 %vm4474_vm10, %v17646_v13  ;;  %14212 = vmatprep.subr.mxu0 %v17680_v16  ;;  %v14808_v34 = vld [vmem:[%s15519_s19 + $0x50] sm:$0xff] }
 0xfe4   :  { %v7504_v17 = vmul.f32 %v7486_v28, %v7104_v10  ;;  %14193 = vmatmul.mubr.msk.f32.vlgmr.msra.gmra.mxu1 %vm5726_vm5, %v7764_v59  ;;  %14213 = vmatpush3.msra.mxu0 %v14804_v62  ;;  %v14807_v59 = vld [vmem:[%s15519_s19 + $0x58] sm:$0xff]  ;;  %v14809_v28 = vld [vmem:[%s15519_s19 + $0x48] sm:$0xff] }
 0xfe5   :  { %14214 = vmatprep.subr.mxu0 %v17680_v16  ;;  %v7115_v47 = vpop.permute.xlu0 %7114  ;;  %14195 = vmatprep.subr.mxu1 %v17680_v16  ;;  %v8009_v57 = vpop.permute.xlu1 %8008  ;;  %v14810_v10 = vld [vmem:[%s15519_s19 + $0x38] sm:$0xff] }
 0xfe6   :  { %v8121_v25 = vcombine.low %v7504_v17, %v7505_v0  ;;  %v7120_v18 = vrot.slane %v7115_v47, %v15550_v27  ;;  %14215 = vmatpush3.msra.mxu0 %v14805_v15  ;;  %14197 = vmatprep.mubr.msk.f32.mxu1 %vm14873_vm1, %v17680_v16  ;;  %vm8011_vm11 = vcmp.eq.s32.totalorder %v8009_v57, %v15977_v38  ;;  %v14813_v0 = vld [vmem:[%s15519_s19 + $0x28] sm:$0xff]  ;;  %v14814_v17 = vld [vmem:[%s15519_s19 + $0x20] sm:$0xff]  ;;  %v14815_v62 = vld [vmem:[%s16042_s26 + $0x38] sm:$0xff] }
 0xfe7   :  { %14216 = vmatprep.subr.mxu0 %v17680_v16  ;;  %v13381_v11 = vsel %vm8011_vm11, 1.0, %v17680_v16  ;;  %v14817_v47 = vld [vmem:[%s15771_s1 + $0x30] sm:$0xff]  ;;  %v14818_v57 = vld [vmem:[%s15771_s1 + $0x28] sm:$0xff] }
 0xfe8   :  { %v7506_v6 = vmul.f32 %v7494_v2, %v7120_v18  ;;  %14217 = vmatpush3.msra.mxu0 %v14806_v20  ;;  %v8128_v8 = vrot.slane %v8121_v25, %v15429_v9  ;;  %v14819_v25 = vld [vmem:[%s15771_s1 + $0x20] sm:$0xff]  ;;  %v14820_v2 = vld [vmem:[%s15771_s1 + $0x18] sm:$0xff]  ;;  %v14821_v18 = vld [vmem:[%s15771_s1 + $0x10] sm:$0xff] }
 0xfe9   :  { %14219 = vmatmul.mubr.msk.f32.vlgmr.msra.gmra.mxu0 %vm192_vm0, %v15917_v52  ;;  %14232 = vmatprep.subr.mxu0 %v17680_v16  ;;  %v16452_v37 = vpop.permute.xlu0 %4470  ;;  %v14822_v15 = vld [vmem:[%s15771_s1 + $0x8] sm:$0xff] }
 0xfea   :  { %17682 = vst [vmem:[#allocation22_spill] sm:$0xff] %v16452_v37  ;;  %v8135_v63 = vrot.slane %v7506_v6, %v15429_v9  ;;  %vm4475_vm12 = vcmp.eq.s32.totalorder %v16452_v37, %v15977_v38  ;;  %14233 = vmatpush3.msra.mxu0 %v14807_v59  ;;  %14240 = vmatprep.mubr.msk.f32.mxu0 %vm14873_vm1, %v17680_v16  ;;  %v14823_v6 = vld [vmem:[%s15771_s1] sm:$0xff] }
 0xfeb   :  { %14196 = vmatpush3.msk.msra.mxu1 %vm4475_vm12, %v17646_v13  ;;  %14234 = vmatprep.subr.mxu0 %v17680_v16 }
 0xfec   :  { %v8136_v41 = vcombine.low %v8128_v8, %v8135_v63  ;;  %14198 = vmatmul.mubr.msk.f32.vlgmr.msra.gmra.mxu1 %vm5726_vm5, %v7862_v21  ;;  %14235 = vmatpush3.msra.mxu0 %v14808_v34  ;;  %v13391_v63 = vld.sshfl [vmem:[#allocation6 + $0x8] sm:$0x13 pattern:$0x75316420] }
 0xfed   :  { %14205 = vmatprep.subr.mxu1 %v17680_v16  ;;  %14236 = vmatprep.subr.mxu0 %v17680_v16  ;;  %v13392_v34 = vld.sshfl [vmem:[#allocation6 + $0xc] sm:$0x13 pattern:$0x75316420] }
 0xfee   :  { %v16472_v5 = vrot.slane %v8136_v41, %v15429_v9  ;;  %14206 = vmatpush3.msk.msra.mxu1 %vm6149_vm8, %v13381_v11  ;;  %14237 = vmatpush3.msra.mxu0 %v14809_v28  ;;  %v14824_v11 = vld [vmem:[%s15829_s5] ss:$0 sm:$0xff]  ;;  %v8557_v28 = vcombine.high %v13391_v63, %v13391_v63 }
 0xfef   :  { %14207 = vmatprep.mubr.msk.f32.mxu1 %vm14873_vm1, %v17680_v16  ;;  %14221 = vmatprep.subr.mxu1 %v17680_v16 }
 0xff0   :  { %17683 = vst [vmem:[#allocation23_spill] sm:$0xff] %v16472_v5  ;;  %14238 = vmatprep.subr.mxu0 %v17680_v16  ;;  %14208 = vmatmul.mubr.msk.f32.vlgmr.msra.gmra.mxu1 %vm8042_vm9, %v16472_v5 }
 0xff1   :  { %14222 = vmatpush3.msra.mxu1 %v14810_v10  ;;  %14239 = vmatpush3.msra.mxu0 %v14811_v60  ;;  %v8564_v10 = vrot.slane %v13391_v63, %v15429_v9 }
 0xff2   :  { %14223 = vmatprep.subr.mxu1 %v17680_v16  ;;  %14241 = vmatmul.mubr.msk.f32.vlgmr.msra.gmra.mxu0 %vm192_vm0, %v15917_v52 }
 0xff3   :  { %14243 = vmatprep.subr.mxu0 %v17680_v16  ;;  %14224 = vmatpush3.msra.mxu1 %v14812_v7 }
 0xff4   :  { %14244 = vmatpush3.msra.mxu0 %v15566_v45  ;;  %14225 = vmatprep.subr.mxu1 %v17680_v16 }
 0xff5   :  { %14226 = vmatpush3.msra.mxu1 %v14813_v0  ;;  %14229 = vmatprep.mubr.msk.f32.mxu1 %vm14873_vm1, %v17680_v16 }
 0xff6   :  { %14227 = vmatprep.subr.mxu1 %v17680_v16  ;;  %14245 = vmatprep.mubr.msk.f32.mxu0 %vm14873_vm1, %v17680_v16 }
 0xff7   :  { %14228 = vmatpush3.msra.mxu1 %v14814_v17  ;;  %9611 = vmatprep.subr.mxu0 %v14815_v62  ;;  %v8580_v62 = vcombine.high %v13392_v34, %v13392_v34 }
 0xff8   :  { %14230 = vmatmul.mubr.msk.f32.vlgmr.msra.gmra.mxu1 %vm192_vm0, %v15917_v52  ;;  %9076 = vmatprep.subr.mxu1 %v14816_v30  ;;  %v8587_v30 = vrot.slane %v13392_v34, %v15429_v9 }
 0xff9   :  { %9077 = vmatpush1.msra.mxu1 %v14817_v47  ;;  %9116 = vmatprep.mubr.f32.mxu1 %v17680_v16 }
 0xffa   :  { %9078 = vmatprep.subr.mxu1 %v14818_v57 }
 0xffb   :  { %9079 = vmatpush1.msra.mxu1 %v14819_v25 }
 0xffc   :  { %9080 = vmatprep.subr.mxu1 %v14820_v2 }
 0xffd   :  { %9081 = vmatpush1.msra.mxu1 %v14821_v18  ;;  %v8571_v18 = vrot.slane %v8557_v28, %v15429_v9 }
 0xffe   :  { %9082 = vmatprep.subr.mxu1 %v14822_v15  ;;  %v8572_v15 = vcombine.high %v8564_v10, %v8564_v10 }
 0xfff   :  { %9083 = vmatpush1.msra.mxu1 %v14823_v6 }
0x1000   :  { %14248 = vmatprep.subr.mxu1 %v17680_v16 }
0x10a1   :  { %v16511_v52 = vpop.f32.mrf.mxu0 }
0x10a2   :  { %17684 = vst [vmem:[#allocation24_spill] sm:$0xff] %v16511_v52 }
0x10a3   :  { %v14204_v20 = vpop.f32.mrf.mxu0 }
0x10a4   :  { %v16513_v21 = vpop.f32.mrf.mxu1 }
0x10a5   :  { %17685 = vst [vmem:[#allocation25_spill] sm:$0xff] %v16513_v21 }
0x10a6   :  { %v14194_v8 = vpop.f32.mrf.mxu1 }
0x10a9   :  { %v8401_v59 = vpop.f32.mrf.mxu0 }
0x10aa   :  { %v8402_v41 = vadd.f32 %v14824_v11, %v8401_v59  ;;  %v8594_v11 = vrot.slane %v8580_v62, %v15429_v9 }
0x10ab   :  { %v14220_v60 = vpop.f32.mrf.mxu0 }
0x10ac   :  { %v8603_v7 = vcombine.high %v8402_v41, %v8402_v41  ;;  %v8610_v0 = vrot.slane %v8402_v41, %v15429_v9  ;;  %v16518_v17 = vpop.f32.mrf.mxu1  ;;  %v8595_v41 = vcombine.high %v8587_v30, %v8587_v30 }
0x10ad   :  { %17686 = vst [vmem:[#allocation26_spill] sm:$0xff] %v16518_v17 }
0x10ae   :  { %v8617_v47 = vrot.slane %v8603_v7, %v15429_v9  ;;  %v8618_v57 = vcombine.high %v8610_v0, %v8610_v0  ;;  %v8626_v25 = vrot.slane %v8610_v0, %v15429_v9  ;;  %v14199_v2 = vpop.f32.mrf.mxu1 }
0x10b0   :  { %v8619_v6 = vcombine.high %v8617_v47, %v8617_v47  ;;  %v8633_v20 = vrot.slane %v8617_v47, %v15429_v9  ;;  %v8640_v8 = vrot.slane %v8618_v57, %v15429_v9  ;;  %v8648_v63 = vcombine.high %v8626_v25, %v8626_v25  ;;  %v16526_v59 = vpop.f32.mrf.mxu1 }
0x10b1   :  { %17687 = vst [vmem:[#allocation27_spill] sm:$0xff] %v16526_v59  ;;  %v8656_v34 = vadd.f32 %v8626_v25, %v8564_v10 }
0x10b2   :  { %v8647_v60 = vrot.slane %v8619_v6, %v15429_v9  ;;  %v8649_v7 = vcombine.high %v8640_v8, %v8640_v8  ;;  %v8657_v0 = vadd.f32 %v8640_v8, %v8571_v18  ;;  %v8658_v2 = vadd.f32 %v8648_v63, %v8572_v15  ;;  %v8541_v13 = vpop.f32.mrf.mxu0  ;;  %v14209_v28 = vpop.f32.mrf.mxu1  ;;  %v14825_v18 = vld [vmem:[%s15829_s5 + $0x1] ss:$0 sm:$0xff]  ;;  %v13400_v63 = vld.sshfl [vmem:[#allocation7 + $0xc] sm:$0x13 pattern:$0x75316420] }
0x10b3   :  { %v8660_v17 = vadd.f32 %v8633_v20, %v8594_v11  ;;  %v13393_v21 = vmul.f32 -1.442695, %v8656_v34  ;;  %v13399_v6 = vld.sshfl [vmem:[#allocation7 + $0x8] sm:$0x13 pattern:$0x75316420] }
0x10b4   :  { %v8659_v47 = vadd.f32 %v8649_v7, %v8587_v30  ;;  %v8661_v52 = vadd.f32 %v8647_v60, %v8595_v41  ;;  %v13394_v57 = vmul.f32 -1.442695, %v8657_v0  ;;  %v13395_v24 = vmul.f32 -1.442695, %v8658_v2  ;;  %v14242_v29 = vpop.f32.mrf.mxu0 }
0x10b5   :  { %14572 = vpow2.f32 %v13393_v21  ;;  %v13397_v59 = vmul.f32 -1.442695, %v8660_v17  ;;  %v8710_v11 = vcombine.high %v13399_v6, %v13399_v6  ;;  %v8740_v0 = vrot.slane %v13400_v63, %v15429_v9 }
0x10b6   :  { %14574 = vpow2.f32 %v13394_v57  ;;  %v13396_v62 = vmul.f32 -1.442695, %v8659_v47  ;;  %v13398_v10 = vmul.f32 -1.442695, %v8661_v52  ;;  %v8733_v52 = vcombine.high %v13400_v63, %v13400_v63 }
0x10b7   :  { %14576 = vpow2.f32 %v13395_v24  ;;  %v8717_v24 = vrot.slane %v13399_v6, %v15429_v9  ;;  %v8724_v7 = vrot.slane %v8710_v11, %v15429_v9 }
0x10b8   :  { %14578 = vpow2.f32 %v13396_v62  ;;  %v8471_v25 = vpop.f32.mrf.mxu1 }
0x10b9   :  { %14580 = vpow2.f32 %v13397_v59  ;;  %v8472_v15 = vadd.f32 %v14825_v18, %v8471_v25  ;;  %v8725_v47 = vcombine.high %v8717_v24, %v8717_v24  ;;  %v8747_v18 = vrot.slane %v8733_v52, %v15429_v9 }
0x10ba   :  { %14582 = vpow2.f32 %v13398_v10  ;;  %v14231_v20 = vpop.f32.mrf.mxu1 }
0x10bb   :  { %v8756_v8 = vcombine.high %v8472_v15, %v8472_v15  ;;  %v8763_v30 = vrot.slane %v8472_v15, %v15429_v9 }
0x10bd   :  { %v8770_v29 = vrot.slane %v8756_v8, %v15429_v9  ;;  %v8771_v21 = vcombine.high %v8763_v30, %v8763_v30  ;;  %v8779_v17 = vrot.slane %v8763_v30, %v15429_v9  ;;  %v14826_v30 = vld [vmem:[%s15829_s5 + $0x2] ss:$0 sm:$0xff] }
0x10bf   :  { %v8772_v41 = vcombine.high %v8770_v29, %v8770_v29  ;;  %v8793_v59 = vrot.slane %v8771_v21, %v15429_v9  ;;  %v8801_v34 = vcombine.high %v8779_v17, %v8779_v17  ;;  %v8809_v60 = vadd.f32 %v8779_v17, %v8717_v24 }
0x10c0   :  { %v8786_v57 = vrot.slane %v8770_v29, %v15429_v9  ;;  %v8542_v21 = vadd.f32 %v14826_v30, %v8541_v13  ;;  %v8748_v24 = vcombine.high %v8740_v0, %v8740_v0 }
0x10c1   :  { %v8802_v2 = vcombine.high %v8793_v59, %v8793_v59  ;;  %v13401_v62 = vmul.f32 -1.442695, %v8809_v60  ;;  %v8800_v15 = vrot.slane %v8772_v41, %v15429_v9  ;;  %v8810_v6 = vadd.f32 %v8793_v59, %v8724_v7 }
0x10c2   :  { %v14573_v28 = vpop.eup %14572  ;;  %v8811_v11 = vadd.f32 %v8801_v34, %v8725_v47  ;;  %v8916_v13 = vrot.slane %v8542_v21, %v15429_v9 }
0x10c3   :  { %v14575_v10 = vpop.eup %14574  ;;  %v8680_v25 = vadd.f32 1.0, %v14573_v28  ;;  %14584 = vpow2.f32 %v13401_v62  ;;  %v8812_v1 = vadd.f32 %v8802_v2, %v8740_v0  ;;  %v8813_v28 = vadd.f32 %v8786_v57, %v8747_v18  ;;  %v13407_v57 = vld.sshfl [vmem:[#allocation8 + $0x8] sm:$0x13 pattern:$0x75316420] }
0x10c4   :  { %v14577_v20 = vpop.eup %14576  ;;  %v8681_v8 = vadd.f32 1.0, %v14575_v10  ;;  %v8814_v41 = vadd.f32 %v8800_v15, %v8748_v24  ;;  %v13402_v59 = vmul.f32 -1.442695, %v8810_v6  ;;  %v13403_v34 = vmul.f32 -1.442695, %v8811_v11 }
0x10c5   :  { %v14579_v63 = vpop.eup %14578  ;;  %v8682_v17 = vadd.f32 1.0, %v14577_v20  ;;  %14586 = vrcp.f32 %v8680_v25  ;;  %v13404_v47 = vmul.f32 -1.442695, %v8812_v1  ;;  %v8909_v62 = vcombine.high %v8542_v21, %v8542_v21 }
0x10c6   :  { %v14581_v29 = vpop.eup %14580  ;;  %v8683_v60 = vadd.f32 1.0, %v14579_v63  ;;  %14588 = vrcp.f32 %v8681_v8  ;;  %v13405_v10 = vmul.f32 -1.442695, %v8813_v28  ;;  %v13406_v0 = vmul.f32 -1.442695, %v8814_v41 }
0x10c7   :  { %v14583_v61 = vpop.eup %14582  ;;  %v8684_v52 = vadd.f32 1.0, %v14581_v29  ;;  %14590 = vrcp.f32 %v8682_v17  ;;  %v8924_v2 = vcombine.high %v8916_v13, %v8916_v13  ;;  %v8923_v25 = vrot.slane %v8909_v62, %v15429_v9  ;;  %v13408_v18 = vld.sshfl [vmem:[#allocation8 + $0xc] sm:$0x13 pattern:$0x75316420] }
0x10c8   :  { %v8685_v7 = vadd.f32 1.0, %v14583_v61  ;;  %14592 = vrcp.f32 %v8683_v60  ;;  %v8932_v61 = vrot.slane %v8916_v13, %v15429_v9  ;;  %v8863_v15 = vcombine.high %v13407_v57, %v13407_v57 }
0x10c9   :  { %14594 = vrcp.f32 %v8684_v52  ;;  %v8946_v6 = vrot.slane %v8924_v2, %v15429_v9  ;;  %v8870_v20 = vrot.slane %v13407_v57, %v15429_v9  ;;  %v8925_v30 = vcombine.high %v8923_v25, %v8923_v25 }
0x10ca   :  { %14596 = vrcp.f32 %v8685_v7  ;;  %v8886_v63 = vcombine.high %v13408_v18, %v13408_v18  ;;  %v8954_v17 = vcombine.high %v8932_v61, %v8932_v61  ;;  %v8877_v60 = vrot.slane %v8863_v15, %v15429_v9 }
0x10cb   :  { %14598 = vpow2.f32 %v13402_v59  ;;  %v8893_v28 = vrot.slane %v13408_v18, %v15429_v9  ;;  %v8955_v52 = vcombine.high %v8946_v6, %v8946_v6  ;;  %v8878_v7 = vcombine.high %v8870_v20, %v8870_v20 }
0x10cc   :  { %14600 = vpow2.f32 %v13403_v34  ;;  %v8939_v13 = vrot.slane %v8923_v25, %v15429_v9 }
0x10cd   :  { %14602 = vpow2.f32 %v13404_v47 }
0x10ce   :  { %14604 = vpow2.f32 %v13405_v10  ;;  %v8953_v10 = vrot.slane %v8925_v30, %v15429_v9 }
0x10cf   :  { %14606 = vpow2.f32 %v13406_v0 }
0x10d0   :  { %v14585_v1 = vpop.eup %14584 }
0x10d1   :  { %v8833_v21 = vadd.f32 1.0, %v14585_v1 }
0x10d2   :  { %v14587_v8 = vpop.eup %14586 }
0x10d3   :  { %v14589_v11 = vpop.eup %14588  ;;  %v8962_v24 = vmul.f32 %v14587_v8, %v8932_v61  ;;  %14608 = vrcp.f32 %v8833_v21  ;;  %v8900_v61 = vrot.slane %v8886_v63, %v15429_v9 }
0x10d4   :  { %v14591_v29 = vpop.eup %14590  ;;  %v8963_v41 = vmul.f32 %v14589_v11, %v8946_v6  ;;  %v8901_v6 = vcombine.high %v8893_v28, %v8893_v28 }
0x10d5   :  { %v14593_v59 = vpop.eup %14592  ;;  %v8964_v34 = vmul.f32 %v14591_v29, %v8954_v17  ;;  %v8968_v47 = vadd.f32 %v8962_v24, %v8870_v20 }
0x10d6   :  { %v14595_v62 = vpop.eup %14594  ;;  %v8965_v0 = vmul.f32 %v14593_v59, %v8955_v52  ;;  %v8969_v2 = vadd.f32 %v8963_v41, %v8877_v60 }
0x10d7   :  { %v14597_v57 = vpop.eup %14596  ;;  %v8966_v15 = vmul.f32 %v14595_v62, %v8939_v13  ;;  %v8970_v1 = vadd.f32 %v8964_v34, %v8878_v7  ;;  %14610 = vtanh.f32 %v8968_v47 }
0x10d8   :  { %v14599_v18 = vpop.eup %14598  ;;  %v8967_v8 = vmul.f32 %v14597_v57, %v8953_v10  ;;  %v8971_v11 = vadd.f32 %v8965_v0, %v8893_v28  ;;  %14612 = vtanh.f32 %v8969_v2 }
0x10d9   :  { %v14601_v25 = vpop.eup %14600  ;;  %v8972_v17 = vadd.f32 %v8966_v15, %v8900_v61  ;;  %14614 = vtanh.f32 %v8970_v1  ;;  %v8834_v20 = vadd.f32 1.0, %v14599_v18 }
0x10da   :  { %v14603_v24 = vpop.eup %14602  ;;  %v8973_v30 = vadd.f32 %v8967_v8, %v8901_v6  ;;  %14616 = vtanh.f32 %v8971_v11  ;;  %v8835_v29 = vadd.f32 1.0, %v14601_v25 }
0x10db   :  { %v14605_v21 = vpop.eup %14604  ;;  %14618 = vtanh.f32 %v8972_v17  ;;  %v8836_v60 = vadd.f32 1.0, %v14603_v24 }
0x10dc   :  { %v14607_v63 = vpop.eup %14606  ;;  %14620 = vtanh.f32 %v8973_v30  ;;  %v8837_v52 = vadd.f32 1.0, %v14605_v21 }
0x10dd   :  { %v8838_v41 = vadd.f32 1.0, %v14607_v63  ;;  %14622 = vrcp.f32 %v8834_v20 }
0x10de   :  { %14624 = vrcp.f32 %v8835_v29 }
0x10df   :  { %14626 = vrcp.f32 %v8836_v60 }
0x10e0   :  { %14628 = vrcp.f32 %v8837_v52  ;;  %v14609_v28 = vpop.eup %14608 }
0x10e1   :  { %14630 = vrcp.f32 %v8838_v41  ;;  %v8980_v62 = vsub.f32 1.0, %v14609_v28  ;;  %v8992_v18 = vmul.f32 %v14609_v28, %v15894_v22 }
0x10e4   :  { %v14611_v59 = vpop.eup %14610 }
0x10e5   :  { %v14613_v7 = vpop.eup %14612  ;;  %v8986_v2 = vmul.f32 %v14611_v59, %v8980_v62 }
0x10e6   :  { %v14615_v13 = vpop.eup %14614 }
0x10e7   :  { %v14617_v34 = vpop.eup %14616  ;;  %v16555_v29 = vadd.f32 %v8992_v18, %v8986_v2 }
0x10e8   :  { %v14619_v47 = vpop.eup %14618 }
0x10e9   :  { %v14621_v10 = vpop.eup %14620 }
0x10ea   :  { %v14623_v0 = vpop.eup %14622 }
0x10eb   :  { %v14625_v57 = vpop.eup %14624  ;;  %v8981_v61 = vsub.f32 1.0, %v14623_v0  ;;  %v8993_v25 = vmul.f32 %v14623_v0, %v15890_v55 }
0x10ec   :  { %v14627_v15 = vpop.eup %14626  ;;  %v8982_v1 = vsub.f32 1.0, %v14625_v57  ;;  %v8994_v30 = vmul.f32 %v14625_v57, %v15898_v31 }
0x10ed   :  { %v14629_v6 = vpop.eup %14628  ;;  %v8983_v8 = vsub.f32 1.0, %v14627_v15  ;;  %v8987_v11 = vmul.f32 %v14613_v7, %v8981_v61  ;;  %v8995_v63 = vmul.f32 %v14627_v15, %v15900_v32 }
0x10ee   :  { %v14631_v17 = vpop.eup %14630  ;;  %v8984_v20 = vsub.f32 1.0, %v14629_v6  ;;  %v8988_v24 = vmul.f32 %v14615_v13, %v8982_v1  ;;  %v8996_v22 = vmul.f32 %v14629_v6, %v15904_v33 }
0x10ef   :  { %v8985_v21 = vsub.f32 1.0, %v14631_v17  ;;  %v8989_v60 = vmul.f32 %v14617_v34, %v8983_v8  ;;  %v16558_v52 = vadd.f32 %v8993_v25, %v8987_v11  ;;  %v8997_v28 = vmul.f32 %v14631_v17, %v15906_v36 }
0x10f0   :  { %v8990_v41 = vmul.f32 %v14619_v47, %v8984_v20  ;;  %v16562_v55 = vadd.f32 %v8994_v30, %v8988_v24 }
0x10f1   :  { %v8991_v59 = vmul.f32 %v14621_v10, %v8985_v21  ;;  %v16564_v7 = vadd.f32 %v8995_v63, %v8989_v60  ;;  %v9010_v31 = vcombine.low %v16555_v29, %v16558_v52 }
0x10f2   :  { %v16568_v13 = vadd.f32 %v8996_v22, %v8990_v41 }
0x10f3   :  { %v16570_v34 = vadd.f32 %v8997_v28, %v8991_v59  ;;  %v9011_v32 = vcombine.low %v16562_v55, %v16564_v7  ;;  %v9019_v36 = vrot.slane %v9010_v31, %v15429_v9 }
0x10f5   :  { %v9012_v33 = vcombine.low %v16568_v13, %v16570_v34  ;;  %v9026_v47 = vrot.slane %v9011_v32, %v15429_v9 }
0x10f7   :  { %v9033_v62 = vrot.slane %v9012_v33, %v15429_v9  ;;  %v9034_v10 = vcombine.low %v9019_v36, %v9026_v47 }
0x10f9   :  { %v9041_v0 = vrot.slane %v9034_v10, %v15429_v9  ;;  %v9048_v2 = vrot.slane %v9033_v62, %v15429_v9 }
0x10fb   :  { %v16581_v57 = vcombine.low %v9041_v0, %v9048_v2 }
0x10fd   :  { %13409 = vmatmul.mubr.msk.f32.vlgmr.msra.gmra.mxu1 %vm192_vm0, %v16581_v57 }
0x10fe   :  { %14249 = vmatpush3.msra.mxu1 %v15582_v4  ;;  %14250 = vmatprep.mubr.msk.f32.mxu1 %vm14873_vm1, %v17680_v16 }
0x10ff   :  { %14253 = vmatprep.subr.mxu1 %v17680_v16 }
0x11bd   :  { %v16589_v61 = vpop.f32.mrf.mxu1 }
0x11bf   :  { %v9120_v15 = vpop.f32.mrf.mxu1 }
0x11c0   :  { %v16592_v1 = vadd.f32 %v9120_v15, %v15932_v58  ;;  %v14827_v15 = vld [vmem:[%s15962_s13] ss:$0 sm:$0xff] }
0x11c2   :  { %v9178_v18 = vcombine.high %v16592_v1, %v16592_v1  ;;  %v9185_v6 = vrot.slane %v16592_v1, %v15429_v9 }
0x11c4   :  { %v9192_v8 = vrot.slane %v9178_v18, %v15429_v9  ;;  %v9193_v11 = vcombine.high %v9185_v6, %v9185_v6  ;;  %v9201_v25 = vrot.slane %v9185_v6, %v15429_v9 }
0x11c6   :  { %v9194_v17 = vcombine.high %v9192_v8, %v9192_v8  ;;  %v9208_v20 = vrot.slane %v9192_v8, %v15429_v9  ;;  %v9215_v24 = vrot.slane %v9193_v11, %v15429_v9  ;;  %v9223_v30 = vcombine.high %v9201_v25, %v9201_v25 }
0x11c7   :  { %v9228_v21 = vrot.slane %v9201_v25, %v15550_v27 }
0x11c8   :  { %v9222_v60 = vrot.slane %v9194_v17, %v15429_v9  ;;  %v9224_v63 = vcombine.high %v9215_v24, %v9215_v24  ;;  %v9232_v41 = vrot.slane %v9215_v24, %v15550_v27  ;;  %v9236_v22 = vrot.slane %v9223_v30, %v15550_v27 }
0x11c9   :  { %v9244_v28 = vrot.slane %v9208_v20, %v15550_v27  ;;  %v9255_v59 = vadd.f32 %v9228_v21, %v15783_v54 }
0x11ca   :  { %v9240_v31 = vrot.slane %v9224_v63, %v15550_v27  ;;  %v9256_v32 = vadd.f32 %v9232_v41, %v15783_v54  ;;  %v9257_v33 = vadd.f32 %v9236_v22, %v15783_v54  ;;  %v9248_v36 = vrot.slane %v9222_v60, %v15550_v27 }
0x11cb   :  { %v9259_v47 = vadd.f32 %v15781_v53, %v9244_v28  ;;  %14632 = vtanh.f32 %v9255_v59 }
0x11cc   :  { %v9258_v62 = vadd.f32 %v15781_v53, %v9240_v31  ;;  %14634 = vtanh.f32 %v9256_v32  ;;  %v9260_v10 = vadd.f32 %v15781_v53, %v9248_v36 }
0x11cd   :  { %14636 = vtanh.f32 %v9257_v33 }
0x11ce   :  { %14638 = vtanh.f32 %v9258_v62 }
0x11cf   :  { %14640 = vtanh.f32 %v9259_v47 }
0x11d0   :  { %14642 = vtanh.f32 %v9260_v10 }
0x11d8   :  { %v14633_v0 = vpop.eup %14632 }
0x11d9   :  { %v14635_v2 = vpop.eup %14634  ;;  %v9267_v18 = vmul.f32 %v14827_v15, %v14633_v0 }
0x11da   :  { %v14637_v6 = vpop.eup %14636  ;;  %v9268_v8 = vmul.f32 %v14827_v15, %v14635_v2 }
0x11db   :  { %v14639_v11 = vpop.eup %14638  ;;  %v9273_v25 = vsel %vm192_vm0, %v9267_v18, 0.0  ;;  %v9269_v17 = vmul.f32 %v14827_v15, %v14637_v6 }
0x11dc   :  { %v14641_v20 = vpop.eup %14640  ;;  %9274 = vadd.xlane.f32.xlu0 %v9273_v25  ;;  %v9276_v24 = vsel %vm192_vm0, %v9268_v8, 0.0  ;;  %v9270_v60 = vmul.f32 %v14827_v15, %v14639_v11 }
0x11dd   :  { %9277 = vadd.xlane.f32.xlu1 %v9276_v24  ;;  %v9271_v30 = vmul.f32 %v14827_v15, %v14641_v20  ;;  %v9279_v21 = vsel %vm192_vm0, %v9269_v17, 0.0  ;;  %v14643_v63 = vpop.eup %14642 }
0x11de   :  { %v9282_v22 = vsel %vm192_vm0, %v9270_v60, 0.0  ;;  %v9272_v28 = vmul.f32 %v14827_v15, %v14643_v63 }
0x11df   :  { %v9285_v41 = vsel %vm192_vm0, %v9271_v30, 0.0 }
0x11e0   :  { %9280 = vadd.xlane.f32.xlu0 %v9279_v21  ;;  %v9288_v59 = vsel %vm192_vm0, %v9272_v28, 0.0 }
0x11e1   :  { %9286 = vadd.xlane.f32.xlu1 %v9285_v41 }
0x11e4   :  { %9283 = vadd.xlane.f32.xlu0 %v9282_v22 }
0x11e8   :  { %9289 = vadd.xlane.f32.xlu0 %v9288_v59 }
0x1265   :  { %v9275_v31 = vpop.xlane.xlu0 %9274 }
0x1266   :  { %v9278_v32 = vpop.xlane.xlu1 %9277  ;;  %v9300_v33 = vrot.slane %v9275_v31, %v15981_v48 }
0x1267   :  { %v9304_v36 = vrot.slane %v9278_v32, %v15981_v48 }
0x1269   :  { %v9281_v47 = vpop.xlane.xlu0 %9280  ;;  %v9321_v62 = vsel %vm2712_vm3, %v9304_v36, %v9300_v33 }
0x126a   :  { %v9308_v10 = vrot.slane %v9281_v47, %v15981_v48  ;;  %v9287_v18 = vpop.xlane.xlu1 %9286  ;;  %v9934_v47 = vld [vmem:[#allocation9 + $0x8] sm:$0x3f] }
0x126b   :  { %v9316_v11 = vrot.slane %v9287_v18, %v15981_v48  ;;  %v14829_v18 = vld [vmem:[%s16042_s26 + $0x28] sm:$0xff] }
0x126c   :  { %v9322_v0 = vsel %vm2715_vm4, %v9308_v10, %v9321_v62 }
0x126d   :  { %v9284_v2 = vpop.xlane.xlu0 %9283  ;;  %v9327_v15 = vsel %vm15990_vm14, %v9322_v0, -1e+30 }
0x126e   :  { %v9329_v6 = vsel %vm5702_vm15, %v9327_v15, -inf  ;;  %v9312_v8 = vrot.slane %v9284_v2, %v15981_v48 }
0x126f   :  { %9330 = vmax.xlane.f32.xlu1 %v9329_v6  ;;  %v14830_v6 = vld [vmem:[%s16042_s26 + $0x20] sm:$0xff] }
0x1270   :  { %v9323_v20 = vsel %vm2712_vm3, %v9316_v11, %v9312_v8  ;;  %v14831_v8 = vld [vmem:[%s16042_s26 + $0x18] sm:$0xff] }
0x1271   :  { %v9290_v25 = vpop.xlane.xlu0 %9289 }
0x1272   :  { %v9320_v17 = vrot.slane %v9290_v25, %v15981_v48  ;;  %v14832_v25 = vld [vmem:[%s16042_s26 + $0x10] sm:$0xff] }
0x1274   :  { %v9324_v24 = vsel %vm2715_vm4, %v9320_v17, %v9323_v20  ;;  %v14833_v20 = vld [vmem:[%s16042_s26 + $0x8] sm:$0xff] }
0x1275   :  { %v9328_v30 = vsel %vm16003_vm2, %v9324_v24, -1e+30  ;;  %v14834_v24 = vld [vmem:[%s16042_s26] sm:$0xff] }
0x1276   :  { %v9332_v21 = vsel %vm5702_vm15, %v9328_v30, -inf }
0x1277   :  { %9333 = vmax.xlane.f32.xlu0 %v9332_v21 }
0x12f8   :  { %v9331_v60 = vpop.xlane.xlu1 %9330 }
0x12f9   :  { %v9335_v63 = vsub.f32 %v9327_v15, %v9331_v60  ;;  %v14828_v15 = vld [vmem:[%s16042_s26 + $0x30] sm:$0xff] }
0x12fb   :  { %v9337_v41 = vmul.f32 1.442695, %v9335_v63 }
0x12fd   :  { %14644 = vpow2.f32 %v9337_v41 }
0x1300   :  { %v9334_v22 = vpop.xlane.xlu0 %9333 }
0x1301   :  { %v9336_v28 = vsub.f32 %v9328_v30, %v9334_v22  ;;  %v17688_v30 = vmov 1.0  }
0x1303   :  { %v9339_v59 = vmul.f32 1.442695, %v9336_v28 }
0x1305   :  { %14646 = vpow2.f32 %v9339_v59 }
0x130a   :  { %v14645_v31 = vpop.eup %14644 }
0x130b   :  { %v9341_v32 = vsel %vm5702_vm15, %v14645_v31, 0.0 }
0x130c   :  { %9342 = vadd.xlane.f32.xlu1 %v9341_v32 }
0x1312   :  { %v14647_v33 = vpop.eup %14646 }
0x1313   :  { %v9344_v36 = vsel %vm5702_vm15, %v14647_v33, 0.0 }
0x1314   :  { %9345 = vadd.xlane.f32.xlu0 %v9344_v36 }
0x132a   :  { %9936 = vrot.lane.b32.xlu0 %v9934_v47, %s14896_s16 }
0x1395   :  { %v9343_v62 = vpop.xlane.xlu1 %9342 }
0x1396   :  { %14648 = vrcp.f32 %v9343_v62 }
0x139d   :  { %v9346_v10 = vpop.xlane.xlu0 %9345 }
0x139e   :  { %14650 = vrcp.f32 %v9346_v10 }
0x13a3   :  { %v14649_v0 = vpop.eup %14648 }
0x13a4   :  { %v16641_v2 = vmul.f32 %v14649_v0, %v14645_v31 }
0x13a6   :  { %14246 = vmatmul.mubr.msk.f32.vlgmr.msra.gmra.mxu0 %vm5726_vm5, %v16641_v2 }
0x13a7   :  { %9612 = vmatpush1.msra.mxu0 %v14828_v15  ;;  %9651 = vmatprep.mubr.f32.mxu0 %v17680_v16 }
0x13a8   :  { %9613 = vmatprep.subr.mxu0 %v14829_v18 }
0x13a9   :  { %9614 = vmatpush1.msra.mxu0 %v14830_v6 }
0x13aa   :  { %9615 = vmatprep.subr.mxu0 %v14831_v8 }
0x13ab   :  { %v14651_v11 = vpop.eup %14650  ;;  %9616 = vmatpush1.msra.mxu0 %v14832_v25 }
0x13ac   :  { %v16651_v17 = vmul.f32 %v14651_v11, %v14647_v33  ;;  %9617 = vmatprep.subr.mxu0 %v14833_v20 }
0x13ad   :  { %9618 = vmatpush1.msra.mxu0 %v14834_v24 }
0x13ae   :  { %14251 = vmatmul.mubr.msk.f32.vlgmr.msra.gmra.mxu1 %vm5726_vm5, %v16651_v17  ;;  %14263 = vmatprep.subr.mxu0 %v17680_v16 }
0x13af   :  { %14254 = vmatpush3.msk.msra.mxu1 %vm4474_vm10, %v17688_v30  ;;  %14255 = vmatprep.mubr.msk.f32.mxu1 %vm14873_vm1, %v17680_v16 }
0x13b0   :  { %14258 = vmatprep.subr.mxu1 %v17680_v16 }
0x1466   :  { %v9420_v21 = vpop.f32.mrf.mxu0 }
0x1467   :  { %v9505_v60 = vrot.slane %v9420_v21, %v15429_v9 }
0x1468   :  { %v14247_v63 = vpop.f32.mrf.mxu0 }
0x1469   :  { %v9506_v41 = vcombine.high %v9505_v60, %v9505_v60  ;;  %v9513_v22 = vrot.slane %v9505_v60, %v15429_v9  ;;  %v9119_v60 = vadd.f32 %v16589_v61, %v16147_v14 }
0x146b   :  { %v9520_v28 = vrot.slane %v9506_v41, %v15429_v9  ;;  %v9521_v33 = vcombine.high %v9513_v22, %v9513_v22  ;;  %v9124_v63 = vcombine.high %v9119_v60, %v9119_v60  ;;  %v9131_v41 = vrot.slane %v9119_v60, %v15429_v9 }
0x146d   :  { %v9545_v36 = vcombine.low %v9513_v22, %v9520_v28  ;;  %v9138_v22 = vrot.slane %v9124_v63, %v15429_v9  ;;  %v9139_v28 = vcombine.high %v9131_v41, %v9131_v41 }
0x146e   :  { %v9493_v59 = vpop.f32.mrf.mxu1 }
0x146f   :  { %v9528_v31 = vrot.slane %v9493_v59, %v15429_v9  ;;  %v9554_v18 = vrot.slane %v9545_v36, %v15429_v9  ;;  %v9147_v59 = vrot.slane %v9131_v41, %v15429_v9  ;;  %v9140_v36 = vcombine.high %v9138_v22, %v9138_v22 }
0x1470   :  { %v14252_v32 = vpop.f32.mrf.mxu1 }
0x1471   :  { %v9529_v47 = vcombine.high %v9528_v31, %v9528_v31  ;;  %v9536_v62 = vrot.slane %v9528_v31, %v15429_v9 }
0x1473   :  { %v9543_v10 = vrot.slane %v9529_v47, %v15429_v9  ;;  %v9544_v0 = vcombine.high %v9536_v62, %v9536_v62  ;;  %v9546_v15 = vcombine.low %v9521_v33, %v9536_v62  ;;  %v9161_v47 = vrot.slane %v9139_v28, %v15429_v9 }
0x1475   :  { %v9547_v6 = vcombine.low %v9543_v10, %v9544_v0  ;;  %v9561_v8 = vrot.slane %v9546_v15, %v15429_v9  ;;  %v9169_v15 = vcombine.high %v9147_v59, %v9147_v59 }
0x1477   :  { %v9568_v11 = vrot.slane %v9547_v6, %v15429_v9  ;;  %v9569_v25 = vcombine.low %v9554_v18, %v9561_v8 }
0x1479   :  { %v9576_v20 = vrot.slane %v9569_v25, %v15429_v9  ;;  %v9583_v24 = vrot.slane %v9568_v11, %v15429_v9  ;;  %v9154_v25 = vrot.slane %v9138_v22, %v15429_v9 }
0x147b   :  { %v9584_v21 = vcombine.low %v9576_v20, %v9583_v24  ;;  %v9168_v20 = vrot.slane %v9140_v36, %v15429_v9  ;;  %v9170_v24 = vcombine.high %v9161_v47, %v9161_v47  ;;  %v9937_v36 = vpop.permute.xlu0 %9936 }
0x147d   :  { %13412 = vmatmul.mubr.msk.f32.vlgmr.msra.gmra.mxu0 %vm192_vm0, %v9584_v21 }
0x147e   :  { %14265 = vmatprep.mubr.msk.f32.mxu0 %vm14873_vm1, %v17680_v16 }
0x153d   :  { %v9653_v31 = vpop.f32.mrf.mxu0 }
0x153e   :  { %v9659_v32 = vcombine.high %v9653_v31, %v9653_v31  ;;  %v9666_v33 = vrot.slane %v9653_v31, %v15429_v9 }
0x153f   :  { %v9655_v62 = vpop.f32.mrf.mxu0 }
0x1540   :  { %v9673_v10 = vrot.slane %v9659_v32, %v15429_v9  ;;  %v9674_v0 = vcombine.high %v9666_v33, %v9666_v33  ;;  %v9682_v61 = vrot.slane %v9666_v33, %v15429_v9  ;;  %9929 = vrot.lane.b32.xlu1 %v9655_v62, %s14896_s16 }
0x1542   :  { %v9675_v18 = vcombine.high %v9673_v10, %v9673_v10  ;;  %v9689_v6 = vrot.slane %v9673_v10, %v15429_v9  ;;  %v9696_v8 = vrot.slane %v9674_v0, %v15429_v9  ;;  %v9704_v11 = vcombine.high %v9682_v61, %v9682_v61 }
0x1543   :  { %v16693_v21 = vadd.f32 %v9682_v61, %v9147_v59 }
0x1544   :  { %v9703_v60 = vrot.slane %v9675_v18, %v15429_v9  ;;  %v9705_v63 = vcombine.high %v9696_v8, %v9696_v8  ;;  %v16696_v41 = vadd.f32 %v9696_v8, %v9161_v47  ;;  %v16698_v28 = vadd.f32 %v9704_v11, %v9169_v15 }
0x1545   :  { %v16700_v31 = vadd.f32 %v9689_v6, %v9154_v25 }
0x1546   :  { %17689 = vst [vmem:[#allocation28_spill] sm:$0xff] %v16698_v28  ;;  %v16702_v32 = vadd.f32 %v9705_v63, %v9170_v24  ;;  %v16704_v33 = vadd.f32 %v9703_v60, %v9168_v20 }
0x1548   :  { %17690 = vst [vmem:[#allocation29_spill] sm:$0xff] %v16704_v33 }
0x15b2   :  { %v9930_v62 = vpop.permute.xlu1 %9929 }
0x15b3   :  { %v9932_v22 = vadd.f32 %v9930_v62, %v16592_v1 }
0x15b5   :  { %v9939_v10 = vadd.f32 %v9937_v36, %v9932_v22 }
0x15b7   :  { %v13413_v59 = vmul.f32 -1.442695, %v9939_v10 }
0x15b9   :  { %14652 = vpow2.f32 %v13413_v59 }
0x15c6   :  { %v14653_v0 = vpop.eup %14652 }
0x15c7   :  { %v9943_v61 = vadd.f32 1.0, %v14653_v0 }
0x15c9   :  { %14654 = vrcp.f32 %v9943_v61 }
0x15d6   :  { %v14655_v47 = vpop.eup %14654 }
0x15d7   :  { %v9954_v15 = vrot.slane %v14655_v47, %v15429_v9  ;;  %v9947_v18 = vcombine.high %v14655_v47, %v14655_v47 }
0x15d9   :  { %v16709_v6 = vrot.slane %v9954_v15, %v15429_v9  ;;  %v9962_v8 = vcombine.high %v9954_v15, %v9954_v15  ;;  %v9961_v11 = vrot.slane %v9947_v18, %v15429_v9 }
0x15db   :  { %17691 = vst [vmem:[#allocation30_spill] sm:$0xff] %v16709_v6  ;;  %v10084_v25 = vsub.f32 1.0, %v16709_v6  ;;  %v16715_v1 = vcombine.high %v16709_v6, %v16709_v6  ;;  %v16718_v20 = vrot.slane %v9962_v8, %v15429_v9  ;;  %v16723_v60 = vrot.slane %v9961_v11, %v15429_v9 }
0x15dc   :  { %v9963_v22 = vcombine.high %v9961_v11, %v9961_v11 }
0x15dd   :  { %17692 = vst [vmem:[#allocation31_spill] sm:$0xff] %v16715_v1  ;;  %17693 = vst [vmem:[#allocation32_spill] sm:$0xff] %v16718_v20  ;;  %10096 = vrot.lane.b32.xlu1 %v10084_v25, %s14898_s22  ;;  %v10086_v24 = vsub.f32 1.0, %v16715_v1  ;;  %v10085_v63 = vsub.f32 1.0, %v16718_v20  ;;  %v16729_v62 = vcombine.high %v16718_v20, %v16718_v20  ;;  %v10088_v36 = vsub.f32 1.0, %v16723_v60 }
0x15de   :  { %17694 = vst [vmem:[#allocation33_spill] sm:$0xff] %v16723_v60  ;;  %v16736_v59 = vrot.slane %v9963_v22, %v15429_v9 }
0x15df   :  { %10100 = vrot.lane.b32.xlu0 %v10086_v24, %s14898_s22  ;;  %17695 = vst [vmem:[#allocation34_spill] sm:$0xff] %v16729_v62  ;;  %v10087_v10 = vsub.f32 1.0, %v16729_v62 }
0x15e0   :  { %17696 = vst [vmem:[#allocation35_spill] sm:$0xff] %v16736_v59  ;;  %v10089_v0 = vsub.f32 1.0, %v16736_v59 }
0x15e1   :  { %10098 = vrot.lane.b32.xlu1 %v10085_v63, %s14898_s22  ;;  %v13418_v63 = vld [vmem:[%s16354_s27 + $0x2] sm:$0x3] }
0x15e3   :  { %10104 = vrot.lane.b32.xlu0 %v10088_v36, %s14898_s22 }
0x15e5   :  { %10102 = vrot.lane.b32.xlu1 %v10087_v10, %s14898_s22  ;;  %v10493_v10 = vrot.slane %v13418_v63, %v15550_v27 }
0x15e9   :  { %10106 = vrot.lane.b32.xlu1 %v10089_v0, %s14898_s22 }
0x164f   :  { %v10097_v61 = vpop.permute.xlu1 %10096 }
0x1650   :  { %v10114_v47 = vmul.f32 %v10097_v61, %v16333_v26 }
0x1651   :  { %v10101_v15 = vpop.permute.xlu0 %10100 }
0x1652   :  { %10122 = vperm.xlu0 %14374, %v10114_v47   ;;  %v10116_v8 = vmul.f32 %v10101_v15, %v16337_v19  ;;  %v10500_v47 = vrot.slane %v13418_v63, %v15926_v56  ;;  %v10180_v15 = vrot.slane %v16641_v2, %v15429_v9 }
0x1653   :  { %v10099_v18 = vpop.permute.xlu1 %10098 }
0x1654   :  { %v10115_v11 = vmul.f32 %v10099_v18, %v16321_v40  ;;  %v10188_v18 = vrot.slane %v10180_v15, %v15429_v9 }
0x1655   :  { %v10105_v25 = vpop.permute.xlu0 %10104 }
0x1656   :  { %10140 = vperm.xlu0 %14374, %v10116_v8   ;;  %10131 = vperm.xlu1 %14375, %v10115_v11   ;;  %v10118_v22 = vmul.f32 %v10105_v25, %v16346_v23  ;;  %v10181_v11 = vcombine.high %v10180_v15, %v10180_v15  ;;  %v10203_v25 = vrot.slane %v16651_v17, %v15429_v9 }
0x1657   :  { %v10103_v24 = vpop.permute.xlu1 %10102 }
0x1658   :  { %v10117_v36 = vmul.f32 %v10103_v24, %v16344_v46  ;;  %v10195_v63 = vrot.slane %v10181_v11, %v15429_v9  ;;  %v10211_v15 = vrot.slane %v10203_v25, %v15429_v9 }
0x165a   :  { %10158 = vperm.xlu0 %14374, %v10118_v22   ;;  %10149 = vperm.xlu1 %14375, %v10117_v36   ;;  %v10196_v22 = vcombine.high %v10188_v18, %v10188_v18 }
0x165b   :  { %v10107_v0 = vpop.permute.xlu1 %10106 }
0x165c   :  { %v10119_v61 = vmul.f32 %v10107_v0, %v16365_v42 }
0x165e   :  { %10167 = vperm.xlu0 %14374, %v10119_v61   ;;  %10495 = vbcast.lane.b32.xlu1 %v10493_v10, 256 }
0x1662   :  { %10502 = vbcast.lane.b32.xlu1 %v10500_v47, 256  ;;  %v10204_v47 = vcombine.high %v10203_v25, %v10203_v25 }
0x16cd   :  { %v10123_v8 = vpop.permute.xlu0 %10122 }
0x16ce   :  { %v10128_v24 = vrot.slane %v10123_v8, %v15550_v27  ;;  %v10218_v8 = vrot.slane %v10204_v47, %v15429_v9  ;;  %v14836_v47 = vld [vmem:[%s15519_s19 + $0x10] sm:$0xff] }
0x16d0   :  { %v10226_v2 = vmul.f32 %v10188_v18, %v10128_v24  ;;  %v10219_v18 = vcombine.high %v10211_v15, %v10211_v15 }
0x16d1   :  { %v10141_v36 = vpop.permute.xlu0 %10140  ;;  %v10132_v0 = vpop.permute.xlu1 %10131 }
0x16d2   :  { %v10146_v10 = vrot.slane %v10141_v36, %v15550_v27  ;;  %v10137_v61 = vrot.slane %v10132_v0, %v15550_v27 }
0x16d4   :  { %v10228_v59 = vmul.f32 %v10196_v22, %v10146_v10  ;;  %v10227_v1 = vmul.f32 %v10195_v63, %v10137_v61  ;;  %v14835_v63 = vld [vmem:[%s15519_s19 + $0x18] sm:$0xff] }
0x16d5   :  { %v10159_v60 = vpop.permute.xlu0 %10158  ;;  %v10150_v62 = vpop.permute.xlu1 %10149 }
0x16d6   :  { %v10235_v17 = vcombine.low %v10226_v2, %v10227_v1  ;;  %v10164_v20 = vrot.slane %v10159_v60, %v15550_v27  ;;  %v10155_v6 = vrot.slane %v10150_v62, %v15550_v27  ;;  %v10249_v36 = vrot.slane %v10228_v59, %v15429_v9 }
0x16d8   :  { %v10242_v11 = vrot.slane %v10235_v17, %v15429_v9  ;;  %v10230_v0 = vmul.f32 %v10218_v8, %v10164_v20  ;;  %v10229_v33 = vmul.f32 %v10211_v15, %v10155_v6  ;;  %v14837_v15 = vld [vmem:[%s15519_s19 + $0x8] sm:$0xff]  ;;  %v14838_v8 = vld [vmem:[%s15519_s19] sm:$0xff] }
0x16d9   :  { %v10168_v24 = vpop.permute.xlu0 %10167  ;;  %v10496_v22 = vpop.permute.xlu1 %10495 }
0x16da   :  { %v10250_v10 = vcombine.low %v10242_v11, %v10249_v36  ;;  %v10333_v25 = vcombine.low %v10229_v33, %v10230_v0  ;;  %v10173_v1 = vrot.slane %v10168_v24, %v15550_v27  ;;  %vm10504_vm13 = vcmp.eq.s32.totalorder %v10496_v22, %v15977_v38  ;;  %v14839_v36 = vld [vmem:[%s15519_s19 + $0x58] sm:$0xff]  ;;  %v14841_v0 = vld [vmem:[%s15519_s19 + $0x50] sm:$0xff]  ;;  %v14843_v24 = vld [vmem:[%s15519_s19 + $0x48] sm:$0xff] }
0x16db   :  { %v13419_v60 = vsel %vm10504_vm13, 1.0, %v17680_v16  ;;  %v14840_v11 = vld [vmem:[%s15519_s19 + $0x38] sm:$0xff]  ;;  %v14844_v22 = vld [vmem:[%s15519_s19 + $0x28] sm:$0xff] }
0x16dc   :  { %v10257_v62 = vrot.slane %v10250_v10, %v15429_v9  ;;  %v10231_v59 = vmul.f32 %v10219_v18, %v10173_v1  ;;  %14264 = vmatpush3.msk.msra.mxu0 %vm6149_vm8, %v13419_v60  ;;  %v10340_v33 = vrot.slane %v10333_v25, %v15429_v9  ;;  %v14842_v18 = vld [vmem:[%s15519_s19 + $0x30] sm:$0xff]  ;;  %v14845_v10 = vld [vmem:[%s15519_s19 + $0x40] sm:$0xff]  ;;  %v14847_v1 = vld [vmem:[%s15771_s1 + $0x38] sm:$0xff] }
0x16dd   :  { %14266 = vmatmul.mubr.msk.f32.vlgmr.msra.gmra.mxu0 %vm8042_vm9, %v16412_v12  ;;  %14273 = vmatprep.subr.mxu0 %v17680_v16  ;;  %v10503_v6 = vpop.permute.xlu1 %10502  ;;  %v14846_v25 = vld [vmem:[%s15519_s19 + $0x20] sm:$0xff]  ;;  %v14848_v60 = vld [vmem:[%s15771_s1 + $0x30] sm:$0xff]  ;;  %s14902_s19 = smov 127  }
0x16de   :  { %v10347_v20 = vrot.slane %v10231_v59, %v15429_v9  ;;  %14256 = vmatmul.mubr.msk.f32.vlgmr.msra.gmra.mxu1 %vm5726_vm5, %v10257_v62  ;;  %14274 = vmatpush3.msra.mxu0 %v14835_v63  ;;  %vm10505_vm7 = vcmp.eq.s32.totalorder %v10503_v6, %v15977_v38  ;;  %v14849_v62 = vld [vmem:[%s15771_s1 + $0x28] sm:$0xff]  ;;  %v14850_v59 = vld [vmem:[%s16042_s26 + $0x38] sm:$0xff] }
0x16df   :  { %14259 = vmatpush3.msk.msra.mxu1 %vm4475_vm12, %v17688_v30  ;;  %14275 = vmatprep.subr.mxu0 %v17680_v16  ;;  %v13420_v17 = vsel %vm10505_vm7, 1.0, %v17680_v16  ;;  %v14852_v6 = vld [vmem:[%s15771_s1 + $0x18] sm:$0xff] }
0x16e0   :  { %v10348_v61 = vcombine.low %v10340_v33, %v10347_v20  ;;  %14276 = vmatpush3.msra.mxu0 %v14836_v47  ;;  %14260 = vmatprep.mubr.msk.f32.mxu1 %vm14873_vm1, %v17680_v16  ;;  %v14854_v33 = vld [vmem:[%s15771_s1 + $0x8] sm:$0xff]  ;;  %v14855_v20 = vld [vmem:[%s15771_s1] sm:$0xff] }
0x16e1   :  { %14277 = vmatprep.subr.mxu0 %v17680_v16  ;;  %14281 = vmatprep.mubr.msk.f32.mxu0 %vm14873_vm1, %v17680_v16 }
0x16e2   :  { %v10355_v2 = vrot.slane %v10348_v61, %v15429_v9  ;;  %14278 = vmatpush3.msra.mxu0 %v14837_v15  ;;  %14268 = vmatprep.subr.mxu1 %v17680_v16 }
0x16e3   :  { %14279 = vmatprep.subr.mxu0 %v17680_v16 }
0x16e4   :  { %14261 = vmatmul.mubr.msk.f32.vlgmr.msra.gmra.mxu1 %vm5726_vm5, %v10355_v2  ;;  %14280 = vmatpush3.msra.mxu0 %v14838_v8 }
0x16e5   :  { %14282 = vmatmul.mubr.msk.f32.vlgmr.msra.gmra.mxu0 %vm192_vm0, %v16581_v57  ;;  %14295 = vmatprep.subr.mxu0 %v17680_v16 }
0x16e6   :  { %14269 = vmatpush3.msk.msra.mxu1 %vm6149_vm8, %v13420_v17  ;;  %14296 = vmatpush3.msra.mxu0 %v14839_v36  ;;  %v13430_v17 = vld.sshfl [vmem:[#allocation6 + $0x10] sm:$0x13 pattern:$0x75316420]  ;;  %v14856_v36 = vld [vmem:[%s15829_s5] ss:$0 sm:$0xff] }
0x16e7   :  { %14270 = vmatprep.mubr.msk.f32.mxu1 %vm14873_vm1, %v17680_v16  ;;  %14284 = vmatprep.subr.mxu1 %v17680_v16 }
0x16e8   :  { %14297 = vmatprep.subr.mxu0 %v17680_v16  ;;  %14271 = vmatmul.mubr.msk.f32.vlgmr.msra.gmra.mxu1 %vm8042_vm9, %v16472_v5 }
0x16e9   :  { %14285 = vmatpush3.msra.mxu1 %v14840_v11  ;;  %14298 = vmatpush3.msra.mxu0 %v14841_v0  ;;  %v13431_v0 = vld.sshfl [vmem:[#allocation6 + $0x14] sm:$0x13 pattern:$0x75316420] }
0x16ea   :  { %14286 = vmatprep.subr.mxu1 %v17680_v16  ;;  %14299 = vmatprep.subr.mxu0 %v17680_v16 }
0x16eb   :  { %14287 = vmatpush3.msra.mxu1 %v14842_v18  ;;  %14300 = vmatpush3.msra.mxu0 %v14843_v24  ;;  %v10995_v24 = vcombine.high %v13430_v17, %v13430_v17 }
0x16ec   :  { %14288 = vmatprep.subr.mxu1 %v17680_v16  ;;  %14301 = vmatprep.subr.mxu0 %v17680_v16 }
0x16ed   :  { %14289 = vmatpush3.msra.mxu1 %v14844_v22  ;;  %14302 = vmatpush3.msra.mxu0 %v14845_v10  ;;  %v11002_v22 = vrot.slane %v13430_v17, %v15429_v9 }
0x16ee   :  { %14303 = vmatprep.mubr.msk.f32.mxu0 %vm14873_vm1, %v17680_v16  ;;  %14290 = vmatprep.subr.mxu1 %v17680_v16 }
0x16ef   :  { %14304 = vmatmul.mubr.msk.f32.vlgmr.msra.gmra.mxu0 %vm192_vm0, %v16581_v57  ;;  %14306 = vmatprep.subr.mxu0 %v17680_v16 }
0x16f0   :  { %14291 = vmatpush3.msra.mxu1 %v14846_v25  ;;  %14292 = vmatprep.mubr.msk.f32.mxu1 %vm14873_vm1, %v17680_v16 }
0x16f1   :  { %14307 = vmatpush3.msra.mxu0 %v15566_v45  ;;  %14293 = vmatmul.mubr.msk.f32.vlgmr.msra.gmra.mxu1 %vm192_vm0, %v16581_v57  ;;  %v14851_v45 = vld [vmem:[%s15771_s1 + $0x20] sm:$0xff]  ;;  %v14853_v57 = vld [vmem:[%s15771_s1 + $0x10] sm:$0xff]  ;;  %s14903_s1 = smov 28  }
0x16f2   :  { %11514 = vmatprep.subr.mxu1 %v14847_v1  ;;  %11554 = vmatprep.mubr.f32.mxu1 %v17680_v16 }
0x16f3   :  { %11515 = vmatpush1.msra.mxu1 %v14848_v60  ;;  %14308 = vmatprep.mubr.msk.f32.mxu0 %vm14873_vm1, %v17680_v16 }
0x16f4   :  { %11516 = vmatprep.subr.mxu1 %v14849_v62  ;;  %12049 = vmatprep.subr.mxu0 %v14850_v59  ;;  %v11018_v62 = vcombine.high %v13431_v0, %v13431_v0  ;;  %v11025_v59 = vrot.slane %v13431_v0, %v15429_v9 }
0x16f5   :  { %11517 = vmatpush1.msra.mxu1 %v14851_v45 }
0x16f6   :  { %11518 = vmatprep.subr.mxu1 %v14852_v6 }
0x16f7   :  { %11519 = vmatpush1.msra.mxu1 %v14853_v57 }
0x16f8   :  { %11520 = vmatprep.subr.mxu1 %v14854_v33 }
0x16f9   :  { %11521 = vmatpush1.msra.mxu1 %v14855_v20  ;;  %v11009_v20 = vrot.slane %v10995_v24, %v15429_v9 }
0x16fa   :  { %14311 = vmatprep.subr.mxu1 %v17680_v16 }
0x179d   :  { %v16842_v63 = vpop.f32.mrf.mxu0 }
0x179e   :  { %17697 = vst [vmem:[#allocation36_spill] sm:$0xff] %v16842_v63  ;;  %v16844_v61 = vpop.f32.mrf.mxu1 }
0x179f   :  { %17698 = vst [vmem:[#allocation37_spill] sm:$0xff] %v16844_v61  ;;  %v14267_v47 = vpop.f32.mrf.mxu0  ;;  %v13438_v61 = vld.sshfl [vmem:[#allocation7 + $0x10] sm:$0x13 pattern:$0x75316420] }
0x17a0   :  { %v14257_v2 = vpop.f32.mrf.mxu1  ;;  %v11010_v47 = vcombine.high %v11002_v22, %v11002_v22 }
0x17a4   :  { %v16846_v15 = vpop.f32.mrf.mxu1 }
0x17a5   :  { %17699 = vst [vmem:[#allocation38_spill] sm:$0xff] %v16846_v15  ;;  %v10839_v8 = vpop.f32.mrf.mxu0 }
0x17a6   :  { %v10840_v11 = vadd.f32 %v14856_v36, %v10839_v8  ;;  %v14262_v18 = vpop.f32.mrf.mxu1 }
0x17a7   :  { %v14283_v10 = vpop.f32.mrf.mxu0  ;;  %v11033_v18 = vcombine.high %v11025_v59, %v11025_v59 }
0x17a8   :  { %v11041_v25 = vcombine.high %v10840_v11, %v10840_v11  ;;  %v11048_v1 = vrot.slane %v10840_v11, %v15429_v9  ;;  %v16851_v60 = vpop.f32.mrf.mxu1  ;;  %v11032_v11 = vrot.slane %v11018_v62, %v15429_v9 }
0x17a9   :  { %17700 = vst [vmem:[#allocation39_spill] sm:$0xff] %v16851_v60 }
0x17aa   :  { %v11055_v45 = vrot.slane %v11041_v25, %v15429_v9  ;;  %v11056_v6 = vcombine.high %v11048_v1, %v11048_v1  ;;  %v11064_v57 = vrot.slane %v11048_v1, %v15429_v9  ;;  %v14272_v33 = vpop.f32.mrf.mxu1 }
0x17ac   :  { %v11057_v2 = vcombine.high %v11055_v45, %v11055_v45  ;;  %v11071_v17 = vrot.slane %v11055_v45, %v15429_v9  ;;  %v11078_v8 = vrot.slane %v11056_v6, %v15429_v9  ;;  %v11086_v36 = vcombine.high %v11064_v57, %v11064_v57 }
0x17ad   :  { %v11094_v10 = vadd.f32 %v11064_v57, %v11002_v22 }
0x17ae   :  { %v11085_v0 = vrot.slane %v11057_v2, %v15429_v9  ;;  %v11087_v25 = vcombine.high %v11078_v8, %v11078_v8  ;;  %v11095_v60 = vadd.f32 %v11078_v8, %v11009_v20  ;;  %v11096_v15 = vadd.f32 %v11086_v36, %v11010_v47  ;;  %v14857_v2 = vld [vmem:[%s15829_s5 + $0x1] ss:$0 sm:$0xff] }
0x17af   :  { %v11098_v1 = vadd.f32 %v11071_v17, %v11032_v11  ;;  %v13432_v33 = vmul.f32 -1.442695, %v11094_v10  ;;  %v10979_v24 = vpop.f32.mrf.mxu0  ;;  %v11148_v20 = vcombine.high %v13438_v61, %v13438_v61  ;;  %v11155_v17 = vrot.slane %v13438_v61, %v15429_v9 }
0x17b0   :  { %v11097_v63 = vadd.f32 %v11087_v25, %v11025_v59  ;;  %v11099_v5 = vadd.f32 %v11085_v0, %v11033_v18  ;;  %v13433_v45 = vmul.f32 -1.442695, %v11095_v60  ;;  %v13434_v37 = vmul.f32 -1.442695, %v11096_v15 }
0x17b1   :  { %14656 = vpow2.f32 %v13432_v33  ;;  %v13436_v6 = vmul.f32 -1.442695, %v11098_v1  ;;  %v10909_v12 = vpop.f32.mrf.mxu1  ;;  %v14305_v62 = vpop.f32.mrf.mxu0  ;;  %v13439_v15 = vld.sshfl [vmem:[#allocation7 + $0x14] sm:$0x13 pattern:$0x75316420] }
0x17b2   :  { %14658 = vpow2.f32 %v13433_v45  ;;  %v13435_v22 = vmul.f32 -1.442695, %v11097_v63  ;;  %v13437_v57 = vmul.f32 -1.442695, %v11099_v5  ;;  %v10910_v28 = vadd.f32 %v14857_v2, %v10909_v12 }
0x17b3   :  { %14660 = vpow2.f32 %v13434_v37  ;;  %v14294_v47 = vpop.f32.mrf.mxu1  ;;  %v11162_v5 = vrot.slane %v11148_v20, %v15429_v9  ;;  %v11163_v12 = vcombine.high %v11155_v17, %v11155_v17  ;;  %v11171_v10 = vcombine.high %v13439_v15, %v13439_v15 }
0x17b4   :  { %14662 = vpow2.f32 %v13435_v22  ;;  %v11194_v8 = vcombine.high %v10910_v28, %v10910_v28  ;;  %v11201_v59 = vrot.slane %v10910_v28, %v15429_v9  ;;  %v11178_v0 = vrot.slane %v13439_v15, %v15429_v9 }
0x17b5   :  { %14664 = vpow2.f32 %v13436_v6  ;;  %v11185_v2 = vrot.slane %v11171_v10, %v15429_v9 }
0x17b6   :  { %14666 = vpow2.f32 %v13437_v57  ;;  %v11208_v60 = vrot.slane %v11194_v8, %v15429_v9  ;;  %v11209_v36 = vcombine.high %v11201_v59, %v11201_v59  ;;  %v11217_v63 = vrot.slane %v11201_v59, %v15429_v9 }
0x17b7   :  { %v11186_v47 = vcombine.high %v11178_v0, %v11178_v0 }
0x17b8   :  { %v11210_v37 = vcombine.high %v11208_v60, %v11208_v60  ;;  %v11231_v11 = vrot.slane %v11209_v36, %v15429_v9  ;;  %v11239_v18 = vcombine.high %v11217_v63, %v11217_v63  ;;  %v11247_v61 = vadd.f32 %v11217_v63, %v11155_v17  ;;  %v14858_v63 = vld [vmem:[%s15829_s5 + $0x2] ss:$0 sm:$0xff] }
0x17b9   :  { %v11224_v33 = vrot.slane %v11208_v60, %v15429_v9 }
0x17ba   :  { %v11240_v28 = vcombine.high %v11231_v11, %v11231_v11  ;;  %v11248_v25 = vadd.f32 %v11231_v11, %v11162_v5  ;;  %v11249_v1 = vadd.f32 %v11239_v18, %v11163_v12  ;;  %v13440_v45 = vmul.f32 -1.442695, %v11247_v61 }
0x17bb   :  { %v11238_v6 = vrot.slane %v11210_v37, %v15429_v9  ;;  %v11251_v15 = vadd.f32 %v11224_v33, %v11185_v2  ;;  %v10980_v5 = vadd.f32 %v14858_v63, %v10979_v24 }
0x17bc   :  { %v11250_v62 = vadd.f32 %v11240_v28, %v11178_v0  ;;  %v13441_v22 = vmul.f32 -1.442695, %v11248_v25  ;;  %v13442_v57 = vmul.f32 -1.442695, %v11249_v1  ;;  %14668 = vpow2.f32 %v13440_v45 }
0x17bd   :  { %v11252_v12 = vadd.f32 %v11238_v6, %v11186_v47  ;;  %v13444_v28 = vmul.f32 -1.442695, %v11251_v15  ;;  %v11354_v1 = vrot.slane %v10980_v5, %v15429_v9  ;;  %v11347_v24 = vcombine.high %v10980_v5, %v10980_v5  ;;  %v13446_v45 = vld.sshfl [vmem:[#allocation8 + $0x10] sm:$0x13 pattern:$0x75316420] }
0x17be   :  { %v14657_v20 = vpop.eup %14656  ;;  %14670 = vpow2.f32 %v13441_v22  ;;  %v13443_v17 = vmul.f32 -1.442695, %v11250_v62  ;;  %v11301_v22 = vcombine.high %v13446_v45, %v13446_v45 }
0x17bf   :  { %v14659_v8 = vpop.eup %14658  ;;  %v11118_v59 = vadd.f32 1.0, %v14657_v20  ;;  %14672 = vpow2.f32 %v13442_v57  ;;  %v13445_v33 = vmul.f32 -1.442695, %v11252_v12  ;;  %v11362_v6 = vcombine.high %v11354_v1, %v11354_v1 }
0x17c0   :  { %v14661_v36 = vpop.eup %14660  ;;  %v11119_v60 = vadd.f32 1.0, %v14659_v8  ;;  %14674 = vpow2.f32 %v13443_v17  ;;  %v11308_v57 = vrot.slane %v13446_v45, %v15429_v9  ;;  %v11361_v2 = vrot.slane %v11347_v24, %v15429_v9 }
0x17c1   :  { %v14663_v37 = vpop.eup %14662  ;;  %v11120_v11 = vadd.f32 1.0, %v14661_v36  ;;  %14676 = vrcp.f32 %v11118_v59  ;;  %v11370_v47 = vrot.slane %v11354_v1, %v15429_v9  ;;  %v13447_v59 = vld.sshfl [vmem:[#allocation8 + $0x14] sm:$0x13 pattern:$0x75316420]  ;;  %v11384_v15 = vrot.slane %v11362_v6, %v15429_v9 }
0x17c2   :  { %v14665_v18 = vpop.eup %14664  ;;  %v11121_v10 = vadd.f32 1.0, %v14663_v37  ;;  %14678 = vrcp.f32 %v11119_v60  ;;  %v11315_v12 = vrot.slane %v11301_v22, %v15429_v9  ;;  %v11316_v37 = vcombine.high %v11308_v57, %v11308_v57 }
0x17c3   :  { %v14667_v61 = vpop.eup %14666  ;;  %v11122_v0 = vadd.f32 1.0, %v14665_v18  ;;  %14680 = vrcp.f32 %v11120_v11  ;;  %v11363_v11 = vcombine.high %v11361_v2, %v11361_v2  ;;  %v11331_v1 = vrot.slane %v13447_v59, %v15429_v9 }
0x17c4   :  { %v11123_v25 = vadd.f32 1.0, %v14667_v61  ;;  %14682 = vrcp.f32 %v11121_v10  ;;  %v11324_v61 = vcombine.high %v13447_v59, %v13447_v59  ;;  %v11377_v6 = vrot.slane %v11361_v2, %v15429_v9 }
0x17c5   :  { %14684 = vrcp.f32 %v11122_v0  ;;  %v11392_v0 = vcombine.high %v11370_v47, %v11370_v47 }
0x17c6   :  { %14686 = vrcp.f32 %v11123_v25 }
0x17c7   :  { %14688 = vpow2.f32 %v13444_v28 }
0x17c8   :  { %14690 = vpow2.f32 %v13445_v33  ;;  %v11393_v33 = vcombine.high %v11384_v15, %v11384_v15 }
0x17c9   :  { %v14669_v62 = vpop.eup %14668 }
0x17ca   :  { %v11271_v17 = vadd.f32 1.0, %v14669_v62 }
0x17cb   :  { %v14671_v20 = vpop.eup %14670 }
0x17cc   :  { %v14673_v8 = vpop.eup %14672  ;;  %v11272_v36 = vadd.f32 1.0, %v14671_v20  ;;  %14692 = vrcp.f32 %v11271_v17  ;;  %v11338_v17 = vrot.slane %v11324_v61, %v15429_v9 }
0x17cd   :  { %v14675_v60 = vpop.eup %14674  ;;  %v11273_v63 = vadd.f32 1.0, %v14673_v8  ;;  %v11391_v8 = vrot.slane %v11363_v11, %v15429_v9 }
0x17ce   :  { %v14677_v5 = vpop.eup %14676  ;;  %v11274_v18 = vadd.f32 1.0, %v14675_v60  ;;  %14694 = vrcp.f32 %v11272_v36  ;;  %v11339_v36 = vcombine.high %v11331_v1, %v11331_v1 }
0x17cf   :  { %v14679_v10 = vpop.eup %14678  ;;  %v11400_v28 = vmul.f32 %v14677_v5, %v11370_v47  ;;  %14696 = vrcp.f32 %v11273_v63 }
0x17d0   :  { %v14681_v25 = vpop.eup %14680  ;;  %v11401_v24 = vmul.f32 %v14679_v10, %v11384_v15  ;;  %14698 = vrcp.f32 %v11274_v18 }
0x17d1   :  { %v14683_v45 = vpop.eup %14682  ;;  %v11402_v62 = vmul.f32 %v14681_v25, %v11392_v0  ;;  %v11406_v20 = vadd.f32 %v11400_v28, %v11308_v57 }
0x17d2   :  { %v14685_v22 = vpop.eup %14684  ;;  %v11403_v60 = vmul.f32 %v14683_v45, %v11393_v33  ;;  %v11407_v49 = vadd.f32 %v11401_v24, %v11315_v12 }
0x17d3   :  { %v14687_v47 = vpop.eup %14686  ;;  %v11404_v5 = vmul.f32 %v14685_v22, %v11377_v6  ;;  %v11408_v59 = vadd.f32 %v11402_v62, %v11316_v37  ;;  %14700 = vtanh.f32 %v11406_v20 }
0x17d4   :  { %v14689_v15 = vpop.eup %14688  ;;  %v11405_v10 = vmul.f32 %v14687_v47, %v11391_v8  ;;  %v11409_v44 = vadd.f32 %v11403_v60, %v11331_v1  ;;  %14702 = vtanh.f32 %v11407_v49 }
0x17d5   :  { %v14691_v2 = vpop.eup %14690  ;;  %v11410_v57 = vadd.f32 %v11404_v5, %v11338_v17  ;;  %14704 = vtanh.f32 %v11408_v59  ;;  %v11275_v63 = vadd.f32 1.0, %v14689_v15 }
0x17d6   :  { %v11411_v0 = vadd.f32 %v11405_v10, %v11339_v36  ;;  %14706 = vtanh.f32 %v11409_v44  ;;  %v11276_v11 = vadd.f32 1.0, %v14691_v2 }
0x17d7   :  { %14708 = vtanh.f32 %v11410_v57 }
0x17d8   :  { %14710 = vtanh.f32 %v11411_v0 }
0x17d9   :  { %14712 = vrcp.f32 %v11275_v63  ;;  %v14693_v12 = vpop.eup %14692 }
0x17da   :  { %14714 = vrcp.f32 %v11276_v11  ;;  %v11418_v28 = vsub.f32 1.0, %v14693_v12  ;;  %v11430_v44 = vmul.f32 %v14693_v12, %v16555_v29 }
0x17db   :  { %v14695_v18 = vpop.eup %14694 }
0x17dc   :  { %v14697_v37 = vpop.eup %14696  ;;  %v11419_v33 = vsub.f32 1.0, %v14695_v18  ;;  %v11431_v20 = vmul.f32 %v14695_v18, %v16558_v52 }
0x17dd   :  { %v14699_v61 = vpop.eup %14698  ;;  %v11420_v49 = vsub.f32 1.0, %v14697_v37  ;;  %v11432_v60 = vmul.f32 %v14697_v37, %v16562_v55 }
0x17de   :  { %v11421_v6 = vsub.f32 1.0, %v14699_v61  ;;  %v11433_v5 = vmul.f32 %v14699_v61, %v16564_v7 }
0x17e0   :  { %v14701_v25 = vpop.eup %14700 }
0x17e1   :  { %v14703_v1 = vpop.eup %14702  ;;  %v11424_v24 = vmul.f32 %v14701_v25, %v11418_v28 }
0x17e2   :  { %v14705_v45 = vpop.eup %14704  ;;  %v11425_v62 = vmul.f32 %v14703_v1, %v11419_v33 }
0x17e3   :  { %v14707_v22 = vpop.eup %14706  ;;  %v11426_v8 = vmul.f32 %v14705_v45, %v11420_v49  ;;  %v11436_v59 = vadd.f32 %v11430_v44, %v11424_v24 }
0x17e4   :  { %v14709_v47 = vpop.eup %14708  ;;  %v11427_v17 = vmul.f32 %v14707_v22, %v11421_v6  ;;  %v11437_v15 = vadd.f32 %v11431_v20, %v11425_v62 }
0x17e5   :  { %v14711_v36 = vpop.eup %14710  ;;  %v11438_v2 = vadd.f32 %v11432_v60, %v11426_v8 }
0x17e6   :  { %v14713_v10 = vpop.eup %14712  ;;  %v11439_v57 = vadd.f32 %v11433_v5, %v11427_v17  ;;  %v11448_v63 = vcombine.low %v11436_v59, %v11437_v15 }
0x17e7   :  { %v14715_v0 = vpop.eup %14714  ;;  %v11422_v11 = vsub.f32 1.0, %v14713_v10  ;;  %v11434_v18 = vmul.f32 %v14713_v10, %v16568_v13 }
0x17e8   :  { %v11423_v29 = vsub.f32 1.0, %v14715_v0  ;;  %v11449_v12 = vcombine.low %v11438_v2, %v11439_v57  ;;  %v11435_v55 = vmul.f32 %v14715_v0, %v16570_v34  ;;  %v11457_v37 = vrot.slane %v11448_v63, %v15429_v9 }
0x17e9   :  { %v11428_v52 = vmul.f32 %v14709_v47, %v11422_v11 }
0x17ea   :  { %v11429_v28 = vmul.f32 %v14711_v36, %v11423_v29  ;;  %v11464_v7 = vrot.slane %v11449_v12, %v15429_v9 }
0x17eb   :  { %v11440_v61 = vadd.f32 %v11434_v18, %v11428_v52 }
0x17ec   :  { %v11441_v25 = vadd.f32 %v11435_v55, %v11429_v28  ;;  %v11472_v33 = vcombine.low %v11457_v37, %v11464_v7  ;;  %v14859_v37 = vld [vmem:[%s15962_s13] ss:$0 sm:$0xff] }
0x17ee   :  { %v11450_v1 = vcombine.low %v11440_v61, %v11441_v25  ;;  %v11479_v24 = vrot.slane %v11472_v33, %v15429_v9 }
0x17f0   :  { %v11471_v49 = vrot.slane %v11450_v1, %v15429_v9 }
0x17f2   :  { %v11486_v45 = vrot.slane %v11471_v49, %v15429_v9 }
0x17f4   :  { %v11487_v6 = vcombine.low %v11479_v24, %v11486_v45 }
0x17f6   :  { %13448 = vmatmul.mubr.msk.f32.vlgmr.msra.gmra.mxu1 %vm192_vm0, %v11487_v6 }
0x17f7   :  { %14312 = vmatpush3.msra.mxu1 %v15582_v4  ;;  %14313 = vmatprep.mubr.msk.f32.mxu1 %vm14873_vm1, %v17680_v16 }
0x17f8   :  { %14316 = vmatprep.subr.mxu1 %v17680_v16 }
0x18b6   :  { %v16899_v13 = vpop.f32.mrf.mxu1 }
0x18b8   :  { %v11558_v34 = vpop.f32.mrf.mxu1 }
0x18b9   :  { %v16902_v62 = vadd.f32 %v11558_v34, %v15932_v58 }
0x18bb   :  { %v11616_v44 = vcombine.high %v16902_v62, %v16902_v62  ;;  %v11623_v20 = vrot.slane %v16902_v62, %v15429_v9 }
0x18bd   :  { %v11630_v22 = vrot.slane %v11616_v44, %v15429_v9  ;;  %v11631_v4 = vcombine.high %v11623_v20, %v11623_v20  ;;  %v11639_v8 = vrot.slane %v11623_v20, %v15429_v9 }
0x18bf   :  { %v11632_v60 = vcombine.high %v11630_v22, %v11630_v22  ;;  %v11646_v47 = vrot.slane %v11630_v22, %v15429_v9  ;;  %v11653_v17 = vrot.slane %v11631_v4, %v15429_v9  ;;  %v11661_v5 = vcombine.high %v11639_v8, %v11639_v8 }
0x18c0   :  { %v11666_v58 = vrot.slane %v11639_v8, %v15550_v27 }
0x18c1   :  { %v11660_v59 = vrot.slane %v11632_v60, %v15429_v9  ;;  %v11662_v15 = vcombine.high %v11653_v17, %v11653_v17  ;;  %v11670_v36 = vrot.slane %v11653_v17, %v15550_v27  ;;  %v11674_v10 = vrot.slane %v11661_v5, %v15550_v27 }
0x18c2   :  { %v11682_v2 = vrot.slane %v11646_v47, %v15550_v27  ;;  %v11693_v57 = vadd.f32 %v11666_v58, %v15783_v54 }
0x18c3   :  { %v11678_v63 = vrot.slane %v11662_v15, %v15550_v27  ;;  %v11694_v0 = vadd.f32 %v11670_v36, %v15783_v54  ;;  %v11695_v11 = vadd.f32 %v11674_v10, %v15783_v54  ;;  %v11686_v29 = vrot.slane %v11660_v59, %v15550_v27 }
0x18c4   :  { %v11697_v12 = vadd.f32 %v15781_v53, %v11682_v2  ;;  %14716 = vtanh.f32 %v11693_v57 }
0x18c5   :  { %v11696_v52 = vadd.f32 %v15781_v53, %v11678_v63  ;;  %14718 = vtanh.f32 %v11694_v0  ;;  %v11698_v18 = vadd.f32 %v15781_v53, %v11686_v29 }
0x18c6   :  { %14720 = vtanh.f32 %v11695_v11 }
0x18c7   :  { %14722 = vtanh.f32 %v11696_v52 }
0x18c8   :  { %14724 = vtanh.f32 %v11697_v12 }
0x18c9   :  { %14726 = vtanh.f32 %v11698_v18 }
0x18d1   :  { %v14717_v28 = vpop.eup %14716 }
0x18d2   :  { %v14719_v55 = vpop.eup %14718  ;;  %v11705_v7 = vmul.f32 %v14859_v37, %v14717_v28 }
0x18d3   :  { %v14721_v61 = vpop.eup %14720  ;;  %v11706_v54 = vmul.f32 %v14859_v37, %v14719_v55 }
0x18d4   :  { %v14723_v25 = vpop.eup %14722  ;;  %v11711_v33 = vsel %vm192_vm0, %v11705_v7, 0.0  ;;  %v11707_v1 = vmul.f32 %v14859_v37, %v14721_v61 }
0x18d5   :  { %v14725_v49 = vpop.eup %14724  ;;  %11712 = vadd.xlane.f32.xlu0 %v11711_v33  ;;  %v11714_v24 = vsel %vm192_vm0, %v11706_v54, 0.0  ;;  %v11708_v6 = vmul.f32 %v14859_v37, %v14723_v25 }
0x18d6   :  { %11715 = vadd.xlane.f32.xlu1 %v11714_v24  ;;  %v11709_v45 = vmul.f32 %v14859_v37, %v14725_v49  ;;  %v11717_v53 = vsel %vm192_vm0, %v11707_v1, 0.0  ;;  %v14727_v34 = vpop.eup %14726  ;;  %v12372_v1 = vld [vmem:[#allocation9 + $0x10] sm:$0x3f] }
0x18d7   :  { %v11720_v20 = vsel %vm192_vm0, %v11708_v6, 0.0  ;;  %v11710_v22 = vmul.f32 %v14859_v37, %v14727_v34  ;;  %v14860_v6 = vld [vmem:[%s16042_s26 + $0x30] sm:$0xff]  ;;  %v14861_v34 = vld [vmem:[%s16042_s26 + $0x28] sm:$0xff] }
0x18d8   :  { %v11723_v44 = vsel %vm192_vm0, %v11709_v45, 0.0 }
0x18d9   :  { %11718 = vadd.xlane.f32.xlu0 %v11717_v53  ;;  %v11726_v4 = vsel %vm192_vm0, %v11710_v22, 0.0 }
0x18da   :  { %11724 = vadd.xlane.f32.xlu1 %v11723_v44  ;;  %v14862_v44 = vld [vmem:[%s16042_s26 + $0x20] sm:$0xff] }
0x18dd   :  { %11721 = vadd.xlane.f32.xlu0 %v11720_v20  ;;  %v14863_v20 = vld [vmem:[%s16042_s26 + $0x18] sm:$0xff] }
0x18e1   :  { %11727 = vadd.xlane.f32.xlu0 %v11726_v4  ;;  %v14864_v4 = vld [vmem:[%s16042_s26 + $0x10] sm:$0xff] }
0x195e   :  { %v11713_v8 = vpop.xlane.xlu0 %11712 }
0x195f   :  { %v11716_v60 = vpop.xlane.xlu1 %11715  ;;  %v11738_v47 = vrot.slane %v11713_v8, %v15981_v48 }
0x1960   :  { %v11742_v17 = vrot.slane %v11716_v60, %v15981_v48  ;;  %v14865_v60 = vld [vmem:[%s16042_s26 + $0x8] sm:$0xff] }
0x1962   :  { %v11759_v5 = vsel %vm2712_vm3, %v11742_v17, %v11738_v47  ;;  %v11719_v58 = vpop.xlane.xlu0 %11718  ;;  %v14866_v47 = vld [vmem:[%s16042_s26] sm:$0xff]  ;;  %s17536_s26 = sld [smem:[%s17636_s0 + %s14903_s1]]  }
0x1963   :  { %v11746_v59 = vrot.slane %v11719_v58, %v15981_v48  ;;  %v11725_v2 = vpop.xlane.xlu1 %11724 }
0x1964   :  { %v11754_v0 = vrot.slane %v11725_v2, %v15981_v48 }
0x1965   :  { %v11760_v15 = vsel %vm2715_vm4, %v11746_v59, %v11759_v5 }
0x1966   :  { %v11722_v36 = vpop.xlane.xlu0 %11721  ;;  %v11765_v10 = vsel %vm15990_vm14, %v11760_v15, -1e+30 }
0x1967   :  { %v11767_v57 = vsel %vm5702_vm15, %v11765_v10, -inf  ;;  %v11750_v63 = vrot.slane %v11722_v36, %v15981_v48 }
0x1968   :  { %11768 = vmax.xlane.f32.xlu1 %v11767_v57 }
0x1969   :  { %v11761_v12 = vsel %vm2712_vm3, %v11754_v0, %v11750_v63 }
0x196a   :  { %v11728_v11 = vpop.xlane.xlu0 %11727 }
0x196b   :  { %v11758_v29 = vrot.slane %v11728_v11, %v15981_v48 }
0x196d   :  { %v11762_v52 = vsel %vm2715_vm4, %v11758_v29, %v11761_v12 }
0x196e   :  { %v11766_v18 = vsel %vm16003_vm2, %v11762_v52, -1e+30 }
0x196f   :  { %v11770_v43 = vsel %vm5702_vm15, %v11766_v18, -inf }
0x1970   :  { %11771 = vmax.xlane.f32.xlu0 %v11770_v43 }
0x19f1   :  { %v11769_v28 = vpop.xlane.xlu1 %11768 }
0x19f2   :  { %v11773_v55 = vsub.f32 %v11765_v10, %v11769_v28 }
0x19f4   :  { %v11775_v37 = vmul.f32 1.442695, %v11773_v55 }
0x19f6   :  { %14728 = vpow2.f32 %v11775_v37 }
0x19f9   :  { %v11772_v7 = vpop.xlane.xlu0 %11771 }
0x19fa   :  { %v11774_v61 = vsub.f32 %v11766_v18, %v11772_v7 }
0x19fc   :  { %v11777_v54 = vmul.f32 1.442695, %v11774_v61 }
0x19fe   :  { %14730 = vpow2.f32 %v11777_v54 }
0x1a03   :  { %v14729_v48 = vpop.eup %14728 }
0x1a04   :  { %v11779_v25 = vsel %vm5702_vm15, %v14729_v48, 0.0 }
0x1a05   :  { %11780 = vadd.xlane.f32.xlu1 %v11779_v25 }
0x1a0b   :  { %v14731_v33 = vpop.eup %14730 }
0x1a0c   :  { %v11782_v3 = vsel %vm5702_vm15, %v14731_v33, 0.0 }
0x1a0d   :  { %11783 = vadd.xlane.f32.xlu0 %v11782_v3 }
0x1a23   :  { %12374 = vrot.lane.b32.xlu0 %v12372_v1, %s14896_s16 }
0x1a8e   :  { %v11781_v49 = vpop.xlane.xlu1 %11780 }
0x1a8f   :  { %14732 = vrcp.f32 %v11781_v49 }
0x1a96   :  { %v11784_v24 = vpop.xlane.xlu0 %11783 }
0x1a97   :  { %14734 = vrcp.f32 %v11784_v24 }
0x1a9c   :  { %v14733_v45 = vpop.eup %14732 }
0x1a9d   :  { %v16951_v53 = vmul.f32 %v14733_v45, %v14729_v48  ;;  %v11557_v48 = vadd.f32 %v16899_v13, %v16147_v14 }
0x1a9f   :  { %14309 = vmatmul.mubr.msk.f32.vlgmr.msra.gmra.mxu0 %vm5726_vm5, %v16951_v53  ;;  %v11562_v25 = vcombine.high %v11557_v48, %v11557_v48 }
0x1aa0   :  { %12050 = vmatpush1.msra.mxu0 %v14860_v6  ;;  %12089 = vmatprep.mubr.f32.mxu0 %v17680_v16 }
0x1aa1   :  { %12051 = vmatprep.subr.mxu0 %v14861_v34  ;;  %v11576_v3 = vrot.slane %v11562_v25, %v15429_v9 }
0x1aa2   :  { %12052 = vmatpush1.msra.mxu0 %v14862_v44 }
0x1aa3   :  { %12053 = vmatprep.subr.mxu0 %v14863_v20  ;;  %v11578_v34 = vcombine.high %v11576_v3, %v11576_v3 }
0x1aa4   :  { %v14735_v22 = vpop.eup %14734  ;;  %12054 = vmatpush1.msra.mxu0 %v14864_v4 }
0x1aa5   :  { %v16961_v8 = vmul.f32 %v14735_v22, %v14731_v33  ;;  %12055 = vmatprep.subr.mxu0 %v14865_v60  ;;  %v11569_v33 = vrot.slane %v11557_v48, %v15429_v9 }
0x1aa6   :  { %12056 = vmatpush1.msra.mxu0 %v14866_v47 }
0x1aa7   :  { %14314 = vmatmul.mubr.msk.f32.vlgmr.msra.gmra.mxu1 %vm5726_vm5, %v16961_v8  ;;  %14326 = vmatprep.subr.mxu0 %v17680_v16  ;;  %v11577_v1 = vcombine.high %v11569_v33, %v11569_v33  ;;  %v11585_v49 = vrot.slane %v11569_v33, %v15429_v9 }
0x1aa8   :  { %14317 = vmatpush3.msk.msra.mxu1 %vm4474_vm10, %v17688_v30  ;;  %14318 = vmatprep.mubr.msk.f32.mxu1 %vm14873_vm1, %v17680_v16 }
0x1aa9   :  { %14321 = vmatprep.subr.mxu1 %v17680_v16  ;;  %v11599_v44 = vrot.slane %v11577_v1, %v15429_v9  ;;  %v11607_v13 = vcombine.high %v11585_v49, %v11585_v49 }
0x1b5f   :  { %v11858_v17 = vpop.f32.mrf.mxu0 }
0x1b60   :  { %v11943_v5 = vrot.slane %v11858_v17, %v15429_v9 }
0x1b61   :  { %v14310_v58 = vpop.f32.mrf.mxu0 }
0x1b62   :  { %v11944_v59 = vcombine.high %v11943_v5, %v11943_v5  ;;  %v11951_v15 = vrot.slane %v11943_v5, %v15429_v9  ;;  %v11592_v58 = vrot.slane %v11576_v3, %v15429_v9 }
0x1b64   :  { %v11958_v36 = vrot.slane %v11944_v59, %v15429_v9  ;;  %v11959_v39 = vcombine.high %v11951_v15, %v11951_v15  ;;  %v11606_v59 = vrot.slane %v11578_v34, %v15429_v9 }
0x1b66   :  { %v11983_v63 = vcombine.low %v11951_v15, %v11958_v36  ;;  %v11608_v15 = vcombine.high %v11599_v44, %v11599_v44 }
0x1b67   :  { %v11931_v10 = vpop.f32.mrf.mxu1 }
0x1b68   :  { %v11966_v2 = vrot.slane %v11931_v10, %v15429_v9  ;;  %v11992_v18 = vrot.slane %v11983_v63, %v15429_v9 }
0x1b69   :  { %v14315_v57 = vpop.f32.mrf.mxu1 }
0x1b6a   :  { %v11967_v0 = vcombine.high %v11966_v2, %v11966_v2  ;;  %v11974_v11 = vrot.slane %v11966_v2, %v15429_v9 }
0x1b6c   :  { %v11981_v29 = vrot.slane %v11967_v0, %v15429_v9  ;;  %v11982_v12 = vcombine.high %v11974_v11, %v11974_v11  ;;  %v11984_v52 = vcombine.low %v11959_v39, %v11974_v11 }
0x1b6e   :  { %v11985_v43 = vcombine.low %v11981_v29, %v11982_v12  ;;  %v11999_v28 = vrot.slane %v11984_v52, %v15429_v9  ;;  %v12375_v52 = vpop.permute.xlu0 %12374 }
0x1b70   :  { %v12006_v55 = vrot.slane %v11985_v43, %v15429_v9  ;;  %v12007_v37 = vcombine.low %v11992_v18, %v11999_v28 }
0x1b72   :  { %v12014_v7 = vrot.slane %v12007_v37, %v15429_v9  ;;  %v12021_v61 = vrot.slane %v12006_v55, %v15429_v9 }
0x1b74   :  { %v12022_v54 = vcombine.low %v12014_v7, %v12021_v61 }
0x1b76   :  { %13451 = vmatmul.mubr.msk.f32.vlgmr.msra.gmra.mxu0 %vm192_vm0, %v12022_v54 }
0x1b77   :  { %14328 = vmatprep.mubr.msk.f32.mxu0 %vm14873_vm1, %v17680_v16 }
0x1c36   :  { %v12091_v24 = vpop.f32.mrf.mxu0 }
0x1c37   :  { %v12097_v45 = vcombine.high %v12091_v24, %v12091_v24  ;;  %v12104_v6 = vrot.slane %v12091_v24, %v15429_v9 }
0x1c38   :  { %v12093_v20 = vpop.f32.mrf.mxu0 }
0x1c39   :  { %v12111_v22 = vrot.slane %v12097_v45, %v15429_v9  ;;  %v12112_v4 = vcombine.high %v12104_v6, %v12104_v6  ;;  %v12120_v14 = vrot.slane %v12104_v6, %v15429_v9  ;;  %12367 = vrot.lane.b32.xlu1 %v12093_v20, %s14896_s16 }
0x1c3b   :  { %v12113_v60 = vcombine.high %v12111_v22, %v12111_v22  ;;  %v12127_v47 = vrot.slane %v12111_v22, %v15429_v9  ;;  %v12134_v17 = vrot.slane %v12112_v4, %v15429_v9  ;;  %v12142_v5 = vcombine.high %v12120_v14, %v12120_v14 }
0x1c3c   :  { %v17003_v36 = vadd.f32 %v12120_v14, %v11585_v49 }
0x1c3d   :  { %v12141_v10 = vrot.slane %v12113_v60, %v15429_v9  ;;  %v12143_v2 = vcombine.high %v12134_v17, %v12134_v17  ;;  %v17006_v57 = vadd.f32 %v12134_v17, %v11599_v44  ;;  %v17008_v39 = vadd.f32 %v12142_v5, %v11607_v13 }
0x1c3e   :  { %v17010_v63 = vadd.f32 %v12127_v47, %v11592_v58 }
0x1c3f   :  { %v17012_v0 = vadd.f32 %v12143_v2, %v11608_v15  ;;  %v17014_v11 = vadd.f32 %v12141_v10, %v11606_v59  ;;  %v13457_v59 = vld [vmem:[%s16354_s27 + $0x4] sm:$0x3] }
0x1c40   :  { %v12931_v2 = vrot.slane %v13457_v59, %v15550_v27 }
0x1cab   :  { %v12368_v29 = vpop.permute.xlu1 %12367 }
0x1cac   :  { %v12370_v12 = vadd.f32 %v12368_v29, %v16902_v62 }
0x1cae   :  { %v12377_v18 = vadd.f32 %v12375_v52, %v12370_v12  ;;  %v12938_v52 = vrot.slane %v13457_v59, %v15926_v56 }
0x1cb0   :  { %v13452_v43 = vmul.f32 -1.442695, %v12377_v18  ;;  %v6101_v18 = vcombine.low %v16166_v35, %v16169_v50 }
0x1cb2   :  { %14736 = vpow2.f32 %v13452_v43  ;;  %v9724_v43 = vcombine.low %v16693_v21, %v16696_v41 }
0x1cbf   :  { %v14737_v28 = vpop.eup %14736 }
0x1cc0   :  { %v12381_v55 = vadd.f32 1.0, %v14737_v28  ;;  %v6108_v28 = vrot.slane %v6101_v18, %v15429_v9 }
0x1cc2   :  { %14738 = vrcp.f32 %v12381_v55  ;;  %v6115_v55 = vrot.slane %v16171_v51, %v15429_v9 }
0x1ccf   :  { %v14739_v37 = vpop.eup %14738 }
0x1cd0   :  { %v12392_v7 = vrot.slane %v14739_v37, %v15429_v9  ;;  %v12385_v61 = vcombine.high %v14739_v37, %v14739_v37  ;;  %v6116_v37 = vcombine.low %v6108_v28, %v6115_v55 }
0x1cd2   :  { %v17019_v54 = vrot.slane %v12392_v7, %v15429_v9  ;;  %v12400_v48 = vcombine.high %v12392_v7, %v12392_v7  ;;  %v12399_v25 = vrot.slane %v12385_v61, %v15429_v9  ;;  %v9731_v7 = vrot.slane %v9724_v43, %v15429_v9 }
0x1cd3   :  { %v9747_v61 = vcombine.low %v16702_v32, %v16700_v31 }
0x1cd4   :  { %v12522_v33 = vsub.f32 1.0, %v17019_v54  ;;  %v17025_v62 = vcombine.high %v17019_v54, %v17019_v54  ;;  %v17028_v3 = vrot.slane %v12400_v48, %v15429_v9  ;;  %v17033_v49 = vrot.slane %v12399_v25, %v15429_v9  ;;  %v17701_v48 = vld [vmem:[#allocation11_spill] sm:$0xff] }
0x1cd5   :  { %v12401_v6 = vcombine.high %v12399_v25, %v12399_v25  ;;  %v17702_v25 = vld [vmem:[#allocation12_spill] sm:$0xff] }
0x1cd6   :  { %12534 = vrot.lane.b32.xlu1 %v12522_v33, %s14898_s22  ;;  %v12524_v1 = vsub.f32 1.0, %v17025_v62  ;;  %v12523_v24 = vsub.f32 1.0, %v17028_v3  ;;  %v17039_v45 = vcombine.high %v17028_v3, %v17028_v3  ;;  %v12526_v34 = vsub.f32 1.0, %v17033_v49 }
0x1cd7   :  { %v17046_v20 = vrot.slane %v12401_v6, %v15429_v9  ;;  %v6124_v33 = vcombine.low %v17702_v25, %v17701_v48  ;;  %v6123_v6 = vrot.slane %v6116_v37, %v15429_v9 }
0x1cd8   :  { %12538 = vrot.lane.b32.xlu0 %v12524_v1, %s14898_s22  ;;  %v12525_v44 = vsub.f32 1.0, %v17039_v45  ;;  %v17703_v1 = vld [vmem:[#allocation28_spill] sm:$0xff] }
0x1cd9   :  { %v12527_v22 = vsub.f32 1.0, %v17046_v20 }
0x1cda   :  { %12536 = vrot.lane.b32.xlu1 %v12523_v24, %s14898_s22  ;;  %v9738_v24 = vrot.slane %v17703_v1, %v15429_v9 }
0x1cdc   :  { %12542 = vrot.lane.b32.xlu0 %v12526_v34, %s14898_s22  ;;  %v9739_v34 = vcombine.low %v9731_v7, %v9738_v24 }
0x1cde   :  { %12540 = vrot.lane.b32.xlu1 %v12525_v44, %s14898_s22  ;;  %v9754_v44 = vrot.slane %v9747_v61, %v15429_v9 }
0x1ce2   :  { %12544 = vrot.lane.b32.xlu1 %v12527_v22, %s14898_s22  ;;  %v12185_v22 = vcombine.low %v17012_v0, %v17010_v63 }
0x1d48   :  { %v12535_v4 = vpop.permute.xlu1 %12534 }
0x1d49   :  { %v12552_v14 = vmul.f32 %v12535_v4, %v16333_v26  ;;  %v12162_v4 = vcombine.low %v17003_v36, %v17006_v57 }
0x1d4a   :  { %v12539_v13 = vpop.permute.xlu0 %12538 }
0x1d4b   :  { %12560 = vperm.xlu0 %14374, %v12552_v14   ;;  %v12554_v47 = vmul.f32 %v12539_v13, %v16337_v19  ;;  %v6131_v14 = vrot.slane %v6124_v33, %v15429_v9  ;;  %v17704_v13 = vld [vmem:[#allocation29_spill] sm:$0xff] }
0x1d4c   :  { %v12537_v60 = vpop.permute.xlu1 %12536 }
0x1d4d   :  { %v12553_v17 = vmul.f32 %v12537_v60, %v16321_v40  ;;  %v9761_v60 = vrot.slane %v17704_v13, %v15429_v9 }
0x1d4e   :  { %v12543_v5 = vpop.permute.xlu0 %12542 }
0x1d4f   :  { %12578 = vperm.xlu0 %14374, %v12554_v47   ;;  %12569 = vperm.xlu1 %14375, %v12553_v17   ;;  %v12556_v15 = vmul.f32 %v12543_v5, %v16346_v23  ;;  %v17705_v47 = vld [vmem:[#allocation13_spill] sm:$0xff]  ;;  %v6150_v5 = vsel %vm6149_vm8, %v6123_v6, -inf  ;;  %v9762_v59 = vcombine.low %v9754_v44, %v9761_v60  ;;  %v17707_v44 = vld [vmem:[#allocation18_spill] sm:$0xff]  ;;  %v17711_v60 = vld [vmem:[#allocation32_spill] sm:$0xff] }
0x1d50   :  { %v12541_v58 = vpop.permute.xlu1 %12540  ;;  %v6138_v17 = vrot.slane %v17705_v47, %v15429_v9 }
0x1d51   :  { %v12555_v10 = vmul.f32 %v12541_v58, %v16344_v46  ;;  %v9746_v58 = vrot.slane %v9739_v34, %v15429_v9  ;;  %v9769_v18 = vrot.slane %v9762_v59, %v15429_v9  ;;  %v17706_v34 = vld [vmem:[#allocation15_spill] sm:$0xff]  ;;  %v17715_v59 = vld [vmem:[#allocation20_spill] sm:$0xff] }
0x1d53   :  { %12596 = vperm.xlu0 %14374, %v12556_v15   ;;  %12587 = vperm.xlu1 %14375, %v12555_v10   ;;  %v12192_v15 = vrot.slane %v12185_v22, %v15429_v9  ;;  %v6139_v10 = vcombine.low %v6131_v14, %v6138_v17  ;;  %v9775_v37 = vsel %vm6149_vm8, %v9769_v18, -inf  ;;  %v17708_v22 = vld [vmem:[#allocation16_spill] sm:$0xff]  ;;  %v17710_v14 = vld [vmem:[#allocation30_spill] sm:$0xff] }
0x1d54   :  { %v12545_v29 = vpop.permute.xlu1 %12544  ;;  %v17712_v17 = vld [vmem:[#allocation34_spill] sm:$0xff] }
0x1d55   :  { %v12557_v12 = vmul.f32 %v12545_v29, %v16365_v42  ;;  %v12199_v29 = vrot.slane %v17014_v11, %v15429_v9  ;;  %v6146_v28 = vrot.slane %v6139_v10, %v15429_v9 }
0x1d57   :  { %12933 = vbcast.lane.b32.xlu0 %v12931_v2, 256  ;;  %12605 = vperm.xlu1 %14375, %v12557_v12   ;;  %v12169_v2 = vrot.slane %v12162_v4, %v15429_v9  ;;  %v12176_v12 = vrot.slane %v17008_v39, %v15429_v9  ;;  %v12200_v43 = vcombine.low %v12192_v15, %v12199_v29  ;;  %v6153_v61 = vsel %vm6149_vm8, %v6146_v28, -inf  ;;  %v17709_v4 = vld [vmem:[#allocation19_spill] sm:$0xff] }
0x1d58   :  { %v17716_v15 = vld [vmem:[#allocation31_spill] sm:$0xff] }
0x1d59   :  { %v12177_v55 = vcombine.low %v12169_v2, %v12176_v12  ;;  %v12207_v7 = vrot.slane %v12200_v43, %v15429_v9  ;;  %v12641_v2 = vrot.slane %v16961_v8, %v15429_v9 }
0x1d5b   :  { %12940 = vbcast.lane.b32.xlu1 %v12938_v52, 256  ;;  %v9772_v52 = vsel %vm6149_vm8, %v9746_v58, -inf  ;;  %v12184_v33 = vrot.slane %v12177_v55, %v15429_v9  ;;  %v12213_v24 = vsel %vm6149_vm8, %v12207_v7, -inf  ;;  %v17714_v58 = vld [vmem:[#allocation17_spill] sm:$0xff]  ;;  %v12642_v28 = vcombine.high %v12641_v2, %v12641_v2 }
0x1d5d   :  { %v12210_v6 = vsel %vm6149_vm8, %v12184_v33, -inf }
0x1d76   :  { %6151 = vmax.xlane.f32.xlu0 %v6150_v5  ;;  %v17713_v5 = vld [vmem:[#allocation33_spill] sm:$0xff] }
0x1d7a   :  { %9773 = vmax.xlane.f32.xlu0 %v9772_v52 }
0x1d7e   :  { %9776 = vmax.xlane.f32.xlu0 %v9775_v37 }
0x1d7f   :  { %6154 = vmax.xlane.f32.xlu1 %v6153_v61  ;;  %v12649_v61 = vrot.slane %v12641_v2, %v15429_v9 }
0x1d82   :  { %12214 = vmax.xlane.f32.xlu0 %v12213_v24  ;;  %v12656_v24 = vrot.slane %v12642_v28, %v15429_v9 }
0x1d83   :  { %12211 = vmax.xlane.f32.xlu1 %v12210_v6 }
0x1d94   :  { %7507 = vrot.lane.b32.xlu1 %v17706_v34, %s14898_s22 }
0x1d98   :  { %7513 = vrot.lane.b32.xlu1 %v17707_v44, %s14898_s22  ;;  %7509 = vrot.lane.b32.xlu0 %v17708_v22, %s14898_s22 }
0x1d9c   :  { %7515 = vrot.lane.b32.xlu1 %v17709_v4, %s14898_s22  ;;  %10000 = vrot.lane.b32.xlu0 %v17710_v14, %s14898_s22 }
0x1da0   :  { %10002 = vrot.lane.b32.xlu1 %v17711_v60, %s14898_s22  ;;  %10006 = vrot.lane.b32.xlu0 %v17712_v17, %s14898_s22  ;;  %v12657_v17 = vcombine.high %v12649_v61, %v12649_v61 }
0x1da4   :  { %10008 = vrot.lane.b32.xlu1 %v17713_v5, %s14898_s22  ;;  %12438 = vrot.lane.b32.xlu0 %v17019_v54, %s14898_s22  ;;  %v17717_v54 = vld [vmem:[#allocation35_spill] sm:$0xff] }
0x1da8   :  { %12440 = vrot.lane.b32.xlu1 %v17028_v3, %s14898_s22  ;;  %12444 = vrot.lane.b32.xlu0 %v17039_v45, %s14898_s22  ;;  %v12618_v3 = vrot.slane %v16951_v53, %v15429_v9 }
0x1daa   :  { %v12619_v10 = vcombine.high %v12618_v3, %v12618_v3 }
0x1dac   :  { %12446 = vrot.lane.b32.xlu1 %v17033_v49, %s14898_s22  ;;  %7511 = vrot.lane.b32.xlu0 %v17714_v58, %s14898_s22  ;;  %v12626_v49 = vrot.slane %v12618_v3, %v15429_v9  ;;  %v12633_v43 = vrot.slane %v12619_v10, %v15429_v9 }
0x1dae   :  { %v12634_v12 = vcombine.high %v12626_v49, %v12626_v49 }
0x1db0   :  { %7517 = vrot.lane.b32.xlu1 %v17715_v59, %s14898_s22  ;;  %10004 = vrot.lane.b32.xlu0 %v17716_v15, %s14898_s22 }
0x1db4   :  { %10010 = vrot.lane.b32.xlu1 %v17717_v54, %s14898_s22  ;;  %12442 = vrot.lane.b32.xlu0 %v17025_v62, %s14898_s22 }
0x1db8   :  { %12448 = vrot.lane.b32.xlu1 %v17046_v20, %s14898_s22 }
0x1dc6   :  { %v12561_v45 = vpop.permute.xlu0 %12560 }
0x1dc7   :  { %v12566_v29 = vrot.slane %v12561_v45, %v15550_v27  ;;  %v17718_v45 = vld [vmem:[#allocation21_spill] sm:$0xff] }
0x1dc9   :  { %v12664_v53 = vmul.f32 %v12626_v49, %v12566_v29 }
0x1dca   :  { %v12579_v52 = vpop.permute.xlu0 %12578  ;;  %v12570_v18 = vpop.permute.xlu1 %12569 }
0x1dcb   :  { %v12584_v62 = vrot.slane %v12579_v52, %v15550_v27  ;;  %v12575_v20 = vrot.slane %v12570_v18, %v15550_v27 }
0x1dcd   :  { %v12666_v55 = vmul.f32 %v12634_v12, %v12584_v62  ;;  %v12665_v37 = vmul.f32 %v12633_v43, %v12575_v20 }
0x1dce   :  { %v12597_v7 = vpop.permute.xlu0 %12596  ;;  %v12588_v33 = vpop.permute.xlu1 %12587 }
0x1dcf   :  { %v12673_v8 = vcombine.low %v12664_v53, %v12665_v37  ;;  %v12602_v6 = vrot.slane %v12597_v7, %v15550_v27  ;;  %v12593_v34 = vrot.slane %v12588_v33, %v15550_v27  ;;  %v12687_v44 = vrot.slane %v12666_v55, %v15429_v9 }
0x1dd1   :  { %v12680_v22 = vrot.slane %v12673_v8, %v15429_v9  ;;  %v12668_v4 = vmul.f32 %v12656_v24, %v12602_v6  ;;  %v12667_v14 = vmul.f32 %v12649_v61, %v12593_v34 }
0x1dd2   :  { %v12934_v60 = vpop.permute.xlu0 %12933  ;;  %v12606_v5 = vpop.permute.xlu1 %12605 }
0x1dd3   :  { %v12688_v58 = vcombine.low %v12680_v22, %v12687_v44  ;;  %v12771_v59 = vcombine.low %v12667_v14, %v12668_v4  ;;  %vm12942_vm0 = vcmp.eq.s32.totalorder %v12934_v60, %v15977_v38  ;;  %v12611_v15 = vrot.slane %v12606_v5, %v15550_v27 }
0x1dd4   :  { %v13458_v54 = vsel %vm12942_vm0, 1.0, %v17680_v16 }
0x1dd5   :  { %v12695_v3 = vrot.slane %v12688_v58, %v15429_v9  ;;  %v12669_v49 = vmul.f32 %v12657_v17, %v12611_v15  ;;  %14327 = vmatpush3.msk.msra.mxu0 %vm6149_vm8, %v13458_v54  ;;  %v12778_v10 = vrot.slane %v12771_v59, %v15429_v9 }
0x1dd6   :  { %14329 = vmatmul.mubr.msk.f32.vlgmr.msra.gmra.mxu0 %vm8042_vm9, %v17718_v45  ;;  %v12941_v29 = vpop.permute.xlu1 %12940 }
0x1dd7   :  { %v12785_v2 = vrot.slane %v12669_v49, %v15429_v9  ;;  %14319 = vmatmul.mubr.msk.f32.vlgmr.msra.gmra.mxu1 %vm5726_vm5, %v12695_v3  ;;  %vm12943_vm3 = vcmp.eq.s32.totalorder %v12941_v29, %v15977_v38  ;;  %v17721_v38 = vld [vmem:[#allocation10_spill] sm:$0xff] }
0x1dd8   :  { %14322 = vmatpush3.msk.msra.mxu1 %vm4475_vm12, %v17688_v30  ;;  %14323 = vmatprep.mubr.msk.f32.mxu1 %vm14873_vm1, %v17680_v16  ;;  %v13459_v62 = vsel %vm12943_vm3, 1.0, %v17680_v16  ;;  %v17720_v30 = vld [vmem:[#allocation23_spill] sm:$0xff] }
0x1dd9   :  { %v12786_v52 = vcombine.low %v12778_v10, %v12785_v2  ;;  %14331 = vmatprep.subr.mxu1 %v17680_v16 }
0x1ddb   :  { %v12793_v18 = vrot.slane %v12786_v52, %v15429_v9 }
0x1ddd   :  { %14324 = vmatmul.mubr.msk.f32.vlgmr.msra.gmra.mxu1 %vm5726_vm5, %v12793_v18 }
0x1dde   :  { %14332 = vmatpush3.msk.msra.mxu1 %vm6149_vm8, %v13459_v62  ;;  %14333 = vmatprep.mubr.msk.f32.mxu1 %vm14873_vm1, %v17680_v16 }
0x1de1   :  { %14334 = vmatmul.mubr.msk.f32.vlgmr.msra.gmra.mxu1 %vm8042_vm9, %v17720_v30 }
0x1dff   :  { %v6152_v43 = vpop.xlane.xlu0 %6151 }
0x1e00   :  { %v6161_v20 = vrot.slane %v6152_v43, %v15550_v27  ;;  %v6165_v28 = vrot.slane %v6152_v43, %v15926_v56  ;;  %v6169_v53 = vrot.slane %v6152_v43, %v17721_v38 }
0x1e02   :  { %v6188_v55 = vsub.f32 %v16166_v35, %v6161_v20  ;;  %v6189_v37 = vsub.f32 %v16169_v50, %v6165_v28  ;;  %v6190_v7 = vsub.f32 %v16171_v51, %v6169_v53 }
0x1e03   :  { %v9774_v61 = vpop.xlane.xlu0 %9773 }
0x1e04   :  { %v6194_v33 = vmul.f32 1.442695, %v6188_v55  ;;  %v6196_v8 = vmul.f32 1.442695, %v6189_v37  ;;  %v6198_v16 = vmul.f32 1.442695, %v6190_v7  ;;  %v9783_v24 = vrot.slane %v9774_v61, %v15550_v27 }
0x1e05   :  { %v9787_v6 = vrot.slane %v9774_v61, %v15926_v56  ;;  %v9791_v34 = vrot.slane %v9774_v61, %v17721_v38 }
0x1e06   :  { %14740 = vpow2.f32 %v6194_v33  ;;  %v9810_v44 = vsub.f32 %v16693_v21, %v9783_v24 }
0x1e07   :  { %14742 = vpow2.f32 %v6196_v8  ;;  %v9811_v35 = vsub.f32 %v16696_v41, %v9787_v6  ;;  %v9812_v50 = vsub.f32 %v17703_v1, %v9791_v34  ;;  %v9777_v22 = vpop.xlane.xlu0 %9776 }
0x1e08   :  { %14744 = vpow2.f32 %v6198_v16  ;;  %v9816_v51 = vmul.f32 1.442695, %v9810_v44  ;;  %v9795_v4 = vrot.slane %v9777_v22, %v15550_v27  ;;  %v9799_v14 = vrot.slane %v9777_v22, %v15926_v56  ;;  %v6155_v60 = vpop.xlane.xlu1 %6154 }
0x1e09   :  { %v9818_v17 = vmul.f32 1.442695, %v9811_v35  ;;  %v9820_v5 = vmul.f32 1.442695, %v9812_v50  ;;  %v9803_v58 = vrot.slane %v9777_v22, %v17721_v38  ;;  %v6173_v59 = vrot.slane %v6155_v60, %v15550_v27 }
0x1e0a   :  { %14746 = vpow2.f32 %v9816_v51  ;;  %v9813_v21 = vsub.f32 %v16702_v32, %v9795_v4  ;;  %v9814_v41 = vsub.f32 %v16700_v31, %v9799_v14  ;;  %v6177_v1 = vrot.slane %v6155_v60, %v15926_v56 }
0x1e0b   :  { %14748 = vpow2.f32 %v9818_v17  ;;  %v9815_v15 = vsub.f32 %v17704_v13, %v9803_v58  ;;  %v6181_v54 = vrot.slane %v6155_v60, %v17721_v38  ;;  %v6191_v3 = vsub.f32 %v17702_v25, %v6173_v59  ;;  %v12215_v49 = vpop.xlane.xlu0 %12214 }
0x1e0c   :  { %14750 = vpow2.f32 %v9820_v5  ;;  %v9822_v45 = vmul.f32 1.442695, %v9813_v21  ;;  %v9824_v10 = vmul.f32 1.442695, %v9814_v41  ;;  %v6192_v2 = vsub.f32 %v17701_v48, %v6177_v1  ;;  %v12212_v29 = vpop.xlane.xlu1 %12211 }
0x1e0d   :  { %v9826_v12 = vmul.f32 1.442695, %v9815_v15  ;;  %v6193_v32 = vsub.f32 %v17705_v47, %v6181_v54  ;;  %v6200_v31 = vmul.f32 1.442695, %v6191_v3  ;;  %v12233_v52 = vrot.slane %v12215_v49, %v15550_v27 }
0x1e0e   :  { %14752 = vpow2.f32 %v9822_v45  ;;  %v6202_v18 = vmul.f32 1.442695, %v6192_v2  ;;  %v12237_v13 = vrot.slane %v12215_v49, %v15926_v56  ;;  %v12241_v62 = vrot.slane %v12215_v49, %v17721_v38 }
0x1e0f   :  { %14754 = vpow2.f32 %v9824_v10  ;;  %v6204_v25 = vmul.f32 1.442695, %v6193_v32  ;;  %v12251_v30 = vsub.f32 %v17012_v0, %v12233_v52  ;;  %v12221_v43 = vrot.slane %v12212_v29, %v15550_v27 }
0x1e10   :  { %14756 = vpow2.f32 %v9826_v12  ;;  %v12252_v48 = vsub.f32 %v17010_v63, %v12237_v13  ;;  %v12253_v47 = vsub.f32 %v17014_v11, %v12241_v62  ;;  %v12225_v20 = vrot.slane %v12212_v29, %v15926_v56 }
0x1e11   :  { %14758 = vpow2.f32 %v6200_v31  ;;  %v12260_v28 = vmul.f32 1.442695, %v12251_v30  ;;  %v12229_v53 = vrot.slane %v12212_v29, %v17721_v38  ;;  %v12248_v55 = vsub.f32 %v17003_v36, %v12221_v43 }
0x1e12   :  { %14760 = vpow2.f32 %v6202_v18  ;;  %v12262_v37 = vmul.f32 1.442695, %v12252_v48  ;;  %v12264_v7 = vmul.f32 1.442695, %v12253_v47  ;;  %v12249_v0 = vsub.f32 %v17006_v57, %v12225_v20 }
0x1e13   :  { %v17214_v61 = vpop.eup %14740  ;;  %14762 = vpow2.f32 %v6204_v25  ;;  %v12250_v63 = vsub.f32 %v17008_v39, %v12229_v53  ;;  %v12254_v33 = vmul.f32 1.442695, %v12248_v55 }
0x1e14   :  { %v17217_v11 = vpop.eup %14742  ;;  %14764 = vpow2.f32 %v12260_v28  ;;  %v12256_v8 = vmul.f32 1.442695, %v12249_v0  ;;  %v7508_v0 = vpop.permute.xlu1 %7507 }
0x1e15   :  { %v17219_v16 = vpop.eup %14744  ;;  %14766 = vpow2.f32 %v12262_v37  ;;  %v12258_v24 = vmul.f32 1.442695, %v12250_v63  ;;  %v6212_v36 = vcombine.low %v17214_v61, %v17217_v11 }
0x1e16   :  { %14768 = vpow2.f32 %v12264_v7  ;;  %v6226_v39 = vrot.slane %v17219_v16, %v15429_v9 }
0x1e17   :  { %v17223_v6 = vpop.eup %14746  ;;  %14770 = vpow2.f32 %v12254_v33  ;;  %v6219_v57 = vrot.slane %v6212_v36, %v15429_v9 }
0x1e18   :  { %v17228_v34 = vpop.eup %14748  ;;  %14772 = vpow2.f32 %v12256_v8 }
0x1e19   :  { %v17230_v44 = vpop.eup %14750  ;;  %14774 = vpow2.f32 %v12258_v24  ;;  %v6227_v35 = vcombine.low %v6219_v57, %v6226_v39  ;;  %v9834_v50 = vcombine.low %v17223_v6, %v17228_v34  ;;  %v7510_v57 = vpop.permute.xlu0 %7509 }
0x1e1a   :  { %v9848_v14 = vrot.slane %v17230_v44, %v15429_v9  ;;  %v7514_v39 = vpop.permute.xlu1 %7513 }
0x1e1b   :  { %v17234_v22 = vpop.eup %14752  ;;  %v6234_v51 = vrot.slane %v6227_v35, %v15429_v9  ;;  %v9841_v4 = vrot.slane %v9834_v50, %v15429_v9 }
0x1e1c   :  { %v17240_v60 = vpop.eup %14754 }
0x1e1d   :  { %v17242_v17 = vpop.eup %14756  ;;  %v6260_v5 = vsel %vm6149_vm8, %v6234_v51, 0.0  ;;  %v9849_v58 = vcombine.low %v9841_v4, %v9848_v14  ;;  %v9857_v59 = vcombine.low %v17234_v22, %v17240_v60  ;;  %v10001_v35 = vpop.permute.xlu0 %10000  ;;  %v7525_v14 = vmul.f32 %v7508_v0, %v16333_v26 }
0x1e1e   :  { %v17247_v21 = vpop.eup %14758  ;;  %6261 = vadd.xlane.f32.xlu0 %v6260_v5  ;;  %v9871_v54 = vrot.slane %v17242_v17, %v15429_v9  ;;  %v7516_v50 = vpop.permute.xlu1 %7515  ;;  %v7526_v5 = vmul.f32 %v7510_v57, %v16321_v40 }
0x1e1f   :  { %v17249_v41 = vpop.eup %14760  ;;  %v9856_v1 = vrot.slane %v9849_v58, %v15429_v9  ;;  %v9864_v15 = vrot.slane %v9857_v59, %v15429_v9 }
0x1e20   :  { %v17255_v3 = vpop.eup %14762  ;;  %v6235_v49 = vcombine.low %v17247_v21, %v17249_v41 }
0x1e21   :  { %v17259_v45 = vpop.eup %14764  ;;  %v9882_v10 = vsel %vm6149_vm8, %v9856_v1, 0.0  ;;  %v9872_v2 = vcombine.low %v9864_v15, %v9871_v54  ;;  %v6249_v32 = vrot.slane %v17255_v3, %v15429_v9  ;;  %v10007_v51 = vpop.permute.xlu0 %10006  ;;  %v7528_v1 = vmul.f32 %v7514_v39, %v16344_v46 }
0x1e22   :  { %v17262_v29 = vpop.eup %14766  ;;  %9883 = vadd.xlane.f32.xlu0 %v9882_v10  ;;  %v6242_v12 = vrot.slane %v6235_v49, %v15429_v9  ;;  %v10003_v4 = vpop.permute.xlu1 %10002  ;;  %v10018_v15 = vmul.f32 %v10001_v35, %v16333_v26  ;;  %v7529_v54 = vmul.f32 %v7516_v50, %v16346_v23 }
0x1e23   :  { %v17267_v31 = vpop.eup %14768  ;;  %v9879_v52 = vrot.slane %v9872_v2, %v15429_v9  ;;  %v12295_v18 = vcombine.low %v17259_v45, %v17262_v29  ;;  %v17722_v2 = vld [vmem:[#allocation14_spill] sm:$0xff] }
0x1e24   :  { %v17272_v13 = vpop.eup %14770  ;;  %v6250_v62 = vcombine.low %v6242_v12, %v6249_v32  ;;  %v12309_v48 = vrot.slane %v17267_v31, %v15429_v9  ;;  %v6973_v12 = vrot.slane %v17722_v2, %v15429_v9  ;;  %v10021_v32 = vmul.f32 %v10007_v51, %v16344_v46 }
0x1e25   :  { %v17274_v25 = vpop.eup %14772  ;;  %v9885_v30 = vsel %vm6149_vm8, %v9879_v52, 0.0  ;;  %v12302_v43 = vrot.slane %v12295_v18, %v15429_v9  ;;  %v12439_v58 = vpop.permute.xlu0 %12438  ;;  %v10019_v52 = vmul.f32 %v10003_v4, %v16321_v40 }
0x1e26   :  { %v17280_v47 = vpop.eup %14774  ;;  %9886 = vadd.xlane.f32.xlu0 %v9885_v30  ;;  %v6257_v20 = vrot.slane %v6250_v62, %v15429_v9  ;;  %v12272_v28 = vcombine.low %v17272_v13, %v17274_v25  ;;  %v10009_v59 = vpop.permute.xlu1 %10008  ;;  %v6981_v18 = vcombine.high %v6973_v12, %v6973_v12  ;;  %v12456_v62 = vmul.f32 %v12439_v58, %v16333_v26 }
0x1e27   :  { %v12310_v53 = vcombine.low %v12302_v43, %v12309_v48  ;;  %v12286_v7 = vrot.slane %v17280_v47, %v15429_v9  ;;  %v10022_v48 = vmul.f32 %v10009_v59, %v16346_v23 }
0x1e28   :  { %v6263_v55 = vsel %vm6149_vm8, %v6257_v20, 0.0  ;;  %v12279_v37 = vrot.slane %v12272_v28, %v15429_v9  ;;  %v6966_v20 = vcombine.high %v17722_v2, %v17722_v2  ;;  %v7003_v28 = vrot.slane %v6981_v18, %v15429_v9 }
0x1e29   :  { %6264 = vadd.xlane.f32.xlu1 %v6263_v55  ;;  %v12317_v63 = vrot.slane %v12310_v53, %v15429_v9  ;;  %v12445_v49 = vpop.permute.xlu0 %12444  ;;  %v6989_v55 = vrot.slane %v6973_v12, %v15429_v9 }
0x1e2a   :  { %v12287_v33 = vcombine.low %v12279_v37, %v12286_v7  ;;  %v12441_v10 = vpop.permute.xlu1 %12440  ;;  %v12459_v53 = vmul.f32 %v12445_v49, %v16344_v46  ;;  %v6980_v0 = vrot.slane %v6966_v20, %v15429_v9 }
0x1e2b   :  { %v12323_v8 = vsel %vm6149_vm8, %v12317_v63, 0.0  ;;  %v12457_v37 = vmul.f32 %v12441_v10, %v16321_v40  ;;  %v7013_v63 = vcombine.low %v6989_v55, %v7003_v28 }
0x1e2c   :  { %12324 = vadd.xlane.f32.xlu0 %v12323_v8  ;;  %v12294_v24 = vrot.slane %v12287_v33, %v15429_v9  ;;  %v7011_v8 = vcombine.high %v6989_v55, %v6989_v55  ;;  %v6982_v46 = vcombine.high %v6980_v0, %v6980_v0  ;;  %v6996_v57 = vrot.slane %v6980_v0, %v15429_v9  ;;  %v17725_v0 = vld [vmem:[#allocation26_spill] sm:$0xff] }
0x1e2d   :  { %v7512_v30 = vpop.permute.xlu0 %7511  ;;  %v7020_v39 = vrot.slane %v7013_v63, %v15429_v9  ;;  %v7966_v63 = vrot.slane %v17725_v0, %v15429_v9 }
0x1e2e   :  { %v12320_v36 = vsel %vm6149_vm8, %v12294_v24, 0.0  ;;  %v12447_v43 = vpop.permute.xlu1 %12446  ;;  %v7527_v33 = vmul.f32 %v7512_v30, %v16337_v19  ;;  %v7012_v24 = vcombine.high %v7003_v28, %v7003_v28  ;;  %v7027_v51 = vrot.slane %v7011_v8, %v15429_v9 }
0x1e2f   :  { %12321 = vadd.xlane.f32.xlu1 %v12320_v36  ;;  %v12460_v36 = vmul.f32 %v12447_v43, %v16346_v23 }
0x1e30   :  { %v7036_v4 = vcombine.low %v7012_v24, %v6996_v57  ;;  %v7028_v58 = vcombine.low %v7020_v39, %v7027_v51  ;;  %v17726_v24 = vld [vmem:[#allocation27_spill] sm:$0xff]  ;;  %v17727_v39 = vld [vmem:[#allocation36_spill] sm:$0xff] }
0x1e31   :  { %v10005_v26 = vpop.permute.xlu0 %10004 }
0x1e32   :  { %v7518_v7 = vpop.permute.xlu1 %7517  ;;  %v10020_v40 = vmul.f32 %v10005_v26, %v16337_v19 }
0x1e35   :  { %v12443_v35 = vpop.permute.xlu0 %12442 }
0x1e36   :  { %v10011_v50 = vpop.permute.xlu1 %10010  ;;  %v12458_v23 = vmul.f32 %v12443_v35, %v16337_v19  ;;  %v17728_v35 = vld [vmem:[#allocation37_spill] sm:$0xff] }
0x1e37   :  { %v10023_v59 = vmul.f32 %v10011_v50, %v16365_v42  ;;  %v10436_v50 = vrot.slane %v17728_v35, %v15429_v9 }
0x1e40   :  { %7533 = vperm.xlu1 %14375, %v7525_v14   ;;  %v7530_v14 = vmul.f32 %v7518_v7, %v16365_v42 }
0x1e42   :  { %7542 = vperm.xlu0 %14374, %v7526_v5   ;;  %v7010_v5 = vrot.slane %v6982_v46, %v15429_v9 }
0x1e44   :  { %7560 = vperm.xlu1 %14375, %v7528_v1   ;;  %v7043_v1 = vrot.slane %v7036_v4, %v15429_v9  ;;  %v7050_v49 = vrot.slane %v7010_v5, %v15429_v9  ;;  %v17357_v5 = vrot.slane %v7966_v63, %v15429_v9 }
0x1e46   :  { %10026 = vperm.xlu0 %14374, %v10018_v15   ;;  %v12449_v15 = vpop.permute.xlu1 %12448  ;;  %v7051_v2 = vcombine.low %v7043_v1, %v7050_v49 }
0x1e47   :  { %v12461_v10 = vmul.f32 %v12449_v15, %v16365_v42 }
0x1e48   :  { %7569 = vperm.xlu1 %14375, %v7529_v54   ;;  %v7035_v54 = vrot.slane %v7028_v58, %v15429_v9  ;;  %v7058_v19 = vrot.slane %v7051_v2, %v15429_v9 }
0x1e4a   :  { %10053 = vperm.xlu0 %14374, %v10021_v32  }
0x1e4c   :  { %10035 = vperm.xlu1 %14375, %v10019_v52  }
0x1e4e   :  { %12464 = vperm.xlu0 %14374, %v12456_v62  }
0x1e50   :  { %10062 = vperm.xlu1 %14375, %v10022_v48  }
0x1e52   :  { %12491 = vperm.xlu0 %14374, %v12459_v53   ;;  %v17723_v53 = vld [vmem:[#allocation24_spill] sm:$0xff] }
0x1e53   :  { %v8227_v55 = vrot.slane %v17723_v53, %v15429_v9  ;;  %v17729_v53 = vld [vmem:[#allocation38_spill] sm:$0xff] }
0x1e54   :  { %12473 = vperm.xlu1 %14375, %v12457_v37   ;;  %v17724_v37 = vld [vmem:[#allocation25_spill] sm:$0xff] }
0x1e55   :  { %v7943_v26 = vrot.slane %v17724_v37, %v15429_v9  ;;  %v8228_v8 = vcombine.high %v8227_v55, %v8227_v55  ;;  %v17345_v46 = vrot.slane %v8227_v55, %v15429_v9  ;;  %v10459_v55 = vrot.slane %v17729_v53, %v15429_v9 }
0x1e56   :  { %7551 = vperm.xlu0 %14374, %v7527_v33  }
0x1e57   :  { %v7944_v57 = vcombine.high %v7943_v26, %v7943_v26  ;;  %v17354_v4 = vrot.slane %v7943_v26, %v15429_v9  ;;  %v8242_v58 = vrot.slane %v8228_v8, %v15429_v9 }
0x1e58   :  { %12500 = vperm.xlu1 %14375, %v12460_v36   ;;  %v8250_v36 = vrot.slane %v17726_v24, %v15429_v9 }
0x1e59   :  { %v7958_v49 = vrot.slane %v7944_v57, %v15429_v9 }
0x1e5a   :  { %10044 = vperm.xlu0 %14374, %v10020_v40   ;;  %v10664_v40 = vrot.slane %v17727_v39, %v15429_v9  ;;  %v17361_v1 = vrot.slane %v8250_v36, %v15429_v9 }
0x1e5c   :  { %7578 = vperm.xlu1 %14375, %v7530_v14   ;;  %v7967_v14 = vcombine.high %v7966_v63, %v7966_v63 }
0x1e5e   :  { %12482 = vperm.xlu0 %14374, %v12458_v23  }
0x1e60   :  { %10071 = vperm.xlu1 %14375, %v10023_v59   ;;  %v8251_v59 = vcombine.high %v8250_v36, %v8250_v36 }
0x1e62   :  { %7059 = vrot.lane.b32.xlu0 %v7035_v54, %s14902_s19  ;;  %v8243_v54 = vcombine.high %v17345_v46, %v17345_v46  ;;  %v17385_v26 = vrot.slane %v8251_v59, %v15429_v9 }
0x1e64   :  { %12509 = vperm.xlu1 %14375, %v12461_v10   ;;  %v10665_v10 = vcombine.high %v10664_v40, %v10664_v40 }
0x1e66   :  { %v17391_v63 = vrot.slane %v10665_v10, %v15429_v9 }
0x1e68   :  { %7061 = vrot.lane.b32.xlu1 %v7058_v19, %s14902_s19 }
0x1e96   :  { %v17326_v12 = vpop.f32.mrf.mxu0 }
0x1e97   :  { %v17328_v32 = vpop.f32.mrf.mxu1 }
0x1e98   :  { %v14330_v52 = vpop.f32.mrf.mxu0 }
0x1e99   :  { %v14320_v18 = vpop.f32.mrf.mxu1  ;;  %v17371_v52 = vrot.slane %v10664_v40, %v15429_v9 }
0x1e9a   :  { %v10437_v18 = vcombine.high %v10436_v50, %v10436_v50 }
0x1e9c   :  { %v17402_v40 = vrot.slane %v10437_v18, %v15429_v9 }
0x1e9d   :  { %v17330_v62 = vpop.f32.mrf.mxu1 }
0x1e9f   :  { %v14325_v30 = vpop.f32.mrf.mxu1 }
0x1ea0   :  { %v17374_v30 = vrot.slane %v10436_v50, %v15429_v9 }
0x1ea1   :  { %v17332_v43 = vpop.f32.mrf.mxu1 }
0x1ea3   :  { %v14335_v48 = vpop.f32.mrf.mxu1 }
0x1ea7   :  { %v6262_v42 = vpop.xlane.xlu0 %6261 }
0x1ea8   :  { %14776 = vrcp.f32 %v6262_v42  ;;  %v7959_v42 = vcombine.high %v17354_v4, %v17354_v4 }
0x1eab   :  { %v9884_v20 = vpop.xlane.xlu0 %9883 }
0x1eac   :  { %14778 = vrcp.f32 %v9884_v20  ;;  %v7981_v20 = vrot.slane %v7967_v14, %v15429_v9  ;;  %v17409_v14 = vrot.slane %v10459_v55, %v15429_v9 }
0x1eaf   :  { %v9887_v28 = vpop.xlane.xlu0 %9886 }
0x1eb0   :  { %14780 = vrcp.f32 %v9887_v28 }
0x1eb2   :  { %v6265_v7 = vpop.xlane.xlu1 %6264 }
0x1eb3   :  { %14782 = vrcp.f32 %v6265_v7 }
0x1eb5   :  { %v17340_v33 = vpop.eup %14776  ;;  %v12325_v15 = vpop.xlane.xlu0 %12324 }
0x1eb6   :  { %v6273_v51 = vrot.slane %v17340_v33, %v15550_v27  ;;  %v6277_v2 = vrot.slane %v17340_v33, %v15926_v56 }
0x1eb8   :  { %v12322_v23 = vpop.xlane.xlu1 %12321  ;;  %v6300_v48 = vmul.f32 %v17214_v61, %v6273_v51  ;;  %v6301_v8 = vmul.f32 %v17217_v11, %v6277_v2  ;;  %v10460_v11 = vcombine.high %v10459_v55, %v10459_v55 }
0x1eb9   :  { %v17368_v19 = vpop.eup %14778  ;;  %14784 = vrcp.f32 %v12322_v23  ;;  %v17730_v23 = vld [vmem:[#allocation39_spill] sm:$0xff] }
0x1eba   :  { %v9895_v36 = vrot.slane %v17368_v19, %v15550_v27  ;;  %v10687_v59 = vrot.slane %v17730_v23, %v15429_v9  ;;  %14786 = vrcp.f32 %v12325_v15  ;;  %v10474_v7 = vrot.slane %v10460_v11, %v15429_v9 }
0x1ebc   :  { %v7534_v37 = vpop.permute.xlu1 %7533  ;;  %v10688_v28 = vcombine.high %v10687_v59, %v10687_v59 }
0x1ebd   :  { %v7539_v61 = vrot.slane %v7534_v37, %v15550_v27  ;;  %v7543_v0 = vpop.permute.xlu0 %7542  ;;  %v17397_v57 = vpop.eup %14780 }
0x1ebe   :  { %v7548_v24 = vrot.slane %v7543_v0, %v15550_v27  ;;  %v9922_v0 = vmul.f32 %v17223_v6, %v9895_v36  ;;  %v9907_v23 = vrot.slane %v17397_v57, %v15550_v27 }
0x1ebf   :  { %v7585_v50 = vmul.f32 %v7539_v61, %v6300_v48 }
0x1ec0   :  { %v17406_v51 = vpop.eup %14782  ;;  %v7586_v10 = vmul.f32 %v7548_v24, %v6301_v8  ;;  %v7561_v2 = vpop.permute.xlu1 %7560 }
0x1ec1   :  { %v7989_v53 = vadd.f32 %v17354_v4, %v7585_v50  ;;  %v6285_v18 = vrot.slane %v17406_v51, %v15550_v27  ;;  %v10027_v37 = vpop.permute.xlu0 %10026  ;;  %v6289_v48 = vrot.slane %v17406_v51, %v15926_v56  ;;  %v7566_v24 = vrot.slane %v7561_v2, %v15550_v27 }
0x1ec2   :  { %v7990_v61 = vadd.f32 %v7958_v49, %v7586_v10  ;;  %v10032_v55 = vrot.slane %v10027_v37, %v15550_v27  ;;  %v13102_v10 = vrot.slane %v17326_v12, %v15429_v9  ;;  %v12874_v12 = vrot.slane %v17328_v32, %v15429_v9 }
0x1ec3   :  { %v17423_v8 = vadd.f32 %v17345_v46, %v7989_v53  ;;  %v6303_v15 = vmul.f32 %v17247_v21, %v6285_v18  ;;  %v6304_v50 = vmul.f32 %v17249_v41, %v6289_v48  ;;  %v9899_v21 = vrot.slane %v17368_v19, %v15926_v56 }
0x1ec4   :  { %v17429_v49 = vadd.f32 %v8242_v58, %v7990_v61  ;;  %v10078_v6 = vmul.f32 %v10032_v55, %v9922_v0  ;;  %v7570_v36 = vpop.permute.xlu1 %7569  ;;  %v9925_v58 = vmul.f32 %v17234_v22, %v9907_v23  ;;  %v17447_v0 = vrot.slane %v10687_v59, %v15429_v9 }
0x1ec5   :  { %v7588_v37 = vmul.f32 %v7566_v24, %v6303_v15  ;;  %v7575_v53 = vrot.slane %v7570_v36, %v15550_v27  ;;  %v10054_v39 = vpop.permute.xlu0 %10053  ;;  %v9911_v22 = vrot.slane %v17397_v57, %v15926_v56  ;;  %v9923_v32 = vmul.f32 %v17228_v34, %v9899_v21 }
0x1ec6   :  { %v8285_v41 = vcombine.low %v17423_v8, %v17429_v49  ;;  %v10482_v11 = vadd.f32 %v17374_v30, %v10078_v6  ;;  %v10059_v2 = vrot.slane %v10054_v39, %v15550_v27  ;;  %v17459_v36 = vpop.eup %14784  ;;  %v10702_v59 = vrot.slane %v10688_v28, %v15429_v9 }
0x1ec7   :  { %v7992_v48 = vadd.f32 %v17357_v5, %v7588_v37  ;;  %v7589_v61 = vmul.f32 %v7575_v53, %v6304_v50  ;;  %v13103_v37 = vcombine.high %v13102_v10, %v13102_v10  ;;  %v17463_v53 = vrot.slane %v13102_v10, %v15429_v9 }
0x1ec8   :  { %v17450_v55 = vadd.f32 %v17371_v52, %v10482_v11  ;;  %v10081_v15 = vmul.f32 %v10059_v2, %v9925_v58  ;;  %v10036_v24 = vpop.permute.xlu1 %10035  ;;  %v12875_v58 = vcombine.high %v12874_v12, %v12874_v12  ;;  %v17467_v2 = vrot.slane %v12874_v12, %v15429_v9 }
0x1ec9   :  { %v17455_v39 = vadd.f32 %v17361_v1, %v7992_v48  ;;  %v7993_v23 = vadd.f32 %v7981_v20, %v7589_v61  ;;  %v10041_v6 = vrot.slane %v10036_v24, %v15550_v27  ;;  %v12465_v50 = vpop.permute.xlu0 %12464  ;;  %v12897_v28 = vrot.slane %v17330_v62, %v15429_v9 }
0x1eca   :  { %v10485_v11 = vadd.f32 %v17409_v14, %v10081_v15  ;;  %v9926_v61 = vmul.f32 %v17240_v60, %v9911_v22  ;;  %v13117_v62 = vrot.slane %v13103_v37, %v15429_v9  ;;  %v12333_v60 = vrot.slane %v17459_v36, %v15550_v27 }
0x1ecb   :  { %v17470_v20 = vadd.f32 %v17385_v26, %v7993_v23  ;;  %v10079_v34 = vmul.f32 %v10041_v6, %v9923_v32  ;;  %v12337_v23 = vrot.slane %v17459_v36, %v15926_v56  ;;  %v17488_v32 = vpop.eup %14786  ;;  %v12889_v22 = vrot.slane %v12875_v58, %v15429_v9 }
0x1ecc   :  { %v17477_v48 = vadd.f32 %v17447_v0, %v10485_v11  ;;  %v10063_v10 = vpop.permute.xlu1 %10062  ;;  %v12898_v21 = vcombine.high %v12897_v28, %v12897_v28  ;;  %v17504_v37 = vrot.slane %v12897_v28, %v15429_v9  ;;  %v17508_v18 = vrot.slane %v17332_v43, %v15429_v9 }
0x1ecd   :  { %v10483_v15 = vadd.f32 %v17402_v40, %v10079_v34  ;;  %v10068_v26 = vrot.slane %v10063_v10, %v15550_v27  ;;  %v17484_v24 = vpop.permute.xlu0 %12491  ;;  %v6281_v40 = vrot.slane %v17340_v33, %v17721_v38  ;;  %v12470_v6 = vrot.slane %v12465_v50, %v15550_v27 }
0x1ece   :  { %v12361_v11 = vmul.f32 %v17274_v25, %v12337_v23  ;;  %v9903_v43 = vrot.slane %v17368_v19, %v17721_v38  ;;  %v6293_v25 = vrot.slane %v17406_v51, %v17721_v38  ;;  %v12912_v23 = vrot.slane %v12898_v21, %v15429_v9 }
0x1ecf   :  { %v17501_v34 = vadd.f32 %v17391_v63, %v10483_v15  ;;  %v10082_v10 = vmul.f32 %v10068_v26, %v9926_v61  ;;  %v12360_v15 = vmul.f32 %v17272_v13, %v12333_v60  ;;  %v6302_v28 = vmul.f32 %v17219_v16, %v6281_v40 }
0x1ed0   :  { %v12474_v33 = vpop.permute.xlu1 %12473  ;;  %v12345_v16 = vrot.slane %v17488_v32, %v15550_v27  ;;  %v13126_v19 = vcombine.high %v17508_v18, %v17508_v18  ;;  %v12341_v21 = vrot.slane %v17459_v36, %v17721_v38  ;;  %v9924_v40 = vmul.f32 %v17230_v44, %v9903_v43 }
0x1ed1   :  { %v10722_v58 = vcombine.low %v17450_v55, %v17501_v34  ;;  %v10486_v12 = vadd.f32 %v10474_v7, %v10082_v10  ;;  %v12479_v63 = vrot.slane %v12474_v33, %v15550_v27  ;;  %v7552_v61 = vpop.permute.xlu0 %7551  ;;  %v12349_v7 = vrot.slane %v17488_v32, %v15926_v56 }
0x1ed2   :  { %v7557_v26 = vrot.slane %v7552_v61, %v15550_v27  ;;  %v12516_v10 = vmul.f32 %v12470_v6, %v12360_v15  ;;  %v12497_v33 = vrot.slane %v17484_v24, %v15550_v27  ;;  %v9915_v4 = vrot.slane %v17397_v57, %v17721_v38 }
0x1ed3   :  { %v17520_v50 = vadd.f32 %v10702_v59, %v10486_v12  ;;  %v12517_v35 = vmul.f32 %v12479_v63, %v12361_v11  ;;  %v12364_v36 = vmul.f32 %v17262_v29, %v12349_v7  ;;  %v8292_v29 = vrot.slane %v8285_v41, %v15429_v9 }
0x1ed4   :  { %v7587_v13 = vmul.f32 %v7557_v26, %v6302_v28  ;;  %v12501_v60 = vpop.permute.xlu1 %12500  ;;  %v12920_v44 = vadd.f32 %v17467_v2, %v12516_v10  ;;  %v12362_v57 = vmul.f32 %v17280_v47, %v12341_v21  ;;  %v17731_v46 = vcombine.high %v17374_v30, %v17374_v30 }
0x1ed5   :  { %v10745_v59 = vcombine.low %v17477_v48, %v17520_v50  ;;  %v12506_v56 = vrot.slane %v12501_v60, %v15550_v27  ;;  %v10045_v51 = vpop.permute.xlu0 %10044  ;;  %v12921_v12 = vadd.f32 %v12889_v22, %v12517_v35  ;;  %v6305_v35 = vmul.f32 %v17255_v3, %v6293_v25 }
0x1ed6   :  { %v7991_v6 = vadd.f32 %v7959_v42, %v7587_v13  ;;  %v10050_v11 = vrot.slane %v10045_v51, %v15550_v27  ;;  %v12363_v42 = vmul.f32 %v17259_v45, %v12345_v16  ;;  %v13133_v43 = vrot.slane %v17508_v18, %v15429_v9 }
0x1ed7   :  { %v12520_v24 = vmul.f32 %v12506_v56, %v12364_v36  ;;  %v13149_v28 = vadd.f32 %v13117_v62, %v12921_v12  ;;  %v12353_v41 = vrot.slane %v17488_v32, %v17721_v38  ;;  %v13148_v47 = vadd.f32 %v17463_v53, %v12920_v44 }
0x1ed8   :  { %v8275_v22 = vadd.f32 %v8243_v54, %v7991_v6  ;;  %v10080_v63 = vmul.f32 %v10050_v11, %v9924_v40  ;;  %v7579_v61 = vpop.permute.xlu1 %7578  ;;  %v12519_v8 = vmul.f32 %v12497_v33, %v12363_v42  ;;  %v17732_v7 = vcombine.high %v17371_v52, %v17371_v52 }
0x1ed9   :  { %v7584_v3 = vrot.slane %v7579_v61, %v15550_v27  ;;  %v12483_v15 = vpop.permute.xlu0 %12482  ;;  %v12924_v16 = vadd.f32 %v12912_v23, %v12520_v24  ;;  %v17733_v18 = vcombine.high %v17357_v5, %v17357_v5  ;;  %v9927_v60 = vmul.f32 %v17242_v17, %v9915_v4 }
0x1eda   :  { %v8299_v45 = vrot.slane %v8275_v22, %v15429_v9  ;;  %v10484_v54 = vadd.f32 %v17731_v46, %v10080_v63  ;;  %v12488_v26 = vrot.slane %v12483_v15, %v15550_v27  ;;  %v10729_v32 = vrot.slane %v10722_v58, %v15429_v9 }
0x1edb   :  { %v7590_v49 = vmul.f32 %v7584_v3, %v6305_v35  ;;  %v13160_v51 = vcombine.low %v13148_v47, %v13149_v28  ;;  %v17734_v23 = vcombine.high %v17467_v2, %v17467_v2  ;;  %v13140_v17 = vrot.slane %v13126_v19, %v15429_v9 }
0x1edc   :  { %v8300_v62 = vcombine.low %v8292_v29, %v8299_v45  ;;  %v10712_v30 = vadd.f32 %v17732_v7, %v10484_v54  ;;  %v12518_v25 = vmul.f32 %v12488_v26, %v12362_v57  ;;  %v10072_v10 = vpop.permute.xlu1 %10071  ;;  %v12923_v5 = vadd.f32 %v17504_v37, %v12519_v8 }
0x1edd   :  { %v7994_v13 = vadd.f32 %v17733_v18, %v7590_v49  ;;  %v10077_v56 = vrot.slane %v10072_v10, %v15550_v27  ;;  %v7060_v38 = vpop.permute.xlu0 %7059  ;;  %v17735_v12 = vcombine.high %v17361_v1, %v17361_v1  ;;  %v17736_v58 = vcombine.low %v17455_v39, %v17470_v20 }
0x1ede   :  { %13386 = vst.sshfl [vmem:[%s17536_s26] sm:$0x15 pattern:$0x73625140] %v8300_v62  ;;  %v10736_v52 = vrot.slane %v10712_v30, %v15429_v9  ;;  %v12922_v21 = vadd.f32 %v17734_v23, %v12518_v25  ;;  %7065 = vst.msk [vmem:[%s17549_s7] sm:$0x7] %vm6607_vm6, %v7060_v38  ;;  %v17737_v2 = vcombine.high %v17463_v53, %v17463_v53 }
0x1edf   :  { %v8278_v55 = vadd.f32 %v17735_v12, %v7994_v13  ;;  %v10083_v34 = vmul.f32 %v10077_v56, %v9927_v60  ;;  %v8315_v6 = vrot.slane %v17736_v58, %v15429_v9  ;;  %v12365_v19 = vmul.f32 %v17267_v31, %v12353_v41 }
0x1ee0   :  { %v10737_v40 = vcombine.low %v10729_v32, %v10736_v52  ;;  %v13150_v11 = vadd.f32 %v17737_v2, %v12922_v21  ;;  %v12510_v33 = vpop.permute.xlu1 %12509  ;;  %v13152_v36 = vadd.f32 %v13140_v17, %v12924_v16  ;;  %v17738_v1 = vcombine.high %v17409_v14, %v17409_v14 }
0x1ee1   :  { %v8322_v35 = vrot.slane %v8278_v55, %v15429_v9  ;;  %v12515_v44 = vrot.slane %v12510_v33, %v15550_v27  ;;  %v12913_v39 = vcombine.high %v17504_v37, %v17504_v37  ;;  %v13167_v53 = vrot.slane %v13160_v51, %v15429_v9 }
0x1ee2   :  { %v10487_v4 = vadd.f32 %v17738_v1, %v10083_v34  ;;  %13466 = vst.sshfl [vmem:[%s17536_s26 + $0x8] sm:$0x15 pattern:$0x73625140] %v10737_v40  ;;  %v13174_v31 = vrot.slane %v13150_v11, %v15429_v9  ;;  %v13151_v20 = vadd.f32 %v13133_v43, %v12923_v5  ;;  %v17739_v22 = vcombine.high %v17447_v0, %v17447_v0 }
0x1ee3   :  { %v8323_v42 = vcombine.low %v8315_v6, %v8322_v35  ;;  %v12521_v63 = vmul.f32 %v12515_v44, %v12365_v19  ;;  %v13141_v61 = vcombine.high %v13133_v43, %v13133_v43  ;;  %v10752_v37 = vrot.slane %v10745_v59, %v15429_v9 }
0x1ee4   :  { %v10715_v14 = vadd.f32 %v17739_v22, %v10487_v4  ;;  %v13175_v27 = vcombine.low %v13167_v53, %v13174_v31  ;;  %v7062_v29 = vpop.permute.xlu1 %7061  ;;  %v13183_v24 = vcombine.low %v13151_v20, %v13152_v36 }
0x1ee5   :  { %13387 = vst.sshfl [vmem:[%s17536_s26 + $0x4] sm:$0x15 pattern:$0x73625140] %v8323_v42  ;;  %v12925_v57 = vadd.f32 %v12913_v39, %v12521_v63  ;;  %7066 = vst.msk [vmem:[%s17549_s7 + $0x4] sm:$0x7] %vm6607_vm6, %v7062_v29 }
0x1ee6   :  { %v10759_v3 = vrot.slane %v10715_v14, %v15429_v9  ;;  %13468 = vst.sshfl [vmem:[%s17536_s26 + $0x10] sm:$0x15 pattern:$0x73625140] %v13175_v27  ;;  %v13190_v28 = vrot.slane %v13183_v24, %v15429_v9 }
0x1ee7   :  { %v13153_v15 = vadd.f32 %v13141_v61, %v12925_v57 }
0x1ee8   :  { %v10760_v0 = vcombine.low %v10752_v37, %v10759_v3 }
0x1ee9   :  { %v13197_v45 = vrot.slane %v13153_v15, %v15429_v9 }
0x1eea   :  { %13467 = vst.sshfl [vmem:[%s17536_s26 + $0xc] sm:$0x15 pattern:$0x73625140] %v10760_v0 }
0x1eeb   :  { %v13198_v46 = vcombine.low %v13190_v28, %v13197_v45 }
0x1eed   :  { %13469 = vst.sshfl [vmem:[%s17536_s26 + $0x14] sm:$0x15 pattern:$0x73625140] %v13198_v46 }

</bundles_post_ra>
